<compile_context>
chip_gen: v6e
topology: v6e:2x2x1
jax: 0.10.0
libtpu: 0.0.40
codegen_flags: <defaults>
</compile_context>

<pallas_src>
import functools

import jax
import jax.numpy as jnp
from jax.experimental import pallas as pl
from jax.experimental.pallas import tpu as pltpu

L = 512   # hidden dim of the feature extractor (self.L)
D = 128   # attention hidden dim (self.D)
K = 1     # number of attention heads (self.K)

_NEG_BIG = -1e30  # finite "minus infinity" for masking (avoids inf-inf NaNs)


def _gated_attention_kernel(
    n_valid_ref,            # SMEM (1,) int32  -- scalar prefetch: true bag size N
    x_ref,                  # (TILE_N, in_dim)  streamed tile (f32 or bf16)
    w1_ref, b1_ref,         # (in_dim, L) bf16, (1, L) f32       resident
    wvu_ref, bvu_ref,       # (L, 2D) bf16, (1, 2D) f32          resident (fused V|U)
    ww_ref, bw_ref,         # (1, D) f32, (1, 1) f32             resident (row layout)
    wc_ref, bc_ref,         # (L, C) f32, (1, C) f32             resident
    logits_ref,             # (1, C) output
    yprob_ref,              # (1, C) output
    m_sc, l_sc, acc_sc,     # VMEM scratch: (1,1), (1,1), (1,L)  f32
    *, mask_padding: bool,
):
    f32 = jnp.float32
    bf16 = jnp.bfloat16
    i = pl.program_id(0)
    tile_n = x_ref.shape[0]

    @pl.when(i == 0)
    def _init():
        m_sc[...] = jnp.full_like(m_sc, _NEG_BIG)
        l_sc[...] = jnp.zeros_like(l_sc)
        acc_sc[...] = jnp.zeros_like(acc_sc)

    # --- feature extractor: Linear(in_dim, 512) + ReLU -----------------------
    # bf16 MXU operands, f32 accumulation; bias add + ReLU in f32.
    feat = jnp.dot(x_ref[...].astype(bf16), w1_ref[...],
                   preferred_element_type=f32) + b1_ref[...]
    feat = jnp.maximum(feat, 0.0)                                   # (TILE_N, L) f32

    # --- gated attention: fused [Wv | Wu] matmul (fills 256-wide MXU) --------
    g = jnp.dot(feat.astype(bf16), wvu_ref[...],
                preferred_element_type=f32) + bvu_ref[...]          # (TILE_N, 2D) f32
    a_v = jnp.tanh(g[:, :D])                                        # (TILE_N, D)
    a_u = jax.nn.sigmoid(g[:, D:])                                  # (TILE_N, D)

    # width-1 score matmul replaced by VPU multiply + lane reduction (D lanes)
    scores = (jnp.sum((a_v * a_u) * ww_ref[...], axis=-1, keepdims=True)
              + bw_ref[...])                                        # (TILE_N, 1)

    # mask rows beyond the true bag size (only traced in when padding exists;
    # cheap VPU filler for interior tiles in that case).
    if mask_padding:
        row_ids = i * tile_n + jax.lax.broadcasted_iota(jnp.int32, (tile_n, 1), 0)
        scores = jnp.where(row_ids < n_valid_ref[0], scores, _NEG_BIG)

    # --- online softmax over the instance axis (deferred normalization) ------
    m_new = jnp.maximum(m_sc[...], jnp.max(scores, axis=0, keepdims=True))  # (1,1)
    alpha = jnp.exp(m_sc[...] - m_new)                                       # (1,1)
    p = jnp.exp(scores - m_new)                                              # (TILE_N,1)
    l_sc[...] = alpha * l_sc[...] + jnp.sum(p, axis=0, keepdims=True)
    acc_sc[...] = alpha * acc_sc[...] + jnp.sum(p * feat, axis=0, keepdims=True)
    m_sc[...] = m_new

    # --- finalize: pooled feature, classifier, class softmax (all f32) -------
    @pl.when(i == pl.num_programs(0) - 1)
    def _finalize():
        M = acc_sc[...] / l_sc[...]                                 # (1, L)
        logits = jnp.dot(M, wc_ref[...], preferred_element_type=f32) + bc_ref[...]
        logits_ref[...] = logits
        lm = jnp.max(logits, axis=1, keepdims=True)
        le = jnp.exp(logits - lm)
        yprob_ref[...] = le / jnp.sum(le, axis=1, keepdims=True)


def _vmem_limit_bytes(tile_n, in_dim, n_classes, x_itemsize):
    """Per-step VMEM footprint estimate with 2x headroom, clamped for v7x (64 MiB)."""
    resident = (in_dim * L * 2            # w1 (bf16, single-buffered)
                + L * (2 * D) * 2         # fused Wvu (bf16)
                + L * n_classes * 4       # wc
                + (L + 2 * D + D + 1 + 3 * n_classes) * 4)
    x_stream = 2 * tile_n * in_dim * x_itemsize            # double-buffered x tile
    live = tile_n * (L * 4 + L * 2 + (2 * D) * 4 + 3 * D * 4 + 64)  # feat/featbf/g/av/au/p
    scratch = (2 + L) * 4
    total = resident + x_stream + live + scratch
    return int(min(max(2 * total + (4 << 20), 16 << 20), 48 << 20))


def gated_attention_forward(x, params, *, tile_n=256):
    """x: (N, in_dim) float32 or bfloat16. Returns (logits, Y_prob, Y_hat, None, {}).

    tile_n: instances per grid step. Use a multiple of 256 (fills the v6e/v7x
    MXU M dim; also a multiple of 16 so bf16 x tiles stay sublane-aligned).
    512-1024 pays off for large bags on v5e/v6e; cap via the 64 MiB VMEM
    budget on v7x (handled by _vmem_limit_bytes).
    """
    N, in_dim = x.shape
    if N == 0:
        raise ValueError("GatedAttention: empty bag (N == 0)")
    n_classes = params["wc"].shape[1]

    num_tiles = pl.cdiv(N, tile_n)
    n_pad = num_tiles * tile_n
    mask_padding = (n_pad != N)
    if mask_padding:
        # Row-pad only (no lane padding, no full re-materialization of x).
        x = jnp.pad(x, ((0, n_pad - N), (0, 0)))

    # bf16 MXU weights (f32 accumulation in-kernel); Wv/Wu fused to (L, 2D).
    w1_bf = params["w1"].astype(jnp.bfloat16)
    wvu_bf = jnp.concatenate([params["wv"], params["wu"]], axis=1).astype(jnp.bfloat16)
    bvu = jnp.concatenate([params["bv"], params["bu"]], axis=1).astype(jnp.float32)
    ww_row = params["ww"].reshape(1, D).astype(jnp.float32)   # (D,1) -> (1,D) row
    n_valid = jnp.array([N], jnp.int32)

    const = lambda i, n: (0, 0)          # resident blocks (weights/biases/outputs)
    x_itemsize = jnp.dtype(x.dtype).itemsize

    flops = int(2 * n_pad * (in_dim * L + L * 2 * D + 2 * D) + 2 * L * n_classes)
    transcendentals = int(n_pad * (2 * D + 1) + n_classes)
    bytes_accessed = int(
        n_pad * in_dim * x_itemsize
        + 2 * (in_dim * L + L * 2 * D)
        + 4 * (L + 3 * D + 1 + L * n_classes + 3 * n_classes))

    kernel = functools.partial(_gated_attention_kernel, mask_padding=mask_padding)

    def build_and_run(single_buffer_weights: bool):
        if single_buffer_weights:
            # Constant block index across the grid -> 1 buffer is enough.
            res_spec = lambda shape: pl.BlockSpec(shape, const,
                                                  pipeline_mode=pl.Buffered(1))
        else:
            res_spec = lambda shape: pl.BlockSpec(shape, const)

        grid_spec = pltpu.PrefetchScalarGridSpec(
            num_scalar_prefetch=1,
            grid=(num_tiles,),
            in_specs=[
                pl.BlockSpec((tile_n, in_dim), lambda i, n: (i, 0)),  # x: streamed
                res_spec((in_dim, L)),          # w1 (bf16)
                res_spec((1, L)),               # b1
                res_spec((L, 2 * D)),           # fused Wvu (bf16)
                res_spec((1, 2 * D)),           # fused bvu
                res_spec((1, D)),               # ww (row layout)
                res_spec((1, 1)),               # bw
                res_spec((L, n_classes)),       # wc
                res_spec((1, n_classes)),       # bc
            ],
            out_specs=(
                pl.BlockSpec((1, n_classes), const),
                pl.BlockSpec((1, n_classes), const),
            ),
            scratch_shapes=[
                pltpu.VMEM((1, 1), jnp.float32),    # running max
                pltpu.VMEM((1, 1), jnp.float32),    # running denom
                pltpu.VMEM((1, L), jnp.float32),    # weighted-feature accumulator
            ],
        )

        return pl.pallas_call(
            kernel,
            out_shape=(
                jax.ShapeDtypeStruct((1, n_classes), jnp.float32),
                jax.ShapeDtypeStruct((1, n_classes), jnp.float32),
            ),
            grid_spec=grid_spec,
            compiler_params=pltpu.CompilerParams(
                dimension_semantics=("arbitrary",),   # N axis carries reduction state
                vmem_limit_bytes=_vmem_limit_bytes(tile_n, in_dim, n_classes, x_itemsize),
            ),
            cost_estimate=pl.CostEstimate(
                flops=flops,
                transcendentals=transcendentals,
                bytes_accessed=bytes_accessed,
            ),
        )(
            n_valid, x,
            w1_bf, params["b1"],
            wvu_bf, bvu,
            ww_row, params["bw"],
            params["wc"], params["bc"],
        )

    try:
        logits, y_prob = build_and_run(True)
    except Exception:
        # TODO(synk): fallback for jax versions where pipeline_mode=pl.Buffered(1)
        # is not supported on the main pallas_call pipeline; default double
        # buffering is functionally identical (just uses a bit more VMEM).
        logits, y_prob = build_and_run(False)

    # Glue: torch.topk(logits, 1, dim=1)[1] -> (1, 1) int32 argmax
    y_hat = jnp.argmax(logits, axis=1, keepdims=True).astype(jnp.int32)
    return logits, y_prob, y_hat, None, {}


def gated_attention_reference(x, params):
    """Pure-JAX reference matching the PyTorch forward (eval mode, f32)."""
    feat = jnp.maximum(x @ params["w1"] + params["b1"], 0.0)
    a_v = jnp.tanh(feat @ params["wv"] + params["bv"])
    a_u = jax.nn.sigmoid(feat @ params["wu"] + params["bu"])
    scores = (a_v * a_u) @ params["ww"] + params["bw"]          # (N, 1)
    attn = jax.nn.softmax(jnp.transpose(scores), axis=1)        # (1, N)
    M = attn @ feat                                             # (1, L)
    logits = M @ params["wc"] + params["bc"]
    y_prob = jax.nn.softmax(logits, axis=1)
    y_hat = jnp.argmax(logits, axis=1, keepdims=True).astype(jnp.int32)
    return logits, y_prob, y_hat


def init_params(key, in_dim, n_classes):
    """Deterministic synthetic parameters (shapes match the PyTorch module)."""
    ks = jax.random.split(key, 10)

    def lin(kw, kb, fan_in, fan_out):
        bound = 1.0 / jnp.sqrt(jnp.float32(fan_in))
        w = jax.random.uniform(kw, (fan_in, fan_out), jnp.float32, -bound, bound)
        b = jax.random.uniform(kb, (1, fan_out), jnp.float32, -bound, bound)
        return w, b

    w1, b1 = lin(ks[0], ks[1], in_dim, L)          # feature Linear(in_dim, 512)
    wv, bv = lin(ks[2], ks[3], L, D)               # attention_V Linear(512, 128)
    wu, bu = lin(ks[4], ks[5], L, D)               # attention_U Linear(512, 128)
    ww, bw = lin(ks[6], ks[7], D, K)               # attention_weights Linear(128, 1)
    wc, bc = lin(ks[8], ks[9], L * K, n_classes)   # classifier Linear(512, C)
    return dict(w1=w1, b1=b1, wv=wv, bv=bv, wu=wu, bu=bu,
                ww=ww, bw=bw, wc=wc, bc=bc)


if __name__ == "__main__":
    key = jax.random.PRNGKey(0)
    k_x, k_p = jax.random.split(key)

    # Small synthetic MIL bag that exercises >1 grid tile and last-tile masking
    # at the default tile_n=256: 400 instances -> 2 tiles, 112 padded rows.
    N, in_dim, n_classes = 400, 32, 4
    x = jax.random.normal(k_x, (N, in_dim), jnp.float32)
    params = init_params(k_p, in_dim, n_classes)

    # Store the bag in bf16: halves the streamed HBM bytes (the kernel's MXU
    # operands are bf16 anyway; accumulation stays f32).
    x_bf = x.astype(jnp.bfloat16)

    logits, y_prob, y_hat, _, _ = gated_attention_forward(x_bf, params)
    jax.block_until_ready((logits, y_prob, y_hat))

    # Reference uses the same (bf16-rounded) inputs in f32 so only the kernel's
    # internal bf16 matmul rounding differs.
    ref_logits, ref_prob, ref_hat = gated_attention_reference(
        x_bf.astype(jnp.float32), params)

    assert logits.shape == (1, n_classes)
    assert y_prob.shape == (1, n_classes)
    assert y_hat.shape == (1, 1)
    # bf16 MXU with f32 accumulation -> loosened tolerance vs the f32 reference.
    assert bool(jnp.allclose(logits, ref_logits, rtol=3e-2, atol=3e-2)), (
        logits, ref_logits)
    assert bool(jnp.allclose(y_prob, ref_prob, rtol=3e-2, atol=3e-2)), (
        y_prob, ref_prob)
    assert bool(jnp.isclose(jnp.sum(y_prob), 1.0, atol=1e-5))
    if int(y_hat[0, 0]) != int(ref_hat[0, 0]):
        # Allow an argmax flip only for a genuine near-tie under bf16 rounding.
        gap = float(ref_logits[0, int(y_hat[0, 0])] - ref_logits[0, int(ref_hat[0, 0])])
        assert abs(gap) < 5e-3, (y_hat, ref_hat, gap)
    print("KERNEL_OK")
</pallas_src>

<mosaic_0001>
module attributes {stable_mosaic.version = 11 : i64} {
  func.func @_gated_attention_kernel(%arg0: i32, %arg1: memref<1xi32, #tpu.memory_space<smem>>, %arg2: memref<256x32xbf16, #tpu.memory_space<vmem>>, %arg3: memref<32x512xbf16, #tpu.memory_space<vmem>>, %arg4: memref<1x512xf32, #tpu.memory_space<vmem>>, %arg5: memref<512x256xbf16, #tpu.memory_space<vmem>>, %arg6: memref<1x256xf32, #tpu.memory_space<vmem>>, %arg7: memref<1x128xf32, #tpu.memory_space<vmem>>, %arg8: memref<1x1xf32, #tpu.memory_space<vmem>>, %arg9: memref<512x4xf32, #tpu.memory_space<vmem>>, %arg10: memref<1x4xf32, #tpu.memory_space<vmem>>, %arg11: memref<1x4xf32, #tpu.memory_space<vmem>>, %arg12: memref<1x4xf32, #tpu.memory_space<vmem>>, %arg13: memref<1x1xf32, #tpu.memory_space<vmem>>, %arg14: memref<1x1xf32, #tpu.memory_space<vmem>>, %arg15: memref<1x512xf32, #tpu.memory_space<vmem>>) attributes {dimension_semantics = [#tpu.dimension_semantics<arbitrary>], iteration_bounds = array<i64: 2>, scalar_prefetch = 1 : i64, scratch_operands = 3 : i64, tpu.core_type = #tpu.core_type<tc>, window_params = [{transform_indices = @transform_0, window_bounds = array<i64: 256, 32>}, {pipeline_mode = #tpu.pipeline_mode<synchronous>, transform_indices = @transform_1, window_bounds = array<i64: 32, 512>}, {pipeline_mode = #tpu.pipeline_mode<synchronous>, transform_indices = @transform_2, window_bounds = array<i64: 1, 512>}, {pipeline_mode = #tpu.pipeline_mode<synchronous>, transform_indices = @transform_3, window_bounds = array<i64: 512, 256>}, {pipeline_mode = #tpu.pipeline_mode<synchronous>, transform_indices = @transform_4, window_bounds = array<i64: 1, 256>}, {pipeline_mode = #tpu.pipeline_mode<synchronous>, transform_indices = @transform_5, window_bounds = array<i64: 1, 128>}, {pipeline_mode = #tpu.pipeline_mode<synchronous>, transform_indices = @transform_6, window_bounds = array<i64: 1, 1>}, {pipeline_mode = #tpu.pipeline_mode<synchronous>, transform_indices = @transform_7, window_bounds = array<i64: 512, 4>}, {pipeline_mode = #tpu.pipeline_mode<synchronous>, transform_indices = @transform_8, window_bounds = array<i64: 1, 4>}, {pipeline_mode = #tpu.pipeline_mode<synchronous>, transform_indices = @transform_9, window_bounds = array<i64: 1, 4>}, {pipeline_mode = #tpu.pipeline_mode<synchronous>, transform_indices = @transform_10, window_bounds = array<i64: 1, 4>}]} {
    %c0_i32 = arith.constant 0 : i32
    %0 = arith.cmpi eq, %arg0, %c0_i32 : i32
    %1 = arith.extui %0 : i1 to i32
    %c0_i32_0 = arith.constant 0 : i32
    %2 = arith.cmpi ne, %1, %c0_i32_0 : i32
    scf.if %2 {
      %cst_38 = arith.constant -1.000000e+30 : f32
      %72 = vector.broadcast %cst_38 : f32 to vector<1x1xf32>
      %c0_39 = arith.constant 0 : index
      %c0_40 = arith.constant 0 : index
      %73 = vector.load %arg13[%c0_39, %c0_40] : memref<1x1xf32, #tpu.memory_space<vmem>>, vector<1x1xf32>
      tpu.vector_store %arg13[%c0_39, %c0_40], %72 {strides = array<i32>} : memref<1x1xf32, #tpu.memory_space<vmem>>, vector<1x1xf32>,
      %cst_41 = arith.constant 0.000000e+00 : f32
      %74 = vector.broadcast %cst_41 : f32 to vector<1x1xf32>
      %c0_42 = arith.constant 0 : index
      %c0_43 = arith.constant 0 : index
      %75 = vector.load %arg14[%c0_42, %c0_43] : memref<1x1xf32, #tpu.memory_space<vmem>>, vector<1x1xf32>
      tpu.vector_store %arg14[%c0_42, %c0_43], %74 {strides = array<i32>} : memref<1x1xf32, #tpu.memory_space<vmem>>, vector<1x1xf32>,
      %cst_44 = arith.constant 0.000000e+00 : f32
      %76 = vector.broadcast %cst_44 : f32 to vector<1x512xf32>
      %c0_45 = arith.constant 0 : index
      %c0_46 = arith.constant 0 : index
      %77 = vector.load %arg15[%c0_45, %c0_46] : memref<1x512xf32, #tpu.memory_space<vmem>>, vector<1x512xf32>
      tpu.vector_store %arg15[%c0_45, %c0_46], %76 {strides = array<i32>} : memref<1x512xf32, #tpu.memory_space<vmem>>, vector<1x512xf32>,
    } else {
    }
    %c0 = arith.constant 0 : index
    %c0_1 = arith.constant 0 : index
    %3 = vector.load %arg2[%c0, %c0_1] : memref<256x32xbf16, #tpu.memory_space<vmem>>, vector<256x32xbf16>
    %c0_2 = arith.constant 0 : index
    %c0_3 = arith.constant 0 : index
    %4 = vector.load %arg3[%c0_2, %c0_3] : memref<32x512xbf16, #tpu.memory_space<vmem>>, vector<32x512xbf16>
    %cst = arith.constant dense<0.000000e+00> : vector<256x512xf32>
    %5 = tpu.matmul %3, %4, %cst {dimension_numbers = #tpu.dot_dimension_numbers<[1], [0], [0], [1], [0, 0, 1, 1], [], []>} : vector<256x32xbf16>, vector<32x512xbf16>, vector<256x512xf32> -> vector<256x512xf32>
    %c0_4 = arith.constant 0 : index
    %c0_5 = arith.constant 0 : index
    %6 = vector.load %arg4[%c0_4, %c0_5] : memref<1x512xf32, #tpu.memory_space<vmem>>, vector<1x512xf32>
    %7 = vector.broadcast %6 : vector<1x512xf32> to vector<256x512xf32>
    %8 = arith.addf %5, %7 : vector<256x512xf32>
    %cst_6 = arith.constant 0.000000e+00 : f32
    %9 = vector.broadcast %cst_6 : f32 to vector<256x512xf32>
    %10 = arith.maximumf %8, %9 : vector<256x512xf32>
    %11 = arith.truncf %10 : vector<256x512xf32> to vector<256x512xbf16>
    %c0_7 = arith.constant 0 : index
    %c0_8 = arith.constant 0 : index
    %12 = vector.load %arg5[%c0_7, %c0_8] : memref<512x256xbf16, #tpu.memory_space<vmem>>, vector<512x256xbf16>
    %cst_9 = arith.constant dense<0.000000e+00> : vector<256x256xf32>
    %13 = tpu.matmul %11, %12, %cst_9 {dimension_numbers = #tpu.dot_dimension_numbers<[1], [0], [0], [1], [0, 0, 1, 1], [], []>} : vector<256x512xbf16>, vector<512x256xbf16>, vector<256x256xf32> -> vector<256x256xf32>
    %c0_10 = arith.constant 0 : index
    %c0_11 = arith.constant 0 : index
    %14 = vector.load %arg6[%c0_10, %c0_11] : memref<1x256xf32, #tpu.memory_space<vmem>>, vector<1x256xf32>
    %15 = vector.broadcast %14 : vector<1x256xf32> to vector<256x256xf32>
    %16 = arith.addf %13, %15 : vector<256x256xf32>
    %17 = vector.extract_strided_slice %16 {offsets = [0, 0], sizes = [256, 128], strides = [1, 1]} : vector<256x256xf32> to vector<256x128xf32>
    %18 = math.tanh %17 : vector<256x128xf32>
    %19 = vector.extract_strided_slice %16 {offsets = [0, 128], sizes = [256, 128], strides = [1, 1]} : vector<256x256xf32> to vector<256x128xf32>
    %20 = arith.negf %19 : vector<256x128xf32>
    %21 = math.exp %20 : vector<256x128xf32>
    %cst_12 = arith.constant 1.000000e+00 : f32
    %22 = vector.broadcast %cst_12 : f32 to vector<256x128xf32>
    %23 = arith.addf %22, %21 : vector<256x128xf32>
    %24 = arith.divf %22, %23 : vector<256x128xf32>
    %25 = arith.mulf %18, %24 : vector<256x128xf32>
    %c0_13 = arith.constant 0 : index
    %c0_14 = arith.constant 0 : index
    %26 = vector.load %arg7[%c0_13, %c0_14] : memref<1x128xf32, #tpu.memory_space<vmem>>, vector<1x128xf32>
    %27 = vector.broadcast %26 : vector<1x128xf32> to vector<256x128xf32>
    %28 = arith.mulf %25, %27 : vector<256x128xf32>
    %cst_15 = arith.constant dense<0.000000e+00> : vector<256xf32>
    %29 = vector.multi_reduction <add>, %28, %cst_15 [1] : vector<256x128xf32> to vector<256xf32>
    %30 = vector.shape_cast %29 : vector<256xf32> to vector<256x1xf32>
    %c0_16 = arith.constant 0 : index
    %c0_17 = arith.constant 0 : index
    %31 = vector.load %arg8[%c0_16, %c0_17] : memref<1x1xf32, #tpu.memory_space<vmem>>, vector<1x1xf32>
    %32 = vector.broadcast %31 : vector<1x1xf32> to vector<256x1xf32>
    %33 = arith.addf %30, %32 : vector<256x1xf32>
    %c256_i32 = arith.constant 256 : i32
    %34 = arith.muli %arg0, %c256_i32 : i32
    %35 = tpu.iota {dimensions = array<i32: 0>} : vector<256x1xi32>
    %36 = vector.broadcast %34 : i32 to vector<256x1xi32>
    %37 = arith.addi %36, %35 : vector<256x1xi32>
    %c0_18 = arith.constant 0 : index
    %38 = memref.load %arg1[%c0_18] : memref<1xi32, #tpu.memory_space<smem>>
    %39 = vector.broadcast %38 : i32 to vector<256x1xi32>
    %40 = arith.cmpi slt, %37, %39 : vector<256x1xi32>
    %cst_19 = arith.constant -1.000000e+30 : f32
    %41 = vector.broadcast %cst_19 : f32 to vector<256x1xf32>
    %42 = arith.select %40, %33, %41 : vector<256x1xi1>, vector<256x1xf32>
    %c0_20 = arith.constant 0 : index
    %c0_21 = arith.constant 0 : index
    %43 = vector.load %arg13[%c0_20, %c0_21] : memref<1x1xf32, #tpu.memory_space<vmem>>, vector<1x1xf32>
    %cst_22 = arith.constant dense<0xFF800000> : vector<1xf32>
    %44 = vector.multi_reduction <maximumf>, %42, %cst_22 [0] : vector<256x1xf32> to vector<1xf32>
    %45 = vector.shape_cast %44 : vector<1xf32> to vector<1x1xf32>
    %46 = arith.maximumf %43, %45 : vector<1x1xf32>
    %c0_23 = arith.constant 0 : index
    %c0_24 = arith.constant 0 : index
    %47 = vector.load %arg13[%c0_23, %c0_24] : memref<1x1xf32, #tpu.memory_space<vmem>>, vector<1x1xf32>
    %48 = arith.subf %47, %46 : vector<1x1xf32>
    %49 = math.exp %48 : vector<1x1xf32>
    %50 = vector.broadcast %46 : vector<1x1xf32> to vector<256x1xf32>
    %51 = arith.subf %42, %50 : vector<256x1xf32>
    %52 = math.exp %51 : vector<256x1xf32>
    %c0_25 = arith.constant 0 : index
    %c0_26 = arith.constant 0 : index
    %53 = vector.load %arg14[%c0_25, %c0_26] : memref<1x1xf32, #tpu.memory_space<vmem>>, vector<1x1xf32>
    %54 = arith.mulf %49, %53 : vector<1x1xf32>
    %cst_27 = arith.constant dense<0.000000e+00> : vector<1xf32>
    %55 = vector.multi_reduction <add>, %52, %cst_27 [0] : vector<256x1xf32> to vector<1xf32>
    %56 = vector.shape_cast %55 : vector<1xf32> to vector<1x1xf32>
    %57 = arith.addf %54, %56 : vector<1x1xf32>
    %c0_28 = arith.constant 0 : index
    %c0_29 = arith.constant 0 : index
    %58 = vector.load %arg14[%c0_28, %c0_29] : memref<1x1xf32, #tpu.memory_space<vmem>>, vector<1x1xf32>
    tpu.vector_store %arg14[%c0_28, %c0_29], %57 {strides = array<i32>} : memref<1x1xf32, #tpu.memory_space<vmem>>, vector<1x1xf32>,
    %c0_30 = arith.constant 0 : index
    %c0_31 = arith.constant 0 : index
    %59 = vector.load %arg15[%c0_30, %c0_31] : memref<1x512xf32, #tpu.memory_space<vmem>>, vector<1x512xf32>
    %60 = vector.broadcast %49 : vector<1x1xf32> to vector<1x512xf32>
    %61 = arith.mulf %60, %59 : vector<1x512xf32>
    %62 = vector.broadcast %52 : vector<256x1xf32> to vector<256x512xf32>
    %63 = arith.mulf %62, %10 : vector<256x512xf32>
    %cst_32 = arith.constant dense<0.000000e+00> : vector<512xf32>
    %64 = vector.multi_reduction <add>, %63, %cst_32 [0] : vector<256x512xf32> to vector<512xf32>
    %65 = vector.shape_cast %64 : vector<512xf32> to vector<1x512xf32>
    %66 = arith.addf %61, %65 : vector<1x512xf32>
    %c0_33 = arith.constant 0 : index
    %c0_34 = arith.constant 0 : index
    %67 = vector.load %arg15[%c0_33, %c0_34] : memref<1x512xf32, #tpu.memory_space<vmem>>, vector<1x512xf32>
    tpu.vector_store %arg15[%c0_33, %c0_34], %66 {strides = array<i32>} : memref<1x512xf32, #tpu.memory_space<vmem>>, vector<1x512xf32>,
    %c0_35 = arith.constant 0 : index
    %c0_36 = arith.constant 0 : index
    %68 = vector.load %arg13[%c0_35, %c0_36] : memref<1x1xf32, #tpu.memory_space<vmem>>, vector<1x1xf32>
    tpu.vector_store %arg13[%c0_35, %c0_36], %46 {strides = array<i32>} : memref<1x1xf32, #tpu.memory_space<vmem>>, vector<1x1xf32>,
    %c1_i32 = arith.constant 1 : i32
    %69 = arith.cmpi eq, %arg0, %c1_i32 : i32
    %70 = arith.extui %69 : i1 to i32
    %c0_i32_37 = arith.constant 0 : i32
    %71 = arith.cmpi ne, %70, %c0_i32_37 : i32
    scf.if %71 {
      %c0_38 = arith.constant 0 : index
      %c0_39 = arith.constant 0 : index
      %72 = vector.load %arg15[%c0_38, %c0_39] : memref<1x512xf32, #tpu.memory_space<vmem>>, vector<1x512xf32>
      %c0_40 = arith.constant 0 : index
      %c0_41 = arith.constant 0 : index
      %73 = vector.load %arg14[%c0_40, %c0_41] : memref<1x1xf32, #tpu.memory_space<vmem>>, vector<1x1xf32>
      %74 = vector.broadcast %73 : vector<1x1xf32> to vector<1x512xf32>
      %75 = arith.divf %72, %74 : vector<1x512xf32>
      %c0_42 = arith.constant 0 : index
      %c0_43 = arith.constant 0 : index
      %76 = vector.load %arg9[%c0_42, %c0_43] : memref<512x4xf32, #tpu.memory_space<vmem>>, vector<512x4xf32>
      %cst_44 = arith.constant dense<0.000000e+00> : vector<1x4xf32>
      %77 = tpu.matmul %75, %76, %cst_44 {dimension_numbers = #tpu.dot_dimension_numbers<[1], [0], [0], [1], [0, 0, 1, 1], [], []>} : vector<1x512xf32>, vector<512x4xf32>, vector<1x4xf32> -> vector<1x4xf32>
      %c0_45 = arith.constant 0 : index
      %c0_46 = arith.constant 0 : index
      %78 = vector.load %arg10[%c0_45, %c0_46] : memref<1x4xf32, #tpu.memory_space<vmem>>, vector<1x4xf32>
      %79 = arith.addf %77, %78 : vector<1x4xf32>
      %c0_47 = arith.constant 0 : index
      %c0_48 = arith.constant 0 : index
      %80 = vector.load %arg11[%c0_47, %c0_48] : memref<1x4xf32, #tpu.memory_space<vmem>>, vector<1x4xf32>
      tpu.vector_store %arg11[%c0_47, %c0_48], %79 {strides = array<i32>} : memref<1x4xf32, #tpu.memory_space<vmem>>, vector<1x4xf32>,
      %cst_49 = arith.constant dense<0xFF800000> : vector<1xf32>
      %81 = vector.multi_reduction <maximumf>, %79, %cst_49 [1] : vector<1x4xf32> to vector<1xf32>
      %82 = vector.shape_cast %81 : vector<1xf32> to vector<1x1xf32>
      %83 = vector.broadcast %82 : vector<1x1xf32> to vector<1x4xf32>
      %84 = arith.subf %79, %83 : vector<1x4xf32>
      %85 = math.exp %84 : vector<1x4xf32>
      %cst_50 = arith.constant dense<0.000000e+00> : vector<1xf32>
      %86 = vector.multi_reduction <add>, %85, %cst_50 [1] : vector<1x4xf32> to vector<1xf32>
      %87 = vector.shape_cast %86 : vector<1xf32> to vector<1x1xf32>
      %88 = vector.broadcast %87 : vector<1x1xf32> to vector<1x4xf32>
      %89 = arith.divf %85, %88 : vector<1x4xf32>
      %c0_51 = arith.constant 0 : index
      %c0_52 = arith.constant 0 : index
      %90 = vector.load %arg12[%c0_51, %c0_52] : memref<1x4xf32, #tpu.memory_space<vmem>>, vector<1x4xf32>
      tpu.vector_store %arg12[%c0_51, %c0_52], %89 {strides = array<i32>} : memref<1x4xf32, #tpu.memory_space<vmem>>, vector<1x4xf32>,
    } else {
    }
    return
  }
  func.func @transform_0(%arg0: i32, %arg1: memref<1xi32, #tpu.memory_space<smem>>) -> (i32, i32) {
    %c0_i32 = arith.constant 0 : i32
    %c0_i32_0 = arith.constant 0 : i32
    return %arg0, %c0_i32 : i32, i32
  }
  func.func @transform_1(%arg0: i32, %arg1: memref<1xi32, #tpu.memory_space<smem>>) -> (i32, i32) {
    %c0_i32 = arith.constant 0 : i32
    %c0_i32_0 = arith.constant 0 : i32
    %c0_i32_1 = arith.constant 0 : i32
    return %c0_i32, %c0_i32_0 : i32, i32
  }
  func.func @transform_2(%arg0: i32, %arg1: memref<1xi32, #tpu.memory_space<smem>>) -> (i32, i32) {
    %c0_i32 = arith.constant 0 : i32
    %c0_i32_0 = arith.constant 0 : i32
    %c0_i32_1 = arith.constant 0 : i32
    return %c0_i32, %c0_i32_0 : i32, i32
  }
  func.func @transform_3(%arg0: i32, %arg1: memref<1xi32, #tpu.memory_space<smem>>) -> (i32, i32) {
    %c0_i32 = arith.constant 0 : i32
    %c0_i32_0 = arith.constant 0 : i32
    %c0_i32_1 = arith.constant 0 : i32
    return %c0_i32, %c0_i32_0 : i32, i32
  }
  func.func @transform_4(%arg0: i32, %arg1: memref<1xi32, #tpu.memory_space<smem>>) -> (i32, i32) {
    %c0_i32 = arith.constant 0 : i32
    %c0_i32_0 = arith.constant 0 : i32
    %c0_i32_1 = arith.constant 0 : i32
    return %c0_i32, %c0_i32_0 : i32, i32
  }
  func.func @transform_5(%arg0: i32, %arg1: memref<1xi32, #tpu.memory_space<smem>>) -> (i32, i32) {
    %c0_i32 = arith.constant 0 : i32
    %c0_i32_0 = arith.constant 0 : i32
    %c0_i32_1 = arith.constant 0 : i32
    return %c0_i32, %c0_i32_0 : i32, i32
  }
  func.func @transform_6(%arg0: i32, %arg1: memref<1xi32, #tpu.memory_space<smem>>) -> (i32, i32) {
    %c0_i32 = arith.constant 0 : i32
    %c0_i32_0 = arith.constant 0 : i32
    %c0_i32_1 = arith.constant 0 : i32
    return %c0_i32, %c0_i32_0 : i32, i32
  }
  func.func @transform_7(%arg0: i32, %arg1: memref<1xi32, #tpu.memory_space<smem>>) -> (i32, i32) {
    %c0_i32 = arith.constant 0 : i32
    %c0_i32_0 = arith.constant 0 : i32
    %c0_i32_1 = arith.constant 0 : i32
    return %c0_i32, %c0_i32_0 : i32, i32
  }
  func.func @transform_8(%arg0: i32, %arg1: memref<1xi32, #tpu.memory_space<smem>>) -> (i32, i32) {
    %c0_i32 = arith.constant 0 : i32
    %c0_i32_0 = arith.constant 0 : i32
    %c0_i32_1 = arith.constant 0 : i32
    return %c0_i32, %c0_i32_0 : i32, i32
  }
  func.func @transform_9(%arg0: i32, %arg1: memref<1xi32, #tpu.memory_space<smem>>) -> (i32, i32) {
    %c0_i32 = arith.constant 0 : i32
    %c0_i32_0 = arith.constant 0 : i32
    %c0_i32_1 = arith.constant 0 : i32
    return %c0_i32, %c0_i32_0 : i32, i32
  }
  func.func @transform_10(%arg0: i32, %arg1: memref<1xi32, #tpu.memory_space<smem>>) -> (i32, i32) {
    %c0_i32 = arith.constant 0 : i32
    %c0_i32_0 = arith.constant 0 : i32
    %c0_i32_1 = arith.constant 0 : i32
    return %c0_i32, %c0_i32_0 : i32, i32
  }
}

module attributes {stable_mosaic.version = 11 : i64} {
  func.func @_gated_attention_kernel(%arg0: i32, %arg1: memref<1xi32, #tpu.memory_space<smem>>, %arg2: memref<256x32xbf16, #tpu.memory_space<vmem>>, %arg3: memref<32x512xbf16, #tpu.memory_space<vmem>>, %arg4: memref<1x512xf32, #tpu.memory_space<vmem>>, %arg5: memref<512x256xbf16, #tpu.memory_space<vmem>>, %arg6: memref<1x256xf32, #tpu.memory_space<vmem>>, %arg7: memref<1x128xf32, #tpu.memory_space<vmem>>, %arg8: memref<1x1xf32, #tpu.memory_space<vmem>>, %arg9: memref<512x4xf32, #tpu.memory_space<vmem>>, %arg10: memref<1x4xf32, #tpu.memory_space<vmem>>, %arg11: memref<1x4xf32, #tpu.memory_space<vmem>>, %arg12: memref<1x4xf32, #tpu.memory_space<vmem>>, %arg13: memref<1x1xf32, #tpu.memory_space<vmem>>, %arg14: memref<1x1xf32, #tpu.memory_space<vmem>>, %arg15: memref<1x512xf32, #tpu.memory_space<vmem>>) attributes {dimension_semantics = [#tpu.dimension_semantics<arbitrary>], iteration_bounds = array<i64: 2>, scalar_prefetch = 1 : i64, scratch_operands = 3 : i64, tpu.core_type = #tpu.core_type<tc>, window_params = [{transform_indices = @transform_0, window_bounds = array<i64: 256, 32>}, {pipeline_mode = #tpu.pipeline_mode<synchronous>, transform_indices = @transform_1, window_bounds = array<i64: 32, 512>}, {pipeline_mode = #tpu.pipeline_mode<synchronous>, transform_indices = @transform_2, window_bounds = array<i64: 1, 512>}, {pipeline_mode = #tpu.pipeline_mode<synchronous>, transform_indices = @transform_3, window_bounds = array<i64: 512, 256>}, {pipeline_mode = #tpu.pipeline_mode<synchronous>, transform_indices = @transform_4, window_bounds = array<i64: 1, 256>}, {pipeline_mode = #tpu.pipeline_mode<synchronous>, transform_indices = @transform_5, window_bounds = array<i64: 1, 128>}, {pipeline_mode = #tpu.pipeline_mode<synchronous>, transform_indices = @transform_6, window_bounds = array<i64: 1, 1>}, {pipeline_mode = #tpu.pipeline_mode<synchronous>, transform_indices = @transform_7, window_bounds = array<i64: 512, 4>}, {pipeline_mode = #tpu.pipeline_mode<synchronous>, transform_indices = @transform_8, window_bounds = array<i64: 1, 4>}, {pipeline_mode = #tpu.pipeline_mode<synchronous>, transform_indices = @transform_9, window_bounds = array<i64: 1, 4>}, {pipeline_mode = #tpu.pipeline_mode<synchronous>, transform_indices = @transform_10, window_bounds = array<i64: 1, 4>}]} {
    %c0_i32 = arith.constant 0 : i32
    %0 = arith.cmpi eq, %arg0, %c0_i32 : i32
    %1 = arith.extui %0 : i1 to i32
    %c0_i32_0 = arith.constant 0 : i32
    %2 = arith.cmpi ne, %1, %c0_i32_0 : i32
    scf.if %2 {
      %cst_38 = arith.constant -1.000000e+30 : f32
      %72 = vector.broadcast %cst_38 : f32 to vector<1x1xf32>
      %c0_39 = arith.constant 0 : index
      %c0_40 = arith.constant 0 : index
      %73 = vector.load %arg13[%c0_39, %c0_40] : memref<1x1xf32, #tpu.memory_space<vmem>>, vector<1x1xf32>
      tpu.vector_store %arg13[%c0_39, %c0_40], %72 {strides = array<i32>} : memref<1x1xf32, #tpu.memory_space<vmem>>, vector<1x1xf32>,
      %cst_41 = arith.constant 0.000000e+00 : f32
      %74 = vector.broadcast %cst_41 : f32 to vector<1x1xf32>
      %c0_42 = arith.constant 0 : index
      %c0_43 = arith.constant 0 : index
      %75 = vector.load %arg14[%c0_42, %c0_43] : memref<1x1xf32, #tpu.memory_space<vmem>>, vector<1x1xf32>
      tpu.vector_store %arg14[%c0_42, %c0_43], %74 {strides = array<i32>} : memref<1x1xf32, #tpu.memory_space<vmem>>, vector<1x1xf32>,
      %cst_44 = arith.constant 0.000000e+00 : f32
      %76 = vector.broadcast %cst_44 : f32 to vector<1x512xf32>
      %c0_45 = arith.constant 0 : index
      %c0_46 = arith.constant 0 : index
      %77 = vector.load %arg15[%c0_45, %c0_46] : memref<1x512xf32, #tpu.memory_space<vmem>>, vector<1x512xf32>
      tpu.vector_store %arg15[%c0_45, %c0_46], %76 {strides = array<i32>} : memref<1x512xf32, #tpu.memory_space<vmem>>, vector<1x512xf32>,
    } else {
    }
    %c0 = arith.constant 0 : index
    %c0_1 = arith.constant 0 : index
    %3 = vector.load %arg2[%c0, %c0_1] : memref<256x32xbf16, #tpu.memory_space<vmem>>, vector<256x32xbf16>
    %c0_2 = arith.constant 0 : index
    %c0_3 = arith.constant 0 : index
    %4 = vector.load %arg3[%c0_2, %c0_3] : memref<32x512xbf16, #tpu.memory_space<vmem>>, vector<32x512xbf16>
    %cst = arith.constant dense<0.000000e+00> : vector<256x512xf32>
    %5 = tpu.matmul %3, %4, %cst {dimension_numbers = #tpu.dot_dimension_numbers<[1], [0], [0], [1], [0, 0, 1, 1], [], []>} : vector<256x32xbf16>, vector<32x512xbf16>, vector<256x512xf32> -> vector<256x512xf32>
    %c0_4 = arith.constant 0 : index
    %c0_5 = arith.constant 0 : index
    %6 = vector.load %arg4[%c0_4, %c0_5] : memref<1x512xf32, #tpu.memory_space<vmem>>, vector<1x512xf32>
    %7 = vector.broadcast %6 : vector<1x512xf32> to vector<256x512xf32>
    %8 = arith.addf %5, %7 : vector<256x512xf32>
    %cst_6 = arith.constant 0.000000e+00 : f32
    %9 = vector.broadcast %cst_6 : f32 to vector<256x512xf32>
    %10 = arith.maximumf %8, %9 : vector<256x512xf32>
    %11 = arith.truncf %10 : vector<256x512xf32> to vector<256x512xbf16>
    %c0_7 = arith.constant 0 : index
    %c0_8 = arith.constant 0 : index
    %12 = vector.load %arg5[%c0_7, %c0_8] : memref<512x256xbf16, #tpu.memory_space<vmem>>, vector<512x256xbf16>
    %cst_9 = arith.constant dense<0.000000e+00> : vector<256x256xf32>
    %13 = tpu.matmul %11, %12, %cst_9 {dimension_numbers = #tpu.dot_dimension_numbers<[1], [0], [0], [1], [0, 0, 1, 1], [], []>} : vector<256x512xbf16>, vector<512x256xbf16>, vector<256x256xf32> -> vector<256x256xf32>
    %c0_10 = arith.constant 0 : index
    %c0_11 = arith.constant 0 : index
    %14 = vector.load %arg6[%c0_10, %c0_11] : memref<1x256xf32, #tpu.memory_space<vmem>>, vector<1x256xf32>
    %15 = vector.broadcast %14 : vector<1x256xf32> to vector<256x256xf32>
    %16 = arith.addf %13, %15 : vector<256x256xf32>
    %17 = vector.extract_strided_slice %16 {offsets = [0, 0], sizes = [256, 128], strides = [1, 1]} : vector<256x256xf32> to vector<256x128xf32>
    %18 = math.tanh %17 : vector<256x128xf32>
    %19 = vector.extract_strided_slice %16 {offsets = [0, 128], sizes = [256, 128], strides = [1, 1]} : vector<256x256xf32> to vector<256x128xf32>
    %20 = arith.negf %19 : vector<256x128xf32>
    %21 = math.exp %20 : vector<256x128xf32>
    %cst_12 = arith.constant 1.000000e+00 : f32
    %22 = vector.broadcast %cst_12 : f32 to vector<256x128xf32>
    %23 = arith.addf %22, %21 : vector<256x128xf32>
    %24 = arith.divf %22, %23 : vector<256x128xf32>
    %25 = arith.mulf %18, %24 : vector<256x128xf32>
    %c0_13 = arith.constant 0 : index
    %c0_14 = arith.constant 0 : index
    %26 = vector.load %arg7[%c0_13, %c0_14] : memref<1x128xf32, #tpu.memory_space<vmem>>, vector<1x128xf32>
    %27 = vector.broadcast %26 : vector<1x128xf32> to vector<256x128xf32>
    %28 = arith.mulf %25, %27 : vector<256x128xf32>
    %cst_15 = arith.constant dense<0.000000e+00> : vector<256xf32>
    %29 = vector.multi_reduction <add>, %28, %cst_15 [1] : vector<256x128xf32> to vector<256xf32>
    %30 = vector.shape_cast %29 : vector<256xf32> to vector<256x1xf32>
    %c0_16 = arith.constant 0 : index
    %c0_17 = arith.constant 0 : index
    %31 = vector.load %arg8[%c0_16, %c0_17] : memref<1x1xf32, #tpu.memory_space<vmem>>, vector<1x1xf32>
    %32 = vector.broadcast %31 : vector<1x1xf32> to vector<256x1xf32>
    %33 = arith.addf %30, %32 : vector<256x1xf32>
    %c256_i32 = arith.constant 256 : i32
    %34 = arith.muli %arg0, %c256_i32 : i32
    %35 = tpu.iota {dimensions = array<i32: 0>} : vector<256x1xi32>
    %36 = vector.broadcast %34 : i32 to vector<256x1xi32>
    %37 = arith.addi %36, %35 : vector<256x1xi32>
    %c0_18 = arith.constant 0 : index
    %38 = memref.load %arg1[%c0_18] : memref<1xi32, #tpu.memory_space<smem>>
    %39 = vector.broadcast %38 : i32 to vector<256x1xi32>
    %40 = arith.cmpi slt, %37, %39 : vector<256x1xi32>
    %cst_19 = arith.constant -1.000000e+30 : f32
    %41 = vector.broadcast %cst_19 : f32 to vector<256x1xf32>
    %42 = arith.select %40, %33, %41 : vector<256x1xi1>, vector<256x1xf32>
    %c0_20 = arith.constant 0 : index
    %c0_21 = arith.constant 0 : index
    %43 = vector.load %arg13[%c0_20, %c0_21] : memref<1x1xf32, #tpu.memory_space<vmem>>, vector<1x1xf32>
    %cst_22 = arith.constant dense<0xFF800000> : vector<1xf32>
    %44 = vector.multi_reduction <maximumf>, %42, %cst_22 [0] : vector<256x1xf32> to vector<1xf32>
    %45 = vector.shape_cast %44 : vector<1xf32> to vector<1x1xf32>
    %46 = arith.maximumf %43, %45 : vector<1x1xf32>
    %c0_23 = arith.constant 0 : index
    %c0_24 = arith.constant 0 : index
    %47 = vector.load %arg13[%c0_23, %c0_24] : memref<1x1xf32, #tpu.memory_space<vmem>>, vector<1x1xf32>
    %48 = arith.subf %47, %46 : vector<1x1xf32>
    %49 = math.exp %48 : vector<1x1xf32>
    %50 = vector.broadcast %46 : vector<1x1xf32> to vector<256x1xf32>
    %51 = arith.subf %42, %50 : vector<256x1xf32>
    %52 = math.exp %51 : vector<256x1xf32>
    %c0_25 = arith.constant 0 : index
    %c0_26 = arith.constant 0 : index
    %53 = vector.load %arg14[%c0_25, %c0_26] : memref<1x1xf32, #tpu.memory_space<vmem>>, vector<1x1xf32>
    %54 = arith.mulf %49, %53 : vector<1x1xf32>
    %cst_27 = arith.constant dense<0.000000e+00> : vector<1xf32>
    %55 = vector.multi_reduction <add>, %52, %cst_27 [0] : vector<256x1xf32> to vector<1xf32>
    %56 = vector.shape_cast %55 : vector<1xf32> to vector<1x1xf32>
    %57 = arith.addf %54, %56 : vector<1x1xf32>
    %c0_28 = arith.constant 0 : index
    %c0_29 = arith.constant 0 : index
    %58 = vector.load %arg14[%c0_28, %c0_29] : memref<1x1xf32, #tpu.memory_space<vmem>>, vector<1x1xf32>
    tpu.vector_store %arg14[%c0_28, %c0_29], %57 {strides = array<i32>} : memref<1x1xf32, #tpu.memory_space<vmem>>, vector<1x1xf32>,
    %c0_30 = arith.constant 0 : index
    %c0_31 = arith.constant 0 : index
    %59 = vector.load %arg15[%c0_30, %c0_31] : memref<1x512xf32, #tpu.memory_space<vmem>>, vector<1x512xf32>
    %60 = vector.broadcast %49 : vector<1x1xf32> to vector<1x512xf32>
    %61 = arith.mulf %60, %59 : vector<1x512xf32>
    %62 = vector.broadcast %52 : vector<256x1xf32> to vector<256x512xf32>
    %63 = arith.mulf %62, %10 : vector<256x512xf32>
    %cst_32 = arith.constant dense<0.000000e+00> : vector<512xf32>
    %64 = vector.multi_reduction <add>, %63, %cst_32 [0] : vector<256x512xf32> to vector<512xf32>
    %65 = vector.shape_cast %64 : vector<512xf32> to vector<1x512xf32>
    %66 = arith.addf %61, %65 : vector<1x512xf32>
    %c0_33 = arith.constant 0 : index
    %c0_34 = arith.constant 0 : index
    %67 = vector.load %arg15[%c0_33, %c0_34] : memref<1x512xf32, #tpu.memory_space<vmem>>, vector<1x512xf32>
    tpu.vector_store %arg15[%c0_33, %c0_34], %66 {strides = array<i32>} : memref<1x512xf32, #tpu.memory_space<vmem>>, vector<1x512xf32>,
    %c0_35 = arith.constant 0 : index
    %c0_36 = arith.constant 0 : index
    %68 = vector.load %arg13[%c0_35, %c0_36] : memref<1x1xf32, #tpu.memory_space<vmem>>, vector<1x1xf32>
    tpu.vector_store %arg13[%c0_35, %c0_36], %46 {strides = array<i32>} : memref<1x1xf32, #tpu.memory_space<vmem>>, vector<1x1xf32>,
    %c1_i32 = arith.constant 1 : i32
    %69 = arith.cmpi eq, %arg0, %c1_i32 : i32
    %70 = arith.extui %69 : i1 to i32
    %c0_i32_37 = arith.constant 0 : i32
    %71 = arith.cmpi ne, %70, %c0_i32_37 : i32
    scf.if %71 {
      %c0_38 = arith.constant 0 : index
      %c0_39 = arith.constant 0 : index
      %72 = vector.load %arg15[%c0_38, %c0_39] : memref<1x512xf32, #tpu.memory_space<vmem>>, vector<1x512xf32>
      %c0_40 = arith.constant 0 : index
      %c0_41 = arith.constant 0 : index
      %73 = vector.load %arg14[%c0_40, %c0_41] : memref<1x1xf32, #tpu.memory_space<vmem>>, vector<1x1xf32>
      %74 = vector.broadcast %73 : vector<1x1xf32> to vector<1x512xf32>
      %75 = arith.divf %72, %74 : vector<1x512xf32>
      %c0_42 = arith.constant 0 : index
      %c0_43 = arith.constant 0 : index
      %76 = vector.load %arg9[%c0_42, %c0_43] : memref<512x4xf32, #tpu.memory_space<vmem>>, vector<512x4xf32>
      %cst_44 = arith.constant dense<0.000000e+00> : vector<1x4xf32>
      %77 = tpu.matmul %75, %76, %cst_44 {dimension_numbers = #tpu.dot_dimension_numbers<[1], [0], [0], [1], [0, 0, 1, 1], [], []>} : vector<1x512xf32>, vector<512x4xf32>, vector<1x4xf32> -> vector<1x4xf32>
      %c0_45 = arith.constant 0 : index
      %c0_46 = arith.constant 0 : index
      %78 = vector.load %arg10[%c0_45, %c0_46] : memref<1x4xf32, #tpu.memory_space<vmem>>, vector<1x4xf32>
      %79 = arith.addf %77, %78 : vector<1x4xf32>
      %c0_47 = arith.constant 0 : index
      %c0_48 = arith.constant 0 : index
      %80 = vector.load %arg11[%c0_47, %c0_48] : memref<1x4xf32, #tpu.memory_space<vmem>>, vector<1x4xf32>
      tpu.vector_store %arg11[%c0_47, %c0_48], %79 {strides = array<i32>} : memref<1x4xf32, #tpu.memory_space<vmem>>, vector<1x4xf32>,
      %cst_49 = arith.constant dense<0xFF800000> : vector<1xf32>
      %81 = vector.multi_reduction <maximumf>, %79, %cst_49 [1] : vector<1x4xf32> to vector<1xf32>
      %82 = vector.shape_cast %81 : vector<1xf32> to vector<1x1xf32>
      %83 = vector.broadcast %82 : vector<1x1xf32> to vector<1x4xf32>
      %84 = arith.subf %79, %83 : vector<1x4xf32>
      %85 = math.exp %84 : vector<1x4xf32>
      %cst_50 = arith.constant dense<0.000000e+00> : vector<1xf32>
      %86 = vector.multi_reduction <add>, %85, %cst_50 [1] : vector<1x4xf32> to vector<1xf32>
      %87 = vector.shape_cast %86 : vector<1xf32> to vector<1x1xf32>
      %88 = vector.broadcast %87 : vector<1x1xf32> to vector<1x4xf32>
      %89 = arith.divf %85, %88 : vector<1x4xf32>
      %c0_51 = arith.constant 0 : index
      %c0_52 = arith.constant 0 : index
      %90 = vector.load %arg12[%c0_51, %c0_52] : memref<1x4xf32, #tpu.memory_space<vmem>>, vector<1x4xf32>
      tpu.vector_store %arg12[%c0_51, %c0_52], %89 {strides = array<i32>} : memref<1x4xf32, #tpu.memory_space<vmem>>, vector<1x4xf32>,
    } else {
    }
    return
  }
  func.func @transform_0(%arg0: i32, %arg1: memref<1xi32, #tpu.memory_space<smem>>) -> (i32, i32) {
    %c0_i32 = arith.constant 0 : i32
    %c0_i32_0 = arith.constant 0 : i32
    return %arg0, %c0_i32 : i32, i32
  }
  func.func @transform_1(%arg0: i32, %arg1: memref<1xi32, #tpu.memory_space<smem>>) -> (i32, i32) {
    %c0_i32 = arith.constant 0 : i32
    %c0_i32_0 = arith.constant 0 : i32
    %c0_i32_1 = arith.constant 0 : i32
    return %c0_i32, %c0_i32_0 : i32, i32
  }
  func.func @transform_2(%arg0: i32, %arg1: memref<1xi32, #tpu.memory_space<smem>>) -> (i32, i32) {
    %c0_i32 = arith.constant 0 : i32
    %c0_i32_0 = arith.constant 0 : i32
    %c0_i32_1 = arith.constant 0 : i32
    return %c0_i32, %c0_i32_0 : i32, i32
  }
  func.func @transform_3(%arg0: i32, %arg1: memref<1xi32, #tpu.memory_space<smem>>) -> (i32, i32) {
    %c0_i32 = arith.constant 0 : i32
    %c0_i32_0 = arith.constant 0 : i32
    %c0_i32_1 = arith.constant 0 : i32
    return %c0_i32, %c0_i32_0 : i32, i32
  }
  func.func @transform_4(%arg0: i32, %arg1: memref<1xi32, #tpu.memory_space<smem>>) -> (i32, i32) {
    %c0_i32 = arith.constant 0 : i32
    %c0_i32_0 = arith.constant 0 : i32
    %c0_i32_1 = arith.constant 0 : i32
    return %c0_i32, %c0_i32_0 : i32, i32
  }
  func.func @transform_5(%arg0: i32, %arg1: memref<1xi32, #tpu.memory_space<smem>>) -> (i32, i32) {
    %c0_i32 = arith.constant 0 : i32
    %c0_i32_0 = arith.constant 0 : i32
    %c0_i32_1 = arith.constant 0 : i32
    return %c0_i32, %c0_i32_0 : i32, i32
  }
  func.func @transform_6(%arg0: i32, %arg1: memref<1xi32, #tpu.memory_space<smem>>) -> (i32, i32) {
    %c0_i32 = arith.constant 0 : i32
    %c0_i32_0 = arith.constant 0 : i32
    %c0_i32_1 = arith.constant 0 : i32
    return %c0_i32, %c0_i32_0 : i32, i32
  }
  func.func @transform_7(%arg0: i32, %arg1: memref<1xi32, #tpu.memory_space<smem>>) -> (i32, i32) {
    %c0_i32 = arith.constant 0 : i32
    %c0_i32_0 = arith.constant 0 : i32
    %c0_i32_1 = arith.constant 0 : i32
    return %c0_i32, %c0_i32_0 : i32, i32
  }
  func.func @transform_8(%arg0: i32, %arg1: memref<1xi32, #tpu.memory_space<smem>>) -> (i32, i32) {
    %c0_i32 = arith.constant 0 : i32
    %c0_i32_0 = arith.constant 0 : i32
    %c0_i32_1 = arith.constant 0 : i32
    return %c0_i32, %c0_i32_0 : i32, i32
  }
  func.func @transform_9(%arg0: i32, %arg1: memref<1xi32, #tpu.memory_space<smem>>) -> (i32, i32) {
    %c0_i32 = arith.constant 0 : i32
    %c0_i32_0 = arith.constant 0 : i32
    %c0_i32_1 = arith.constant 0 : i32
    return %c0_i32, %c0_i32_0 : i32, i32
  }
  func.func @transform_10(%arg0: i32, %arg1: memref<1xi32, #tpu.memory_space<smem>>) -> (i32, i32) {
    %c0_i32 = arith.constant 0 : i32
    %c0_i32_0 = arith.constant 0 : i32
    %c0_i32_1 = arith.constant 0 : i32
    return %c0_i32, %c0_i32_0 : i32, i32
  }
}

</mosaic_0001>

<bundles_post_ra>
// kernel: tpu_custom_call.1
= control target key start
LH: loop header
LB: loop body
LE: loop exit
PB: predicated region body
PF: predicated region fallthrough
CT: control target
= control target key end

     0   :  { %s6873_s0 = inlined_call_operand.<no memory space> [shape: s32[1], index: 0, kind: input, shape index: {}]   ;;  %s6874_s1 = inlined_call_operand.vmem [shape: bf16[512,32], index: 1, kind: input, shape index: {}]   ;;  %s6875_s2 = inlined_call_operand.vmem [shape: bf16[32,512], index: 2, kind: input, shape index: {}]   ;;  %s6876_s3 = inlined_call_operand.vmem [shape: f32[1,512], index: 3, kind: input, shape index: {}]   ;;  %s6877_s4 = inlined_call_operand.vmem [shape: bf16[512,256], index: 4, kind: input, shape index: {}]   ;;  %s6878_s5 = inlined_call_operand.vmem [shape: f32[1,256], index: 5, kind: input, shape index: {}]   ;;  %s6879_s6 = inlined_call_operand.vmem [shape: f32[1,128], index: 6, kind: input, shape index: {}]   ;;  %s6880_s7 = inlined_call_operand.<no memory space> [shape: f32[1,1], index: 7, kind: input, shape index: {}]   ;;  %s6881_s8 = inlined_call_operand.vmem [shape: f32[512,4], index: 8, kind: input, shape index: {}]   ;;  %s6882_s9 = inlined_call_operand.vmem [shape: f32[1,4], index: 9, kind: input, shape index: {}]   ;;  %s6883_s10 = inlined_call_operand.hbm [shape: f32[1,4], index: 10, kind: output, shape index: {0}]   ;;  %s6884_s11 = inlined_call_operand.hbm [shape: f32[1,4], index: 11, kind: output, shape index: {1}]  }
   0x1   :  { %17 = sst [smem:[#allocation6]] %s6873_s0  ;;  %v18_v0 = vstv %s6880_s7 }
   0x2   :  { %19 = vst [vmem:[#allocation7] sm:$0x1] %v18_v0 }
   0x3   :  { %20 = vsyncpa [#allocation9], 0 }
   0x4   :  { %21 = vsyncpa [#allocation11], 0  ;;  %s4339_s21 = smov 0  }
   0x5 LB: > { %s4345_s22 = sadd.s32 4294967295, %s4264_s21   ;;  %p3548_p0 = scmp.ge.s32.totalorder %s4264_s21, 1  ;;  %s4264_s21 = sphi %s4339_s21, %s27_s21  }
   0x6   : > { %p312_p1 = scmp.lt.s32.totalorder %s4264_s21, 3 }
   0x8   : > { %p313_p2 = pnand %p3548_p0, %p312_p1 }
   0xa   : > { %316 = sbr.rel (%p313_p2) target bundleno = 1722 (0x6ba), region = 56 }
   0xf   : > { %s3549_s0 = sshll.u32 %s4345_s22, 5  ;;  %p3551_p4 = scmp.ne.s32.totalorder %s4345_s22, 0 }
  0x10   : > { %p346_p3 = scmp.lt.s32.totalorder %s3549_s0, 63 }
  0x11   : > { %355 = sbr.rel (%p3551_p4) target bundleno = 26 (0x1a), region = 60 }
  0x12   : > { %s7537_s0 = smov (!%p346_p3, %s3549_s0), 63 }
  0x13   : > { %s3550_s7 = sshll.u32 %s7537_s0, 2 }
  0x14   : > { %s4353_s25 = scalar_lea.vmem %s6874_s1, %s3550_s7 }
  0x16   : > { %vm356_vm0 = vcmask 0   ;;  %v359_v1 = vlaneseq  ;;  %v4266_v2 = vmov -1e+30   ;;  %v4267_v3 = vmov 0.0  }
  0x17   : > { %357 = vst.msk [vmem:[#allocation2] sm:$0x1] %vm356_vm0, %v4266_v2  ;;  %358 = vst.msk [vmem:[#allocation3] sm:$0x1] %vm356_vm0, %v4267_v3 }
  0x18   : > { %vm361_vm1 = vcmp.lt.s32.totalorder %v359_v1, 512 }
  0x19   : > { %363 = vst.msk [vmem:[#allocation4] sm:$0xf] %vm361_vm1, %v4267_v3 }
  0x1a PF: > { %v3813_v4 = vld [vmem:[%s6875_s2 + $0x24] ss:$16 sps:$4 sm:$0xff]   ;;  %v3815_v5 = vld [vmem:[%s6875_s2 + $0x2c] ss:$16 sps:$4 sm:$0xff]   ;;  %v4268_v6 = vmov 0   ;;  %vm546_vm2 = vcmask 261120  }
  0x1b   : > { %627 = vmatprep.mubr.bf16.mxu0 %v4268_v6  ;;  %820 = vmatprep.mubr.bf16.mxu1 %v4268_v6  ;;  %v3817_v7 = vld [vmem:[%s6875_s2 + $0x20] ss:$16 sps:$4 sm:$0xff]   ;;  %v3818_v8 = vld [vmem:[%s6875_s2 + $0x28] ss:$16 sps:$4 sm:$0xff]   ;;  %v3819_v9 = vld [vmem:[%s6875_s2 + $0x4] ss:$16 sps:$4 sm:$0xff]  }
  0x1c   : > { %607 = vmatprep.subr.bf16.mxu0 %v3813_v4  ;;  %3811 = vset.pattern.permute.xlu0 %v4268_v6  ;;  %v3821_v10 = vld [vmem:[%s6875_s2 + $0xc] ss:$16 sps:$4 sm:$0xff]   ;;  %v3823_v11 = vld [vmem:[%s6875_s2] ss:$16 sps:$4 sm:$0xff]   ;;  %v3824_v12 = vld [vmem:[%s6875_s2 + $0x8] ss:$16 sps:$4 sm:$0xff]  }
  0x1d   : > { %800 = vmatprep.subr.bf16.mxu1 %v3815_v5  ;;  %3812 = vset.pattern.permute.xlu1 %v4268_v6  ;;  %v3825_v13 = vld [vmem:[%s4353_s25] sm:$0xff]   ;;  %v3826_v14 = vld [vmem:[%s4353_s25 + $0x8] sm:$0xff]   ;;  %v3837_v15 = vld [vmem:[%s6877_s4 + $0x74] ss:$8 sps:$4 sm:$0xff]   ;;  %s2420_s12 = sld [smem:[#allocation6]]  ;;  %s3706_s13 = sshll.u32 %s4345_s22, 8 }
  0x1e   : > { %608 = vmatpush1.bf16.msra.mxu0 %v3817_v7  ;;  %801 = vmatpush1.bf16.msra.mxu1 %v3818_v8  ;;  %v3835_v16 = vld [vmem:[%s6877_s4 + $0x70] ss:$8 sps:$4 sm:$0xff]   ;;  %v3840_v17 = vld [vmem:[%s6877_s4 + $0x174] ss:$8 sps:$4 sm:$0xff]   ;;  %v3844_v19 = vld [vmem:[%s6877_s4 + $0x64] ss:$8 sps:$4 sm:$0xff]  }
  0x1f   : > { %609 = vmatprep.subr.bf16.mxu0 %v3819_v9  ;;  %802 = vmatprep.subr.bf16.mxu1 %v3821_v10  ;;  %v3838_v18 = vld [vmem:[%s6877_s4 + $0x170] ss:$8 sps:$4 sm:$0xff]   ;;  %v3842_v20 = vld [vmem:[%s6877_s4 + $0x60] ss:$8 sps:$4 sm:$0xff]   ;;  %v3847_v21 = vld [vmem:[%s6877_s4 + $0x164] ss:$8 sps:$4 sm:$0xff]  }
  0x20   : > { %v3845_v22 = vld [vmem:[%s6877_s4 + $0x160] ss:$8 sps:$4 sm:$0xff]   ;;  %v3827_v23 = vld [vmem:[%s4353_s25 + $0x10] sm:$0xff]   ;;  %v3858_v28 = vld [vmem:[%s6877_s4 + $0x44] ss:$8 sps:$4 sm:$0xff]   ;;  %vm2487_vm12 = vcmask 7168  }
  0x21   : > { %v3851_v24 = vld [vmem:[%s6877_s4 + $0x54] ss:$8 sps:$4 sm:$0xff]   ;;  %v3849_v25 = vld [vmem:[%s6877_s4 + $0x50] ss:$8 sps:$4 sm:$0xff]   ;;  %v3861_v29 = vld [vmem:[%s6877_s4 + $0x144] ss:$8 sps:$4 sm:$0xff]  }
  0x22   : > { %610 = vmatpush1.bf16.msra.mxu0 %v3823_v11  ;;  %803 = vmatpush1.bf16.msra.mxu1 %v3824_v12  ;;  %v3854_v26 = vld [vmem:[%s6877_s4 + $0x154] ss:$8 sps:$4 sm:$0xff]   ;;  %v3852_v27 = vld [vmem:[%s6877_s4 + $0x150] ss:$8 sps:$4 sm:$0xff]   ;;  %v3856_v31 = vld [vmem:[%s6877_s4 + $0x40] ss:$8 sps:$4 sm:$0xff]  }
  0x23   : > { %1569 = vmatprep.subr.bf16.mxu0 %v3837_v15  ;;  %1762 = vmatprep.subr.bf16.mxu1 %v3840_v17  ;;  %v3828_v30 = vld [vmem:[%s4353_s25 + $0x18] sm:$0xff]   ;;  %v3859_v32 = vld [vmem:[%s6877_s4 + $0x140] ss:$8 sps:$4 sm:$0xff]   ;;  %v3872_v37 = vld [vmem:[%s6877_s4 + $0x24] ss:$8 sps:$4 sm:$0xff]   ;;  %p3707_p5 = scmp.ne.s32.totalorder %s4345_s22, 1 }
  0x24   : > { %v3865_v33 = vld [vmem:[%s6877_s4 + $0x34] ss:$8 sps:$4 sm:$0xff]   ;;  %v3863_v34 = vld [vmem:[%s6877_s4 + $0x30] ss:$8 sps:$4 sm:$0xff]   ;;  %v3875_v38 = vld [vmem:[%s6877_s4 + $0x124] ss:$8 sps:$4 sm:$0xff]  }
  0x25   : > { %3576 = vmatmul.mubr.msk.bf16.vlgmr.msra.gmra.mxu0 %vm546_vm2, %v3825_v13  ;;  %3592 = vmatmul.mubr.msk.bf16.vlgmr.msra.gmra.mxu1 %vm546_vm2, %v3825_v13  ;;  %v3868_v35 = vld [vmem:[%s6877_s4 + $0x134] ss:$8 sps:$4 sm:$0xff]   ;;  %v3866_v36 = vld [vmem:[%s6877_s4 + $0x130] ss:$8 sps:$4 sm:$0xff]   ;;  %v3870_v39 = vld [vmem:[%s6877_s4 + $0x20] ss:$8 sps:$4 sm:$0xff]  }
  0x26   : > { %637 = vmatprep.mubr.bf16.mxu0 %v4268_v6  ;;  %830 = vmatprep.mubr.bf16.mxu1 %v4268_v6  ;;  %v3873_v40 = vld [vmem:[%s6877_s4 + $0x120] ss:$8 sps:$4 sm:$0xff]   ;;  %v3879_v41 = vld [vmem:[%s6877_s4 + $0x14] ss:$8 sps:$4 sm:$0xff]   ;;  %v3877_v43 = vld [vmem:[%s6877_s4 + $0x10] ss:$8 sps:$4 sm:$0xff]  }
  0x27   : > { %1570 = vmatpush1.bf16.msra.mxu0 %v3835_v16  ;;  %1763 = vmatpush1.bf16.msra.mxu1 %v3838_v18  ;;  %v3829_v42 = vld [vmem:[%s4353_s25 + $0x20] sm:$0xff]   ;;  %v3882_v44 = vld [vmem:[%s6877_s4 + $0x114] ss:$8 sps:$4 sm:$0xff]   ;;  %v3880_v45 = vld [vmem:[%s6877_s4 + $0x110] ss:$8 sps:$4 sm:$0xff]  }
  0x28   : > { %1571 = vmatprep.subr.bf16.mxu0 %v3844_v19  ;;  %1764 = vmatprep.subr.bf16.mxu1 %v3847_v21  ;;  %v3885_v46 = vld [vmem:[%s6877_s4 + $0x4] ss:$8 sps:$4 sm:$0xff]   ;;  %v3883_v48 = vld [vmem:[%s6877_s4] ss:$8 sps:$4 sm:$0xff]   ;;  %v3891_v50 = vld [vmem:[%s6877_s4 + $0xf4] ss:$8 sps:$4 sm:$0xff]  }
  0x29   : > { %v3888_v47 = vld [vmem:[%s6877_s4 + $0x104] ss:$8 sps:$4 sm:$0xff]   ;;  %v3886_v49 = vld [vmem:[%s6877_s4 + $0x100] ss:$8 sps:$4 sm:$0xff]   ;;  %v3889_v52 = vld [vmem:[%s6877_s4 + $0xf0] ss:$8 sps:$4 sm:$0xff]  }
  0x2a   : > { %v3830_v51 = vld [vmem:[%s4353_s25 + $0x28] sm:$0xff]   ;;  %v3894_v53 = vld [vmem:[%s6877_s4 + $0x1f4] ss:$8 sps:$4 sm:$0xff]   ;;  %v3892_v54 = vld [vmem:[%s6877_s4 + $0x1f0] ss:$8 sps:$4 sm:$0xff]  }
  0x2b   : > { %1572 = vmatpush1.bf16.msra.mxu0 %v3842_v20  ;;  %1765 = vmatpush1.bf16.msra.mxu1 %v3845_v22  ;;  %v3897_v55 = vld [vmem:[%s6877_s4 + $0xe4] ss:$8 sps:$4 sm:$0xff]   ;;  %v3895_v57 = vld [vmem:[%s6877_s4 + $0xe0] ss:$8 sps:$4 sm:$0xff]   ;;  %v3903_v59 = vld [vmem:[%s6877_s4 + $0xd4] ss:$8 sps:$4 sm:$0xff]  }
  0x2c   : > { %1573 = vmatprep.subr.bf16.mxu0 %v3851_v24  ;;  %1766 = vmatprep.subr.bf16.mxu1 %v3854_v26  ;;  %v3900_v56 = vld [vmem:[%s6877_s4 + $0x1e4] ss:$8 sps:$4 sm:$0xff]   ;;  %v3898_v58 = vld [vmem:[%s6877_s4 + $0x1e0] ss:$8 sps:$4 sm:$0xff]   ;;  %v3831_v60 = vld [vmem:[%s4353_s25 + $0x30] sm:$0xff]  }
  0x2d   : > { %3577 = vmatmul.mubr.msk.bf16.gmra.mxu0 %vm546_vm2, %v3826_v14  ;;  %3593 = vmatmul.mubr.msk.bf16.gmra.mxu1 %vm546_vm2, %v3826_v14  ;;  %v3901_v61 = vld [vmem:[%s6877_s4 + $0xd0] ss:$8 sps:$4 sm:$0xff]   ;;  %v3906_v62 = vld [vmem:[%s6877_s4 + $0x1d4] ss:$8 sps:$4 sm:$0xff]   ;;  %v3909_v0 = vld [vmem:[%s6877_s4 + $0xc4] ss:$8 sps:$4 sm:$0xff]  }
  0x2e   : > { %647 = vmatprep.mubr.bf16.mxu0 %v4268_v6  ;;  %840 = vmatprep.mubr.bf16.mxu1 %v4268_v6  ;;  %v3904_v63 = vld [vmem:[%s6877_s4 + $0x1d0] ss:$8 sps:$4 sm:$0xff]   ;;  %v3912_v1 = vld [vmem:[%s6877_s4 + $0x1c4] ss:$8 sps:$4 sm:$0xff]   ;;  %v3907_v2 = vld [vmem:[%s6877_s4 + $0xc0] ss:$8 sps:$4 sm:$0xff]  }
  0x2f   : > { %1574 = vmatpush1.bf16.msra.mxu0 %v3849_v25  ;;  %1767 = vmatpush1.bf16.msra.mxu1 %v3852_v27  ;;  %v3910_v3 = vld [vmem:[%s6877_s4 + $0x1c0] ss:$8 sps:$4 sm:$0xff]   ;;  %v3915_v4 = vld [vmem:[%s6877_s4 + $0xb4] ss:$8 sps:$4 sm:$0xff]   ;;  %v3913_v7 = vld [vmem:[%s6877_s4 + $0xb0] ss:$8 sps:$4 sm:$0xff]  }
  0x30   : > { %1575 = vmatprep.subr.bf16.mxu0 %v3858_v28  ;;  %1768 = vmatprep.subr.bf16.mxu1 %v3861_v29  ;;  %v3832_v5 = vld [vmem:[%s4353_s25 + $0x38] sm:$0xff]   ;;  %v3921_v10 = vld [vmem:[%s6877_s4 + $0xa4] ss:$8 sps:$4 sm:$0xff]   ;;  %v3919_v12 = vld [vmem:[%s6877_s4 + $0xa0] ss:$8 sps:$4 sm:$0xff]  }
  0x31   : > { %v3918_v8 = vld [vmem:[%s6877_s4 + $0x1b4] ss:$8 sps:$4 sm:$0xff]   ;;  %v3916_v9 = vld [vmem:[%s6877_s4 + $0x1b0] ss:$8 sps:$4 sm:$0xff]   ;;  %v3924_v11 = vld [vmem:[%s6877_s4 + $0x1a4] ss:$8 sps:$4 sm:$0xff]  }
  0x32   : > { %v3922_v13 = vld [vmem:[%s6877_s4 + $0x1a0] ss:$8 sps:$4 sm:$0xff]   ;;  %v3927_v14 = vld [vmem:[%s6877_s4 + $0x94] ss:$8 sps:$4 sm:$0xff]   ;;  %v3925_v16 = vld [vmem:[%s6877_s4 + $0x90] ss:$8 sps:$4 sm:$0xff]  }
  0x33   : > { %1576 = vmatpush1.bf16.msra.mxu0 %v3856_v31  ;;  %1769 = vmatpush1.bf16.msra.mxu1 %v3859_v32  ;;  %v3833_v15 = vld [vmem:[%s4353_s25 + $0x40] sm:$0xff]   ;;  %v3930_v17 = vld [vmem:[%s6877_s4 + $0x194] ss:$8 sps:$4 sm:$0xff]   ;;  %v3928_v18 = vld [vmem:[%s6877_s4 + $0x190] ss:$8 sps:$4 sm:$0xff]  }
  0x34   : > { %1577 = vmatprep.subr.bf16.mxu0 %v3865_v33  ;;  %1770 = vmatprep.subr.bf16.mxu1 %v3868_v35  ;;  %v3834_v19 = vld [vmem:[%s4353_s25 + $0x48] sm:$0xff]   ;;  %v3841_v24 = vld [vmem:[%s4353_s25 + $0x50] sm:$0xff]   ;;  %v3848_v25 = vld [vmem:[%s4353_s25 + $0x58] sm:$0xff]  }
  0x35   : > { %3578 = vmatmul.mubr.msk.bf16.gmra.mxu0 %vm546_vm2, %v3827_v23  ;;  %3594 = vmatmul.mubr.msk.bf16.gmra.mxu1 %vm546_vm2, %v3827_v23  ;;  %v3933_v20 = vld [vmem:[%s6877_s4 + $0x84] ss:$8 sps:$4 sm:$0xff]   ;;  %v3931_v22 = vld [vmem:[%s6877_s4 + $0x80] ss:$8 sps:$4 sm:$0xff]   ;;  %v3869_v28 = vld [vmem:[%s4353_s25 + $0x70] sm:$0xff]  }
  0x36   : > { %657 = vmatprep.mubr.bf16.mxu0 %v4268_v6  ;;  %850 = vmatprep.mubr.bf16.mxu1 %v4268_v6  ;;  %v3936_v21 = vld [vmem:[%s6877_s4 + $0x184] ss:$8 sps:$4 sm:$0xff]   ;;  %v3934_v23 = vld [vmem:[%s6877_s4 + $0x180] ss:$8 sps:$4 sm:$0xff]   ;;  %v3876_v29 = vld [vmem:[%s4353_s25 + $0x78] sm:$0xff]  }
  0x37   : > { %1578 = vmatpush1.bf16.msra.mxu0 %v3863_v34  ;;  %1771 = vmatpush1.bf16.msra.mxu1 %v3866_v36  ;;  %v3855_v26 = vld [vmem:[%s4353_s25 + $0x60] sm:$0xff]   ;;  %v3862_v27 = vld [vmem:[%s4353_s25 + $0x68] sm:$0xff]  }
  0x38   : > { %1579 = vmatprep.subr.bf16.mxu0 %v3872_v37  ;;  %1772 = vmatprep.subr.bf16.mxu1 %v3875_v38 }
  0x3b   : > { %1580 = vmatpush1.bf16.msra.mxu0 %v3870_v39  ;;  %1773 = vmatpush1.bf16.msra.mxu1 %v3873_v40 }
  0x3c   : > { %1581 = vmatprep.subr.bf16.mxu0 %v3879_v41  ;;  %1774 = vmatprep.subr.bf16.mxu1 %v3882_v44 }
  0x3d   : > { %3579 = vmatmul.mubr.msk.bf16.gmra.mxu0 %vm546_vm2, %v3828_v30  ;;  %3595 = vmatmul.mubr.msk.bf16.gmra.mxu1 %vm546_vm2, %v3828_v30  ;;  %v6887_v30 = vlaneseq }
  0x3e   : > { %667 = vmatprep.mubr.bf16.mxu0 %v4268_v6  ;;  %860 = vmatprep.mubr.bf16.mxu1 %v4268_v6 }
  0x3f   : > { %1582 = vmatpush1.bf16.msra.mxu0 %v3877_v43  ;;  %1775 = vmatpush1.bf16.msra.mxu1 %v3880_v45  ;;  %v4655_v31 = vshrl.u32 %v6887_v30, 7 }
  0x40   : > { %1583 = vmatprep.subr.bf16.mxu0 %v3885_v46  ;;  %1776 = vmatprep.subr.bf16.mxu1 %v3888_v47 }
  0x41   : > { %7126 = vst [vmem:[#allocation14_spill] sm:$0xff] %v4655_v31  ;;  %v4658_v32 = vsub.s32 1, %v4655_v31  ;;  %v6886_v33 = vsub.s32 3, %v4655_v31  ;;  %v4662_v34 = vsub.s32 0, %v4655_v31  ;;  %v6885_v35 = vsub.s32 2, %v4655_v31 }
  0x43   : > { %1584 = vmatpush1.bf16.msra.mxu0 %v3883_v48  ;;  %1777 = vmatpush1.bf16.msra.mxu1 %v3886_v49  ;;  %7127 = vst [vmem:[#allocation15_spill] sm:$0xff] %v4658_v32 }
  0x44   : > { %1585 = vmatprep.subr.bf16.mxu0 %v3891_v50  ;;  %1778 = vmatprep.subr.bf16.mxu1 %v3894_v53 }
  0x45   : > { %3580 = vmatmul.mubr.msk.bf16.gmra.mxu0 %vm546_vm2, %v3829_v42  ;;  %3596 = vmatmul.mubr.msk.bf16.gmra.mxu1 %vm546_vm2, %v3829_v42 }
  0x46   : > { %677 = vmatprep.mubr.bf16.mxu0 %v4268_v6  ;;  %870 = vmatprep.mubr.bf16.mxu1 %v4268_v6 }
  0x47   : > { %1586 = vmatpush2.bf16.msra.mxu0 %v3889_v52  ;;  %1779 = vmatpush2.bf16.msra.mxu1 %v3892_v54 }
  0x48   : > { %1587 = vmatprep.subr.bf16.mxu0 %v3897_v55  ;;  %1780 = vmatprep.subr.bf16.mxu1 %v3900_v56 }
  0x4b   : > { %1588 = vmatpush2.bf16.msra.mxu0 %v3895_v57  ;;  %1781 = vmatpush2.bf16.msra.mxu1 %v3898_v58 }
  0x4c   : > { %1589 = vmatprep.subr.bf16.mxu0 %v3903_v59  ;;  %1782 = vmatprep.subr.bf16.mxu1 %v3906_v62 }
  0x4d   : > { %3581 = vmatmul.mubr.msk.bf16.gmra.mxu0 %vm546_vm2, %v3830_v51  ;;  %3597 = vmatmul.mubr.msk.bf16.gmra.mxu1 %vm546_vm2, %v3830_v51 }
  0x4e   : > { %687 = vmatprep.mubr.bf16.mxu0 %v4268_v6  ;;  %880 = vmatprep.mubr.bf16.mxu1 %v4268_v6 }
  0x4f   : > { %1590 = vmatpush2.bf16.msra.mxu0 %v3901_v61  ;;  %1783 = vmatpush2.bf16.msra.mxu1 %v3904_v63 }
  0x50   : > { %1591 = vmatprep.subr.bf16.mxu0 %v3909_v0  ;;  %1784 = vmatprep.subr.bf16.mxu1 %v3912_v1 }
  0x53   : > { %1592 = vmatpush2.bf16.msra.mxu0 %v3907_v2  ;;  %1785 = vmatpush2.bf16.msra.mxu1 %v3910_v3 }
  0x54   : > { %1593 = vmatprep.subr.bf16.mxu0 %v3915_v4  ;;  %1786 = vmatprep.subr.bf16.mxu1 %v3918_v8 }
  0x55   : > { %3582 = vmatmul.mubr.msk.bf16.gmra.mxu0 %vm546_vm2, %v3831_v60  ;;  %3598 = vmatmul.mubr.msk.bf16.gmra.mxu1 %vm546_vm2, %v3831_v60 }
  0x56   : > { %697 = vmatprep.mubr.bf16.mxu0 %v4268_v6  ;;  %890 = vmatprep.mubr.bf16.mxu1 %v4268_v6 }
  0x57   : > { %1594 = vmatpush2.bf16.msra.mxu0 %v3913_v7  ;;  %1787 = vmatpush2.bf16.msra.mxu1 %v3916_v9 }
  0x58   : > { %1595 = vmatprep.subr.bf16.mxu0 %v3921_v10  ;;  %1788 = vmatprep.subr.bf16.mxu1 %v3924_v11 }
  0x5b   : > { %1596 = vmatpush2.bf16.msra.mxu0 %v3919_v12  ;;  %1789 = vmatpush2.bf16.msra.mxu1 %v3922_v13 }
  0x5c   : > { %1597 = vmatprep.subr.bf16.mxu0 %v3927_v14  ;;  %1790 = vmatprep.subr.bf16.mxu1 %v3930_v17 }
  0x5d   : > { %3583 = vmatmul.mubr.msk.bf16.gmra.mxu0 %vm546_vm2, %v3832_v5  ;;  %3599 = vmatmul.mubr.msk.bf16.gmra.mxu1 %vm546_vm2, %v3832_v5 }
  0x5e   : > { %707 = vmatprep.mubr.bf16.mxu0 %v4268_v6  ;;  %900 = vmatprep.mubr.bf16.mxu1 %v4268_v6 }
  0x5f   : > { %1598 = vmatpush2.bf16.msra.mxu0 %v3925_v16  ;;  %1791 = vmatpush2.bf16.msra.mxu1 %v3928_v18 }
  0x60   : > { %1599 = vmatprep.subr.bf16.mxu0 %v3933_v20  ;;  %1792 = vmatprep.subr.bf16.mxu1 %v3936_v21 }
  0x63   : > { %1600 = vmatpush2.bf16.msra.mxu0 %v3931_v22  ;;  %1793 = vmatpush2.bf16.msra.mxu1 %v3934_v23 }
  0x65   : > { %3584 = vmatmul.mubr.msk.bf16.gmra.mxu0 %vm546_vm2, %v3833_v15  ;;  %3600 = vmatmul.mubr.msk.bf16.gmra.mxu1 %vm546_vm2, %v3833_v15 }
  0x66   : > { %717 = vmatprep.mubr.bf16.mxu0 %v4268_v6  ;;  %910 = vmatprep.mubr.bf16.mxu1 %v4268_v6 }
  0x6d   : > { %3585 = vmatmul.mubr.msk.bf16.gmra.mxu0 %vm546_vm2, %v3834_v19  ;;  %3601 = vmatmul.mubr.msk.bf16.gmra.mxu1 %vm546_vm2, %v3834_v19 }
  0x6e   : > { %727 = vmatprep.mubr.bf16.mxu0 %v4268_v6  ;;  %920 = vmatprep.mubr.bf16.mxu1 %v4268_v6 }
  0x75   : > { %3586 = vmatmul.mubr.msk.bf16.gmra.mxu0 %vm546_vm2, %v3841_v24  ;;  %3602 = vmatmul.mubr.msk.bf16.gmra.mxu1 %vm546_vm2, %v3841_v24 }
  0x76   : > { %737 = vmatprep.mubr.bf16.mxu0 %v4268_v6  ;;  %930 = vmatprep.mubr.bf16.mxu1 %v4268_v6 }
  0x7d   : > { %3587 = vmatmul.mubr.msk.bf16.gmra.mxu0 %vm546_vm2, %v3848_v25  ;;  %3603 = vmatmul.mubr.msk.bf16.gmra.mxu1 %vm546_vm2, %v3848_v25 }
  0x7e   : > { %747 = vmatprep.mubr.bf16.mxu0 %v4268_v6  ;;  %940 = vmatprep.mubr.bf16.mxu1 %v4268_v6 }
  0x85   : > { %3588 = vmatmul.mubr.msk.bf16.gmra.mxu0 %vm546_vm2, %v3855_v26  ;;  %3604 = vmatmul.mubr.msk.bf16.gmra.mxu1 %vm546_vm2, %v3855_v26 }
  0x86   : > { %757 = vmatprep.mubr.bf16.mxu0 %v4268_v6  ;;  %950 = vmatprep.mubr.bf16.mxu1 %v4268_v6 }
  0x8d   : > { %3589 = vmatmul.mubr.msk.bf16.gmra.mxu0 %vm546_vm2, %v3862_v27  ;;  %3605 = vmatmul.mubr.msk.bf16.gmra.mxu1 %vm546_vm2, %v3862_v27 }
  0x8e   : > { %767 = vmatprep.mubr.bf16.mxu0 %v4268_v6  ;;  %960 = vmatprep.mubr.bf16.mxu1 %v4268_v6 }
  0x95   : > { %3590 = vmatmul.mubr.msk.bf16.gmra.mxu0 %vm546_vm2, %v3869_v28  ;;  %3606 = vmatmul.mubr.msk.bf16.gmra.mxu1 %vm546_vm2, %v3869_v28 }
  0x96   : > { %777 = vmatprep.mubr.bf16.mxu0 %v4268_v6  ;;  %970 = vmatprep.mubr.bf16.mxu1 %v4268_v6  ;;  %v404_v6 = vld [vmem:[%s6876_s3] sm:$0xf] }
  0x97   : > { %v4669_v38 = vrot.slane %v404_v6, %v4658_v32  ;;  %v4673_v39 = vrot.slane %v404_v6, %v6886_v33  ;;  %v4676_v40 = vrot.slane %v404_v6, %v4662_v34  ;;  %v4680_v41 = vrot.slane %v404_v6, %v6885_v35 }
  0x9d   : > { %3591 = vmatmul.mubr.msk.bf16.gmra.mxu0 %vm546_vm2, %v3876_v29  ;;  %3607 = vmatmul.mubr.msk.bf16.gmra.mxu1 %vm546_vm2, %v3876_v29 }
  0xe5   : > { %v629_v36 = vpop.f32.mrf.mxu0  ;;  %v822_v37 = vpop.f32.mrf.mxu1 }
  0xe6   : > { %v4695_v50 = vadd.f32 %v629_v36, %v4676_v40  ;;  %v4698_v51 = vadd.f32 %v822_v37, %v4680_v41 }
  0xe7   : > { %v631_v42 = vpop.f32.mrf.mxu0  ;;  %v824_v43 = vpop.f32.mrf.mxu1 }
  0xe8   : > { %v4683_v46 = vadd.f32 %v631_v42, %v4669_v38  ;;  %v4686_v47 = vadd.f32 %v824_v43, %v4673_v39  ;;  %7131 = vst [vmem:[#allocation19_spill] sm:$0xff] %v4695_v50  ;;  %7132 = vst [vmem:[#allocation20_spill] sm:$0xff] %v4698_v51  ;;  %v6915_v0 = vmax.f32 %v4695_v50, 0.0  ;;  %v6913_v1 = vmax.f32 %v4698_v51, 0.0 }
  0xe9   : > { %v633_v44 = vpop.f32.mrf.mxu0  ;;  %v826_v45 = vpop.f32.mrf.mxu1 }
  0xea   : > { %7128 = vst [vmem:[#allocation16_spill] sm:$0xff] %v4683_v46  ;;  %7129 = vst [vmem:[#allocation17_spill] sm:$0xff] %v4686_v47  ;;  %v4689_v48 = vadd.f32 %v633_v44, %v4676_v40  ;;  %v4692_v49 = vadd.f32 %v826_v45, %v4680_v41  ;;  %v6914_v60 = vmax.f32 %v4683_v46, 0.0  ;;  %v6904_v61 = vmax.f32 %v4686_v47, 0.0 }
  0xeb   : > { %v635_v52 = vpop.f32.mrf.mxu0  ;;  %v828_v53 = vpop.f32.mrf.mxu1 }
  0xec   : > { %7130 = vst [vmem:[#allocation18_spill] sm:$0xff] %v4692_v49  ;;  %v4701_v54 = vadd.f32 %v635_v52, %v4669_v38  ;;  %v4704_v55 = vadd.f32 %v828_v53, %v4673_v39  ;;  %v6919_v56 = vmax.f32 %v4689_v48, 0.0  ;;  %v6917_v57 = vmax.f32 %v4692_v49, 0.0 }
  0xed   : > { %v639_v58 = vpop.f32.mrf.mxu0  ;;  %v832_v59 = vpop.f32.mrf.mxu1 }
  0xee   : > { %7133 = vst [vmem:[#allocation21_spill] sm:$0xff] %v4701_v54  ;;  %7134 = vst [vmem:[#allocation22_spill] sm:$0xff] %v4704_v55  ;;  %v6918_v62 = vmax.f32 %v4701_v54, 0.0  ;;  %v6916_v63 = vmax.f32 %v4704_v55, 0.0  ;;  %v1109_v7 = vpack.c.bf16 %v6919_v56, %v6915_v0  ;;  %v1111_v8 = vpack.c.bf16 %v6917_v57, %v6913_v1 }
  0xef   : > { %v641_v2 = vpop.f32.mrf.mxu0  ;;  %v834_v3 = vpop.f32.mrf.mxu1  ;;  %v4743_v15 = vadd.f32 %v639_v58, %v4676_v40  ;;  %v4746_v16 = vadd.f32 %v832_v59, %v4680_v41 }
  0xf0   : > { %v1110_v4 = vpack.c.bf16 %v6918_v62, %v6914_v60  ;;  %v1112_v5 = vpack.c.bf16 %v6916_v63, %v6904_v61  ;;  %v4731_v9 = vadd.f32 %v641_v2, %v4669_v38  ;;  %v4734_v12 = vadd.f32 %v834_v3, %v4673_v39 }
  0xf1   : > { %v643_v10 = vpop.f32.mrf.mxu0  ;;  %v836_v11 = vpop.f32.mrf.mxu1  ;;  %7139 = vst [vmem:[#allocation27_spill] sm:$0xff] %v4743_v15  ;;  %7140 = vst [vmem:[#allocation28_spill] sm:$0xff] %v4746_v16  ;;  %v6903_v29 = vmax.f32 %v4743_v15, 0.0  ;;  %v6901_v6 = vmax.f32 %v4746_v16, 0.0  ;;  %v2384_v15 = vadd.s32 232, %v4655_v31 }
  0xf2   : > { %7135 = vst [vmem:[#allocation23_spill] sm:$0xff] %v4731_v9  ;;  %7136 = vst [vmem:[#allocation24_spill] sm:$0xff] %v4734_v12  ;;  %v4737_v13 = vadd.f32 %v643_v10, %v4676_v40  ;;  %v4740_v14 = vadd.f32 %v836_v11, %v4680_v41  ;;  %1601 = vmatprep.mubr.bf16.mxu0 %v1110_v4  ;;  %1794 = vmatprep.mubr.bf16.mxu1 %v1112_v5  ;;  %v6902_v25 = vmax.f32 %v4731_v9, 0.0 }
  0xf3   : > { %v645_v17 = vpop.f32.mrf.mxu0  ;;  %v838_v18 = vpop.f32.mrf.mxu1  ;;  %1602 = vmatmul.mubr.bf16.vlgmr.msra.gmra.mxu0 %v1109_v7  ;;  %1795 = vmatmul.mubr.bf16.vlgmr.msra.gmra.mxu1 %v1111_v8  ;;  %v6900_v26 = vmax.f32 %v4734_v12, 0.0  ;;  %v2382_v9 = vadd.s32 216, %v4655_v31 }
  0xf4   : > { %7137 = vst [vmem:[#allocation25_spill] sm:$0xff] %v4737_v13  ;;  %7138 = vst [vmem:[#allocation26_spill] sm:$0xff] %v4740_v14  ;;  %v4749_v19 = vadd.f32 %v645_v17, %v4669_v38  ;;  %v4752_v20 = vadd.f32 %v838_v18, %v4673_v39  ;;  %v6899_v21 = vmax.f32 %v4737_v13, 0.0  ;;  %v6897_v22 = vmax.f32 %v4740_v14, 0.0  ;;  %v5838_v14 = vld [vmem:[#allocation7] ss:$0 sm:$0xff] }
  0xf5   : > { %v649_v23 = vpop.f32.mrf.mxu0  ;;  %v842_v24 = vpop.f32.mrf.mxu1 }
  0xf6   : > { %7141 = vst [vmem:[#allocation29_spill] sm:$0xff] %v4749_v19  ;;  %7142 = vst [vmem:[#allocation30_spill] sm:$0xff] %v4752_v20  ;;  %v6898_v27 = vmax.f32 %v4749_v19, 0.0  ;;  %v6888_v28 = vmax.f32 %v4752_v20, 0.0  ;;  %v1113_v44 = vpack.c.bf16 %v6899_v21, %v6903_v29  ;;  %v1115_v45 = vpack.c.bf16 %v6897_v22, %v6901_v6 }
  0xf7   : > { %v651_v36 = vpop.f32.mrf.mxu0  ;;  %v844_v37 = vpop.f32.mrf.mxu1  ;;  %v4791_v4 = vadd.f32 %v649_v23, %v4676_v40  ;;  %v4794_v5 = vadd.f32 %v842_v24, %v4680_v41 }
  0xf8   : > { %v1114_v42 = vpack.c.bf16 %v6898_v27, %v6902_v25  ;;  %v1116_v43 = vpack.c.bf16 %v6888_v28, %v6900_v26  ;;  %v4779_v52 = vadd.f32 %v651_v36, %v4669_v38  ;;  %v4782_v59 = vadd.f32 %v844_v37, %v4673_v39 }
  0xf9   : > { %v653_v53 = vpop.f32.mrf.mxu0  ;;  %v846_v58 = vpop.f32.mrf.mxu1  ;;  %7147 = vst [vmem:[#allocation35_spill] sm:$0xff] %v4791_v4  ;;  %7148 = vst [vmem:[#allocation36_spill] sm:$0xff] %v4794_v5 }
  0xfa   : > { %7143 = vst [vmem:[#allocation31_spill] sm:$0xff] %v4779_v52  ;;  %7144 = vst [vmem:[#allocation32_spill] sm:$0xff] %v4782_v59  ;;  %v4785_v2 = vadd.f32 %v653_v53, %v4676_v40  ;;  %v4788_v3 = vadd.f32 %v846_v58, %v4680_v41  ;;  %1611 = vmatprep.mubr.bf16.mxu0 %v1114_v42  ;;  %1804 = vmatprep.mubr.bf16.mxu1 %v1116_v43  ;;  %v6890_v37 = vmax.f32 %v4779_v52, 0.0 }
  0xfb   : > { %v655_v7 = vpop.f32.mrf.mxu0  ;;  %v848_v8 = vpop.f32.mrf.mxu1  ;;  %1612 = vmatmul.mubr.bf16.gmra.mxu0 %v1113_v44  ;;  %1805 = vmatmul.mubr.bf16.gmra.mxu1 %v1115_v45  ;;  %v6892_v24 = vmax.f32 %v4782_v59, 0.0  ;;  %v6896_v44 = vmax.f32 %v4791_v4, 0.0  ;;  %v6895_v45 = vmax.f32 %v4794_v5, 0.0  ;;  %v2378_v52 = vadd.s32 184, %v4655_v31 }
  0xfc   : > { %7145 = vst [vmem:[#allocation33_spill] sm:$0xff] %v4785_v2  ;;  %7146 = vst [vmem:[#allocation34_spill] sm:$0xff] %v4788_v3  ;;  %v4797_v10 = vadd.f32 %v655_v7, %v4669_v38  ;;  %v4800_v11 = vadd.f32 %v848_v8, %v4673_v39  ;;  %v6893_v17 = vmax.f32 %v4785_v2, 0.0  ;;  %v6894_v18 = vmax.f32 %v4788_v3, 0.0 }
  0xfd   : > { %v659_v36 = vpop.f32.mrf.mxu0  ;;  %v852_v23 = vpop.f32.mrf.mxu1  ;;  %v2375_v3 = vadd.s32 160, %v4655_v31  ;;  %v2377_v2 = vadd.s32 176, %v4655_v31 }
  0xfe   : > { %7149 = vst [vmem:[#allocation37_spill] sm:$0xff] %v4797_v10  ;;  %7150 = vst [vmem:[#allocation38_spill] sm:$0xff] %v4800_v11  ;;  %v6889_v42 = vmax.f32 %v4797_v10, 0.0  ;;  %v6891_v43 = vmax.f32 %v4800_v11, 0.0  ;;  %v1117_v35 = vpack.c.bf16 %v6893_v17, %v6896_v44  ;;  %v1119_v33 = vpack.c.bf16 %v6894_v18, %v6895_v45 }
  0xff   : > { %v661_v53 = vpop.f32.mrf.mxu0  ;;  %v854_v58 = vpop.f32.mrf.mxu1  ;;  %v4839_v17 = vadd.f32 %v659_v36, %v4676_v40  ;;  %v4842_v18 = vadd.f32 %v852_v23, %v4680_v41  ;;  %v2376_v10 = vadd.s32 168, %v4655_v31 }
 0x100   : > { %v1118_v7 = vpack.c.bf16 %v6889_v42, %v6890_v37  ;;  %v1120_v8 = vpack.c.bf16 %v6891_v43, %v6892_v24  ;;  %v4827_v30 = vadd.f32 %v661_v53, %v4669_v38  ;;  %v4830_v37 = vadd.f32 %v854_v58, %v4673_v39 }
 0x101   : > { %v663_v28 = vpop.f32.mrf.mxu0  ;;  %v856_v42 = vpop.f32.mrf.mxu1  ;;  %7155 = vst [vmem:[#allocation43_spill] sm:$0xff] %v4839_v17  ;;  %7156 = vst [vmem:[#allocation44_spill] sm:$0xff] %v4842_v18 }
 0x102   : > { %7151 = vst [vmem:[#allocation39_spill] sm:$0xff] %v4827_v30  ;;  %7152 = vst [vmem:[#allocation40_spill] sm:$0xff] %v4830_v37  ;;  %v4833_v43 = vadd.f32 %v663_v28, %v4676_v40  ;;  %v4836_v24 = vadd.f32 %v856_v42, %v4680_v41  ;;  %1621 = vmatprep.mubr.bf16.mxu0 %v1118_v7  ;;  %1814 = vmatprep.mubr.bf16.mxu1 %v1120_v8  ;;  %v6906_v44 = vmax.f32 %v4827_v30, 0.0 }
 0x103   : > { %v665_v53 = vpop.f32.mrf.mxu0  ;;  %v858_v45 = vpop.f32.mrf.mxu1  ;;  %1622 = vmatmul.mubr.bf16.gmra.mxu0 %v1117_v35  ;;  %1815 = vmatmul.mubr.bf16.gmra.mxu1 %v1119_v33  ;;  %v6908_v23 = vmax.f32 %v4830_v37, 0.0  ;;  %v6912_v35 = vmax.f32 %v4839_v17, 0.0  ;;  %v2373_v30 = vadd.s32 144, %v4655_v31  ;;  %v2374_v17 = vadd.s32 152, %v4655_v31 }
 0x104   : > { %7153 = vst [vmem:[#allocation41_spill] sm:$0xff] %v4833_v43  ;;  %7154 = vst [vmem:[#allocation42_spill] sm:$0xff] %v4836_v24  ;;  %v4845_v58 = vadd.f32 %v665_v53, %v4669_v38  ;;  %v4848_v28 = vadd.f32 %v858_v45, %v4673_v39  ;;  %v6909_v42 = vmax.f32 %v4833_v43, 0.0  ;;  %v6910_v7 = vmax.f32 %v4836_v24, 0.0 }
 0x105   : > { %v669_v8 = vpop.f32.mrf.mxu0  ;;  %v862_v36 = vpop.f32.mrf.mxu1  ;;  %v6911_v53 = vmax.f32 %v4842_v18, 0.0  ;;  %v2371_v18 = vadd.s32 128, %v4655_v31 }
 0x106   : > { %7157 = vst [vmem:[#allocation45_spill] sm:$0xff] %v4845_v58  ;;  %7158 = vst [vmem:[#allocation46_spill] sm:$0xff] %v4848_v28  ;;  %v6905_v22 = vmax.f32 %v4845_v58, 0.0  ;;  %v6907_v33 = vmax.f32 %v4848_v28, 0.0  ;;  %v1121_v6 = vpack.c.bf16 %v6909_v42, %v6912_v35  ;;  %v4887_v42 = vadd.f32 %v669_v8, %v4676_v40 }
 0x107   : > { %v671_v45 = vpop.f32.mrf.mxu0  ;;  %v864_v27 = vpop.f32.mrf.mxu1  ;;  %v1123_v25 = vpack.c.bf16 %v6910_v7, %v6911_v53  ;;  %v4890_v7 = vadd.f32 %v862_v36, %v4680_v41 }
 0x108   : > { %v1122_v21 = vpack.c.bf16 %v6905_v22, %v6906_v44  ;;  %v1124_v26 = vpack.c.bf16 %v6907_v33, %v6908_v23  ;;  %v4875_v29 = vadd.f32 %v671_v45, %v4669_v38  ;;  %v4878_v44 = vadd.f32 %v864_v27, %v4673_v39  ;;  %7163 = vst [vmem:[#allocation51_spill] sm:$0xff] %v4887_v42 }
 0x109   : > { %v673_v61 = vpop.f32.mrf.mxu0  ;;  %v866_v22 = vpop.f32.mrf.mxu1  ;;  %7164 = vst [vmem:[#allocation52_spill] sm:$0xff] %v4890_v7 }
 0x10a   : > { %7159 = vst [vmem:[#allocation47_spill] sm:$0xff] %v4875_v29  ;;  %7160 = vst [vmem:[#allocation48_spill] sm:$0xff] %v4878_v44  ;;  %v4881_v33 = vadd.f32 %v673_v61, %v4676_v40  ;;  %v4884_v23 = vadd.f32 %v866_v22, %v4680_v41  ;;  %1631 = vmatprep.mubr.bf16.mxu0 %v1122_v21  ;;  %1824 = vmatprep.mubr.bf16.mxu1 %v1124_v26  ;;  %v6922_v35 = vmax.f32 %v4875_v29, 0.0 }
 0x10b   : > { %v675_v45 = vpop.f32.mrf.mxu0  ;;  %v868_v53 = vpop.f32.mrf.mxu1  ;;  %1632 = vmatmul.mubr.bf16.gmra.mxu0 %v1121_v6  ;;  %1825 = vmatmul.mubr.bf16.gmra.mxu1 %v1123_v25  ;;  %v6924_v36 = vmax.f32 %v4878_v44, 0.0  ;;  %v6928_v6 = vmax.f32 %v4887_v42, 0.0 }
 0x10c   : > { %7161 = vst [vmem:[#allocation49_spill] sm:$0xff] %v4881_v33  ;;  %7162 = vst [vmem:[#allocation50_spill] sm:$0xff] %v4884_v23  ;;  %v4893_v27 = vadd.f32 %v675_v45, %v4669_v38  ;;  %v4896_v61 = vadd.f32 %v868_v53, %v4673_v39  ;;  %v6925_v22 = vmax.f32 %v4881_v33, 0.0  ;;  %v6926_v21 = vmax.f32 %v4884_v23, 0.0 }
 0x10d   : > { %v679_v26 = vpop.f32.mrf.mxu0  ;;  %v872_v8 = vpop.f32.mrf.mxu1  ;;  %v6927_v45 = vmax.f32 %v4890_v7, 0.0 }
 0x10e   : > { %7165 = vst [vmem:[#allocation53_spill] sm:$0xff] %v4893_v27  ;;  %7166 = vst [vmem:[#allocation54_spill] sm:$0xff] %v4896_v61  ;;  %v6921_v1 = vmax.f32 %v4893_v27, 0.0  ;;  %v6923_v25 = vmax.f32 %v4896_v61, 0.0  ;;  %v1125_v57 = vpack.c.bf16 %v6925_v22, %v6928_v6  ;;  %v4935_v22 = vadd.f32 %v679_v26, %v4676_v40 }
 0x10f   : > { %v681_v53 = vpop.f32.mrf.mxu0  ;;  %v874_v60 = vpop.f32.mrf.mxu1  ;;  %v1127_v62 = vpack.c.bf16 %v6926_v21, %v6927_v45  ;;  %v4938_v21 = vadd.f32 %v872_v8, %v4680_v41 }
 0x110   : > { %v1126_v0 = vpack.c.bf16 %v6921_v1, %v6922_v35  ;;  %v1128_v63 = vpack.c.bf16 %v6923_v25, %v6924_v36  ;;  %v4923_v56 = vadd.f32 %v681_v53, %v4669_v38  ;;  %v4926_v35 = vadd.f32 %v874_v60, %v4673_v39  ;;  %7171 = vst [vmem:[#allocation59_spill] sm:$0xff] %v4935_v22 }
 0x111   : > { %v683_v27 = vpop.f32.mrf.mxu0  ;;  %v876_v1 = vpop.f32.mrf.mxu1  ;;  %7172 = vst [vmem:[#allocation60_spill] sm:$0xff] %v4938_v21 }
 0x112   : > { %7167 = vst [vmem:[#allocation55_spill] sm:$0xff] %v4923_v56  ;;  %7168 = vst [vmem:[#allocation56_spill] sm:$0xff] %v4926_v35  ;;  %v4929_v25 = vadd.f32 %v683_v27, %v4676_v40  ;;  %v4932_v36 = vadd.f32 %v876_v1, %v4680_v41  ;;  %1641 = vmatprep.mubr.bf16.mxu0 %v1126_v0  ;;  %1834 = vmatprep.mubr.bf16.mxu1 %v1128_v63  ;;  %v6938_v6 = vmax.f32 %v4923_v56, 0.0 }
 0x113   : > { %v685_v53 = vpop.f32.mrf.mxu0  ;;  %v878_v45 = vpop.f32.mrf.mxu1  ;;  %1642 = vmatmul.mubr.bf16.gmra.mxu0 %v1125_v57  ;;  %1835 = vmatmul.mubr.bf16.gmra.mxu1 %v1127_v62  ;;  %v6940_v8 = vmax.f32 %v4926_v35, 0.0  ;;  %v6942_v62 = vmax.f32 %v4935_v22, 0.0 }
 0x114   : > { %7169 = vst [vmem:[#allocation57_spill] sm:$0xff] %v4929_v25  ;;  %7170 = vst [vmem:[#allocation58_spill] sm:$0xff] %v4932_v36  ;;  %v4941_v60 = vadd.f32 %v685_v53, %v4669_v38  ;;  %v4944_v27 = vadd.f32 %v878_v45, %v4673_v39  ;;  %v6941_v53 = vmax.f32 %v4938_v21, 0.0  ;;  %v7175_v33 = vmax.f32 %v4929_v25, 0.0 }
 0x115   : > { %v689_v0 = vpop.f32.mrf.mxu0  ;;  %v882_v26 = vpop.f32.mrf.mxu1  ;;  %v7176_v7 = vmax.f32 %v4932_v36, 0.0 }
 0x116   : > { %7173 = vst [vmem:[#allocation61_spill] sm:$0xff] %v4941_v60  ;;  %7174 = vst [vmem:[#allocation62_spill] sm:$0xff] %v4944_v27  ;;  %v6937_v61 = vmax.f32 %v4941_v60, 0.0  ;;  %v6939_v57 = vmax.f32 %v4944_v27, 0.0  ;;  %v1129_v44 = vpack.c.bf16 %v7175_v33, %v6942_v62  ;;  %v4983_v33 = vadd.f32 %v689_v0, %v4676_v40 }
 0x117   : > { %v691_v45 = vpop.f32.mrf.mxu0  ;;  %v884_v23 = vpop.f32.mrf.mxu1  ;;  %v1131_v29 = vpack.c.bf16 %v7176_v7, %v6941_v53  ;;  %v4986_v7 = vadd.f32 %v882_v26, %v4680_v41 }
 0x118   : > { %v1130_v63 = vpack.c.bf16 %v6937_v61, %v6938_v6  ;;  %v1132_v1 = vpack.c.bf16 %v6939_v57, %v6940_v8  ;;  %v4971_v56 = vadd.f32 %v691_v45, %v4669_v38  ;;  %v4974_v6 = vadd.f32 %v884_v23, %v4673_v39  ;;  %7181 = vst [vmem:[#allocation67_spill] sm:$0xff] %v4983_v33 }
 0x119   : > { %v693_v60 = vpop.f32.mrf.mxu0  ;;  %v886_v61 = vpop.f32.mrf.mxu1  ;;  %7182 = vst [vmem:[#allocation68_spill] sm:$0xff] %v4986_v7 }
 0x11a   : > { %7177 = vst [vmem:[#allocation63_spill] sm:$0xff] %v4971_v56  ;;  %7178 = vst [vmem:[#allocation64_spill] sm:$0xff] %v4974_v6  ;;  %v4977_v57 = vadd.f32 %v693_v60, %v4676_v40  ;;  %v4980_v8 = vadd.f32 %v886_v61, %v4680_v41  ;;  %1651 = vmatprep.mubr.bf16.mxu0 %v1130_v63  ;;  %1844 = vmatprep.mubr.bf16.mxu1 %v1132_v1  ;;  %v6952_v62 = vmax.f32 %v4971_v56, 0.0 }
 0x11b   : > { %v695_v45 = vpop.f32.mrf.mxu0  ;;  %v888_v53 = vpop.f32.mrf.mxu1  ;;  %1652 = vmatmul.mubr.bf16.gmra.mxu0 %v1129_v44  ;;  %1845 = vmatmul.mubr.bf16.gmra.mxu1 %v1131_v29  ;;  %v6954_v26 = vmax.f32 %v4974_v6, 0.0  ;;  %v6956_v44 = vmax.f32 %v4983_v33, 0.0 }
 0x11c   : > { %7179 = vst [vmem:[#allocation65_spill] sm:$0xff] %v4977_v57  ;;  %7180 = vst [vmem:[#allocation66_spill] sm:$0xff] %v4980_v8  ;;  %v4989_v23 = vadd.f32 %v695_v45, %v4669_v38  ;;  %v4992_v60 = vadd.f32 %v888_v53, %v4673_v39  ;;  %v6955_v45 = vmax.f32 %v4986_v7, 0.0  ;;  %v7185_v25 = vmax.f32 %v4977_v57, 0.0 }
 0x11d   : > { %v699_v63 = vpop.f32.mrf.mxu0  ;;  %v892_v0 = vpop.f32.mrf.mxu1  ;;  %v7186_v21 = vmax.f32 %v4980_v8, 0.0 }
 0x11e   : > { %7183 = vst [vmem:[#allocation69_spill] sm:$0xff] %v4989_v23  ;;  %7184 = vst [vmem:[#allocation70_spill] sm:$0xff] %v4992_v60  ;;  %v6951_v27 = vmax.f32 %v4989_v23, 0.0  ;;  %v6953_v29 = vmax.f32 %v4992_v60, 0.0  ;;  %v1133_v35 = vpack.c.bf16 %v7185_v25, %v6956_v44  ;;  %v5031_v25 = vadd.f32 %v699_v63, %v4676_v40 }
 0x11f   : > { %v701_v53 = vpop.f32.mrf.mxu0  ;;  %v894_v36 = vpop.f32.mrf.mxu1  ;;  %v1135_v22 = vpack.c.bf16 %v7186_v21, %v6955_v45  ;;  %v5034_v21 = vadd.f32 %v892_v0, %v4680_v41 }
 0x120   : > { %v1134_v1 = vpack.c.bf16 %v6951_v27, %v6952_v62  ;;  %v1136_v61 = vpack.c.bf16 %v6953_v29, %v6954_v26  ;;  %v5019_v56 = vadd.f32 %v701_v53, %v4669_v38  ;;  %v5022_v62 = vadd.f32 %v894_v36, %v4673_v39  ;;  %7191 = vst [vmem:[#allocation75_spill] sm:$0xff] %v5031_v25 }
 0x121   : > { %v703_v23 = vpop.f32.mrf.mxu0  ;;  %v896_v27 = vpop.f32.mrf.mxu1  ;;  %7192 = vst [vmem:[#allocation76_spill] sm:$0xff] %v5034_v21 }
 0x122   : > { %7187 = vst [vmem:[#allocation71_spill] sm:$0xff] %v5019_v56  ;;  %7188 = vst [vmem:[#allocation72_spill] sm:$0xff] %v5022_v62  ;;  %v5025_v29 = vadd.f32 %v703_v23, %v4676_v40  ;;  %v5028_v26 = vadd.f32 %v896_v27, %v4680_v41  ;;  %1661 = vmatprep.mubr.bf16.mxu0 %v1134_v1  ;;  %1854 = vmatprep.mubr.bf16.mxu1 %v1136_v61  ;;  %v6966_v44 = vmax.f32 %v5019_v56, 0.0 }
 0x123   : > { %v705_v53 = vpop.f32.mrf.mxu0  ;;  %v898_v45 = vpop.f32.mrf.mxu1  ;;  %1662 = vmatmul.mubr.bf16.gmra.mxu0 %v1133_v35  ;;  %1855 = vmatmul.mubr.bf16.gmra.mxu1 %v1135_v22  ;;  %v6968_v0 = vmax.f32 %v5022_v62, 0.0  ;;  %v6970_v22 = vmax.f32 %v5031_v25, 0.0 }
 0x124   : > { %7189 = vst [vmem:[#allocation73_spill] sm:$0xff] %v5025_v29  ;;  %7190 = vst [vmem:[#allocation74_spill] sm:$0xff] %v5028_v26  ;;  %v5037_v36 = vadd.f32 %v705_v53, %v4669_v38  ;;  %v5040_v23 = vadd.f32 %v898_v45, %v4673_v39  ;;  %v6969_v53 = vmax.f32 %v5034_v21, 0.0  ;;  %v7195_v57 = vmax.f32 %v5025_v29, 0.0 }
 0x125   : > { %v709_v1 = vpop.f32.mrf.mxu0  ;;  %v902_v63 = vpop.f32.mrf.mxu1  ;;  %v7196_v7 = vmax.f32 %v5028_v26, 0.0 }
 0x126   : > { %7193 = vst [vmem:[#allocation77_spill] sm:$0xff] %v5037_v36  ;;  %7194 = vst [vmem:[#allocation78_spill] sm:$0xff] %v5040_v23  ;;  %v6965_v60 = vmax.f32 %v5037_v36, 0.0  ;;  %v6967_v35 = vmax.f32 %v5040_v23, 0.0  ;;  %v1137_v6 = vpack.c.bf16 %v7195_v57, %v6970_v22  ;;  %v5079_v57 = vadd.f32 %v709_v1, %v4676_v40 }
 0x127   : > { %v711_v45 = vpop.f32.mrf.mxu0  ;;  %v904_v8 = vpop.f32.mrf.mxu1  ;;  %v1139_v33 = vpack.c.bf16 %v7196_v7, %v6969_v53  ;;  %v5082_v7 = vadd.f32 %v902_v63, %v4680_v41 }
 0x128   : > { %v1138_v61 = vpack.c.bf16 %v6965_v60, %v6966_v44  ;;  %v1140_v27 = vpack.c.bf16 %v6967_v35, %v6968_v0  ;;  %v5067_v56 = vadd.f32 %v711_v45, %v4669_v38  ;;  %v5070_v44 = vadd.f32 %v904_v8, %v4673_v39  ;;  %7201 = vst [vmem:[#allocation83_spill] sm:$0xff] %v5079_v57 }
 0x129   : > { %v713_v36 = vpop.f32.mrf.mxu0  ;;  %v906_v60 = vpop.f32.mrf.mxu1  ;;  %7202 = vst [vmem:[#allocation84_spill] sm:$0xff] %v5082_v7 }
 0x12a   : > { %7197 = vst [vmem:[#allocation79_spill] sm:$0xff] %v5067_v56  ;;  %7198 = vst [vmem:[#allocation80_spill] sm:$0xff] %v5070_v44  ;;  %v5073_v35 = vadd.f32 %v713_v36, %v4676_v40  ;;  %v5076_v0 = vadd.f32 %v906_v60, %v4680_v41  ;;  %1671 = vmatprep.mubr.bf16.mxu0 %v1138_v61  ;;  %1864 = vmatprep.mubr.bf16.mxu1 %v1140_v27  ;;  %v6980_v22 = vmax.f32 %v5067_v56, 0.0 }
 0x12b   : > { %v715_v45 = vpop.f32.mrf.mxu0  ;;  %v908_v53 = vpop.f32.mrf.mxu1  ;;  %1672 = vmatmul.mubr.bf16.gmra.mxu0 %v1137_v6  ;;  %1865 = vmatmul.mubr.bf16.gmra.mxu1 %v1139_v33  ;;  %v6982_v63 = vmax.f32 %v5070_v44, 0.0  ;;  %v6984_v33 = vmax.f32 %v5079_v57, 0.0 }
 0x12c   : > { %7199 = vst [vmem:[#allocation81_spill] sm:$0xff] %v5073_v35  ;;  %7200 = vst [vmem:[#allocation82_spill] sm:$0xff] %v5076_v0  ;;  %v5085_v8 = vadd.f32 %v715_v45, %v4669_v38  ;;  %v5088_v36 = vadd.f32 %v908_v53, %v4673_v39  ;;  %v6983_v45 = vmax.f32 %v5082_v7, 0.0  ;;  %v7205_v29 = vmax.f32 %v5073_v35, 0.0 }
 0x12d   : > { %v719_v61 = vpop.f32.mrf.mxu0  ;;  %v912_v1 = vpop.f32.mrf.mxu1  ;;  %v7206_v21 = vmax.f32 %v5076_v0, 0.0 }
 0x12e   : > { %7203 = vst [vmem:[#allocation85_spill] sm:$0xff] %v5085_v8  ;;  %7204 = vst [vmem:[#allocation86_spill] sm:$0xff] %v5088_v36  ;;  %v6979_v23 = vmax.f32 %v5085_v8, 0.0  ;;  %v6981_v6 = vmax.f32 %v5088_v36, 0.0  ;;  %v1141_v62 = vpack.c.bf16 %v7205_v29, %v6984_v33  ;;  %v5127_v29 = vadd.f32 %v719_v61, %v4676_v40 }
 0x12f   : > { %v721_v53 = vpop.f32.mrf.mxu0  ;;  %v914_v26 = vpop.f32.mrf.mxu1  ;;  %v1143_v25 = vpack.c.bf16 %v7206_v21, %v6983_v45  ;;  %v5130_v21 = vadd.f32 %v912_v1, %v4680_v41 }
 0x130   : > { %v1142_v27 = vpack.c.bf16 %v6979_v23, %v6980_v22  ;;  %v1144_v60 = vpack.c.bf16 %v6981_v6, %v6982_v63  ;;  %v5115_v56 = vadd.f32 %v721_v53, %v4669_v38  ;;  %v5118_v22 = vadd.f32 %v914_v26, %v4673_v39  ;;  %7211 = vst [vmem:[#allocation91_spill] sm:$0xff] %v5127_v29 }
 0x131   : > { %v723_v8 = vpop.f32.mrf.mxu0  ;;  %v916_v23 = vpop.f32.mrf.mxu1  ;;  %7212 = vst [vmem:[#allocation92_spill] sm:$0xff] %v5130_v21 }
 0x132   : > { %7207 = vst [vmem:[#allocation87_spill] sm:$0xff] %v5115_v56  ;;  %7208 = vst [vmem:[#allocation88_spill] sm:$0xff] %v5118_v22  ;;  %v5121_v6 = vadd.f32 %v723_v8, %v4676_v40  ;;  %v5124_v63 = vadd.f32 %v916_v23, %v4680_v41  ;;  %1681 = vmatprep.mubr.bf16.mxu0 %v1142_v27  ;;  %1874 = vmatprep.mubr.bf16.mxu1 %v1144_v60  ;;  %v6994_v33 = vmax.f32 %v5115_v56, 0.0 }
 0x133   : > { %v725_v53 = vpop.f32.mrf.mxu0  ;;  %v918_v45 = vpop.f32.mrf.mxu1  ;;  %1682 = vmatmul.mubr.bf16.gmra.mxu0 %v1141_v62  ;;  %1875 = vmatmul.mubr.bf16.gmra.mxu1 %v1143_v25  ;;  %v6996_v1 = vmax.f32 %v5118_v22, 0.0  ;;  %v6998_v25 = vmax.f32 %v5127_v29, 0.0 }
 0x134   : > { %7209 = vst [vmem:[#allocation89_spill] sm:$0xff] %v5121_v6  ;;  %7210 = vst [vmem:[#allocation90_spill] sm:$0xff] %v5124_v63  ;;  %v5133_v26 = vadd.f32 %v725_v53, %v4669_v38  ;;  %v5136_v8 = vadd.f32 %v918_v45, %v4673_v39  ;;  %v6997_v53 = vmax.f32 %v5130_v21, 0.0  ;;  %v7215_v35 = vmax.f32 %v5121_v6, 0.0 }
 0x135   : > { %v729_v27 = vpop.f32.mrf.mxu0  ;;  %v922_v61 = vpop.f32.mrf.mxu1  ;;  %v7216_v7 = vmax.f32 %v5124_v63, 0.0 }
 0x136   : > { %7213 = vst [vmem:[#allocation93_spill] sm:$0xff] %v5133_v26  ;;  %7214 = vst [vmem:[#allocation94_spill] sm:$0xff] %v5136_v8  ;;  %v6993_v36 = vmax.f32 %v5133_v26, 0.0  ;;  %v6995_v62 = vmax.f32 %v5136_v8, 0.0  ;;  %v1145_v44 = vpack.c.bf16 %v7215_v35, %v6998_v25  ;;  %v5175_v35 = vadd.f32 %v729_v27, %v4676_v40 }
 0x137   : > { %v731_v45 = vpop.f32.mrf.mxu0  ;;  %v924_v0 = vpop.f32.mrf.mxu1  ;;  %v1147_v57 = vpack.c.bf16 %v7216_v7, %v6997_v53  ;;  %v5178_v7 = vadd.f32 %v922_v61, %v4680_v41 }
 0x138   : > { %v1146_v60 = vpack.c.bf16 %v6993_v36, %v6994_v33  ;;  %v1148_v23 = vpack.c.bf16 %v6995_v62, %v6996_v1  ;;  %v5163_v56 = vadd.f32 %v731_v45, %v4669_v38  ;;  %v5166_v33 = vadd.f32 %v924_v0, %v4673_v39  ;;  %7221 = vst [vmem:[#allocation99_spill] sm:$0xff] %v5175_v35 }
 0x139   : > { %v733_v26 = vpop.f32.mrf.mxu0  ;;  %v926_v36 = vpop.f32.mrf.mxu1  ;;  %7222 = vst [vmem:[#allocation100_spill] sm:$0xff] %v5178_v7 }
 0x13a   : > { %7217 = vst [vmem:[#allocation95_spill] sm:$0xff] %v5163_v56  ;;  %7218 = vst [vmem:[#allocation96_spill] sm:$0xff] %v5166_v33  ;;  %v5169_v62 = vadd.f32 %v733_v26, %v4676_v40  ;;  %v5172_v1 = vadd.f32 %v926_v36, %v4680_v41  ;;  %1691 = vmatprep.mubr.bf16.mxu0 %v1146_v60  ;;  %1884 = vmatprep.mubr.bf16.mxu1 %v1148_v23  ;;  %v7008_v25 = vmax.f32 %v5163_v56, 0.0 }
 0x13b   : > { %v735_v45 = vpop.f32.mrf.mxu0  ;;  %v928_v53 = vpop.f32.mrf.mxu1  ;;  %1692 = vmatmul.mubr.bf16.gmra.mxu0 %v1145_v44  ;;  %1885 = vmatmul.mubr.bf16.gmra.mxu1 %v1147_v57  ;;  %v7010_v61 = vmax.f32 %v5166_v33, 0.0  ;;  %v7012_v57 = vmax.f32 %v5175_v35, 0.0 }
 0x13c   : > { %7219 = vst [vmem:[#allocation97_spill] sm:$0xff] %v5169_v62  ;;  %7220 = vst [vmem:[#allocation98_spill] sm:$0xff] %v5172_v1  ;;  %v5181_v0 = vadd.f32 %v735_v45, %v4669_v38  ;;  %v5184_v26 = vadd.f32 %v928_v53, %v4673_v39  ;;  %v7011_v45 = vmax.f32 %v5178_v7, 0.0  ;;  %v7225_v6 = vmax.f32 %v5169_v62, 0.0 }
 0x13d   : > { %v739_v60 = vpop.f32.mrf.mxu0  ;;  %v932_v27 = vpop.f32.mrf.mxu1  ;;  %v7226_v21 = vmax.f32 %v5172_v1, 0.0 }
 0x13e   : > { %7223 = vst [vmem:[#allocation101_spill] sm:$0xff] %v5181_v0  ;;  %7224 = vst [vmem:[#allocation102_spill] sm:$0xff] %v5184_v26  ;;  %v7007_v8 = vmax.f32 %v5181_v0, 0.0  ;;  %v7009_v44 = vmax.f32 %v5184_v26, 0.0  ;;  %v1149_v22 = vpack.c.bf16 %v7225_v6, %v7012_v57  ;;  %v5223_v6 = vadd.f32 %v739_v60, %v4676_v40 }
 0x13f   : > { %v741_v53 = vpop.f32.mrf.mxu0  ;;  %v934_v63 = vpop.f32.mrf.mxu1  ;;  %v1151_v29 = vpack.c.bf16 %v7226_v21, %v7011_v45  ;;  %v5226_v21 = vadd.f32 %v932_v27, %v4680_v41 }
 0x140   : > { %v1150_v23 = vpack.c.bf16 %v7007_v8, %v7008_v25  ;;  %v1152_v36 = vpack.c.bf16 %v7009_v44, %v7010_v61  ;;  %v5211_v56 = vadd.f32 %v741_v53, %v4669_v38  ;;  %v5214_v25 = vadd.f32 %v934_v63, %v4673_v39  ;;  %7231 = vst [vmem:[#allocation107_spill] sm:$0xff] %v5223_v6 }
 0x141   : > { %v743_v0 = vpop.f32.mrf.mxu0  ;;  %v936_v8 = vpop.f32.mrf.mxu1  ;;  %7232 = vst [vmem:[#allocation108_spill] sm:$0xff] %v5226_v21 }
 0x142   : > { %7227 = vst [vmem:[#allocation103_spill] sm:$0xff] %v5211_v56  ;;  %7228 = vst [vmem:[#allocation104_spill] sm:$0xff] %v5214_v25  ;;  %v5217_v44 = vadd.f32 %v743_v0, %v4676_v40  ;;  %v5220_v61 = vadd.f32 %v936_v8, %v4680_v41  ;;  %1701 = vmatprep.mubr.bf16.mxu0 %v1150_v23  ;;  %1894 = vmatprep.mubr.bf16.mxu1 %v1152_v36  ;;  %v7022_v57 = vmax.f32 %v5211_v56, 0.0 }
 0x143   : > { %v745_v53 = vpop.f32.mrf.mxu0  ;;  %v938_v45 = vpop.f32.mrf.mxu1  ;;  %1702 = vmatmul.mubr.bf16.gmra.mxu0 %v1149_v22  ;;  %1895 = vmatmul.mubr.bf16.gmra.mxu1 %v1151_v29  ;;  %v7024_v27 = vmax.f32 %v5214_v25, 0.0  ;;  %v7026_v29 = vmax.f32 %v5223_v6, 0.0 }
 0x144   : > { %7229 = vst [vmem:[#allocation105_spill] sm:$0xff] %v5217_v44  ;;  %7230 = vst [vmem:[#allocation106_spill] sm:$0xff] %v5220_v61  ;;  %v5229_v63 = vadd.f32 %v745_v53, %v4669_v38  ;;  %v5232_v0 = vadd.f32 %v938_v45, %v4673_v39  ;;  %v7025_v53 = vmax.f32 %v5226_v21, 0.0  ;;  %v7235_v62 = vmax.f32 %v5217_v44, 0.0 }
 0x145   : > { %v749_v23 = vpop.f32.mrf.mxu0  ;;  %v942_v60 = vpop.f32.mrf.mxu1  ;;  %v7236_v7 = vmax.f32 %v5220_v61, 0.0 }
 0x146   : > { %7233 = vst [vmem:[#allocation109_spill] sm:$0xff] %v5229_v63  ;;  %7234 = vst [vmem:[#allocation110_spill] sm:$0xff] %v5232_v0  ;;  %v7021_v26 = vmax.f32 %v5229_v63, 0.0  ;;  %v7023_v22 = vmax.f32 %v5232_v0, 0.0  ;;  %v1153_v33 = vpack.c.bf16 %v7235_v62, %v7026_v29  ;;  %v5271_v62 = vadd.f32 %v749_v23, %v4676_v40 }
 0x147   : > { %v751_v45 = vpop.f32.mrf.mxu0  ;;  %v944_v1 = vpop.f32.mrf.mxu1  ;;  %v1155_v35 = vpack.c.bf16 %v7236_v7, %v7025_v53  ;;  %v5274_v7 = vadd.f32 %v942_v60, %v4680_v41 }
 0x148   : > { %v1154_v36 = vpack.c.bf16 %v7021_v26, %v7022_v57  ;;  %v1156_v8 = vpack.c.bf16 %v7023_v22, %v7024_v27  ;;  %v5259_v56 = vadd.f32 %v751_v45, %v4669_v38  ;;  %v5262_v57 = vadd.f32 %v944_v1, %v4673_v39  ;;  %7241 = vst [vmem:[#allocation115_spill] sm:$0xff] %v5271_v62 }
 0x149   : > { %v753_v63 = vpop.f32.mrf.mxu0  ;;  %v946_v26 = vpop.f32.mrf.mxu1  ;;  %7242 = vst [vmem:[#allocation116_spill] sm:$0xff] %v5274_v7 }
 0x14a   : > { %7237 = vst [vmem:[#allocation111_spill] sm:$0xff] %v5259_v56  ;;  %7238 = vst [vmem:[#allocation112_spill] sm:$0xff] %v5262_v57  ;;  %v5265_v22 = vadd.f32 %v753_v63, %v4676_v40  ;;  %v5268_v27 = vadd.f32 %v946_v26, %v4680_v41  ;;  %1711 = vmatprep.mubr.bf16.mxu0 %v1154_v36  ;;  %1904 = vmatprep.mubr.bf16.mxu1 %v1156_v8  ;;  %v7036_v29 = vmax.f32 %v5259_v56, 0.0 }
 0x14b   : > { %v755_v45 = vpop.f32.mrf.mxu0  ;;  %v948_v53 = vpop.f32.mrf.mxu1  ;;  %1712 = vmatmul.mubr.bf16.gmra.mxu0 %v1153_v33  ;;  %1905 = vmatmul.mubr.bf16.gmra.mxu1 %v1155_v35  ;;  %v7038_v60 = vmax.f32 %v5262_v57, 0.0  ;;  %v7040_v35 = vmax.f32 %v5271_v62, 0.0 }
 0x14c   : > { %7239 = vst [vmem:[#allocation113_spill] sm:$0xff] %v5265_v22  ;;  %7240 = vst [vmem:[#allocation114_spill] sm:$0xff] %v5268_v27  ;;  %v5277_v1 = vadd.f32 %v755_v45, %v4669_v38  ;;  %v5280_v63 = vadd.f32 %v948_v53, %v4673_v39  ;;  %v7039_v45 = vmax.f32 %v5274_v7, 0.0  ;;  %v7245_v44 = vmax.f32 %v5265_v22, 0.0 }
 0x14d   : > { %v759_v36 = vpop.f32.mrf.mxu0  ;;  %v952_v23 = vpop.f32.mrf.mxu1  ;;  %v7246_v21 = vmax.f32 %v5268_v27, 0.0 }
 0x14e   : > { %7243 = vst [vmem:[#allocation117_spill] sm:$0xff] %v5277_v1  ;;  %7244 = vst [vmem:[#allocation118_spill] sm:$0xff] %v5280_v63  ;;  %v7035_v0 = vmax.f32 %v5277_v1, 0.0  ;;  %v7037_v33 = vmax.f32 %v5280_v63, 0.0  ;;  %v1157_v25 = vpack.c.bf16 %v7245_v44, %v7040_v35  ;;  %v5319_v44 = vadd.f32 %v759_v36, %v4676_v40 }
 0x14f   : > { %v761_v53 = vpop.f32.mrf.mxu0  ;;  %v954_v61 = vpop.f32.mrf.mxu1  ;;  %v1159_v6 = vpack.c.bf16 %v7246_v21, %v7039_v45  ;;  %v5322_v21 = vadd.f32 %v952_v23, %v4680_v41 }
 0x150   : > { %v1158_v8 = vpack.c.bf16 %v7035_v0, %v7036_v29  ;;  %v1160_v26 = vpack.c.bf16 %v7037_v33, %v7038_v60  ;;  %v5307_v56 = vadd.f32 %v761_v53, %v4669_v38  ;;  %v5310_v29 = vadd.f32 %v954_v61, %v4673_v39  ;;  %7251 = vst [vmem:[#allocation123_spill] sm:$0xff] %v5319_v44 }
 0x151   : > { %v763_v1 = vpop.f32.mrf.mxu0  ;;  %v956_v0 = vpop.f32.mrf.mxu1  ;;  %7252 = vst [vmem:[#allocation124_spill] sm:$0xff] %v5322_v21 }
 0x152   : > { %7247 = vst [vmem:[#allocation119_spill] sm:$0xff] %v5307_v56  ;;  %7248 = vst [vmem:[#allocation120_spill] sm:$0xff] %v5310_v29  ;;  %v5313_v33 = vadd.f32 %v763_v1, %v4676_v40  ;;  %v5316_v60 = vadd.f32 %v956_v0, %v4680_v41  ;;  %1721 = vmatprep.mubr.bf16.mxu0 %v1158_v8  ;;  %1914 = vmatprep.mubr.bf16.mxu1 %v1160_v26  ;;  %v7050_v35 = vmax.f32 %v5307_v56, 0.0 }
 0x153   : > { %v765_v53 = vpop.f32.mrf.mxu0  ;;  %v958_v45 = vpop.f32.mrf.mxu1  ;;  %1722 = vmatmul.mubr.bf16.gmra.mxu0 %v1157_v25  ;;  %1915 = vmatmul.mubr.bf16.gmra.mxu1 %v1159_v6  ;;  %v7052_v23 = vmax.f32 %v5310_v29, 0.0  ;;  %v7054_v6 = vmax.f32 %v5319_v44, 0.0 }
 0x154   : > { %7249 = vst [vmem:[#allocation121_spill] sm:$0xff] %v5313_v33  ;;  %7250 = vst [vmem:[#allocation122_spill] sm:$0xff] %v5316_v60  ;;  %v5325_v61 = vadd.f32 %v765_v53, %v4669_v38  ;;  %v5328_v1 = vadd.f32 %v958_v45, %v4673_v39  ;;  %v7053_v53 = vmax.f32 %v5322_v21, 0.0  ;;  %v7255_v22 = vmax.f32 %v5313_v33, 0.0 }
 0x155   : > { %v769_v8 = vpop.f32.mrf.mxu0  ;;  %v962_v36 = vpop.f32.mrf.mxu1  ;;  %v7256_v7 = vmax.f32 %v5316_v60, 0.0 }
 0x156   : > { %7253 = vst [vmem:[#allocation125_spill] sm:$0xff] %v5325_v61  ;;  %7254 = vst [vmem:[#allocation126_spill] sm:$0xff] %v5328_v1  ;;  %v7049_v63 = vmax.f32 %v5325_v61, 0.0  ;;  %v7051_v25 = vmax.f32 %v5328_v1, 0.0  ;;  %v1161_v57 = vpack.c.bf16 %v7255_v22, %v7054_v6  ;;  %v5367_v22 = vadd.f32 %v769_v8, %v4676_v40 }
 0x157   : > { %v771_v45 = vpop.f32.mrf.mxu0  ;;  %v964_v27 = vpop.f32.mrf.mxu1  ;;  %v1163_v62 = vpack.c.bf16 %v7256_v7, %v7053_v53  ;;  %v5370_v7 = vadd.f32 %v962_v36, %v4680_v41 }
 0x158   : > { %v1162_v26 = vpack.c.bf16 %v7049_v63, %v7050_v35  ;;  %v1164_v0 = vpack.c.bf16 %v7051_v25, %v7052_v23  ;;  %v5355_v56 = vadd.f32 %v771_v45, %v4669_v38  ;;  %v5358_v35 = vadd.f32 %v964_v27, %v4673_v39  ;;  %7261 = vst [vmem:[#allocation131_spill] sm:$0xff] %v5367_v22 }
 0x159   : > { %v773_v61 = vpop.f32.mrf.mxu0  ;;  %v966_v63 = vpop.f32.mrf.mxu1  ;;  %7262 = vst [vmem:[#allocation132_spill] sm:$0xff] %v5370_v7 }
 0x15a   : > { %7257 = vst [vmem:[#allocation127_spill] sm:$0xff] %v5355_v56  ;;  %7258 = vst [vmem:[#allocation128_spill] sm:$0xff] %v5358_v35  ;;  %v5361_v25 = vadd.f32 %v773_v61, %v4676_v40  ;;  %v5364_v23 = vadd.f32 %v966_v63, %v4680_v41  ;;  %1731 = vmatprep.mubr.bf16.mxu0 %v1162_v26  ;;  %1924 = vmatprep.mubr.bf16.mxu1 %v1164_v0  ;;  %v7064_v6 = vmax.f32 %v5355_v56, 0.0 }
 0x15b   : > { %v775_v45 = vpop.f32.mrf.mxu0  ;;  %v968_v53 = vpop.f32.mrf.mxu1  ;;  %1732 = vmatmul.mubr.bf16.gmra.mxu0 %v1161_v57  ;;  %1925 = vmatmul.mubr.bf16.gmra.mxu1 %v1163_v62  ;;  %v7066_v36 = vmax.f32 %v5358_v35, 0.0  ;;  %v7074_v62 = vmax.f32 %v5367_v22, 0.0 }
 0x15c   : > { %7259 = vst [vmem:[#allocation129_spill] sm:$0xff] %v5361_v25  ;;  %7260 = vst [vmem:[#allocation130_spill] sm:$0xff] %v5364_v23  ;;  %v5373_v27 = vadd.f32 %v775_v45, %v4669_v38  ;;  %v5376_v61 = vadd.f32 %v968_v53, %v4673_v39  ;;  %v7067_v45 = vmax.f32 %v5370_v7, 0.0  ;;  %v7265_v33 = vmax.f32 %v5361_v25, 0.0 }
 0x15d   : > { %v779_v26 = vpop.f32.mrf.mxu0  ;;  %v972_v8 = vpop.f32.mrf.mxu1  ;;  %v7266_v21 = vmax.f32 %v5364_v23, 0.0 }
 0x15e   : > { %7263 = vst [vmem:[#allocation133_spill] sm:$0xff] %v5373_v27  ;;  %7264 = vst [vmem:[#allocation134_spill] sm:$0xff] %v5376_v61  ;;  %v7063_v1 = vmax.f32 %v5373_v27, 0.0  ;;  %v7065_v57 = vmax.f32 %v5376_v61, 0.0  ;;  %v1165_v29 = vpack.c.bf16 %v7265_v33, %v7074_v62  ;;  %v5415_v33 = vadd.f32 %v779_v26, %v4676_v40 }
 0x15f   : > { %v781_v53 = vpop.f32.mrf.mxu0  ;;  %v974_v60 = vpop.f32.mrf.mxu1  ;;  %v1167_v44 = vpack.c.bf16 %v7266_v21, %v7067_v45  ;;  %v5418_v21 = vadd.f32 %v972_v8, %v4680_v41 }
 0x160   : > { %v1166_v0 = vpack.c.bf16 %v7063_v1, %v7064_v6  ;;  %v1168_v63 = vpack.c.bf16 %v7065_v57, %v7066_v36  ;;  %v5403_v56 = vadd.f32 %v781_v53, %v4669_v38  ;;  %v5406_v6 = vadd.f32 %v974_v60, %v4673_v39  ;;  %7271 = vst [vmem:[#allocation139_spill] sm:$0xff] %v5415_v33 }
 0x161   : > { %v783_v27 = vpop.f32.mrf.mxu0  ;;  %v976_v1 = vpop.f32.mrf.mxu1  ;;  %7272 = vst [vmem:[#allocation140_spill] sm:$0xff] %v5418_v21 }
 0x162   : > { %7267 = vst [vmem:[#allocation135_spill] sm:$0xff] %v5403_v56  ;;  %7268 = vst [vmem:[#allocation136_spill] sm:$0xff] %v5406_v6  ;;  %v5409_v57 = vadd.f32 %v783_v27, %v4676_v40  ;;  %v5412_v36 = vadd.f32 %v976_v1, %v4680_v41  ;;  %1741 = vmatprep.mubr.bf16.mxu0 %v1166_v0  ;;  %1934 = vmatprep.mubr.bf16.mxu1 %v1168_v63  ;;  %v7071_v40 = vmax.f32 %v5403_v56, 0.0 }
 0x163   : > { %v785_v53 = vpop.f32.mrf.mxu0  ;;  %v978_v45 = vpop.f32.mrf.mxu1  ;;  %1742 = vmatmul.mubr.bf16.gmra.mxu0 %v1165_v29  ;;  %1935 = vmatmul.mubr.bf16.gmra.mxu1 %v1167_v44  ;;  %v7070_v0 = vmax.f32 %v5406_v6, 0.0  ;;  %v7073_v29 = vmax.f32 %v5415_v33, 0.0 }
 0x164   : > { %7269 = vst [vmem:[#allocation137_spill] sm:$0xff] %v5409_v57  ;;  %7270 = vst [vmem:[#allocation138_spill] sm:$0xff] %v5412_v36  ;;  %v5421_v60 = vadd.f32 %v785_v53, %v4669_v38  ;;  %v5424_v27 = vadd.f32 %v978_v45, %v4673_v39  ;;  %v7072_v1 = vmax.f32 %v5409_v57, 0.0  ;;  %v7076_v63 = vmax.f32 %v5412_v36, 0.0  ;;  %v1237_v53 = vld [vmem:[%s6878_s5] sm:$0x3] }
 0x165   : > { %v7077_v38 = vmax.f32 %v5418_v21, 0.0  ;;  %v5460_v56 = vrot.slane %v1237_v53, %v4662_v34 }
 0x166   : > { %7273 = vst [vmem:[#allocation141_spill] sm:$0xff] %v5421_v60  ;;  %7274 = vst [vmem:[#allocation142_spill] sm:$0xff] %v5424_v27  ;;  %v7069_v41 = vmax.f32 %v5421_v60, 0.0  ;;  %v7068_v26 = vmax.f32 %v5424_v27, 0.0  ;;  %v1169_v8 = vpack.c.bf16 %v7072_v1, %v7073_v29 }
 0x167   : > { %v1171_v45 = vpack.c.bf16 %v7076_v63, %v7077_v38 }
 0x168   : > { %v1170_v39 = vpack.c.bf16 %v7069_v41, %v7071_v40  ;;  %v1172_v44 = vpack.c.bf16 %v7068_v26, %v7070_v0  ;;  %v5454_v26 = vrot.slane %v1237_v53, %v4658_v32 }
 0x16a   : > { %1751 = vmatprep.mubr.bf16.mxu0 %v1170_v39  ;;  %1944 = vmatprep.mubr.bf16.mxu1 %v1172_v44 }
 0x16b   : > { %1752 = vmatmul.mubr.bf16.gmra.mxu0 %v1169_v8  ;;  %1945 = vmatmul.mubr.bf16.gmra.mxu1 %v1171_v45 }
 0x1b3   : > { %v1603_v41 = vpop.f32.mrf.mxu0  ;;  %v1796_v0 = vpop.f32.mrf.mxu1 }
 0x1b5   : > { %v1605_v40 = vpop.f32.mrf.mxu0  ;;  %v1798_v1 = vpop.f32.mrf.mxu1 }
 0x1b6   : > { %v1606_v29 = vadd.f32 %v1605_v40, %v5454_v26 }
 0x1b7   : > { %v1607_v62 = vpop.f32.mrf.mxu0  ;;  %v1800_v27 = vpop.f32.mrf.mxu1 }
 0x1b8   : > { %v1799_v63 = vadd.f32 %v1798_v1, %v1606_v29 }
 0x1b9   : > { %v1609_v39 = vpop.f32.mrf.mxu0  ;;  %v1802_v44 = vpop.f32.mrf.mxu1 }
 0x1ba   : > { %v3672_v8 = vmul.f32 -1.442695, %v1799_v63  ;;  %v1610_v45 = vadd.f32 %v1609_v39, %v5454_v26 }
 0x1bb   : > { %v1613_v38 = vpop.f32.mrf.mxu0  ;;  %v1806_v36 = vpop.f32.mrf.mxu1 }
 0x1bc   : > { %3937 = vpow2.f32 %v3672_v8  ;;  %v1803_v60 = vadd.f32 %v1802_v44, %v1610_v45  ;;  %v1604_v8 = vadd.f32 %v1603_v41, %v5460_v56 }
 0x1bd   : > { %v1615_v32 = vpop.f32.mrf.mxu0  ;;  %v1808_v57 = vpop.f32.mrf.mxu1 }
 0x1be   : > { %v3673_v6 = vmul.f32 -1.442695, %v1803_v60  ;;  %v1616_v21 = vadd.f32 %v1615_v32, %v5454_v26  ;;  %v1797_v35 = vadd.f32 %v1796_v0, %v1604_v8 }
 0x1bf   : > { %v1617_v40 = vpop.f32.mrf.mxu0  ;;  %v1810_v33 = vpop.f32.mrf.mxu1 }
 0x1c0   : > { %3939 = vpow2.f32 %v3673_v6  ;;  %v1809_v1 = vadd.f32 %v1808_v57, %v1616_v21  ;;  %v1608_v6 = vadd.f32 %v1607_v62, %v5460_v56 }
 0x1c1   : > { %v1619_v29 = vpop.f32.mrf.mxu0  ;;  %v1812_v63 = vpop.f32.mrf.mxu1 }
 0x1c2   : > { %v3674_v61 = vmul.f32 -1.442695, %v1809_v1  ;;  %v1620_v39 = vadd.f32 %v1619_v29, %v5454_v26 }
 0x1c3   : > { %v1623_v44 = vpop.f32.mrf.mxu0  ;;  %v1816_v45 = vpop.f32.mrf.mxu1 }
 0x1c4   : > { %3941 = vpow2.f32 %v3674_v61  ;;  %v1813_v60 = vadd.f32 %v1812_v63, %v1620_v39  ;;  %v1801_v63 = vadd.f32 %v1800_v27, %v1608_v6  ;;  %v1614_v39 = vadd.f32 %v1613_v38, %v5460_v56 }
 0x1c5   : > { %v1625_v23 = vpop.f32.mrf.mxu0  ;;  %v1818_v32 = vpop.f32.mrf.mxu1 }
 0x1c6   : > { %v3675_v25 = vmul.f32 -1.442695, %v1813_v60  ;;  %v1626_v53 = vadd.f32 %v1625_v23, %v5454_v26 }
 0x1c7   : > { %v1627_v57 = vpop.f32.mrf.mxu0  ;;  %v1820_v21 = vpop.f32.mrf.mxu1 }
 0x1c8   : > { %3943 = vpow2.f32 %v3675_v25  ;;  %v1819_v1 = vadd.f32 %v1818_v32, %v1626_v53 }
 0x1c9   : > { %v3938_v7 = vpop.eup %3937  ;;  %v1629_v29 = vpop.f32.mrf.mxu0  ;;  %3945 = vtanh.f32 %v1797_v35 }
 0x1ca   : > { %v1822_v22 = vpop.f32.mrf.mxu1  ;;  %v2083_v41 = vadd.f32 1.0, %v3938_v7  ;;  %v3676_v42 = vmul.f32 -1.442695, %v1819_v1  ;;  %v1630_v61 = vadd.f32 %v1629_v29, %v5454_v26  ;;  %v1807_v7 = vadd.f32 %v1806_v36, %v1614_v39 }
 0x1cb   : > { %v1633_v60 = vpop.f32.mrf.mxu0  ;;  %v1618_v1 = vadd.f32 %v1617_v40, %v5460_v56  ;;  %v1624_v36 = vadd.f32 %v1623_v44, %v5460_v56 }
 0x1cc   : > { %v5468_v23 = vpop.f32.mrf.mxu1  ;;  %3947 = vrcp.f32 %v2083_v41  ;;  %v1823_v62 = vadd.f32 %v1822_v22, %v1630_v61 }
 0x1cd   : > { %v3940_v0 = vpop.eup %3939  ;;  %3949 = vpow2.f32 %v3676_v42  ;;  %v1635_v25 = vpop.f32.mrf.mxu0 }
 0x1ce   : > { %v1828_v8 = vpop.f32.mrf.mxu1  ;;  %v2084_v32 = vadd.f32 1.0, %v3940_v0  ;;  %v3677_v53 = vmul.f32 -1.442695, %v1823_v62  ;;  %3951 = vtanh.f32 %v1801_v63  ;;  %v1636_v35 = vadd.f32 %v1635_v25, %v5454_v26 }
 0x1cf   : > { %v5472_v27 = vpop.f32.mrf.mxu0  ;;  %v1811_v63 = vadd.f32 %v1810_v33, %v1618_v1  ;;  %v1628_v0 = vadd.f32 %v1627_v57, %v5460_v56 }
 0x1d0   : > { %v5474_v38 = vpop.f32.mrf.mxu1  ;;  %3953 = vrcp.f32 %v2084_v32  ;;  %v1829_v22 = vadd.f32 %v1828_v8, %v1636_v35 }
 0x1d1   : > { %v3942_v6 = vpop.eup %3941  ;;  %3955 = vpow2.f32 %v3677_v53  ;;  %v1639_v29 = vpop.f32.mrf.mxu0 }
 0x1d2   : > { %v1832_v42 = vpop.f32.mrf.mxu1  ;;  %v2085_v41 = vadd.f32 1.0, %v3942_v6  ;;  %v1640_v61 = vadd.f32 %v1639_v29, %v5454_v26  ;;  %3957 = vtanh.f32 %v1807_v7  ;;  %v3678_v40 = vmul.f32 -1.442695, %v1829_v22 }
 0x1d3   : > { %v5478_v39 = vpop.f32.mrf.mxu0  ;;  %v1817_v7 = vadd.f32 %v1816_v45, %v1624_v36  ;;  %v1821_v29 = vadd.f32 %v1820_v21, %v1628_v0 }
 0x1d4   : > { %v5480_v62 = vpop.f32.mrf.mxu1  ;;  %3959 = vrcp.f32 %v2085_v41  ;;  %v1833_v25 = vadd.f32 %v1832_v42, %v1640_v61 }
 0x1d5   : > { %v3944_v32 = vpop.eup %3943  ;;  %3961 = vpow2.f32 %v3678_v40  ;;  %v1645_v8 = vpop.f32.mrf.mxu0  ;;  %v5491_v40 = vld [vmem:[%s6879_s6] ss:$0 sm:$0xff] }
 0x1d6   : > { %v1838_v53 = vpop.f32.mrf.mxu1  ;;  %v2086_v35 = vadd.f32 1.0, %v3944_v32  ;;  %v3679_v6 = vmul.f32 -1.442695, %v1833_v25  ;;  %3963 = vtanh.f32 %v1811_v63  ;;  %v1646_v33 = vadd.f32 %v1645_v8, %v5454_v26  ;;  %v3946_v22 = vpop.eup %3945 }
 0x1d7   : > { %v5484_v44 = vpop.f32.mrf.mxu0  ;;  %v1634_v32 = vadd.f32 %v1633_v60, %v5460_v56 }
 0x1d8   : > { %v5486_v1 = vpop.f32.mrf.mxu1  ;;  %3965 = vrcp.f32 %v2086_v35  ;;  %v1839_v57 = vadd.f32 %v1838_v53, %v1646_v33 }
 0x1d9   : > { %v3948_v41 = vpop.eup %3947  ;;  %3967 = vpow2.f32 %v3679_v6  ;;  %v1649_v42 = vpop.f32.mrf.mxu0 }
 0x1da   : > { %v1842_v61 = vpop.f32.mrf.mxu1  ;;  %v3950_v45 = vpop.eup %3949  ;;  %v1650_v63 = vadd.f32 %v1649_v42, %v5454_v26  ;;  %v2179_v36 = vmul.f32 %v3948_v41, %v3946_v22  ;;  %3969 = vtanh.f32 %v1817_v7  ;;  %v3680_v8 = vmul.f32 -1.442695, %v1839_v57 }
 0x1db   : > { %v2087_v25 = vadd.f32 1.0, %v3950_v45  ;;  %v5495_v21 = vpop.f32.mrf.mxu0  ;;  %v3952_v53 = vpop.eup %3951  ;;  %3971 = vtanh.f32 %v1821_v29  ;;  %v1827_v41 = vadd.f32 %v5468_v23, %v1634_v32  ;;  %v1638_v57 = vadd.f32 %v5472_v27, %v5460_v56 }
 0x1dc   : > { %v5497_v0 = vpop.f32.mrf.mxu1  ;;  %v1843_v35 = vadd.f32 %v1842_v61, %v1650_v63  ;;  %v2218_v6 = vmul.f32 %v5491_v40, %v2179_v36 }
 0x1dd   : > { %v3954_v33 = vpop.eup %3953  ;;  %3973 = vrcp.f32 %v2087_v25  ;;  %v1655_v28 = vpop.f32.mrf.mxu0  ;;  %v1831_v32 = vadd.f32 %v5474_v38, %v1638_v57 }
 0x1de   : > { %v1848_v24 = vpop.f32.mrf.mxu1  ;;  %v3956_v42 = vpop.eup %3955  ;;  %3975 = vpow2.f32 %v3680_v8  ;;  %v3681_v7 = vmul.f32 -1.442695, %v1843_v35  ;;  %v1656_v22 = vadd.f32 %v1655_v28, %v5454_v26  ;;  %2250 = vadd.xlane.f32.xlu0 %v2218_v6  ;;  %v2180_v45 = vmul.f32 %v3954_v33, %v3952_v53 }
 0x1df   : > { %v2088_v60 = vadd.f32 1.0, %v3956_v42  ;;  %v5504_v29 = vpop.f32.mrf.mxu0  ;;  %v3958_v63 = vpop.eup %3957 }
 0x1e0   : > { %v5506_v61 = vpop.f32.mrf.mxu1  ;;  %3977 = vpow2.f32 %v3681_v7  ;;  %v1849_v36 = vadd.f32 %v1848_v24, %v1656_v22  ;;  %v2219_v28 = vmul.f32 %v5491_v40, %v2180_v45 }
 0x1e1   : > { %v3960_v25 = vpop.eup %3959  ;;  %3979 = vrcp.f32 %v2088_v60  ;;  %v1659_v8 = vpop.f32.mrf.mxu0  ;;  %v1644_v60 = vadd.f32 %v5478_v39, %v5460_v56 }
 0x1e2   : > { %v1852_v35 = vpop.f32.mrf.mxu1  ;;  %v3962_v6 = vpop.eup %3961  ;;  %v3682_v42 = vmul.f32 -1.442695, %v1849_v36  ;;  %v1660_v23 = vadd.f32 %v1659_v8, %v5454_v26  ;;  %3981 = vtanh.f32 %v1827_v41  ;;  %2252 = vadd.xlane.f32.xlu0 %v2219_v28  ;;  %v2181_v24 = vmul.f32 %v3960_v25, %v3958_v63 }
 0x1e3   : > { %v2089_v27 = vadd.f32 1.0, %v3962_v6  ;;  %v5511_v58 = vpop.f32.mrf.mxu0  ;;  %v3964_v33 = vpop.eup %3963  ;;  %v1648_v63 = vadd.f32 %v5484_v44, %v5460_v56  ;;  %v1654_v44 = vadd.f32 %v5495_v21, %v5460_v56 }
 0x1e4   : > { %v5513_v53 = vpop.f32.mrf.mxu1  ;;  %3983 = vpow2.f32 %v3682_v42  ;;  %v1853_v7 = vadd.f32 %v1852_v35, %v1660_v23  ;;  %v2220_v41 = vmul.f32 %v5491_v40, %v2181_v24 }
 0x1e5   : > { %v3966_v22 = vpop.eup %3965  ;;  %3985 = vrcp.f32 %v2089_v27  ;;  %v1665_v45 = vpop.f32.mrf.mxu0  ;;  %v1837_v27 = vadd.f32 %v5480_v62, %v1644_v60 }
 0x1e6   : > { %v1858_v36 = vpop.f32.mrf.mxu1  ;;  %v3968_v8 = vpop.eup %3967  ;;  %v3683_v38 = vmul.f32 -1.442695, %v1853_v7  ;;  %v1666_v57 = vadd.f32 %v1665_v45, %v5454_v26  ;;  %3987 = vtanh.f32 %v1831_v32  ;;  %2254 = vadd.xlane.f32.xlu1 %v2220_v41  ;;  %v2182_v6 = vmul.f32 %v3966_v22, %v3964_v33 }
 0x1e7   : > { %v2090_v28 = vadd.f32 1.0, %v3968_v8  ;;  %v5521_v25 = vpop.f32.mrf.mxu0  ;;  %v3970_v39 = vpop.eup %3969  ;;  %v1841_v33 = vadd.f32 %v5486_v1, %v1648_v63  ;;  %v1847_v1 = vadd.f32 %v5497_v0, %v1654_v44 }
 0x1e8   : > { %v5523_v35 = vpop.f32.mrf.mxu1  ;;  %3989 = vpow2.f32 %v3683_v38  ;;  %v1859_v42 = vadd.f32 %v1858_v36, %v1666_v57  ;;  %v3972_v23 = vpop.eup %3971  ;;  %v2221_v32 = vmul.f32 %v5491_v40, %v2182_v6 }
 0x1e9   : > { %3991 = vrcp.f32 %v2090_v28  ;;  %v1669_v24 = vpop.f32.mrf.mxu0 }
 0x1ea   : > { %v1862_v7 = vpop.f32.mrf.mxu1  ;;  %v3974_v45 = vpop.eup %3973  ;;  %v3684_v41 = vmul.f32 -1.442695, %v1859_v42  ;;  %v1670_v8 = vadd.f32 %v1669_v24, %v5454_v26  ;;  %2256 = vadd.xlane.f32.xlu1 %v2221_v32  ;;  %v1658_v32 = vadd.f32 %v5504_v29, %v5460_v56 }
 0x1eb   : > { %v3976_v43 = vpop.eup %3975  ;;  %v5531_v22 = vpop.f32.mrf.mxu0  ;;  %v2183_v62 = vmul.f32 %v3974_v45, %v3970_v39 }
 0x1ec   : > { %v5533_v36 = vpop.f32.mrf.mxu1  ;;  %v2091_v60 = vadd.f32 1.0, %v3976_v43  ;;  %3993 = vpow2.f32 %v3684_v41  ;;  %v1863_v38 = vadd.f32 %v1862_v7, %v1670_v8 }
 0x1ed   : > { %v3978_v57 = vpop.eup %3977  ;;  %3995 = vtanh.f32 %v1837_v27  ;;  %v1675_v28 = vpop.f32.mrf.mxu0  ;;  %v2222_v21 = vmul.f32 %v5491_v40, %v2183_v62 }
 0x1ee   : > { %v1868_v6 = vpop.f32.mrf.mxu1  ;;  %v3980_v42 = vpop.eup %3979  ;;  %3997 = vrcp.f32 %v2091_v60  ;;  %v2092_v24 = vadd.f32 1.0, %v3978_v57  ;;  %v3685_v63 = vmul.f32 -1.442695, %v1863_v38  ;;  %v1676_v43 = vadd.f32 %v1675_v28, %v5454_v26 }
 0x1ef   : > { %3999 = vtanh.f32 %v1841_v33  ;;  %2258 = vadd.xlane.f32.xlu0 %v2222_v21  ;;  %v5540_v39 = vpop.f32.mrf.mxu0  ;;  %v2184_v7 = vmul.f32 %v3980_v42, %v3972_v23  ;;  %v3982_v45 = vpop.eup %3981  ;;  %v1851_v38 = vadd.f32 %v5506_v61, %v1658_v32  ;;  %v1664_v57 = vadd.f32 %v5511_v58, %v5460_v56 }
 0x1f0   : > { %v5542_v27 = vpop.f32.mrf.mxu1  ;;  %4001 = vrcp.f32 %v2092_v24  ;;  %v1869_v8 = vadd.f32 %v1868_v6, %v1676_v43  ;;  %v1668_v58 = vadd.f32 %v5521_v25, %v5460_v56 }
 0x1f1   : > { %v3984_v41 = vpop.eup %3983  ;;  %4003 = vpow2.f32 %v3685_v63  ;;  %v1679_v62 = vpop.f32.mrf.mxu0  ;;  %v2223_v44 = vmul.f32 %v5491_v40, %v2184_v7 }
 0x1f2   : > { %v1872_v0 = vpop.f32.mrf.mxu1  ;;  %v3986_v33 = vpop.eup %3985  ;;  %4005 = vtanh.f32 %v1847_v1  ;;  %v2093_v29 = vadd.f32 1.0, %v3984_v41  ;;  %v1680_v60 = vadd.f32 %v1679_v62, %v5454_v26  ;;  %v3686_v23 = vmul.f32 -1.442695, %v1869_v8 }
 0x1f3   : > { %2260 = vadd.xlane.f32.xlu1 %v2223_v44  ;;  %v5549_v28 = vpop.f32.mrf.mxu0  ;;  %v2185_v6 = vmul.f32 %v3986_v33, %v3982_v45  ;;  %v3988_v42 = vpop.eup %3987  ;;  %v1857_v8 = vadd.f32 %v5513_v53, %v1664_v57  ;;  %v1861_v53 = vadd.f32 %v5523_v35, %v1668_v58  ;;  %v1674_v57 = vadd.f32 %v5531_v22, %v5460_v56 }
 0x1f4   : > { %v5551_v21 = vpop.f32.mrf.mxu1  ;;  %4007 = vrcp.f32 %v2093_v29  ;;  %v1873_v24 = vadd.f32 %v1872_v0, %v1680_v60 }
 0x1f5   : > { %v3990_v63 = vpop.eup %3989  ;;  %4009 = vpow2.f32 %v3686_v23  ;;  %v1685_v1 = vpop.f32.mrf.mxu0  ;;  %v2224_v7 = vmul.f32 %v5491_v40, %v2185_v6  ;;  %v1867_v22 = vadd.f32 %v5533_v36, %v1674_v57 }
 0x1f6   : > { %v1878_v43 = vpop.f32.mrf.mxu1  ;;  %v3992_v61 = vpop.eup %3991  ;;  %v2094_v32 = vadd.f32 1.0, %v3990_v63  ;;  %v3687_v41 = vmul.f32 -1.442695, %v1873_v24  ;;  %4011 = vtanh.f32 %v1851_v38  ;;  %v1686_v45 = vadd.f32 %v1685_v1, %v5454_v26 }
 0x1f7   : > { %2262 = vadd.xlane.f32.xlu0 %v2224_v7  ;;  %v5558_v62 = vpop.f32.mrf.mxu0  ;;  %v2186_v44 = vmul.f32 %v3992_v61, %v3988_v42 }
 0x1f8   : > { %v5560_v0 = vpop.f32.mrf.mxu1  ;;  %4013 = vrcp.f32 %v2094_v32  ;;  %v1879_v29 = vadd.f32 %v1878_v43, %v1686_v45 }
 0x1f9   : > { %v3994_v33 = vpop.eup %3993  ;;  %4015 = vpow2.f32 %v3687_v41  ;;  %v1689_v60 = vpop.f32.mrf.mxu0  ;;  %v2225_v25 = vmul.f32 %v5491_v40, %v2186_v44 }
 0x1fa   : > { %v1882_v23 = vpop.f32.mrf.mxu1  ;;  %v3996_v6 = vpop.eup %3995  ;;  %v2095_v38 = vadd.f32 1.0, %v3994_v33  ;;  %v1690_v24 = vadd.f32 %v1689_v60, %v5454_v26  ;;  %4017 = vtanh.f32 %v1857_v8  ;;  %v3688_v42 = vmul.f32 -1.442695, %v1879_v29 }
 0x1fb   : > { %v3998_v63 = vpop.eup %3997  ;;  %2264 = vadd.xlane.f32.xlu1 %v2225_v25  ;;  %v5567_v1 = vpop.f32.mrf.mxu0  ;;  %v1678_v60 = vadd.f32 %v5540_v39, %v5460_v56 }
 0x1fc   : > { %v5569_v43 = vpop.f32.mrf.mxu1  ;;  %v4000_v7 = vpop.eup %3999  ;;  %4019 = vrcp.f32 %v2095_v38  ;;  %v1883_v61 = vadd.f32 %v1882_v23, %v1690_v24  ;;  %v2187_v32 = vmul.f32 %v3998_v63, %v3996_v6 }
 0x1fd   : > { %v4002_v41 = vpop.eup %4001  ;;  %4021 = vpow2.f32 %v3688_v42  ;;  %v1695_v35 = vpop.f32.mrf.mxu0 }
 0x1fe   : > { %v1888_v58 = vpop.f32.mrf.mxu1  ;;  %v4004_v45 = vpop.eup %4003  ;;  %4023 = vtanh.f32 %v1861_v53  ;;  %v3689_v44 = vmul.f32 -1.442695, %v1883_v61  ;;  %v1696_v8 = vadd.f32 %v1695_v35, %v5454_v26  ;;  %v2226_v25 = vmul.f32 %v5491_v40, %v2187_v32 }
 0x1ff   : > { %v4006_v33 = vpop.eup %4005  ;;  %v2096_v29 = vadd.f32 1.0, %v4004_v45  ;;  %v5576_v23 = vpop.f32.mrf.mxu0  ;;  %v2188_v38 = vmul.f32 %v4002_v41, %v4000_v7  ;;  %v1871_v35 = vadd.f32 %v5542_v27, %v1678_v60  ;;  %v1684_v7 = vadd.f32 %v5549_v28, %v5460_v56 }
 0x200   : > { %v5578_v6 = vpop.f32.mrf.mxu1  ;;  %4025 = vpow2.f32 %v3689_v44  ;;  %v1889_v24 = vadd.f32 %v1888_v58, %v1696_v8  ;;  %2266 = vadd.xlane.f32.xlu0 %v2226_v25  ;;  %v1688_v27 = vadd.f32 %v5558_v62, %v5460_v56 }
 0x201   : > { %v4008_v53 = vpop.eup %4007  ;;  %4027 = vrcp.f32 %v2096_v29  ;;  %v1699_v36 = vpop.f32.mrf.mxu0  ;;  %v2227_v63 = vmul.f32 %v5491_v40, %v2188_v38 }
 0x202   : > { %v1892_v57 = vpop.f32.mrf.mxu1  ;;  %v4010_v42 = vpop.eup %4009  ;;  %4029 = vtanh.f32 %v1867_v22  ;;  %v3690_v61 = vmul.f32 -1.442695, %v1889_v24  ;;  %v1700_v39 = vadd.f32 %v1699_v36, %v5454_v26  ;;  %v2189_v45 = vmul.f32 %v4008_v53, %v4006_v33 }
 0x203   : > { %v2097_v32 = vadd.f32 1.0, %v4010_v42  ;;  %2268 = vadd.xlane.f32.xlu1 %v2227_v63  ;;  %v5585_v41 = vpop.f32.mrf.mxu0  ;;  %v4012_v44 = vpop.eup %4011  ;;  %v1877_v33 = vadd.f32 %v5551_v21, %v1684_v7 }
 0x204   : > { %v5587_v58 = vpop.f32.mrf.mxu1  ;;  %4031 = vpow2.f32 %v3690_v61  ;;  %v1893_v8 = vadd.f32 %v1892_v57, %v1700_v39  ;;  %v2228_v38 = vmul.f32 %v5491_v40, %v2189_v45 }
 0x205   : > { %v4014_v29 = vpop.eup %4013  ;;  %4033 = vrcp.f32 %v2097_v32  ;;  %v1705_v22 = vpop.f32.mrf.mxu0 }
 0x206   : > { %v1898_v25 = vpop.f32.mrf.mxu1  ;;  %v4016_v24 = vpop.eup %4015  ;;  %v3691_v28 = vmul.f32 -1.442695, %v1893_v8  ;;  %v1706_v60 = vadd.f32 %v1705_v22, %v5454_v26  ;;  %4035 = vtanh.f32 %v1871_v35  ;;  %2270 = vadd.xlane.f32.xlu0 %v2228_v38  ;;  %v2190_v63 = vmul.f32 %v4014_v29, %v4012_v44 }
 0x207   : > { %v2098_v36 = vadd.f32 1.0, %v4016_v24  ;;  %v5594_v53 = vpop.f32.mrf.mxu0  ;;  %v4018_v42 = vpop.eup %4017  ;;  %v1881_v35 = vadd.f32 %v5560_v0, %v1688_v27  ;;  %v1694_v44 = vadd.f32 %v5567_v1, %v5460_v56 }
 0x208   : > { %v5596_v57 = vpop.f32.mrf.mxu1  ;;  %4037 = vpow2.f32 %v3691_v28  ;;  %v1899_v61 = vadd.f32 %v1898_v25, %v1706_v60  ;;  %v2229_v45 = vmul.f32 %v5491_v40, %v2190_v63 }
 0x209   : > { %v4020_v39 = vpop.eup %4019  ;;  %4039 = vrcp.f32 %v2098_v36  ;;  %v1709_v32 = vpop.f32.mrf.mxu0  ;;  %v1887_v1 = vadd.f32 %v5569_v43, %v1694_v44 }
 0x20a   : > { %v1902_v62 = vpop.f32.mrf.mxu1  ;;  %v4022_v8 = vpop.eup %4021  ;;  %v3692_v22 = vmul.f32 -1.442695, %v1899_v61  ;;  %v1710_v21 = vadd.f32 %v1709_v32, %v5454_v26  ;;  %4041 = vtanh.f32 %v1877_v33  ;;  %2272 = vadd.xlane.f32.xlu1 %v2229_v45  ;;  %v2191_v24 = vmul.f32 %v4020_v39, %v4018_v42 }
 0x20b   : > { %v4024_v7 = vpop.eup %4023  ;;  %v2099_v38 = vadd.f32 1.0, %v4022_v8  ;;  %v5603_v29 = vpop.f32.mrf.mxu0  ;;  %v1698_v45 = vadd.f32 %v5576_v23, %v5460_v56  ;;  %v1704_v23 = vadd.f32 %v5585_v41, %v5460_v56 }
 0x20c   : > { %v5605_v25 = vpop.f32.mrf.mxu1  ;;  %4043 = vpow2.f32 %v3692_v22  ;;  %v1903_v28 = vadd.f32 %v1902_v62, %v1710_v21  ;;  %v2230_v36 = vmul.f32 %v5491_v40, %v2191_v24 }
 0x20d   : > { %v4026_v60 = vpop.eup %4025  ;;  %4045 = vrcp.f32 %v2099_v38  ;;  %v1715_v0 = vpop.f32.mrf.mxu0 }
 0x20e   : > { %v1908_v27 = vpop.f32.mrf.mxu1  ;;  %v4028_v63 = vpop.eup %4027  ;;  %4047 = vtanh.f32 %v1881_v35  ;;  %v2100_v33 = vadd.f32 1.0, %v4026_v60  ;;  %v3693_v61 = vmul.f32 -1.442695, %v1903_v28  ;;  %v1716_v42 = vadd.f32 %v1715_v0, %v5454_v26  ;;  %2274 = vadd.xlane.f32.xlu0 %v2230_v36 }
 0x20f   : > { %v4030_v32 = vpop.eup %4029  ;;  %v5612_v39 = vpop.f32.mrf.mxu0  ;;  %v2192_v8 = vmul.f32 %v4028_v63, %v4024_v7  ;;  %v1891_v60 = vadd.f32 %v5578_v6, %v1698_v45  ;;  %v1897_v6 = vadd.f32 %v5587_v58, %v1704_v23 }
 0x210   : > { %v5614_v62 = vpop.f32.mrf.mxu1  ;;  %4049 = vrcp.f32 %v2100_v33  ;;  %v1909_v35 = vadd.f32 %v1908_v27, %v1716_v42 }
 0x211   : > { %v4032_v22 = vpop.eup %4031  ;;  %4051 = vpow2.f32 %v3693_v61  ;;  %v1719_v21 = vpop.f32.mrf.mxu0  ;;  %v2231_v24 = vmul.f32 %v5491_v40, %v2192_v8 }
 0x212   : > { %v1912_v38 = vpop.f32.mrf.mxu1  ;;  %v4034_v43 = vpop.eup %4033  ;;  %v2101_v44 = vadd.f32 1.0, %v4032_v22  ;;  %v1720_v28 = vadd.f32 %v1719_v21, %v5454_v26  ;;  %4053 = vtanh.f32 %v1887_v1  ;;  %v3694_v0 = vmul.f32 -1.442695, %v1909_v35 }
 0x213   : > { %2276 = vadd.xlane.f32.xlu1 %v2231_v24  ;;  %v5621_v7 = vpop.f32.mrf.mxu0  ;;  %v2193_v27 = vmul.f32 %v4034_v43, %v4030_v32  ;;  %v4036_v63 = vpop.eup %4035  ;;  %v1708_v35 = vadd.f32 %v5594_v53, %v5460_v56 }
 0x214   : > { %v5623_v36 = vpop.f32.mrf.mxu1  ;;  %4055 = vrcp.f32 %v2101_v44  ;;  %v1913_v33 = vadd.f32 %v1912_v38, %v1720_v28 }
 0x215   : > { %v4038_v61 = vpop.eup %4037  ;;  %4057 = vpow2.f32 %v3694_v0  ;;  %v1725_v42 = vpop.f32.mrf.mxu0  ;;  %v2232_v41 = vmul.f32 %v5491_v40, %v2193_v27 }
 0x216   : > { %v1918_v8 = vpop.f32.mrf.mxu1  ;;  %v4040_v22 = vpop.eup %4039  ;;  %v2102_v1 = vadd.f32 1.0, %v4038_v61  ;;  %v3695_v45 = vmul.f32 -1.442695, %v1913_v33  ;;  %4059 = vtanh.f32 %v1891_v60  ;;  %v1726_v32 = vadd.f32 %v1725_v42, %v5454_v26 }
 0x217   : > { %2278 = vadd.xlane.f32.xlu0 %v2232_v41  ;;  %v5630_v21 = vpop.f32.mrf.mxu0  ;;  %v2194_v24 = vmul.f32 %v4040_v22, %v4036_v63  ;;  %v4042_v43 = vpop.eup %4041  ;;  %v1901_v61 = vadd.f32 %v5596_v57, %v1708_v35  ;;  %v1714_v63 = vadd.f32 %v5603_v29, %v5460_v56  ;;  %v1718_v57 = vadd.f32 %v5612_v39, %v5460_v56 }
 0x218   : > { %v5632_v38 = vpop.f32.mrf.mxu1  ;;  %4061 = vrcp.f32 %v2102_v1  ;;  %v1919_v28 = vadd.f32 %v1918_v8, %v1726_v32 }
 0x219   : > { %v4044_v44 = vpop.eup %4043  ;;  %4063 = vpow2.f32 %v3695_v45  ;;  %v1729_v0 = vpop.f32.mrf.mxu0  ;;  %v2233_v23 = vmul.f32 %v5491_v40, %v2194_v24 }
 0x21a   : > { %v1922_v58 = vpop.f32.mrf.mxu1  ;;  %v4046_v60 = vpop.eup %4045  ;;  %4065 = vtanh.f32 %v1897_v6  ;;  %v2103_v53 = vadd.f32 1.0, %v4044_v44  ;;  %v1730_v27 = vadd.f32 %v1729_v0, %v5454_v26  ;;  %v3696_v42 = vmul.f32 -1.442695, %v1919_v28 }
 0x21b   : > { %v4048_v33 = vpop.eup %4047  ;;  %2280 = vadd.xlane.f32.xlu1 %v2233_v23  ;;  %v5639_v41 = vpop.f32.mrf.mxu0  ;;  %v2195_v22 = vmul.f32 %v4046_v60, %v4042_v43  ;;  %v1907_v0 = vadd.f32 %v5605_v25, %v1714_v63 }
 0x21c   : > { %v5641_v8 = vpop.f32.mrf.mxu1  ;;  %4067 = vrcp.f32 %v2103_v53  ;;  %v1923_v1 = vadd.f32 %v1922_v58, %v1730_v27 }
 0x21d   : > { %v4050_v45 = vpop.eup %4049  ;;  %4069 = vpow2.f32 %v3696_v42  ;;  %v1735_v6 = vpop.f32.mrf.mxu0  ;;  %v2234_v24 = vmul.f32 %v5491_v40, %v2195_v22 }
 0x21e   : > { %v1928_v32 = vpop.f32.mrf.mxu1  ;;  %v4052_v44 = vpop.eup %4051  ;;  %v3697_v29 = vmul.f32 -1.442695, %v1923_v1  ;;  %v1736_v35 = vadd.f32 %v1735_v6, %v5454_v26  ;;  %4071 = vtanh.f32 %v1901_v61  ;;  %v2196_v23 = vmul.f32 %v4050_v45, %v4048_v33 }
 0x21f   : > { %v2104_v28 = vadd.f32 1.0, %v4052_v44  ;;  %2282 = vadd.xlane.f32.xlu0 %v2234_v24  ;;  %v5648_v43 = vpop.f32.mrf.mxu0  ;;  %v4054_v60 = vpop.eup %4053  ;;  %v1911_v61 = vadd.f32 %v5614_v62, %v1718_v57  ;;  %v1724_v33 = vadd.f32 %v5621_v7, %v5460_v56 }
 0x220   : > { %v5650_v58 = vpop.f32.mrf.mxu1  ;;  %4073 = vpow2.f32 %v3697_v29  ;;  %v1929_v53 = vadd.f32 %v1928_v32, %v1736_v35  ;;  %v2235_v22 = vmul.f32 %v5491_v40, %v2196_v23 }
 0x221   : > { %v4056_v27 = vpop.eup %4055  ;;  %4075 = vrcp.f32 %v2104_v28  ;;  %v1739_v42 = vpop.f32.mrf.mxu0 }
 0x222   : > { %v1932_v39 = vpop.f32.mrf.mxu1  ;;  %v4058_v1 = vpop.eup %4057  ;;  %v3698_v6 = vmul.f32 -1.442695, %v1929_v53  ;;  %v1740_v25 = vadd.f32 %v1739_v42, %v5454_v26  ;;  %4077 = vtanh.f32 %v1907_v0  ;;  %2284 = vadd.xlane.f32.xlu1 %v2235_v22  ;;  %v2197_v24 = vmul.f32 %v4056_v27, %v4054_v60 }
 0x223   : > { %v2105_v63 = vadd.f32 1.0, %v4058_v1  ;;  %v5657_v45 = vpop.f32.mrf.mxu0  ;;  %v4060_v44 = vpop.eup %4059  ;;  %v1917_v22 = vadd.f32 %v5623_v36, %v1724_v33  ;;  %v1728_v60 = vadd.f32 %v5630_v21, %v5460_v56  ;;  %v1734_v36 = vadd.f32 %v5639_v41, %v5460_v56 }
 0x224   : > { %v5659_v32 = vpop.f32.mrf.mxu1  ;;  %4079 = vpow2.f32 %v3698_v6  ;;  %v1933_v29 = vadd.f32 %v1932_v39, %v1740_v25  ;;  %v2236_v28 = vmul.f32 %v5491_v40, %v2197_v24 }
 0x225   : > { %v4062_v35 = vpop.eup %4061  ;;  %4081 = vrcp.f32 %v2105_v63  ;;  %v1745_v62 = vpop.f32.mrf.mxu0 }
 0x226   : > { %v1938_v57 = vpop.f32.mrf.mxu1  ;;  %v4064_v0 = vpop.eup %4063  ;;  %4083 = vtanh.f32 %v1911_v61  ;;  %v3699_v23 = vmul.f32 -1.442695, %v1933_v29  ;;  %v1746_v7 = vadd.f32 %v1745_v62, %v5454_v26  ;;  %2286 = vadd.xlane.f32.xlu0 %v2236_v28  ;;  %v2198_v1 = vmul.f32 %v4062_v35, %v4060_v44 }
 0x227   : > { %v4066_v53 = vpop.eup %4065  ;;  %v2106_v42 = vadd.f32 1.0, %v4064_v0  ;;  %v5666_v27 = vpop.f32.mrf.mxu0  ;;  %v1921_v28 = vadd.f32 %v5632_v38, %v1728_v60  ;;  %v1738_v60 = vadd.f32 %v5648_v43, %v5460_v56 }
 0x228   : > { %v5668_v39 = vpop.f32.mrf.mxu1  ;;  %4085 = vpow2.f32 %v3699_v23  ;;  %v1939_v6 = vadd.f32 %v1938_v57, %v1746_v7  ;;  %v2237_v24 = vmul.f32 %v5491_v40, %v2198_v1 }
 0x229   : > { %v4068_v25 = vpop.eup %4067  ;;  %4087 = vrcp.f32 %v2106_v42  ;;  %v1749_v61 = vpop.f32.mrf.mxu0 }
 0x22a   : > { %v1942_v63 = vpop.f32.mrf.mxu1  ;;  %v4070_v29 = vpop.eup %4069  ;;  %v3700_v33 = vmul.f32 -1.442695, %v1939_v6  ;;  %v1750_v21 = vadd.f32 %v1749_v61, %v5454_v26  ;;  %4089 = vtanh.f32 %v1917_v22  ;;  %2288 = vadd.xlane.f32.xlu1 %v2237_v24  ;;  %v2199_v57 = vmul.f32 %v4068_v25, %v4066_v53 }
 0x22b   : > { %v2107_v62 = vadd.f32 1.0, %v4070_v29  ;;  %v5675_v44 = vpop.f32.mrf.mxu0  ;;  %v4072_v0 = vpop.eup %4071  ;;  %v1927_v61 = vadd.f32 %v5641_v8, %v1734_v36 }
 0x22c   : > { %v5677_v35 = vpop.f32.mrf.mxu1  ;;  %4091 = vpow2.f32 %v3700_v33  ;;  %v1943_v23 = vadd.f32 %v1942_v63, %v1750_v21  ;;  %v2238_v1 = vmul.f32 %v5491_v40, %v2199_v57 }
 0x22d   : > { %v4074_v7 = vpop.eup %4073  ;;  %4093 = vrcp.f32 %v2107_v62  ;;  %v1755_v42 = vpop.f32.mrf.mxu0 }
 0x22e   : > { %v1948_v41 = vpop.f32.mrf.mxu1  ;;  %v4076_v6 = vpop.eup %4075  ;;  %v2108_v22 = vadd.f32 1.0, %v4074_v7  ;;  %v3701_v38 = vmul.f32 -1.442695, %v1943_v23  ;;  %4095 = vtanh.f32 %v1921_v28  ;;  %v1756_v53 = vadd.f32 %v1755_v42, %v5454_v26  ;;  %2290 = vadd.xlane.f32.xlu0 %v2238_v1 }
 0x22f   : > { %v1757_v25 = vpop.f32.mrf.mxu0  ;;  %v2200_v24 = vmul.f32 %v4076_v6, %v4072_v0  ;;  %v4078_v29 = vpop.eup %4077  ;;  %v1931_v23 = vadd.f32 %v5650_v58, %v1738_v60  ;;  %v1744_v7 = vadd.f32 %v5657_v45, %v5460_v56  ;;  %v1748_v45 = vadd.f32 %v5666_v27, %v5460_v56 }
 0x230   : > { %v5684_v63 = vpop.f32.mrf.mxu1  ;;  %4097 = vrcp.f32 %v2108_v22  ;;  %v1949_v21 = vadd.f32 %v1948_v41, %v1756_v53 }
 0x231   : > { %v4080_v33 = vpop.eup %4079  ;;  %4099 = vpow2.f32 %v3701_v38  ;;  %v1759_v62 = vpop.f32.mrf.mxu0  ;;  %v2239_v8 = vmul.f32 %v5491_v40, %v2200_v24 }
 0x232   : > { %v4082_v36 = vpop.eup %4081  ;;  %4101 = vtanh.f32 %v1927_v61  ;;  %v2109_v28 = vadd.f32 1.0, %v4080_v33  ;;  %v1760_v43 = vadd.f32 %v1759_v62, %v5454_v26  ;;  %v3702_v0 = vmul.f32 -1.442695, %v1949_v21  ;;  %v1952_v42 = vpop.f32.mrf.mxu1 }
 0x233   : > { %v4084_v57 = vpop.eup %4083  ;;  %2292 = vadd.xlane.f32.xlu1 %v2239_v8  ;;  %v2201_v1 = vmul.f32 %v4082_v36, %v4078_v29  ;;  %v1937_v26 = vadd.f32 %v5659_v32, %v1744_v7  ;;  %v1941_v32 = vadd.f32 %v5668_v39, %v1748_v45  ;;  %v1754_v36 = vadd.f32 %v5675_v44, %v5460_v56 }
 0x234   : > { %4103 = vrcp.f32 %v2109_v28  ;;  %v1953_v41 = vadd.f32 %v1952_v42, %v1760_v43  ;;  %v1758_v42 = vadd.f32 %v1757_v25, %v5460_v56 }
 0x235   : > { %v4086_v6 = vpop.eup %4085  ;;  %4105 = vpow2.f32 %v3702_v0  ;;  %v2240_v22 = vmul.f32 %v5491_v40, %v2201_v1  ;;  %v1947_v0 = vadd.f32 %v5677_v35, %v1754_v36 }
 0x236   : > { %v4088_v61 = vpop.eup %4087  ;;  %v2110_v38 = vadd.f32 1.0, %v4086_v6  ;;  %v3703_v53 = vmul.f32 -1.442695, %v1953_v41  ;;  %4107 = vtanh.f32 %v1931_v23 }
 0x237   : > { %2294 = vadd.xlane.f32.xlu0 %v2240_v22  ;;  %v2202_v58 = vmul.f32 %v4088_v61, %v4084_v57  ;;  %v4090_v60 = vpop.eup %4089  ;;  %v1951_v61 = vadd.f32 %v5684_v63, %v1758_v42 }
 0x238   : > { %4109 = vrcp.f32 %v2110_v38 }
 0x239   : > { %v4092_v24 = vpop.eup %4091  ;;  %4111 = vpow2.f32 %v3703_v53  ;;  %v2241_v29 = vmul.f32 %v5491_v40, %v2202_v58 }
 0x23a   : > { %v4094_v33 = vpop.eup %4093  ;;  %v2111_v21 = vadd.f32 1.0, %v4092_v24  ;;  %4113 = vtanh.f32 %v1937_v26 }
 0x23b   : > { %2296 = vadd.xlane.f32.xlu1 %v2241_v29  ;;  %v2203_v62 = vmul.f32 %v4094_v33, %v4090_v60  ;;  %v4096_v8 = vpop.eup %4095 }
 0x23c   : > { %4115 = vrcp.f32 %v2111_v21 }
 0x23d   : > { %v4098_v28 = vpop.eup %4097  ;;  %v2242_v43 = vmul.f32 %v5491_v40, %v2203_v62  ;;  %4117 = vtanh.f32 %v1941_v32 }
 0x23e   : > { %v4100_v27 = vpop.eup %4099  ;;  %v2204_v57 = vmul.f32 %v4098_v28, %v4096_v8 }
 0x23f   : > { %v4102_v23 = vpop.eup %4101  ;;  %v2112_v7 = vadd.f32 1.0, %v4100_v27  ;;  %2298 = vadd.xlane.f32.xlu0 %v2242_v43 }
 0x240   : > { %v2243_v1 = vmul.f32 %v5491_v40, %v2204_v57 }
 0x241   : > { %v4104_v41 = vpop.eup %4103  ;;  %4119 = vrcp.f32 %v2112_v7 }
 0x242   : > { %v4106_v39 = vpop.eup %4105  ;;  %2300 = vadd.xlane.f32.xlu1 %v2243_v1  ;;  %v2205_v44 = vmul.f32 %v4104_v41, %v4102_v23  ;;  %4121 = vtanh.f32 %v1947_v0 }
 0x243   : > { %v2113_v6 = vadd.f32 1.0, %v4106_v39  ;;  %v4108_v22 = vpop.eup %4107 }
 0x244   : > { %v2244_v38 = vmul.f32 %v5491_v40, %v2205_v44 }
 0x245   : > { %v4110_v53 = vpop.eup %4109  ;;  %4123 = vrcp.f32 %v2113_v6 }
 0x246   : > { %v4112_v26 = vpop.eup %4111  ;;  %2302 = vadd.xlane.f32.xlu0 %v2244_v38  ;;  %v2206_v35 = vmul.f32 %v4110_v53, %v4108_v22  ;;  %4125 = vtanh.f32 %v1951_v61  ;;  %v5731_v22 = vstv %s3706_s13  ;;  %v2356_v61 = vadd.s32 8, %v4655_v31 }
 0x247   : > { %v2114_v56 = vadd.f32 1.0, %v4112_v26  ;;  %v4114_v25 = vpop.eup %4113  ;;  %v2357_v38 = vadd.s32 16, %v4655_v31  ;;  %v2358_v53 = vadd.s32 24, %v4655_v31  ;;  %v5857_v12 = vadd.s32 %v5731_v22, %v2375_v3 }
 0x248   : > { %v2245_v58 = vmul.f32 %v5491_v40, %v2206_v35  ;;  %v5860_v16 = vadd.s32 %v5731_v22, %v2376_v10  ;;  %v2383_v3 = vadd.s32 224, %v4655_v31  ;;  %v5916_v54 = vadd.s32 %v5731_v22, %v2382_v9 }
 0x249   : > { %v4116_v60 = vpop.eup %4115  ;;  %4127 = vrcp.f32 %v2114_v56  ;;  %v2359_v56 = vadd.s32 32, %v4655_v31  ;;  %v2386_v9 = vadd.s32 248, %v4655_v31 }
 0x24a   : > { %2304 = vadd.xlane.f32.xlu1 %v2245_v58  ;;  %v2207_v45 = vmul.f32 %v4116_v60, %v4114_v25  ;;  %v4118_v29 = vpop.eup %4117  ;;  %v2360_v25 = vadd.s32 40, %v4655_v31  ;;  %v2361_v58 = vadd.s32 48, %v4655_v31  ;;  %v2362_v60 = vadd.s32 56, %v4655_v31 }
 0x24c   : > { %v2246_v24 = vmul.f32 %v5491_v40, %v2207_v45  ;;  %v5746_v45 = vadd.s32 %v5731_v22, %v4655_v31 }
 0x24e   : > { %v4120_v63 = vpop.eup %4119  ;;  %2306 = vadd.xlane.f32.xlu0 %v2246_v24  ;;  %v2363_v24 = vadd.s32 64, %v4655_v31 }
 0x24f   : > { %v2208_v33 = vmul.f32 %v4120_v63, %v4118_v29  ;;  %v4122_v21 = vpop.eup %4121  ;;  %v5749_v29 = vstv %s2420_s12  ;;  %v5752_v63 = vadd.s32 %v5731_v22, %v2356_v61  ;;  %v2366_v61 = vadd.s32 88, %v4655_v31 }
 0x250   : > { %vm2422_vm3 = vcmp.lt.s32.totalorder %v5746_v45, %v5749_v29 }
 0x251   : > { %v2247_v62 = vmul.f32 %v5491_v40, %v2208_v33  ;;  %v5755_v33 = vadd.s32 %v5731_v22, %v2357_v38  ;;  %v2367_v38 = vadd.s32 96, %v4655_v31  ;;  %vm2423_vm4 = vcmp.lt.s32.totalorder %v5752_v63, %v5749_v29 }
 0x252   : > { %v4124_v8 = vpop.eup %4123 }
 0x253   : > { %2308 = vadd.xlane.f32.xlu1 %v2247_v62  ;;  %v2209_v32 = vmul.f32 %v4124_v8, %v4122_v21  ;;  %v4126_v36 = vpop.eup %4125  ;;  %v5758_v21 = vadd.s32 %v5731_v22, %v2358_v53  ;;  %v5781_v53 = vadd.s32 %v5731_v22, %v2363_v24  ;;  %v2372_v24 = vadd.s32 136, %v4655_v31 }
 0x254   : > { %vm2424_vm5 = vcmp.lt.s32.totalorder %v5755_v33, %v5749_v29  ;;  %v5823_v5 = vadd.s32 %v5731_v22, %v2367_v38  ;;  %v5841_v38 = vadd.s32 %v5731_v22, %v2371_v18  ;;  %v5863_v18 = vadd.s32 %v5731_v22, %v2377_v2 }
 0x255   : > { %v2248_v28 = vmul.f32 %v5491_v40, %v2209_v32  ;;  %v5765_v32 = vadd.s32 %v5731_v22, %v2359_v56  ;;  %v2368_v56 = vadd.s32 104, %v4655_v31  ;;  %vm2425_vm6 = vcmp.lt.s32.totalorder %v5758_v21, %v5749_v29 }
 0x256   : > { %v4128_v43 = vpop.eup %4127  ;;  %vm2430_vm11 = vcmp.lt.s32.totalorder %v5781_v53, %v5749_v29  ;;  %v5846_v13 = vadd.s32 %v5731_v22, %v2372_v24  ;;  %v2380_v24 = vadd.s32 200, %v4655_v31  ;;  %vm2434_vm0 = vcmp.lt.s32.totalorder %v5823_v5, %v5749_v29 }
 0x257   : > { %2310 = vadd.xlane.f32.xlu0 %v2248_v28  ;;  %v2210_v27 = vmul.f32 %v4128_v43, %v4126_v36  ;;  %v5768_v36 = vadd.s32 %v5731_v22, %v2360_v25  ;;  %v5771_v28 = vadd.s32 %v5731_v22, %v2361_v58  ;;  %v2364_v43 = vadd.s32 72, %v4655_v31 }
 0x258   : > { %v2369_v25 = vadd.s32 112, %v4655_v31  ;;  %v2370_v58 = vadd.s32 120, %v4655_v31  ;;  %vm2426_vm7 = vcmp.lt.s32.totalorder %v5765_v32, %v5749_v29  ;;  %v5829_v4 = vadd.s32 %v5731_v22, %v2368_v56 }
 0x259   : > { %v2249_v57 = vmul.f32 %v5491_v40, %v2210_v27  ;;  %v5775_v27 = vadd.s32 %v5731_v22, %v2362_v60  ;;  %v5805_v11 = vadd.s32 %v5731_v22, %v2364_v43  ;;  %vm2427_vm8 = vcmp.lt.s32.totalorder %v5768_v36, %v5749_v29 }
 0x25a   : > { %vm2428_vm9 = vcmp.lt.s32.totalorder %v5771_v28, %v5749_v29  ;;  %v5820_v43 = vadd.s32 %v5731_v22, %v2366_v61  ;;  %v5832_v20 = vadd.s32 %v5731_v22, %v2369_v25  ;;  %v2379_v61 = vadd.s32 192, %v4655_v31 }
 0x25b   : > { %2312 = vadd.xlane.f32.xlu1 %v2249_v57  ;;  %v2365_v57 = vadd.s32 80, %v4655_v31  ;;  %vm2429_vm10 = vcmp.lt.s32.totalorder %v5775_v27, %v5749_v29  ;;  %v5851_v25 = vadd.s32 %v5731_v22, %v2373_v30  ;;  %vm2431_vm13 = vcmp.lt.s32.totalorder %v5805_v11, %v5749_v29 }
 0x25c   : > { %v5869_v30 = vadd.s32 %v5731_v22, %v2378_v52  ;;  %vm2433_vm15 = vcmp.lt.s32.totalorder %v5820_v43, %v5749_v29  ;;  %v5885_v52 = vadd.s32 %v5731_v22, %v2379_v61  ;;  %vm2435_vm1 = vcmp.lt.s32.totalorder %v5829_v4, %v5749_v29 }
 0x25d   : > { %v5817_v59 = vadd.s32 %v5731_v22, %v2365_v57  ;;  %v5835_v57 = vadd.s32 %v5731_v22, %v2370_v58  ;;  %v5854_v58 = vadd.s32 %v5731_v22, %v2374_v17  ;;  %v2381_v17 = vadd.s32 208, %v4655_v31 }
 0x25e   : > { %v2385_v61 = vadd.s32 240, %v4655_v31  ;;  %vm2436_vm2 = vcmp.lt.s32.totalorder %v5832_v20, %v5749_v29 }
 0x25f   : > { %vm2432_vm14 = vcmp.lt.s32.totalorder %v5817_v59, %v5749_v29  ;;  %v5913_v49 = vadd.s32 %v5731_v22, %v2381_v17 }
 0x260   : > { %v5963_v21 = vadd.s32 %v5731_v22, %v2385_v61 }
 0x267   : > { %v5710_v23 = vpop.xlane.xlu0 %2250 }
 0x268   : > { %v2321_v10 = vadd.f32 %v5838_v14, %v5710_v23 }
 0x26b   : > { %v5714_v0 = vpop.xlane.xlu0 %2252 }
 0x26c   : > { %v2322_v2 = vadd.f32 %v5838_v14, %v5714_v0 }
 0x26f   : > { %v5712_v7 = vpop.xlane.xlu1 %2254 }
 0x270   : > { %v2323_v23 = vadd.f32 %v5838_v14, %v5712_v7 }
 0x273   : > { %v5716_v42 = vpop.xlane.xlu1 %2256 }
 0x274   : > { %v2324_v0 = vadd.f32 %v5838_v14, %v5716_v42 }
 0x276   : > { %v5945_v45 = vsel %vm2425_vm6, %v2324_v0, -1e+30  ;;  %vm2440_vm6 = vcmp.lt.s32.totalorder %v5851_v25, %v5749_v29 }
 0x278   : > { %v5718_v1 = vpop.xlane.xlu0 %2258 }
 0x279   : > { %v2325_v47 = vadd.f32 %v5838_v14, %v5718_v1  ;;  %v5908_v1 = vadd.s32 %v5731_v22, %v2380_v24  ;;  %v5940_v24 = vsel %vm2424_vm5, %v2323_v23, -1e+30  ;;  %vm2439_vm5 = vcmp.lt.s32.totalorder %v5846_v13, %v5749_v29 }
 0x27b   : > { %v5950_v63 = vsel %vm2426_vm7, %v2325_v47, -1e+30  ;;  %vm2441_vm7 = vcmp.lt.s32.totalorder %v5854_v58, %v5749_v29 }
 0x27c   : > { %v5720_v41 = vpop.xlane.xlu1 %2260  ;;  %v2492_v53 = vsel %vm2487_vm12, %v5950_v63, -inf }
 0x27d   : > { %v2326_v50 = vadd.f32 %v5838_v14, %v5720_v41  ;;  %v5919_v41 = vadd.s32 %v5731_v22, %v2383_v3 }
 0x27f   : > { %v5968_v47 = vsel %vm2427_vm8, %v2326_v50, -1e+30  ;;  %vm2442_vm8 = vcmp.lt.s32.totalorder %v5857_v12, %v5749_v29 }
 0x280   : > { %v5722_v39 = vpop.xlane.xlu0 %2262 }
 0x281   : > { %v2327_v7 = vadd.f32 %v5838_v14, %v5722_v39  ;;  %v5924_v39 = vsel %vm2422_vm3, %v2321_v10, -1e+30  ;;  %vm2437_vm3 = vcmp.lt.s32.totalorder %v5835_v57, %v5749_v29 }
 0x283   : > { %v5973_v32 = vsel %vm2428_vm9, %v2327_v7, -1e+30  ;;  %vm2443_vm9 = vcmp.lt.s32.totalorder %v5860_v16, %v5749_v29 }
 0x284   : > { %v5724_v44 = vpop.xlane.xlu1 %2264 }
 0x285   : > { %v2328_v42 = vadd.f32 %v5838_v14, %v5724_v44  ;;  %v5929_v44 = vsel %vm2423_vm4, %v2322_v2, -1e+30  ;;  %vm2438_vm4 = vcmp.lt.s32.totalorder %v5841_v38, %v5749_v29  ;;  %v2494_v2 = vsel %vm2487_vm12, %v5968_v47, -inf }
 0x286   : > { %v2489_v27 = vsel %vm2487_vm12, %v5929_v44, -inf }
 0x287   : > { %v5978_v17 = vsel %vm2429_vm10, %v2328_v42, -1e+30  ;;  %vm2444_vm10 = vcmp.lt.s32.totalorder %v5863_v18, %v5749_v29 }
 0x288   : > { %v2498_v0 = vsel %vm2487_vm12, %v5978_v17, -inf }
 0x289   : > { %v5726_v6 = vpop.xlane.xlu0 %2266 }
 0x28a   : > { %v2329_v55 = vadd.f32 %v5838_v14, %v5726_v6  ;;  %v5934_v6 = vadd.s32 %v5731_v22, %v2384_v15 }
 0x28c   : > { %v5728_v40 = vpop.xlane.xlu1 %2268  ;;  %v5985_v10 = vsel %vm2430_vm11, %v2329_v55, -1e+30  ;;  %vm2445_vm11 = vcmp.lt.s32.totalorder %v5869_v30, %v5749_v29 }
 0x28d   : > { %v2330_v3 = vadd.f32 %v5838_v14, %v5728_v40  ;;  %v2488_v40 = vsel %vm2487_vm12, %v5924_v39, -inf  ;;  %v2500_v61 = vsel %vm2487_vm12, %v5985_v10, -inf }
 0x28f   : > { %v5736_v26 = vpop.xlane.xlu0 %2270  ;;  %v6023_v7 = vsel %vm2431_vm13, %v2330_v3, -1e+30  ;;  %vm2447_vm13 = vcmp.lt.s32.totalorder %v5908_v1, %v5749_v29 }
 0x290   : > { %v2331_v50 = vadd.f32 %v5838_v14, %v5736_v26  ;;  %v6002_v26 = vadd.s32 %v5731_v22, %v2386_v9  ;;  %v2496_v22 = vsel %vm2487_vm12, %v5973_v32, -inf }
 0x292   : > { %v6030_v42 = vsel %vm2432_vm14, %v2331_v50, -1e+30  ;;  %v2493_v50 = vmax.f32 %v2488_v40, %v2492_v53  ;;  %vm2446_vm14 = vcmp.lt.s32.totalorder %v5885_v52, %v5749_v29 }
 0x293   : > { %v5738_v35 = vpop.xlane.xlu1 %2272 }
 0x294   : > { %v2332_v36 = vadd.f32 %v5838_v14, %v5738_v35  ;;  %v2490_v35 = vsel %vm2487_vm12, %v5940_v24, -inf }
 0x296   : > { %v6035_v9 = vsel %vm2433_vm15, %v2332_v36, -1e+30  ;;  %v2495_v36 = vmax.f32 %v2489_v27, %v2494_v2  ;;  %vm2448_vm15 = vcmp.lt.s32.totalorder %v5913_v49, %v5749_v29 }
 0x297   : > { %v5760_v62 = vpop.xlane.xlu0 %2274  ;;  %v2506_v40 = vsel %vm2487_vm12, %v6035_v9, -inf }
 0x298   : > { %v2333_v28 = vadd.f32 %v5838_v14, %v5760_v62  ;;  %v2491_v62 = vsel %vm2487_vm12, %v5945_v45, -inf }
 0x29a   : > { %v6040_v31 = vsel %vm2434_vm0, %v2333_v28, -1e+30  ;;  %v2499_v28 = vmax.f32 %v2491_v62, %v2498_v0  ;;  %vm2449_vm0 = vcmp.lt.s32.totalorder %v5916_v54, %v5749_v29 }
 0x29c   : > { %v5762_v8 = vpop.xlane.xlu1 %2276 }
 0x29d   : > { %v2334_v55 = vadd.f32 %v5838_v14, %v5762_v8 }
 0x29f   : > { %v6049_v59 = vsel %vm2435_vm1, %v2334_v55, -1e+30  ;;  %v2501_v55 = vmax.f32 %v2493_v50, %v2500_v61  ;;  %vm2451_vm1 = vcmp.lt.s32.totalorder %v5934_v6, %v5749_v29 }
 0x2a0   : > { %v5790_v60 = vpop.xlane.xlu0 %2278  ;;  %v2510_v62 = vsel %vm2487_vm12, %v6049_v59, -inf }
 0x2a1   : > { %v2335_v11 = vadd.f32 %v5838_v14, %v5790_v60  ;;  %v2497_v60 = vmax.f32 %v2490_v35, %v2496_v22  ;;  %v2508_v35 = vsel %vm2487_vm12, %v6040_v31, -inf }
 0x2a2   : > { %v2509_v13 = vmax.f32 %v2501_v55, %v2508_v35 }
 0x2a3   : > { %v6080_v53 = vsel %vm2436_vm2, %v2335_v11, -1e+30  ;;  %v2507_v11 = vmax.f32 %v2499_v28, %v2506_v40  ;;  %vm2450_vm2 = vcmp.lt.s32.totalorder %v5919_v41, %v5749_v29 }
 0x2a4   : > { %v5792_v37 = vpop.xlane.xlu1 %2280  ;;  %v2512_v38 = vsel %vm2487_vm12, %v6080_v53, -inf }
 0x2a5   : > { %v2336_v43 = vadd.f32 %v5838_v14, %v5792_v37 }
 0x2a8   : > { %v5843_v19 = vpop.xlane.xlu0 %2282 }
 0x2a9   : > { %v2337_v3 = vadd.f32 %v5838_v14, %v5843_v19  ;;  %v2502_v19 = vsel %vm2487_vm12, %v6023_v7, -inf }
 0x2aa   : > { %v2503_v0 = vmax.f32 %v2495_v36, %v2502_v19 }
 0x2ab   : > { %v5848_v56 = vpop.xlane.xlu1 %2284  ;;  %v6096_v20 = vsel %vm2438_vm4, %v2337_v3, -1e+30  ;;  %vm2453_vm4 = vcmp.lt.s32.totalorder %v6002_v26, %v5749_v29 }
 0x2ac   : > { %v2338_v5 = vadd.f32 %v5838_v14, %v5848_v56  ;;  %v2504_v56 = vsel %vm2487_vm12, %v6030_v42, -inf  ;;  %v2511_v3 = vmax.f32 %v2503_v0, %v2510_v62  ;;  %v2516_v36 = vsel %vm2487_vm12, %v6096_v20, -inf }
 0x2ad   : > { %v2505_v61 = vmax.f32 %v2497_v60, %v2504_v56 }
 0x2ae   : > { %v6101_v2 = vsel %vm2439_vm5, %v2338_v5, -1e+30  ;;  %vm2735_vm5 = vcmask 0  }
 0x2af   : > { %v5896_v51 = vpop.xlane.xlu0 %2286  ;;  %v2518_v60 = vsel %vm2487_vm12, %v6101_v2, -inf  ;;  %v2513_v56 = vmax.f32 %v2505_v61, %v2512_v38 }
 0x2b0   : > { %v2339_v27 = vadd.f32 %v5838_v14, %v5896_v51  ;;  %v6091_v51 = vsel %vm2437_vm3, %v2336_v43, -1e+30  ;;  %vm2452_vm3 = vcmp.lt.s32.totalorder %v5963_v21, %v5749_v29  ;;  %v2519_v0 = vmax.f32 %v2511_v3, %v2518_v60 }
 0x2b1   : > { %v2514_v5 = vsel %vm2487_vm12, %v6091_v51, -inf }
 0x2b2   : > { %v2515_v62 = vmax.f32 %v2507_v11, %v2514_v5 }
 0x2b3   : > { %v5898_v46 = vpop.xlane.xlu1 %2288 }
 0x2b4   : > { %v2340_v22 = vadd.f32 %v5838_v14, %v5898_v46  ;;  %v6116_v46 = vsel %vm2440_vm6, %v2339_v27, -1e+30 }
 0x2b5   : > { %v2520_v40 = vsel %vm2487_vm12, %v6116_v46, -inf }
 0x2b6   : > { %v6129_v28 = vsel %vm2441_vm7, %v2340_v22, -1e+30  ;;  %v2517_v22 = vmax.f32 %v2509_v13, %v2516_v36 }
 0x2b7   : > { %v5958_v15 = vpop.xlane.xlu0 %2290 }
 0x2b8   : > { %v2341_v57 = vadd.f32 %v5838_v14, %v5958_v15 }
 0x2ba   : > { %v6139_v27 = vsel %vm2442_vm8, %v2341_v57, -1e+30 }
 0x2bc   : > { %v5960_v33 = vpop.xlane.xlu1 %2292 }
 0x2bd   : > { %v2342_v15 = vadd.f32 %v5838_v14, %v5960_v33 }
 0x2c0   : > { %v2295_v23 = vpop.xlane.xlu0 %2294 }
 0x2c1   : > { %v2343_v25 = vadd.f32 %v5838_v14, %v2295_v23  ;;  %v6147_v23 = vsel %vm2443_vm9, %v2342_v15, -1e+30 }
 0x2c2   : > { %v2526_v18 = vsel %vm2487_vm12, %v6147_v23, -inf }
 0x2c3   : > { %v6157_v61 = vsel %vm2444_vm10, %v2343_v25, -1e+30  ;;  %v2527_v54 = vmax.f32 %v2519_v0, %v2526_v18 }
 0x2c4   : > { %v2297_v8 = vpop.xlane.xlu1 %2296  ;;  %v2528_v5 = vsel %vm2487_vm12, %v6157_v61, -inf }
 0x2c5   : > { %v2344_v19 = vadd.f32 %v5838_v14, %v2297_v8 }
 0x2c7   : > { %v6162_v16 = vsel %vm2445_vm11, %v2344_v19, -1e+30 }
 0x2c8   : > { %v2299_v4 = vpop.xlane.xlu0 %2298  ;;  %v2530_v49 = vsel %vm2487_vm12, %v6162_v16, -inf }
 0x2c9   : > { %v2345_v55 = vadd.f32 %v5838_v14, %v2299_v4  ;;  %v2522_v4 = vsel %vm2487_vm12, %v6129_v28, -inf }
 0x2ca   : > { %v2523_v3 = vmax.f32 %v2515_v62, %v2522_v4 }
 0x2cb   : > { %v2301_v37 = vpop.xlane.xlu1 %2300  ;;  %v6177_v30 = vsel %vm2446_vm14, %v2345_v55, -1e+30 }
 0x2cc   : > { %v2346_v33 = vadd.f32 %v5838_v14, %v2301_v37  ;;  %v2532_v60 = vsel %vm2487_vm12, %v6177_v30, -inf  ;;  %v2531_v41 = vmax.f32 %v2523_v3, %v2530_v49 }
 0x2ce   : > { %v6167_v57 = vsel %vm2447_vm13, %v2346_v33, -1e+30 }
 0x2cf   : > { %v2303_v43 = vpop.xlane.xlu0 %2302  ;;  %v2534_v36 = vsel %vm2487_vm12, %v6167_v57, -inf }
 0x2d0   : > { %v2347_v8 = vadd.f32 %v5838_v14, %v2303_v43  ;;  %v2521_v43 = vmax.f32 %v2513_v56, %v2520_v40 }
 0x2d2   : > { %v6182_v1 = vsel %vm2448_vm15, %v2347_v8, -1e+30 }
 0x2d3   : > { %v2305_v50 = vpop.xlane.xlu1 %2304  ;;  %v2536_v33 = vsel %vm2487_vm12, %v6182_v1, -inf }
 0x2d4   : > { %v2348_v37 = vadd.f32 %v5838_v14, %v2305_v50  ;;  %v2524_v50 = vsel %vm2487_vm12, %v6139_v27, -inf }
 0x2d5   : > { %v2525_v19 = vmax.f32 %v2517_v22, %v2524_v50 }
 0x2d6   : > { %v6187_v38 = vsel %vm2449_vm0, %v2348_v37, -1e+30 }
 0x2d7   : > { %v2307_v58 = vpop.xlane.xlu0 %2306  ;;  %v2538_v56 = vsel %vm2487_vm12, %v6187_v38, -inf  ;;  %v2533_v37 = vmax.f32 %v2525_v19, %v2532_v60  ;;  %v2486_v60 = vld [vmem:[#allocation2] sm:$0x1] }
 0x2d8   : > { %v2349_v11 = vadd.f32 %v5838_v14, %v2307_v58  ;;  %v2529_v58 = vmax.f32 %v2521_v43, %v2528_v5  ;;  %v2539_v22 = vmax.f32 %v2531_v41, %v2538_v56 }
 0x2da   : > { %v6206_v6 = vsel %vm2450_vm2, %v2349_v11, -1e+30  ;;  %v2537_v62 = vmax.f32 %v2529_v58, %v2536_v33 }
 0x2db   : > { %v2540_v21 = vsel %vm2487_vm12, %v6206_v6, -inf }
 0x2dc   : > { %v2309_v35 = vpop.xlane.xlu1 %2308  ;;  %v2541_v43 = vmax.f32 %v2533_v37, %v2540_v21 }
 0x2dd   : > { %v2350_v12 = vadd.f32 %v5838_v14, %v2309_v35  ;;  %v2535_v35 = vmax.f32 %v2527_v54, %v2534_v36 }
 0x2df   : > { %v6192_v15 = vsel %vm2451_vm1, %v2350_v12, -1e+30 }
 0x2e0   : > { %v2311_v13 = vpop.xlane.xlu0 %2310  ;;  %v2542_v40 = vsel %vm2487_vm12, %v6192_v15, -inf }
 0x2e1   : > { %v2351_v52 = vadd.f32 %v5838_v14, %v2311_v13  ;;  %v2543_v0 = vmax.f32 %v2535_v35, %v2542_v40 }
 0x2e3   : > { %v6211_v25 = vsel %vm2452_vm3, %v2351_v52, -1e+30  ;;  %v2548_v18 = vmax.f32 %v2541_v43, %v2543_v0 }
 0x2e4   : > { %v2313_v55 = vpop.xlane.xlu1 %2312  ;;  %v2544_v12 = vsel %vm2487_vm12, %v6211_v25, -inf }
 0x2e5   : > { %v2352_v8 = vadd.f32 %v5838_v14, %v2313_v55  ;;  %v2545_v14 = vmax.f32 %v2537_v62, %v2544_v12 }
 0x2e7   : > { %v6227_v4 = vsel %vm2453_vm4, %v2352_v8, -1e+30 }
 0x2e8   : > { %v2546_v11 = vsel %vm2487_vm12, %v6227_v4, -inf }
 0x2e9   : > { %v2547_v50 = vmax.f32 %v2539_v22, %v2546_v11 }
 0x2eb   : > { %v2549_v13 = vmax.f32 %v2545_v14, %v2547_v50 }
 0x2ed   : > { %v2550_v52 = vmax.f32 %v2548_v18, %v2549_v13 }
 0x2ef   : > { %v2551_v3 = vrot.slane %v2550_v52, 4 }
 0x2f1   : > { %v2552_v5 = vmax.f32 %v2550_v52, %v2551_v3 }
 0x2f3   : > { %v2553_v49 = vrot.slane %v2552_v5, 2 }
 0x2f5   : > { %v2554_v36 = vmax.f32 %v2552_v5, %v2553_v49 }
 0x2f7   : > { %v2555_v54 = vrot.slane %v2554_v36, 1 }
 0x2f9   : > { %v2556_v19 = vmax.f32 %v2554_v36, %v2555_v54 }
 0x2fb   : > { %v2557_v29 = vmax.f32 %v2486_v60, %v2556_v19 }
 0x2fd   : > { %v2558_v26 = vsub.f32 %v2486_v60, %v2557_v29  ;;  %3219 = vst.msk [vmem:[#allocation2] sm:$0x1] %vm2735_vm5, %v2557_v29  ;;  %v6233_v56 = vrot.slane %v2557_v29, %v4662_v34 }
 0x2ff   : > { %v2559_v33 = vmul.f32 1.442695, %v2558_v26  ;;  %v2567_v40 = vsub.f32 %v5924_v39, %v6233_v56  ;;  %v2568_v55 = vsub.f32 %v5929_v44, %v6233_v56  ;;  %v2569_v58 = vsub.f32 %v5940_v24, %v6233_v56 }
 0x300   : > { %v2570_v41 = vsub.f32 %v5945_v45, %v6233_v56  ;;  %v2571_v35 = vsub.f32 %v5950_v63, %v6233_v56  ;;  %v2572_v21 = vsub.f32 %v5968_v47, %v6233_v56  ;;  %v2575_v39 = vsub.f32 %v5985_v10, %v6233_v56 }
 0x301   : > { %4129 = vpow2.f32 %v2559_v33  ;;  %v2599_v8 = vmul.f32 1.442695, %v2567_v40  ;;  %v2601_v37 = vmul.f32 1.442695, %v2568_v55  ;;  %v2603_v12 = vmul.f32 1.442695, %v2569_v58 }
 0x302   : > { %v2605_v62 = vmul.f32 1.442695, %v2570_v41  ;;  %v2573_v44 = vsub.f32 %v5973_v32, %v6233_v56  ;;  %v2607_v24 = vmul.f32 1.442695, %v2571_v35  ;;  %v2574_v45 = vsub.f32 %v5978_v17, %v6233_v56 }
 0x303   : > { %4131 = vpow2.f32 %v2599_v8  ;;  %v2609_v63 = vmul.f32 1.442695, %v2572_v21  ;;  %v2577_v47 = vsub.f32 %v6030_v42, %v6233_v56  ;;  %v2615_v22 = vmul.f32 1.442695, %v2575_v39 }
 0x304   : > { %4133 = vpow2.f32 %v2601_v37  ;;  %v2611_v10 = vmul.f32 1.442695, %v2573_v44  ;;  %v2576_v32 = vsub.f32 %v6023_v7, %v6233_v56  ;;  %v2613_v11 = vmul.f32 1.442695, %v2574_v45 }
 0x305   : > { %4135 = vpow2.f32 %v2603_v12  ;;  %v2579_v17 = vsub.f32 %v6040_v31, %v6233_v56  ;;  %v2619_v43 = vmul.f32 1.442695, %v2577_v47  ;;  %v2578_v42 = vsub.f32 %v6035_v9, %v6233_v56 }
 0x306   : > { %4137 = vpow2.f32 %v2605_v62  ;;  %v2617_v14 = vmul.f32 1.442695, %v2576_v32  ;;  %v2581_v50 = vsub.f32 %v6080_v53, %v6233_v56  ;;  %v2580_v31 = vsub.f32 %v6049_v59, %v6233_v56 }
 0x307   : > { %4139 = vpow2.f32 %v2607_v24  ;;  %v2623_v18 = vmul.f32 1.442695, %v2579_v17  ;;  %v2621_v5 = vmul.f32 1.442695, %v2578_v42  ;;  %v2583_v36 = vsub.f32 %v6096_v20, %v6233_v56 }
 0x308   : > { %4141 = vpow2.f32 %v2609_v63  ;;  %v2627_v53 = vmul.f32 1.442695, %v2581_v50  ;;  %v2582_v26 = vsub.f32 %v6091_v51, %v6233_v56  ;;  %v2625_v59 = vmul.f32 1.442695, %v2580_v31 }
 0x309   : > { %4143 = vpow2.f32 %v2615_v22  ;;  %v2585_v55 = vsub.f32 %v6116_v46, %v6233_v56  ;;  %v2631_v20 = vmul.f32 1.442695, %v2583_v36  ;;  %v2584_v51 = vsub.f32 %v6101_v2, %v6233_v56 }
 0x30a   : > { %4145 = vpow2.f32 %v2611_v10  ;;  %v2629_v21 = vmul.f32 1.442695, %v2582_v26  ;;  %v2587_v46 = vsub.f32 %v6139_v27, %v6233_v56  ;;  %v2586_v2 = vsub.f32 %v6129_v28, %v6233_v56 }
 0x30b   : > { %4147 = vpow2.f32 %v2613_v11  ;;  %v2635_v39 = vmul.f32 1.442695, %v2585_v55  ;;  %v2633_v47 = vmul.f32 1.442695, %v2584_v51  ;;  %v2589_v27 = vsub.f32 %v6157_v61, %v6233_v56 }
 0x30c   : > { %4149 = vpow2.f32 %v2619_v43  ;;  %v2639_v32 = vmul.f32 1.442695, %v2587_v46  ;;  %v2588_v28 = vsub.f32 %v6147_v23, %v6233_v56  ;;  %v2591_v61 = vsub.f32 %v6177_v30, %v6233_v56 }
 0x30d   : > { %4151 = vpow2.f32 %v2617_v14  ;;  %v2637_v14 = vmul.f32 1.442695, %v2586_v2  ;;  %v2590_v23 = vsub.f32 %v6162_v16, %v6233_v56  ;;  %v2593_v30 = vsub.f32 %v6182_v1, %v6233_v56 }
 0x30e   : > { %v6255_v0 = vpop.eup %4129  ;;  %4153 = vpow2.f32 %v2623_v18  ;;  %v2647_v36 = vmul.f32 1.442695, %v2591_v61  ;;  %v2592_v16 = vsub.f32 %v6167_v57, %v6233_v56  ;;  %v2595_v1 = vsub.f32 %v6206_v6, %v6233_v56 }
 0x30f   : > { %2740 = vperm.xlu0 %3811, %v6255_v0   ;;  %4155 = vpow2.f32 %v2621_v5  ;;  %v2641_v5 = vmul.f32 1.442695, %v2588_v28  ;;  %v2594_v57 = vsub.f32 %v6187_v38, %v6233_v56  ;;  %v2597_v6 = vsub.f32 %v6211_v25, %v6233_v56 }
 0x310   : > { %v4132_v13 = vpop.eup %4131  ;;  %4157 = vpow2.f32 %v2627_v53  ;;  %v2596_v38 = vsub.f32 %v6192_v15, %v6233_v56 }
 0x311   : > { %v4134_v7 = vpop.eup %4133  ;;  %v2665_v52 = vsel %vm2487_vm12, %v4132_v13, 0.0  ;;  %2750 = vperm.xlu1 %3812, %v4132_v13   ;;  %4159 = vpow2.f32 %v2625_v59  ;;  %v2643_v13 = vmul.f32 1.442695, %v2589_v27  ;;  %v2659_v25 = vmul.f32 1.442695, %v2597_v6 }
 0x312   : > { %v4136_v3 = vpop.eup %4135  ;;  %v2666_v9 = vsel %vm2487_vm12, %v4134_v7, 0.0  ;;  %4161 = vpow2.f32 %v2631_v20  ;;  %v2657_v15 = vmul.f32 1.442695, %v2596_v38 }
 0x313   : > { %v4138_v49 = vpop.eup %4137  ;;  %v2667_v54 = vadd.f32 %v2666_v9, %v2665_v52  ;;  %v2668_v60 = vsel %vm2487_vm12, %v4136_v3, 0.0  ;;  %4163 = vpow2.f32 %v2629_v21 }
 0x314   : > { %v4140_v19 = vpop.eup %4139  ;;  %v2670_v33 = vsel %vm2487_vm12, %v4138_v49, 0.0  ;;  %4165 = vpow2.f32 %v2635_v39 }
 0x315   : > { %v2669_v29 = vadd.f32 %v2668_v60, %v2667_v54  ;;  %2755 = vperm.xlu1 %3812, %v4134_v7   ;;  %v4142_v40 = vpop.eup %4141  ;;  %v2672_v35 = vsel %vm2487_vm12, %v4140_v19, 0.0  ;;  %4167 = vpow2.f32 %v2633_v47  ;;  %v2598_v47 = vsub.f32 %v6227_v4, %v6233_v56 }
 0x316   : > { %v4144_v41 = vpop.eup %4143  ;;  %v2674_v12 = vsel %vm2487_vm12, %v4142_v40, 0.0  ;;  %4169 = vpow2.f32 %v2639_v32 }
 0x317   : > { %v2671_v58 = vadd.f32 %v2670_v33, %v2669_v29  ;;  %v4146_v8 = vpop.eup %4145  ;;  %2790 = vperm.xlu0 %3811, %v4144_v41   ;;  %v2680_v43 = vsel %vm2487_vm12, %v4144_v41, 0.0  ;;  %4171 = vpow2.f32 %v2637_v14  ;;  %v2645_v29 = vmul.f32 1.442695, %v2590_v23 }
 0x318   : > { %v6282_v62 = vpop.eup %4147  ;;  %v2676_v45 = vsel %vm2487_vm12, %v4146_v8, 0.0  ;;  %4173 = vpow2.f32 %v2643_v13  ;;  %v2651_v33 = vmul.f32 1.442695, %v2593_v30  ;;  %v2649_v41 = vmul.f32 1.442695, %v2592_v16 }
 0x319   : > { %v2673_v37 = vadd.f32 %v2672_v35, %v2671_v58  ;;  %2760 = vperm.xlu1 %3812, %v4136_v3   ;;  %v4150_v24 = vpop.eup %4149  ;;  %v2678_v22 = vsel %vm2487_vm12, %v6282_v62, 0.0  ;;  %4175 = vpow2.f32 %v2641_v5 }
 0x31a   : > { %v6291_v10 = vpop.eup %4151  ;;  %v2684_v3 = vsel %vm2487_vm12, %v4150_v24, 0.0  ;;  %4177 = vpow2.f32 %v2647_v36 }
 0x31b   : > { %v2675_v44 = vadd.f32 %v2674_v12, %v2673_v37  ;;  %2800 = vperm.xlu0 %3811, %v4150_v24   ;;  %v4154_v17 = vpop.eup %4153  ;;  %v2682_v50 = vsel %vm2487_vm12, %v6291_v10, 0.0  ;;  %4179 = vpow2.f32 %v2645_v29  ;;  %v2655_v37 = vmul.f32 1.442695, %v2595_v1 }
 0x31c   : > { %v6300_v18 = vpop.eup %4155  ;;  %v2688_v60 = vsel %vm2487_vm12, %v4154_v17, 0.0  ;;  %4181 = vpow2.f32 %v2651_v33 }
 0x31d   : > { %v2677_v63 = vadd.f32 %v2676_v45, %v2675_v44  ;;  %2765 = vperm.xlu1 %3812, %v4138_v49   ;;  %v4158_v52 = vpop.eup %4157  ;;  %v2686_v9 = vsel %vm2487_vm12, %v6300_v18, 0.0  ;;  %4183 = vpow2.f32 %v2649_v41  ;;  %v2663_v41 = vld [vmem:[#allocation3] sm:$0x1] }
 0x31e   : > { %v4160_v49 = vpop.eup %4159  ;;  %v2692_v20 = vsel %vm2487_vm12, %v4158_v52, 0.0  ;;  %4185 = vpow2.f32 %v2655_v37 }
 0x31f   : > { %v2679_v11 = vadd.f32 %v2678_v22, %v2677_v63  ;;  %2810 = vperm.xlu0 %3811, %v4154_v17   ;;  %v4162_v54 = vpop.eup %4161  ;;  %v2690_v26 = vsel %vm2487_vm12, %v4160_v49, 0.0 }
 0x320   : > { %v4164_v59 = vpop.eup %4163  ;;  %v2696_v12 = vsel %vm2487_vm12, %v4162_v54, 0.0 }
 0x321   : > { %v2681_v42 = vadd.f32 %v2680_v43, %v2679_v11  ;;  %2770 = vperm.xlu1 %3812, %v4140_v19   ;;  %v4166_v55 = vpop.eup %4165  ;;  %v2694_v35 = vsel %vm2487_vm12, %v4164_v59, 0.0  ;;  %v2661_v43 = vmul.f32 1.442695, %v2598_v47 }
 0x322   : > { %v2700_v63 = vsel %vm2487_vm12, %v4166_v55, 0.0 }
 0x323   : > { %v2683_v7 = vadd.f32 %v2682_v50, %v2681_v42  ;;  %2820 = vperm.xlu0 %3811, %v4158_v52  }
 0x325   : > { %v2685_v31 = vadd.f32 %v2684_v3, %v2683_v7  ;;  %2775 = vperm.xlu1 %3812, %v4142_v40  }
 0x327   : > { %v2687_v53 = vadd.f32 %v2686_v9, %v2685_v31  ;;  %2830 = vperm.xlu0 %3811, %v4162_v54  }
 0x329   : > { %v2689_v19 = vadd.f32 %v2688_v60, %v2687_v53  ;;  %2780 = vperm.xlu1 %3812, %v4146_v8   ;;  %v4168_v8 = vpop.eup %4167 }
 0x32a   : > { %v4170_v21 = vpop.eup %4169  ;;  %v2698_v39 = vsel %vm2487_vm12, %v4168_v8, 0.0 }
 0x32b   : > { %v2691_v40 = vadd.f32 %v2690_v26, %v2689_v19  ;;  %2840 = vperm.xlu0 %3811, %v4166_v55   ;;  %v4172_v44 = vpop.eup %4171  ;;  %v2704_v11 = vsel %vm2487_vm12, %v4170_v21, 0.0 }
 0x32c   : > { %v4174_v45 = vpop.eup %4173  ;;  %v2702_v22 = vsel %vm2487_vm12, %v4172_v44, 0.0 }
 0x32d   : > { %v2693_v58 = vadd.f32 %v2692_v20, %v2691_v40  ;;  %2785 = vperm.xlu1 %3812, %v6282_v62   ;;  %v2653_v62 = vmul.f32 1.442695, %v2594_v57  ;;  %v2708_v56 = vsel %vm2487_vm12, %v4174_v45, 0.0 }
 0x32f   : > { %v2695_v51 = vadd.f32 %v2694_v35, %v2693_v58  ;;  %2850 = vperm.xlu0 %3811, %v4170_v21   ;;  %4187 = vpow2.f32 %v2653_v62 }
 0x330   : > { %4189 = vpow2.f32 %v2659_v25 }
 0x331   : > { %v2697_v46 = vadd.f32 %v2696_v12, %v2695_v51  ;;  %2795 = vperm.xlu1 %3812, %v6291_v10   ;;  %v4176_v10 = vpop.eup %4175  ;;  %4191 = vpow2.f32 %v2657_v15  ;;  %v7280_v15 = vld [vmem:[#allocation22_spill] sm:$0xff] }
 0x332   : > { %v4178_v32 = vpop.eup %4177  ;;  %v2706_v42 = vsel %vm2487_vm12, %v4176_v10, 0.0  ;;  %4193 = vpow2.f32 %v2661_v43 }
 0x333   : > { %v2699_v24 = vadd.f32 %v2698_v39, %v2697_v46  ;;  %2860 = vperm.xlu0 %3811, %v4174_v45   ;;  %v4180_v28 = vpop.eup %4179  ;;  %v2712_v52 = vsel %vm2487_vm12, %v4178_v32, 0.0 }
 0x334   : > { %v4182_v4 = vpop.eup %4181 }
 0x335   : > { %v2701_v2 = vadd.f32 %v2700_v63, %v2699_v24  ;;  %2805 = vperm.xlu1 %3812, %v6300_v18   ;;  %v2710_v18 = vsel %vm2487_vm12, %v4180_v28, 0.0  ;;  %v4184_v61 = vpop.eup %4183  ;;  %v7276_v24 = vld [vmem:[#allocation21_spill] sm:$0xff]  ;;  %v7278_v63 = vld [vmem:[#allocation18_spill] sm:$0xff] }
 0x336   : > { %v4186_v7 = vpop.eup %4185  ;;  %v2714_v31 = vsel %vm2487_vm12, %v4184_v61, 0.0 }
 0x337   : > { %v2703_v27 = vadd.f32 %v2702_v22, %v2701_v2  ;;  %2870 = vperm.xlu0 %3811, %v4178_v32   ;;  %v2720_v60 = vsel %vm2487_vm12, %v4186_v7, 0.0  ;;  %v7279_v2 = vmax.f32 %v7278_v63, 0.0  ;;  %v7281_v22 = vmax.f32 %v7280_v15, 0.0  ;;  %v7310_v63 = vld [vmem:[#allocation36_spill] sm:$0xff] }
 0x338   : > { %v7312_v15 = vld [vmem:[#allocation32_spill] sm:$0xff] }
 0x339   : > { %v2705_v17 = vadd.f32 %v2704_v11, %v2703_v27  ;;  %2815 = vperm.xlu1 %3812, %v4160_v49   ;;  %v2716_v49 = vsel %vm2487_vm12, %v4182_v4, 0.0  ;;  %v7282_v27 = vld [vmem:[#allocation19_spill] sm:$0xff] }
 0x33a   : > { %v7283_v32 = vmax.f32 %v7282_v27, 0.0 }
 0x33b   : > { %v2707_v14 = vadd.f32 %v2706_v42, %v2705_v17  ;;  %2880 = vperm.xlu0 %3811, %v4182_v4   ;;  %v7284_v17 = vld [vmem:[#allocation16_spill] sm:$0xff] }
 0x33c   : > { %v4188_v23 = vpop.eup %4187  ;;  %v7285_v43 = vmax.f32 %v7284_v17, 0.0  ;;  %v7314_v17 = vld [vmem:[#allocation33_spill] sm:$0xff] }
 0x33d   : > { %v2709_v50 = vadd.f32 %v2708_v56, %v2707_v14  ;;  %2825 = vperm.xlu1 %3812, %v4164_v59   ;;  %v4190_v9 = vpop.eup %4189  ;;  %v2718_v36 = vsel %vm2487_vm12, %v4188_v23, 0.0 }
 0x33e   : > { %v4192_v53 = vpop.eup %4191  ;;  %v2724_v59 = vsel %vm2487_vm12, %v4190_v9, 0.0 }
 0x33f   : > { %v2711_v13 = vadd.f32 %v2710_v18, %v2709_v50  ;;  %2890 = vperm.xlu0 %3811, %v4186_v7   ;;  %v2722_v16 = vsel %vm2487_vm12, %v4192_v53, 0.0  ;;  %v4194_v29 = vpop.eup %4193  ;;  %v7290_v18 = vld [vmem:[#allocation27_spill] sm:$0xff] }
 0x340   : > { %v2726_v33 = vsel %vm2487_vm12, %v4194_v29, 0.0  ;;  %v7292_v7 = vld [vmem:[#allocation23_spill] sm:$0xff] }
 0x341   : > { %v2713_v3 = vadd.f32 %v2712_v52, %v2711_v13  ;;  %2835 = vperm.xlu1 %3812, %v4168_v8   ;;  %v2664_v8 = vmul.f32 %v6255_v0, %v2663_v41  ;;  %v7277_v0 = vmax.f32 %v7276_v24, 0.0  ;;  %v7293_v52 = vmax.f32 %v7292_v7, 0.0  ;;  %v7308_v24 = vld [vmem:[#allocation31_spill] sm:$0xff] }
 0x343   : > { %v2715_v5 = vadd.f32 %v2714_v31, %v2713_v3  ;;  %2900 = vperm.xlu0 %3811, %v4190_v9   ;;  %v7294_v31 = vld [vmem:[#allocation28_spill] sm:$0xff] }
 0x344   : > { %v7296_v9 = vld [vmem:[#allocation24_spill] sm:$0xff] }
 0x345   : > { %v2717_v30 = vadd.f32 %v2716_v49, %v2715_v5  ;;  %2845 = vperm.xlu1 %3812, %v4172_v44   ;;  %v7275_v44 = vmax.f32 %v4689_v48, 0.0  ;;  %v7288_v48 = vld [vmem:[#allocation17_spill] sm:$0xff]  ;;  %v7297_v49 = vmax.f32 %v7296_v9, 0.0  ;;  %v7322_v9 = vld [vmem:[#allocation43_spill] sm:$0xff] }
 0x346   : > { %v7289_v56 = vmax.f32 %v7288_v48, 0.0  ;;  %v7318_v48 = vld [vmem:[#allocation34_spill] sm:$0xff] }
 0x347   : > { %v2719_v54 = vadd.f32 %v2718_v36, %v2717_v30 }
 0x349   : > { %v2721_v19 = vadd.f32 %v2720_v60, %v2719_v54  ;;  %2855 = vperm.xlu1 %3812, %v4176_v10  }
 0x34b   : > { %v2723_v26 = vadd.f32 %v2722_v16, %v2721_v19 }
 0x34d   : > { %v2725_v1 = vadd.f32 %v2724_v59, %v2723_v26  ;;  %2865 = vperm.xlu1 %3812, %v4180_v28   ;;  %v7286_v28 = vld [vmem:[#allocation20_spill] sm:$0xff] }
 0x34e   : > { %v7287_v14 = vmax.f32 %v7286_v28, 0.0  ;;  %v7316_v28 = vld [vmem:[#allocation37_spill] sm:$0xff] }
 0x34f   : > { %v2727_v40 = vadd.f32 %v2726_v33, %v2725_v1  ;;  %v7300_v1 = vld [vmem:[#allocation29_spill] sm:$0xff] }
 0x350   : > { %v7301_v33 = vmax.f32 %v7300_v1, 0.0 }
 0x351   : > { %v2728_v55 = vrot.slane %v2727_v40, 4  ;;  %2875 = vperm.xlu1 %3812, %v4184_v61   ;;  %v7291_v61 = vmax.f32 %v7290_v18, 0.0  ;;  %v7320_v18 = vld [vmem:[#allocation38_spill] sm:$0xff] }
 0x353   : > { %v2729_v20 = vadd.f32 %v2728_v55, %v2727_v40  ;;  %v7302_v55 = vld [vmem:[#allocation26_spill] sm:$0xff] }
 0x355   : > { %v2730_v58 = vrot.slane %v2729_v20, 2  ;;  %2885 = vperm.xlu1 %3812, %v4188_v23   ;;  %v7295_v23 = vmax.f32 %v7294_v31, 0.0 }
 0x357   : > { %v2731_v57 = vadd.f32 %v2730_v58, %v2729_v20  ;;  %v7303_v20 = vmax.f32 %v7302_v55, 0.0 }
 0x359   : > { %v2732_v35 = vrot.slane %v2731_v57, 1  ;;  %2895 = vperm.xlu1 %3812, %v4192_v53  }
 0x35b   : > { %v2733_v6 = vadd.f32 %v2732_v35, %v2731_v57  ;;  %v7304_v57 = vld [vmem:[#allocation30_spill] sm:$0xff] }
 0x35c   : > { %v7305_v41 = vmax.f32 %v7304_v57, 0.0 }
 0x35d   : > { %v2734_v37 = vadd.f32 %v2733_v6, %v2664_v8  ;;  %2905 = vperm.xlu1 %3812, %v4194_v29   ;;  %v7298_v29 = vld [vmem:[#allocation25_spill] sm:$0xff] }
 0x35e   : > { %v7299_v26 = vmax.f32 %v7298_v29, 0.0 }
 0x35f   : > { %2736 = vst.msk [vmem:[#allocation3] sm:$0x1] %vm2735_vm5, %v2734_v37 }
 0x38a   : > { %v6348_v21 = vpop.permute.xlu0 %2740 }
 0x38c   : > { %v2751_v51 = vpop.permute.xlu1 %2750 }
 0x38d   : > { %v2908_v11 = vmul.f32 %v2751_v51, %v7283_v32  ;;  %v2909_v42 = vmul.f32 %v2751_v51, %v7285_v43  ;;  %v2910_v4 = vmul.f32 %v2751_v51, %v7287_v14  ;;  %v2911_v50 = vmul.f32 %v2751_v51, %v7289_v56 }
 0x38e   : > { %v7315_v43 = vmax.f32 %v7314_v17, 0.0  ;;  %v7317_v14 = vmax.f32 %v7316_v28, 0.0  ;;  %v7319_v56 = vmax.f32 %v7318_v48, 0.0 }
 0x390   : > { %v2756_v12 = vpop.permute.xlu1 %2755 }
 0x391   : > { %v2912_v25 = vmul.f32 %v2756_v12, %v7275_v44  ;;  %v2913_v45 = vmul.f32 %v2756_v12, %v7277_v0  ;;  %v2914_v47 = vmul.f32 %v2756_v12, %v7279_v2  ;;  %v2915_v10 = vmul.f32 %v2756_v12, %v7281_v22 }
 0x392   : > { %v6350_v46 = vpop.permute.xlu0 %2790  ;;  %v7309_v0 = vmax.f32 %v7308_v24, 0.0  ;;  %v7311_v2 = vmax.f32 %v7310_v63, 0.0  ;;  %v7313_v22 = vmax.f32 %v7312_v15, 0.0  ;;  %v7334_v24 = vld [vmem:[#allocation42_spill] sm:$0xff] }
 0x393   : > { %v3036_v53 = vadd.f32 %v2912_v25, %v2908_v11  ;;  %v3073_v54 = vadd.f32 %v2913_v45, %v2909_v42  ;;  %v3110_v60 = vadd.f32 %v2914_v47, %v2910_v4  ;;  %v3147_v19 = vadd.f32 %v2915_v10, %v2911_v50  ;;  %v7336_v63 = vld [vmem:[#allocation46_spill] sm:$0xff] }
 0x394   : > { %v2761_v38 = vpop.permute.xlu1 %2760 }
 0x395   : > { %v2916_v13 = vmul.f32 %v2761_v38, %v7291_v61  ;;  %v2917_v3 = vmul.f32 %v2761_v38, %v7293_v52  ;;  %v2918_v5 = vmul.f32 %v2761_v38, %v7295_v23  ;;  %v2919_v30 = vmul.f32 %v2761_v38, %v7297_v49  ;;  %v7306_v38 = vld [vmem:[#allocation35_spill] sm:$0xff] }
 0x396   : > { %v6352_v62 = vpop.permute.xlu0 %2800  ;;  %v7307_v44 = vmax.f32 %v7306_v38, 0.0  ;;  %v7321_v61 = vmax.f32 %v7320_v18, 0.0  ;;  %v7323_v49 = vmax.f32 %v7322_v9, 0.0  ;;  %v7332_v38 = vld [vmem:[#allocation45_spill] sm:$0xff] }
 0x397   : > { %v3037_v8 = vadd.f32 %v3036_v53, %v2916_v13  ;;  %v3074_v6 = vadd.f32 %v3073_v54, %v2917_v3  ;;  %v3111_v37 = vadd.f32 %v3110_v60, %v2918_v5  ;;  %v3148_v51 = vadd.f32 %v3147_v19, %v2919_v30  ;;  %v7326_v60 = vld [vmem:[#allocation44_spill] sm:$0xff] }
 0x398   : > { %v2766_v39 = vpop.permute.xlu1 %2765  ;;  %v7327_v19 = vmax.f32 %v7326_v60, 0.0 }
 0x399   : > { %v2920_v59 = vmul.f32 %v2766_v39, %v7299_v26  ;;  %v2921_v40 = vmul.f32 %v2766_v39, %v7301_v33  ;;  %v2922_v58 = vmul.f32 %v2766_v39, %v7303_v20  ;;  %v2923_v35 = vmul.f32 %v2766_v39, %v7305_v41  ;;  %v7328_v26 = vld [vmem:[#allocation40_spill] sm:$0xff] }
 0x39a   : > { %v6378_v16 = vpop.permute.xlu0 %2810 }
 0x39b   : > { %v3038_v27 = vadd.f32 %v3037_v8, %v2920_v59  ;;  %v3075_v32 = vadd.f32 %v3074_v6, %v2921_v40  ;;  %v3112_v39 = vadd.f32 %v3111_v37, %v2922_v58  ;;  %v3149_v11 = vadd.f32 %v3148_v51, %v2923_v35  ;;  %v7330_v37 = vld [vmem:[#allocation41_spill] sm:$0xff] }
 0x39c   : > { %v2771_v36 = vpop.permute.xlu1 %2770  ;;  %v7329_v59 = vmax.f32 %v7328_v26, 0.0  ;;  %v7331_v51 = vmax.f32 %v7330_v37, 0.0  ;;  %v7354_v26 = vld [vmem:[#allocation59_spill] sm:$0xff] }
 0x39d   : > { %v2924_v25 = vmul.f32 %v2771_v36, %v7307_v44  ;;  %v2925_v45 = vmul.f32 %v2771_v36, %v7309_v0  ;;  %v2926_v47 = vmul.f32 %v2771_v36, %v7311_v2  ;;  %v2927_v10 = vmul.f32 %v2771_v36, %v7313_v22  ;;  %v7324_v36 = vld [vmem:[#allocation39_spill] sm:$0xff] }
 0x39e   : > { %v6404_v7 = vpop.permute.xlu0 %2820  ;;  %v7325_v53 = vmax.f32 %v7324_v36, 0.0  ;;  %v7333_v44 = vmax.f32 %v7332_v38, 0.0  ;;  %v7335_v0 = vmax.f32 %v7334_v24, 0.0  ;;  %v7337_v2 = vmax.f32 %v7336_v63, 0.0 }
 0x39f   : > { %v3039_v3 = vadd.f32 %v3038_v27, %v2924_v25  ;;  %v3076_v31 = vadd.f32 %v3075_v32, %v2925_v45  ;;  %v3113_v23 = vadd.f32 %v3112_v39, %v2926_v47  ;;  %v3150_v5 = vadd.f32 %v3149_v11, %v2927_v10  ;;  %v7338_v39 = vld [vmem:[#allocation51_spill] sm:$0xff] }
 0x3a0   : > { %v2776_v12 = vpop.permute.xlu1 %2775  ;;  %v7339_v11 = vmax.f32 %v7338_v39, 0.0 }
 0x3a1   : > { %v2928_v42 = vmul.f32 %v2776_v12, %v7315_v43  ;;  %v2929_v4 = vmul.f32 %v2776_v12, %v7317_v14  ;;  %v2930_v50 = vmul.f32 %v2776_v12, %v7319_v56  ;;  %v2931_v13 = vmul.f32 %v2776_v12, %v7321_v61  ;;  %v7340_v43 = vld [vmem:[#allocation47_spill] sm:$0xff]  ;;  %v7342_v14 = vld [vmem:[#allocation52_spill] sm:$0xff]  ;;  %v7346_v61 = vld [vmem:[#allocation49_spill] sm:$0xff] }
 0x3a2   : > { %v6414_v6 = vpop.permute.xlu0 %2830  ;;  %v2940_v17 = vmul.f32 %v6350_v46, %v7339_v11  ;;  %v7344_v56 = vld [vmem:[#allocation48_spill] sm:$0xff] }
 0x3a3   : > { %v3040_v33 = vadd.f32 %v3039_v3, %v2928_v42  ;;  %v3077_v40 = vadd.f32 %v3076_v31, %v2929_v4  ;;  %v3114_v55 = vadd.f32 %v3113_v23, %v2930_v50  ;;  %v3151_v20 = vadd.f32 %v3150_v5, %v2931_v13  ;;  %v7348_v3 = vld [vmem:[#allocation53_spill] sm:$0xff]  ;;  %v7350_v5 = vld [vmem:[#allocation50_spill] sm:$0xff] }
 0x3a4   : > { %v2781_v52 = vpop.permute.xlu1 %2780  ;;  %v7341_v42 = vmax.f32 %v7340_v43, 0.0  ;;  %v7343_v4 = vmax.f32 %v7342_v14, 0.0  ;;  %v7345_v50 = vmax.f32 %v7344_v56, 0.0  ;;  %v7347_v13 = vmax.f32 %v7346_v61, 0.0 }
 0x3a5   : > { %v2932_v30 = vmul.f32 %v2781_v52, %v7323_v49  ;;  %v2933_v54 = vmul.f32 %v2781_v52, %v7325_v53  ;;  %v2934_v29 = vmul.f32 %v2781_v52, %v7327_v19  ;;  %v2935_v1 = vmul.f32 %v2781_v52, %v7329_v59 }
 0x3a6   : > { %v2941_v28 = vmul.f32 %v6350_v46, %v7341_v42  ;;  %v2942_v48 = vmul.f32 %v6350_v46, %v7343_v4  ;;  %v2943_v18 = vmul.f32 %v6350_v46, %v7345_v50  ;;  %v7349_v31 = vmax.f32 %v7348_v3, 0.0  ;;  %v7378_v3 = vld [vmem:[#allocation75_spill] sm:$0xff] }
 0x3a7   : > { %v3041_v57 = vadd.f32 %v3040_v33, %v2932_v30  ;;  %v3078_v41 = vadd.f32 %v3077_v40, %v2933_v54  ;;  %v3115_v35 = vadd.f32 %v3114_v55, %v2934_v29  ;;  %v3152_v8 = vadd.f32 %v3151_v20, %v2935_v1  ;;  %v7352_v30 = vld [vmem:[#allocation54_spill] sm:$0xff]  ;;  %v7356_v1 = vld [vmem:[#allocation55_spill] sm:$0xff]  ;;  %v7358_v55 = vld [vmem:[#allocation60_spill] sm:$0xff] }
 0x3a8   : > { %v2786_v58 = vpop.permute.xlu1 %2785  ;;  %v7351_v9 = vmax.f32 %v7350_v5, 0.0  ;;  %v7353_v36 = vmax.f32 %v7352_v30, 0.0  ;;  %v7355_v59 = vmax.f32 %v7354_v26, 0.0  ;;  %v7357_v33 = vmax.f32 %v7356_v1, 0.0  ;;  %v7380_v5 = vld [vmem:[#allocation71_spill] sm:$0xff]  ;;  %v7382_v30 = vld [vmem:[#allocation76_spill] sm:$0xff] }
 0x3a9   : > { %v2936_v12 = vmul.f32 %v2786_v58, %v7331_v51  ;;  %v2937_v25 = vmul.f32 %v2786_v58, %v7333_v44  ;;  %v2938_v45 = vmul.f32 %v2786_v58, %v7335_v0  ;;  %v2939_v47 = vmul.f32 %v2786_v58, %v7337_v2  ;;  %v7362_v51 = vld [vmem:[#allocation67_spill] sm:$0xff]  ;;  %v7366_v0 = vld [vmem:[#allocation68_spill] sm:$0xff] }
 0x3aa   : > { %v2948_v46 = vmul.f32 %v6352_v62, %v7355_v59  ;;  %v2949_v40 = vmul.f32 %v6352_v62, %v7357_v33  ;;  %v7359_v20 = vmax.f32 %v7358_v55, 0.0  ;;  %v7364_v44 = vld [vmem:[#allocation63_spill] sm:$0xff]  ;;  %v7368_v2 = vld [vmem:[#allocation64_spill] sm:$0xff]  ;;  %v7386_v33 = vld [vmem:[#allocation65_spill] sm:$0xff] }
 0x3ab   : > { %v3042_v15 = vadd.f32 %v3041_v57, %v2936_v12  ;;  %v3079_v22 = vadd.f32 %v3078_v41, %v2937_v25  ;;  %v3116_v10 = vadd.f32 %v3115_v35, %v2938_v45  ;;  %v3153_v27 = vadd.f32 %v3152_v8, %v2939_v47  ;;  %v7360_v57 = vld [vmem:[#allocation56_spill] sm:$0xff]  ;;  %v2841_v8 = vpop.permute.xlu0 %2840 }
 0x3ac   : > { %v2796_v32 = vpop.permute.xlu1 %2795  ;;  %v2950_v58 = vmul.f32 %v6352_v62, %v7359_v20  ;;  %v7361_v41 = vmax.f32 %v7360_v57, 0.0  ;;  %v7363_v12 = vmax.f32 %v7362_v51, 0.0  ;;  %v7365_v25 = vmax.f32 %v7364_v44, 0.0  ;;  %v7388_v20 = vld [vmem:[#allocation69_spill] sm:$0xff]  ;;  %v7392_v51 = vld [vmem:[#allocation70_spill] sm:$0xff] }
 0x3ad   : > { %v2944_v52 = vmul.f32 %v2796_v32, %v7347_v13  ;;  %v2945_v23 = vmul.f32 %v2796_v32, %v7349_v31  ;;  %v2946_v49 = vmul.f32 %v2796_v32, %v7351_v9  ;;  %v2947_v53 = vmul.f32 %v2796_v32, %v7353_v36  ;;  %v7370_v32 = vld [vmem:[#allocation57_spill] sm:$0xff] }
 0x3ae   : > { %v3043_v54 = vadd.f32 %v3042_v15, %v2940_v17  ;;  %v3080_v60 = vadd.f32 %v3079_v22, %v2941_v28  ;;  %v3117_v19 = vadd.f32 %v3116_v10, %v2942_v48  ;;  %v3154_v29 = vadd.f32 %v3153_v27, %v2943_v18  ;;  %v7372_v17 = vld [vmem:[#allocation61_spill] sm:$0xff]  ;;  %v7374_v28 = vld [vmem:[#allocation58_spill] sm:$0xff] }
 0x3af   : > { %v2951_v35 = vmul.f32 %v6352_v62, %v7361_v41  ;;  %v2956_v38 = vmul.f32 %v6378_v16, %v7363_v12  ;;  %v2957_v24 = vmul.f32 %v6378_v16, %v7365_v25  ;;  %v7367_v45 = vmax.f32 %v7366_v0, 0.0  ;;  %v7376_v48 = vld [vmem:[#allocation62_spill] sm:$0xff] }
 0x3b0   : > { %v2806_v37 = vpop.permute.xlu1 %2805  ;;  %v7369_v47 = vmax.f32 %v7368_v2, 0.0  ;;  %v3044_v22 = vadd.f32 %v3043_v54, %v2944_v52  ;;  %v3081_v62 = vadd.f32 %v3080_v60, %v2945_v23  ;;  %v3118_v10 = vadd.f32 %v3117_v19, %v2946_v49  ;;  %v7384_v54 = vld [vmem:[#allocation72_spill] sm:$0xff]  ;;  %v7390_v41 = vld [vmem:[#allocation66_spill] sm:$0xff] }
 0x3b1   : > { %v2958_v63 = vmul.f32 %v6378_v16, %v7367_v45  ;;  %v3155_v27 = vadd.f32 %v3154_v29, %v2947_v53  ;;  %v7371_v39 = vmax.f32 %v7370_v32, 0.0  ;;  %v7373_v43 = vmax.f32 %v7372_v17, 0.0  ;;  %v2851_v29 = vpop.permute.xlu0 %2850 }
 0x3b2   : > { %v2959_v15 = vmul.f32 %v6378_v16, %v7369_v47  ;;  %v7375_v14 = vmax.f32 %v7374_v28, 0.0  ;;  %v7377_v56 = vmax.f32 %v7376_v48, 0.0  ;;  %v3045_v18 = vadd.f32 %v3044_v22, %v2948_v46  ;;  %v7394_v47 = vld [vmem:[#allocation83_spill] sm:$0xff] }
 0x3b3   : > { %v2952_v11 = vmul.f32 %v2806_v37, %v7371_v39  ;;  %v2953_v42 = vmul.f32 %v2806_v37, %v7373_v43  ;;  %v3082_v61 = vadd.f32 %v3081_v62, %v2949_v40  ;;  %v3119_v13 = vadd.f32 %v3118_v10, %v2950_v58  ;;  %v7396_v10 = vld [vmem:[#allocation79_spill] sm:$0xff]  ;;  %v7398_v39 = vld [vmem:[#allocation84_spill] sm:$0xff] }
 0x3b4   : > { %v2954_v4 = vmul.f32 %v2806_v37, %v7375_v14  ;;  %v2955_v50 = vmul.f32 %v2806_v37, %v7377_v56  ;;  %v3156_v16 = vadd.f32 %v3155_v27, %v2951_v35  ;;  %v2816_v52 = vpop.permute.xlu1 %2815  ;;  %v7379_v31 = vmax.f32 %v7378_v3, 0.0  ;;  %v7400_v43 = vld [vmem:[#allocation80_spill] sm:$0xff]  ;;  %v7402_v14 = vld [vmem:[#allocation73_spill] sm:$0xff] }
 0x3b5   : > { %v7381_v9 = vmax.f32 %v7380_v5, 0.0  ;;  %v7383_v36 = vmax.f32 %v7382_v30, 0.0  ;;  %v7385_v60 = vmax.f32 %v7384_v54, 0.0  ;;  %v3046_v26 = vadd.f32 %v3045_v18, %v2952_v11  ;;  %v7404_v56 = vld [vmem:[#allocation77_spill] sm:$0xff]  ;;  %v2861_v5 = vpop.permute.xlu0 %2860 }
 0x3b6   : > { %v2964_v23 = vmul.f32 %v6404_v7, %v7379_v31  ;;  %v3083_v59 = vadd.f32 %v3082_v61, %v2953_v42  ;;  %v3120_v46 = vadd.f32 %v3119_v13, %v2954_v4  ;;  %v3157_v1 = vadd.f32 %v3156_v16, %v2955_v50  ;;  %v7406_v61 = vld [vmem:[#allocation74_spill] sm:$0xff] }
 0x3b7   : > { %v2965_v49 = vmul.f32 %v6404_v7, %v7381_v9  ;;  %v2966_v53 = vmul.f32 %v6404_v7, %v7383_v36  ;;  %v2967_v19 = vmul.f32 %v6404_v7, %v7385_v60  ;;  %v7387_v40 = vmax.f32 %v7386_v33, 0.0  ;;  %v7410_v60 = vld [vmem:[#allocation91_spill] sm:$0xff] }
 0x3b8   : > { %v7389_v58 = vmax.f32 %v7388_v20, 0.0  ;;  %v7391_v35 = vmax.f32 %v7390_v41, 0.0  ;;  %v7393_v12 = vmax.f32 %v7392_v51, 0.0  ;;  %v3047_v25 = vadd.f32 %v3046_v26, %v2956_v38  ;;  %v2826_v2 = vpop.permute.xlu1 %2825 }
 0x3b9   : > { %v2960_v55 = vmul.f32 %v2816_v52, %v7387_v40  ;;  %v3084_v0 = vadd.f32 %v3083_v59, %v2957_v24  ;;  %v3121_v7 = vadd.f32 %v3120_v46, %v2958_v63  ;;  %v3158_v45 = vadd.f32 %v3157_v1, %v2959_v15  ;;  %v7412_v46 = vld [vmem:[#allocation87_spill] sm:$0xff]  ;;  %v7414_v40 = vld [vmem:[#allocation92_spill] sm:$0xff] }
 0x3ba   : > { %v2961_v57 = vmul.f32 %v2816_v52, %v7389_v58  ;;  %v2962_v37 = vmul.f32 %v2816_v52, %v7391_v35  ;;  %v2963_v44 = vmul.f32 %v2816_v52, %v7393_v12  ;;  %v7395_v22 = vmax.f32 %v7394_v47, 0.0  ;;  %v7408_v52 = vld [vmem:[#allocation78_spill] sm:$0xff]  ;;  %v7416_v58 = vld [vmem:[#allocation88_spill] sm:$0xff]  ;;  %v7420_v12 = vld [vmem:[#allocation85_spill] sm:$0xff] }
 0x3bb   : > { %v7397_v27 = vmax.f32 %v7396_v10, 0.0  ;;  %v7399_v11 = vmax.f32 %v7398_v39, 0.0  ;;  %v7401_v42 = vmax.f32 %v7400_v43, 0.0  ;;  %v3048_v24 = vadd.f32 %v3047_v25, %v2960_v55  ;;  %v7426_v43 = vld [vmem:[#allocation99_spill] sm:$0xff] }
 0x3bc   : > { %v2972_v62 = vmul.f32 %v6414_v6, %v7395_v22  ;;  %v3085_v63 = vadd.f32 %v3084_v0, %v2961_v57  ;;  %v3122_v15 = vadd.f32 %v3121_v7, %v2962_v37  ;;  %v3159_v28 = vadd.f32 %v3158_v45, %v2963_v44  ;;  %v2836_v54 = vpop.permute.xlu1 %2835  ;;  %v7422_v0 = vld [vmem:[#allocation82_spill] sm:$0xff] }
 0x3bd   : > { %v2973_v32 = vmul.f32 %v6414_v6, %v7397_v27  ;;  %v2974_v17 = vmul.f32 %v6414_v6, %v7399_v11  ;;  %v2975_v38 = vmul.f32 %v6414_v6, %v7401_v42  ;;  %v7403_v4 = vmax.f32 %v7402_v14, 0.0  ;;  %v7430_v14 = vld [vmem:[#allocation100_spill] sm:$0xff] }
 0x3be   : > { %v7405_v50 = vmax.f32 %v7404_v56, 0.0  ;;  %v7407_v13 = vmax.f32 %v7406_v61, 0.0  ;;  %v7409_v3 = vmax.f32 %v7408_v52, 0.0  ;;  %v3049_v9 = vadd.f32 %v3048_v24, %v2964_v23  ;;  %v7432_v56 = vld [vmem:[#allocation96_spill] sm:$0xff]  ;;  %v2871_v61 = vpop.permute.xlu0 %2870 }
 0x3bf   : > { %v2968_v48 = vmul.f32 %v2826_v2, %v7403_v4  ;;  %v3086_v30 = vadd.f32 %v3085_v63, %v2965_v49  ;;  %v3123_v6 = vadd.f32 %v3122_v15, %v2966_v53  ;;  %v3160_v36 = vadd.f32 %v3159_v28, %v2967_v19  ;;  %v7418_v49 = vld [vmem:[#allocation81_spill] sm:$0xff]  ;;  %v7428_v63 = vld [vmem:[#allocation95_spill] sm:$0xff] }
 0x3c0   : > { %v2969_v18 = vmul.f32 %v2826_v2, %v7405_v50  ;;  %v2970_v16 = vmul.f32 %v2826_v2, %v7407_v13  ;;  %v2971_v31 = vmul.f32 %v2826_v2, %v7409_v3  ;;  %v7411_v26 = vmax.f32 %v7410_v60, 0.0  ;;  %v7424_v2 = vld [vmem:[#allocation86_spill] sm:$0xff]  ;;  %v2846_v11 = vpop.permute.xlu1 %2845  ;;  %v7436_v3 = vld [vmem:[#allocation93_spill] sm:$0xff] }
 0x3c1   : > { %v7413_v1 = vmax.f32 %v7412_v46, 0.0  ;;  %v7415_v55 = vmax.f32 %v7414_v40, 0.0  ;;  %v7417_v57 = vmax.f32 %v7416_v58, 0.0  ;;  %v3050_v35 = vadd.f32 %v3049_v9, %v2968_v48  ;;  %v7442_v58 = vld [vmem:[#allocation97_spill] sm:$0xff] }
 0x3c2   : > { %v2980_v59 = vmul.f32 %v2841_v8, %v7411_v26  ;;  %v3087_v37 = vadd.f32 %v3086_v30, %v2969_v18  ;;  %v3124_v51 = vadd.f32 %v3123_v6, %v2970_v16  ;;  %v3161_v23 = vadd.f32 %v3160_v36, %v2971_v31  ;;  %v7438_v30 = vld [vmem:[#allocation90_spill] sm:$0xff] }
 0x3c3   : > { %v2981_v33 = vmul.f32 %v2841_v8, %v7413_v1  ;;  %v2982_v20 = vmul.f32 %v2841_v8, %v7415_v55  ;;  %v2983_v41 = vmul.f32 %v2841_v8, %v7417_v57  ;;  %v7419_v53 = vmax.f32 %v7418_v49, 0.0  ;;  %v7446_v49 = vld [vmem:[#allocation98_spill] sm:$0xff] }
 0x3c4   : > { %v7421_v44 = vmax.f32 %v7420_v12, 0.0  ;;  %v7423_v7 = vmax.f32 %v7422_v0, 0.0  ;;  %v7425_v47 = vmax.f32 %v7424_v2, 0.0  ;;  %v3051_v10 = vadd.f32 %v3050_v35, %v2972_v62  ;;  %v2856_v55 = vpop.permute.xlu1 %2855  ;;  %v7448_v12 = vld [vmem:[#allocation102_spill] sm:$0xff]  ;;  %v7452_v2 = vld [vmem:[#allocation103_spill] sm:$0xff] }
 0x3c5   : > { %v2976_v19 = vmul.f32 %v2836_v54, %v7419_v53  ;;  %v3088_v27 = vadd.f32 %v3087_v37, %v2973_v32  ;;  %v3125_v39 = vadd.f32 %v3124_v51, %v2974_v17  ;;  %v3162_v8 = vadd.f32 %v3161_v23, %v2975_v38  ;;  %v7434_v17 = vld [vmem:[#allocation89_spill] sm:$0xff] }
 0x3c6   : > { %v2977_v25 = vmul.f32 %v2836_v54, %v7421_v44  ;;  %v2978_v45 = vmul.f32 %v2836_v54, %v7423_v7  ;;  %v2979_v22 = vmul.f32 %v2836_v54, %v7425_v47  ;;  %v7427_v42 = vmax.f32 %v7426_v43, 0.0  ;;  %v7440_v54 = vld [vmem:[#allocation94_spill] sm:$0xff]  ;;  %v7444_v37 = vld [vmem:[#allocation101_spill] sm:$0xff] }
 0x3c7   : > { %v7429_v15 = vmax.f32 %v7428_v63, 0.0  ;;  %v7431_v4 = vmax.f32 %v7430_v14, 0.0  ;;  %v7433_v50 = vmax.f32 %v7432_v56, 0.0  ;;  %v3052_v13 = vadd.f32 %v3051_v10, %v2976_v19  ;;  %v7454_v10 = vld [vmem:[#allocation108_spill] sm:$0xff] }
 0x3c8   : > { %v2988_v24 = vmul.f32 %v2851_v29, %v7427_v42  ;;  %v3089_v16 = vadd.f32 %v3088_v27, %v2977_v25  ;;  %v3126_v62 = vadd.f32 %v3125_v39, %v2978_v45  ;;  %v3163_v32 = vadd.f32 %v3162_v8, %v2979_v22  ;;  %v7456_v8 = vld [vmem:[#allocation104_spill] sm:$0xff]  ;;  %v2881_v42 = vpop.permute.xlu0 %2880  ;;  %v2866_v56 = vpop.permute.xlu1 %2865 }
 0x3c9   : > { %v2989_v28 = vmul.f32 %v2851_v29, %v7429_v15  ;;  %v2990_v48 = vmul.f32 %v2851_v29, %v7431_v4  ;;  %v2991_v18 = vmul.f32 %v2851_v29, %v7433_v50  ;;  %v7435_v38 = vmax.f32 %v7434_v17, 0.0  ;;  %v7458_v50 = vld [vmem:[#allocation105_spill] sm:$0xff] }
 0x3ca   : > { %v7437_v31 = vmax.f32 %v7436_v3, 0.0  ;;  %v7439_v6 = vmax.f32 %v7438_v30, 0.0  ;;  %v7441_v60 = vmax.f32 %v7440_v54, 0.0  ;;  %v3053_v46 = vadd.f32 %v3052_v13, %v2980_v59  ;;  %v7468_v54 = vld [vmem:[#allocation111_spill] sm:$0xff] }
 0x3cb   : > { %v2984_v52 = vmul.f32 %v2846_v11, %v7435_v38  ;;  %v3090_v1 = vadd.f32 %v3089_v16, %v2981_v33  ;;  %v3127_v29 = vadd.f32 %v3126_v62, %v2982_v20  ;;  %v3164_v40 = vadd.f32 %v3163_v32, %v2983_v41  ;;  %v7450_v33 = vld [vmem:[#allocation107_spill] sm:$0xff]  ;;  %v7460_v62 = vld [vmem:[#allocation109_spill] sm:$0xff]  ;;  %v7462_v38 = vld [vmem:[#allocation106_spill] sm:$0xff] }
 0x3cc   : > { %v2985_v9 = vmul.f32 %v2846_v11, %v7437_v31  ;;  %v2986_v36 = vmul.f32 %v2846_v11, %v7439_v6  ;;  %v2987_v26 = vmul.f32 %v2846_v11, %v7441_v60  ;;  %v7443_v57 = vmax.f32 %v7442_v58, 0.0  ;;  %v7464_v31 = vld [vmem:[#allocation110_spill] sm:$0xff] }
 0x3cd   : > { %v7445_v51 = vmax.f32 %v7444_v37, 0.0  ;;  %v7447_v53 = vmax.f32 %v7446_v49, 0.0  ;;  %v7449_v44 = vmax.f32 %v7448_v12, 0.0  ;;  %v3054_v0 = vadd.f32 %v3053_v46, %v2984_v52  ;;  %v7470_v46 = vld [vmem:[#allocation116_spill] sm:$0xff]  ;;  %v7476_v12 = vld [vmem:[#allocation117_spill] sm:$0xff] }
 0x3ce   : > { %v2992_v35 = vmul.f32 %v2856_v55, %v7443_v57  ;;  %v3091_v7 = vadd.f32 %v3090_v1, %v2985_v9  ;;  %v3128_v45 = vadd.f32 %v3127_v29, %v2986_v36  ;;  %v3165_v59 = vadd.f32 %v3164_v40, %v2987_v26  ;;  %v7472_v40 = vld [vmem:[#allocation112_spill] sm:$0xff] }
 0x3cf   : > { %v2993_v23 = vmul.f32 %v2856_v55, %v7445_v51  ;;  %v2994_v19 = vmul.f32 %v2856_v55, %v7447_v53  ;;  %v2995_v25 = vmul.f32 %v2856_v55, %v7449_v44  ;;  %v7451_v20 = vmax.f32 %v7450_v33, 0.0 }
 0x3d0   : > { %v7453_v47 = vmax.f32 %v7452_v2, 0.0  ;;  %v7455_v27 = vmax.f32 %v7454_v10, 0.0  ;;  %v7457_v11 = vmax.f32 %v7456_v8, 0.0  ;;  %v3055_v63 = vadd.f32 %v3054_v0, %v2988_v24  ;;  %v7478_v0 = vld [vmem:[#allocation114_spill] sm:$0xff]  ;;  %v2891_v2 = vpop.permute.xlu0 %2890  ;;  %v7482_v10 = vld [vmem:[#allocation123_spill] sm:$0xff] }
 0x3d1   : > { %v2996_v41 = vmul.f32 %v2861_v5, %v7451_v20  ;;  %v3092_v15 = vadd.f32 %v3091_v7, %v2989_v28  ;;  %v3129_v14 = vadd.f32 %v3128_v45, %v2990_v48  ;;  %v3166_v4 = vadd.f32 %v3165_v59, %v2991_v18  ;;  %v7466_v28 = vld [vmem:[#allocation115_spill] sm:$0xff]  ;;  %v7480_v59 = vld [vmem:[#allocation118_spill] sm:$0xff] }
 0x3d2   : > { %v2997_v22 = vmul.f32 %v2861_v5, %v7453_v47  ;;  %v2998_v39 = vmul.f32 %v2861_v5, %v7455_v27  ;;  %v2999_v43 = vmul.f32 %v2861_v5, %v7457_v11  ;;  %v7459_v13 = vmax.f32 %v7458_v50, 0.0  ;;  %v7484_v8 = vld [vmem:[#allocation119_spill] sm:$0xff] }
 0x3d3   : > { %v7461_v32 = vmax.f32 %v7460_v62, 0.0  ;;  %v7463_v52 = vmax.f32 %v7462_v38, 0.0  ;;  %v7465_v9 = vmax.f32 %v7464_v31, 0.0  ;;  %v3056_v6 = vadd.f32 %v3055_v63, %v2992_v35  ;;  %v2876_v35 = vpop.permute.xlu1 %2875  ;;  %v7486_v63 = vld [vmem:[#allocation124_spill] sm:$0xff]  ;;  %v7492_v31 = vld [vmem:[#allocation125_spill] sm:$0xff] }
 0x3d4   : > { %v3000_v16 = vmul.f32 %v2866_v56, %v7459_v13  ;;  %v3093_v5 = vadd.f32 %v3092_v15, %v2993_v23  ;;  %v3130_v36 = vadd.f32 %v3129_v14, %v2994_v19  ;;  %v3167_v24 = vadd.f32 %v3166_v4, %v2995_v25  ;;  %v7474_v23 = vld [vmem:[#allocation113_spill] sm:$0xff]  ;;  %v7488_v4 = vld [vmem:[#allocation120_spill] sm:$0xff] }
 0x3d5   : > { %v3001_v17 = vmul.f32 %v2866_v56, %v7461_v32  ;;  %v3002_v3 = vmul.f32 %v2866_v56, %v7463_v52  ;;  %v3003_v30 = vmul.f32 %v2866_v56, %v7465_v9  ;;  %v7467_v48 = vmax.f32 %v7466_v28, 0.0 }
 0x3d6   : > { %v7469_v60 = vmax.f32 %v7468_v54, 0.0  ;;  %v7471_v1 = vmax.f32 %v7470_v46, 0.0  ;;  %v7473_v55 = vmax.f32 %v7472_v40, 0.0  ;;  %v3057_v57 = vadd.f32 %v3056_v6, %v2996_v41  ;;  %v7494_v6 = vld [vmem:[#allocation122_spill] sm:$0xff] }
 0x3d7   : > { %v3004_v18 = vmul.f32 %v2871_v61, %v7467_v48  ;;  %v3094_v37 = vadd.f32 %v3093_v5, %v2997_v22  ;;  %v3131_v51 = vadd.f32 %v3130_v36, %v2998_v39  ;;  %v3168_v49 = vadd.f32 %v3167_v24, %v2999_v43  ;;  %v7496_v24 = vld [vmem:[#allocation126_spill] sm:$0xff] }
 0x3d8   : > { %v3005_v26 = vmul.f32 %v2871_v61, %v7469_v60  ;;  %v3006_v29 = vmul.f32 %v2871_v61, %v7471_v1  ;;  %v3007_v58 = vmul.f32 %v2871_v61, %v7473_v55  ;;  %v7475_v53 = vmax.f32 %v7474_v23, 0.0  ;;  %v2901_v23 = vpop.permute.xlu0 %2900 }
 0x3d9   : > { %v7477_v44 = vmax.f32 %v7476_v12, 0.0  ;;  %v7479_v7 = vmax.f32 %v7478_v0, 0.0  ;;  %v7481_v33 = vmax.f32 %v7480_v59, 0.0  ;;  %v3058_v47 = vadd.f32 %v3057_v57, %v3000_v16  ;;  %v2886_v16 = vpop.permute.xlu1 %2885  ;;  %v7506_v0 = vld [vmem:[#allocation129_spill] sm:$0xff] }
 0x3da   : > { %v3008_v19 = vmul.f32 %v2876_v35, %v7475_v53  ;;  %v3095_v61 = vadd.f32 %v3094_v37, %v3001_v17  ;;  %v3132_v41 = vadd.f32 %v3131_v51, %v3002_v3  ;;  %v3169_v22 = vadd.f32 %v3168_v49, %v3003_v30  ;;  %v7490_v17 = vld [vmem:[#allocation121_spill] sm:$0xff]  ;;  %v7504_v51 = vld [vmem:[#allocation128_spill] sm:$0xff] }
 0x3db   : > { %v3009_v25 = vmul.f32 %v2876_v35, %v7477_v44  ;;  %v3010_v45 = vmul.f32 %v2876_v35, %v7479_v7  ;;  %v3011_v20 = vmul.f32 %v2876_v35, %v7481_v33  ;;  %v7483_v27 = vmax.f32 %v7482_v10, 0.0  ;;  %v7508_v59 = vld [vmem:[#allocation133_spill] sm:$0xff] }
 0x3dc   : > { %v7485_v11 = vmax.f32 %v7484_v8, 0.0  ;;  %v7487_v15 = vmax.f32 %v7486_v63, 0.0  ;;  %v7489_v56 = vmax.f32 %v7488_v4, 0.0  ;;  %v3059_v13 = vadd.f32 %v3058_v47, %v3004_v18  ;;  %v7510_v47 = vld [vmem:[#allocation130_spill] sm:$0xff] }
 0x3dd   : > { %v3012_v39 = vmul.f32 %v2881_v42, %v7483_v27  ;;  %v3096_v62 = vadd.f32 %v3095_v61, %v3005_v26  ;;  %v3133_v32 = vadd.f32 %v3132_v41, %v3006_v29  ;;  %v3170_v38 = vadd.f32 %v3169_v22, %v3007_v58  ;;  %v7498_v26 = vld [vmem:[#allocation131_spill] sm:$0xff]  ;;  %v7502_v58 = vld [vmem:[#allocation132_spill] sm:$0xff]  ;;  %v7512_v22 = vld [vmem:[#allocation134_spill] sm:$0xff] }
 0x3de   : > { %v3013_v43 = vmul.f32 %v2881_v42, %v7485_v11  ;;  %v3014_v14 = vmul.f32 %v2881_v42, %v7487_v15  ;;  %v3015_v50 = vmul.f32 %v2881_v42, %v7489_v56  ;;  %v7491_v52 = vmax.f32 %v7490_v17, 0.0  ;;  %v7500_v29 = vld [vmem:[#allocation127_spill] sm:$0xff] }
 0x3df   : > { %v7493_v9 = vmax.f32 %v7492_v31, 0.0  ;;  %v7495_v5 = vmax.f32 %v7494_v6, 0.0  ;;  %v7497_v28 = vmax.f32 %v7496_v24, 0.0  ;;  %v3060_v54 = vadd.f32 %v3059_v13, %v3008_v19 }
 0x3e0   : > { %v3016_v3 = vmul.f32 %v2886_v16, %v7491_v52  ;;  %v3097_v60 = vadd.f32 %v3096_v62, %v3009_v25  ;;  %v3134_v42 = vadd.f32 %v3133_v32, %v3010_v45  ;;  %v3171_v18 = vadd.f32 %v3170_v38, %v3011_v20  ;;  %v2896_v25 = vpop.permute.xlu1 %2895  ;;  %v7520_v32 = vld [vmem:[#allocation136_spill] sm:$0xff] }
 0x3e1   : > { %v3017_v30 = vmul.f32 %v2886_v16, %v7493_v9  ;;  %v3018_v36 = vmul.f32 %v2886_v16, %v7495_v5  ;;  %v3019_v48 = vmul.f32 %v2886_v16, %v7497_v28  ;;  %v7499_v46 = vmax.f32 %v7498_v26, 0.0 }
 0x3e2   : > { %v7501_v40 = vmax.f32 %v7500_v29, 0.0  ;;  %v7503_v57 = vmax.f32 %v7502_v58, 0.0  ;;  %v7505_v49 = vmax.f32 %v7504_v51, 0.0  ;;  %v3061_v53 = vadd.f32 %v3060_v54, %v3012_v39 }
 0x3e3   : > { %v3020_v1 = vmul.f32 %v2891_v2, %v7499_v46  ;;  %v3098_v12 = vadd.f32 %v3097_v60, %v3013_v43  ;;  %v3135_v44 = vadd.f32 %v3134_v42, %v3014_v14  ;;  %v3172_v19 = vadd.f32 %v3171_v18, %v3015_v50  ;;  %v7514_v43 = vld [vmem:[#allocation139_spill] sm:$0xff]  ;;  %v7518_v50 = vld [vmem:[#allocation140_spill] sm:$0xff]  ;;  %v7528_v42 = vld [vmem:[#allocation142_spill] sm:$0xff] }
 0x3e4   : > { %v3021_v55 = vmul.f32 %v2891_v2, %v7501_v40  ;;  %v3022_v37 = vmul.f32 %v2891_v2, %v7503_v57  ;;  %v3023_v35 = vmul.f32 %v2891_v2, %v7505_v49  ;;  %v7507_v7 = vmax.f32 %v7506_v0, 0.0  ;;  %v7516_v14 = vld [vmem:[#allocation135_spill] sm:$0xff] }
 0x3e5   : > { %v7509_v33 = vmax.f32 %v7508_v59, 0.0  ;;  %v7511_v61 = vmax.f32 %v7510_v47, 0.0  ;;  %v7513_v10 = vmax.f32 %v7512_v22, 0.0  ;;  %v3062_v8 = vadd.f32 %v3061_v53, %v3016_v3  ;;  %v2906_v3 = vpop.permute.xlu1 %2905 }
 0x3e6   : > { %v3024_v45 = vmul.f32 %v2896_v25, %v7507_v7  ;;  %v3099_v2 = vadd.f32 %v3098_v12, %v3017_v30  ;;  %v3136_v11 = vadd.f32 %v3135_v44, %v3018_v36  ;;  %v3173_v39 = vadd.f32 %v3172_v19, %v3019_v48  ;;  %v7522_v30 = vld [vmem:[#allocation137_spill] sm:$0xff]  ;;  %v7526_v48 = vld [vmem:[#allocation138_spill] sm:$0xff] }
 0x3e7   : > { %v3025_v20 = vmul.f32 %v2896_v25, %v7509_v33  ;;  %v3026_v41 = vmul.f32 %v2896_v25, %v7511_v61  ;;  %v3027_v27 = vmul.f32 %v2896_v25, %v7513_v10  ;;  %v7515_v63 = vmax.f32 %v7514_v43, 0.0  ;;  %v7524_v36 = vld [vmem:[#allocation141_spill] sm:$0xff] }
 0x3e8   : > { %v7517_v4 = vmax.f32 %v7516_v14, 0.0  ;;  %v7519_v13 = vmax.f32 %v7518_v50, 0.0  ;;  %v7521_v38 = vmax.f32 %v7520_v32, 0.0  ;;  %v3063_v17 = vadd.f32 %v3062_v8, %v3020_v1 }
 0x3e9   : > { %v3028_v15 = vmul.f32 %v2901_v23, %v7515_v63  ;;  %v3100_v52 = vadd.f32 %v3099_v2, %v3021_v55  ;;  %v3137_v31 = vadd.f32 %v3136_v11, %v3022_v37  ;;  %v3174_v9 = vadd.f32 %v3173_v39, %v3023_v35 }
 0x3ea   : > { %v3029_v56 = vmul.f32 %v2901_v23, %v7517_v4  ;;  %v3030_v62 = vmul.f32 %v2901_v23, %v7519_v13  ;;  %v3031_v16 = vmul.f32 %v2901_v23, %v7521_v38  ;;  %v7523_v6 = vmax.f32 %v7522_v30, 0.0 }
 0x3eb   : > { %v7525_v24 = vmax.f32 %v7524_v36, 0.0  ;;  %v7527_v54 = vmax.f32 %v7526_v48, 0.0  ;;  %v7529_v18 = vmax.f32 %v7528_v42, 0.0  ;;  %v3064_v46 = vadd.f32 %v3063_v17, %v3024_v45 }
 0x3ec   : > { %v3032_v5 = vmul.f32 %v2906_v3, %v7523_v6  ;;  %v3101_v29 = vadd.f32 %v3100_v52, %v3025_v20  ;;  %v3138_v40 = vadd.f32 %v3137_v31, %v3026_v41  ;;  %v3175_v1 = vadd.f32 %v3174_v9, %v3027_v27  ;;  %v2737_v52 = vld [vmem:[#allocation4] sm:$0xf] }
 0x3ed   : > { %v3033_v28 = vmul.f32 %v2906_v3, %v7525_v24  ;;  %v3034_v60 = vmul.f32 %v2906_v3, %v7527_v54  ;;  %v3035_v26 = vmul.f32 %v2906_v3, %v7529_v18  ;;  %v3065_v55 = vadd.f32 %v3064_v46, %v3028_v15  ;;  %v7530_v15 = vld [vmem:[#allocation14_spill] sm:$0xff] }
 0x3ee   : > { %v3102_v58 = vadd.f32 %v3101_v29, %v3029_v56  ;;  %v3139_v57 = vadd.f32 %v3138_v40, %v3030_v62  ;;  %v3176_v37 = vadd.f32 %v3175_v1, %v3031_v16  ;;  %v4269_v25 = vmov 1966171168  }
 0x3ef   : > { %v3066_v51 = vadd.f32 %v3065_v55, %v3032_v5  ;;  %v3191_v0 = vunpack.c.l.s4 %v4269_v25  ;;  %v2746_v38 = vrot.slane %v6348_v21, %v4662_v34  ;;  %v7531_v30 = vlaneseq }
 0x3f0   : > { %v3103_v49 = vadd.f32 %v3102_v58, %v3033_v28  ;;  %v3140_v35 = vadd.f32 %v3139_v57, %v3034_v60  ;;  %v3177_v23 = vadd.f32 %v3176_v37, %v3035_v26 }
 0x3f1   : > { %v3067_v53 = vrot.slane %v3066_v51, 4  ;;  %v3192_v22 = vunpack.c.0.s8 %v3191_v0  ;;  %v2747_v9 = vmul.f32 %v2746_v38, %v2737_v52  ;;  %vm3216_vm12 = vcmp.lt.s32.totalorder %v7531_v30, 512 }
 0x3f2   : > { %v3104_v12 = vrot.slane %v3103_v49, 4  ;;  %v3141_v44 = vrot.slane %v3140_v35, 4  ;;  %v3178_v19 = vrot.slane %v3177_v23, 4 }
 0x3f3   : > { %v3068_v7 = vadd.f32 %v3067_v53, %v3066_v51  ;;  %v3195_v14 = vsub.s32 %v3192_v22, %v7530_v15 }
 0x3f4   : > { %v3105_v59 = vadd.f32 %v3104_v12, %v3103_v49  ;;  %v3142_v45 = vadd.f32 %v3141_v44, %v3140_v35  ;;  %v3179_v33 = vadd.f32 %v3178_v19, %v3177_v23 }
 0x3f5   : > { %v3069_v20 = vrot.slane %v3068_v7, 2 }
 0x3f6   : > { %v3106_v47 = vrot.slane %v3105_v59, 2  ;;  %v3143_v61 = vrot.slane %v3142_v45, 2  ;;  %v3180_v41 = vrot.slane %v3179_v33, 2 }
 0x3f7   : > { %v3070_v10 = vadd.f32 %v3069_v20, %v3068_v7 }
 0x3f8   : > { %v3107_v27 = vadd.f32 %v3106_v47, %v3105_v59  ;;  %v3144_v8 = vadd.f32 %v3143_v61, %v3142_v45  ;;  %v3181_v2 = vadd.f32 %v3180_v41, %v3179_v33 }
 0x3f9   : > { %v3071_v11 = vrot.slane %v3070_v10, 1 }
 0x3fa   : > { %v3108_v39 = vrot.slane %v3107_v27, 1  ;;  %v3145_v43 = vrot.slane %v3144_v8, 1  ;;  %v3182_v63 = vrot.slane %v3181_v2, 1 }
 0x3fb   : > { %v3072_v4 = vadd.f32 %v3071_v11, %v3070_v10 }
 0x3fc   : > { %v3109_v56 = vadd.f32 %v3108_v39, %v3107_v27  ;;  %v3146_v50 = vadd.f32 %v3145_v43, %v3144_v8  ;;  %v3183_v13 = vadd.f32 %v3182_v63, %v3181_v2 }
 0x3fe   : > { %v3188_v62 = vcombine.low %v3072_v4, %v3109_v56  ;;  %v3189_v32 = vcombine.low %v3146_v50, %v3183_v13 }
 0x400   : > { %v3196_v16 = vrot.slane %v3188_v62, %v3195_v14  ;;  %v3203_v17 = vrot.slane %v3189_v32, %v3195_v14 }
 0x402   : > { %v3204_v31 = vcombine.low %v3196_v16, %v3203_v17 }
 0x404   : > { %v3211_v3 = vrot.slane %v3204_v31, %v3195_v14  ;;  %3223 = sbr.rel (%p3707_p5) target bundleno = 1694 (0x69e), region = 64 }
 0x406   : > { %v3213_v6 = vadd.f32 %v3211_v3, %v2747_v9 }
 0x408   : > { %3218 = vst.msk [vmem:[#allocation4] sm:$0xf] %vm3216_vm12, %v3213_v6 }
 0x409   : > { %v3225_v5 = vld [vmem:[#allocation3] sm:$0x1]  ;;  %v3268_v36 = vld [vmem:[%s6881_s8 + $0xf8] sm:$0xff]  ;;  %v4270_v24 = vmov 0   ;;  %v3267_v54 = vld [vmem:[%s6881_s8 + $0xf0] sm:$0xff]  ;;  %vm3463_vm6 = vcmask 24576  }
 0x40a   : > { %v3300_v21 = vld [vmem:[%s6881_s8 + $0x1f8] sm:$0xff]  ;;  %4195 = vset.pattern.permute.xlu0 %v4270_v24  ;;  %3714 = vmatprep.subr.mxu0 %v3268_v36  ;;  %v3299_v60 = vld [vmem:[%s6881_s8 + $0x1f0] sm:$0xff]  ;;  %v3266_v26 = vld [vmem:[%s6881_s8 + $0xe8] sm:$0xff] }
 0x40b   : > { %v3252_v28 = vld [vmem:[%s6881_s8 + $0x78] sm:$0xff]  ;;  %3228 = vperm.xlu0 %4195, %v3225_v5   ;;  %3749 = vmatprep.subr.mxu1 %v3300_v21  ;;  %v3251_v42 = vld [vmem:[%s6881_s8 + $0x70] sm:$0xff]  ;;  %v3298_v46 = vld [vmem:[%s6881_s8 + $0x1e8] sm:$0xff] }
 0x40c   : > { %v3284_v48 = vld [vmem:[%s6881_s8 + $0x178] sm:$0xff]  ;;  %v3283_v18 = vld [vmem:[%s6881_s8 + $0x170] sm:$0xff]  ;;  %3715 = vmatpush3.msra.mxu0 %v3252_v28  ;;  %v3250_v29 = vld [vmem:[%s6881_s8 + $0x68] sm:$0xff] }
 0x40d   : > { %3750 = vmatpush3.msra.mxu1 %v3284_v48  ;;  %3716 = vmatprep.subr.mxu0 %v3267_v54  ;;  %v3282_v40 = vld [vmem:[%s6881_s8 + $0x168] sm:$0xff]  ;;  %v3265_v1 = vld [vmem:[%s6881_s8 + $0xe0] sm:$0xff]  ;;  %v3264_v37 = vld [vmem:[%s6881_s8 + $0xd8] sm:$0xff] }
 0x40e   : > { %3751 = vmatprep.subr.mxu1 %v3299_v60  ;;  %3717 = vmatpush3.msra.mxu0 %v3251_v42  ;;  %v3297_v55 = vld [vmem:[%s6881_s8 + $0x1e0] sm:$0xff]  ;;  %v3296_v51 = vld [vmem:[%s6881_s8 + $0x1d8] sm:$0xff]  ;;  %v3263_v23 = vld [vmem:[%s6881_s8 + $0xd0] sm:$0xff] }
 0x40f   : > { %3752 = vmatpush3.msra.mxu1 %v3283_v18  ;;  %3718 = vmatprep.subr.mxu0 %v3266_v26  ;;  %v3249_v58 = vld [vmem:[%s6881_s8 + $0x60] sm:$0xff]  ;;  %v3248_v49 = vld [vmem:[%s6881_s8 + $0x58] sm:$0xff]  ;;  %v3295_v53 = vld [vmem:[%s6881_s8 + $0x1d0] sm:$0xff] }
 0x410   : > { %3753 = vmatprep.subr.mxu1 %v3298_v46  ;;  %v3281_v57 = vld [vmem:[%s6881_s8 + $0x160] sm:$0xff]  ;;  %3719 = vmatpush3.msra.mxu0 %v3250_v29  ;;  %v3280_v35 = vld [vmem:[%s6881_s8 + $0x158] sm:$0xff]  ;;  %v3247_v12 = vld [vmem:[%s6881_s8 + $0x50] sm:$0xff] }
 0x411   : > { %3754 = vmatpush3.msra.mxu1 %v3282_v40  ;;  %3720 = vmatprep.subr.mxu0 %v3265_v1  ;;  %v3279_v44 = vld [vmem:[%s6881_s8 + $0x150] sm:$0xff]  ;;  %v3262_v19 = vld [vmem:[%s6881_s8 + $0xc8] sm:$0xff]  ;;  %v3261_v59 = vld [vmem:[%s6881_s8 + $0xc0] sm:$0xff] }
 0x412   : > { %3755 = vmatprep.subr.mxu1 %v3297_v55  ;;  %3721 = vmatpush3.msra.mxu0 %v3249_v58  ;;  %v3294_v25 = vld [vmem:[%s6881_s8 + $0x1c8] sm:$0xff]  ;;  %v3293_v45 = vld [vmem:[%s6881_s8 + $0x1c0] sm:$0xff]  ;;  %v3260_v47 = vld [vmem:[%s6881_s8 + $0xb8] sm:$0xff] }
 0x413   : > { %3756 = vmatpush3.msra.mxu1 %v3281_v57  ;;  %3722 = vmatprep.subr.mxu0 %v3264_v37  ;;  %v3246_v0 = vld [vmem:[%s6881_s8 + $0x48] sm:$0xff]  ;;  %v3245_v33 = vld [vmem:[%s6881_s8 + $0x40] sm:$0xff]  ;;  %v3292_v61 = vld [vmem:[%s6881_s8 + $0x1b8] sm:$0xff] }
 0x414   : > { %3757 = vmatprep.subr.mxu1 %v3296_v51  ;;  %3723 = vmatpush3.msra.mxu0 %v3248_v49  ;;  %v3278_v7 = vld [vmem:[%s6881_s8 + $0x148] sm:$0xff]  ;;  %v3277_v20 = vld [vmem:[%s6881_s8 + $0x140] sm:$0xff]  ;;  %v3244_v41 = vld [vmem:[%s6881_s8 + $0x38] sm:$0xff] }
 0x415   : > { %3758 = vmatpush3.msra.mxu1 %v3280_v35  ;;  %3724 = vmatprep.subr.mxu0 %v3263_v23  ;;  %v3276_v22 = vld [vmem:[%s6881_s8 + $0x138] sm:$0xff]  ;;  %v3259_v10 = vld [vmem:[%s6881_s8 + $0xb0] sm:$0xff]  ;;  %v3258_v11 = vld [vmem:[%s6881_s8 + $0xa8] sm:$0xff] }
 0x416   : > { %3759 = vmatprep.subr.mxu1 %v3295_v53  ;;  %3725 = vmatpush3.msra.mxu0 %v3247_v12  ;;  %v3291_v27 = vld [vmem:[%s6881_s8 + $0x1b0] sm:$0xff]  ;;  %v3290_v39 = vld [vmem:[%s6881_s8 + $0x1a8] sm:$0xff]  ;;  %v3257_v15 = vld [vmem:[%s6881_s8 + $0xa0] sm:$0xff] }
 0x417   : > { %3760 = vmatpush3.msra.mxu1 %v3279_v44  ;;  %3726 = vmatprep.subr.mxu0 %v3262_v19  ;;  %v3243_v8 = vld [vmem:[%s6881_s8 + $0x30] sm:$0xff]  ;;  %v3242_v43 = vld [vmem:[%s6881_s8 + $0x28] sm:$0xff]  ;;  %v3289_v14 = vld [vmem:[%s6881_s8 + $0x1a0] sm:$0xff] }
 0x418   : > { %3761 = vmatprep.subr.mxu1 %v3294_v25  ;;  %3727 = vmatpush3.msra.mxu0 %v3246_v0  ;;  %v3275_v2 = vld [vmem:[%s6881_s8 + $0x130] sm:$0xff]  ;;  %v3274_v63 = vld [vmem:[%s6881_s8 + $0x128] sm:$0xff]  ;;  %v3241_v4 = vld [vmem:[%s6881_s8 + $0x20] sm:$0xff] }
 0x419   : > { %3762 = vmatpush3.msra.mxu1 %v3278_v7  ;;  %3728 = vmatprep.subr.mxu0 %v3261_v59  ;;  %v3273_v56 = vld [vmem:[%s6881_s8 + $0x120] sm:$0xff]  ;;  %v3256_v50 = vld [vmem:[%s6881_s8 + $0x98] sm:$0xff]  ;;  %v3255_v38 = vld [vmem:[%s6881_s8 + $0x90] sm:$0xff] }
 0x41a   : > { %3763 = vmatprep.subr.mxu1 %v3293_v45  ;;  %3729 = vmatpush3.msra.mxu0 %v3245_v33  ;;  %v3288_v13 = vld [vmem:[%s6881_s8 + $0x198] sm:$0xff]  ;;  %v3287_v16 = vld [vmem:[%s6881_s8 + $0x190] sm:$0xff]  ;;  %v3254_v31 = vld [vmem:[%s6881_s8 + $0x88] sm:$0xff] }
 0x41b   : > { %3764 = vmatpush3.msra.mxu1 %v3277_v20  ;;  %3730 = vmatprep.subr.mxu0 %v3260_v47  ;;  %v3240_v62 = vld [vmem:[%s6881_s8 + $0x18] sm:$0xff]  ;;  %v3239_v17 = vld [vmem:[%s6881_s8 + $0x10] sm:$0xff]  ;;  %v3286_v9 = vld [vmem:[%s6881_s8 + $0x188] sm:$0xff] }
 0x41c   : > { %3765 = vmatprep.subr.mxu1 %v3292_v61  ;;  %3731 = vmatpush3.msra.mxu0 %v3244_v41  ;;  %v3272_v32 = vld [vmem:[%s6881_s8 + $0x118] sm:$0xff]  ;;  %v3271_v52 = vld [vmem:[%s6881_s8 + $0x110] sm:$0xff]  ;;  %v3238_v3 = vld [vmem:[%s6881_s8 + $0x8] sm:$0xff] }
 0x41d   : > { %3766 = vmatpush3.msra.mxu1 %v3276_v22  ;;  %3732 = vmatprep.subr.mxu0 %v3259_v10  ;;  %v3270_v30 = vld [vmem:[%s6881_s8 + $0x108] sm:$0xff]  ;;  %v3253_v6 = vld [vmem:[%s6881_s8 + $0x80] sm:$0xff]  ;;  %v7532_v42 = vld [vmem:[#allocation15_spill] sm:$0xff] }
 0x41e   : > { %3767 = vmatprep.subr.mxu1 %v3291_v27  ;;  %3733 = vmatpush3.msra.mxu0 %v3243_v8  ;;  %v3285_v5 = vld [vmem:[%s6881_s8 + $0x180] sm:$0xff]  ;;  %v7533_v26 = vld [vmem:[#allocation14_spill] sm:$0xff] }
 0x41f   : > { %3768 = vmatpush3.msra.mxu1 %v3275_v2  ;;  %3734 = vmatprep.subr.mxu0 %v3258_v11  ;;  %v3237_v36 = vld [vmem:[%s6881_s8] sm:$0xff]  ;;  %v7534_v46 = vsub.s32 3, %v7533_v26  ;;  %v7535_v1 = vsub.s32 2, %v7533_v26 }
 0x420   : > { %3769 = vmatprep.subr.mxu1 %v3290_v39  ;;  %3735 = vmatpush3.msra.mxu0 %v3242_v43  ;;  %v3269_v21 = vld [vmem:[%s6881_s8 + $0x100] sm:$0xff] }
 0x421   : > { %3770 = vmatpush3.msra.mxu1 %v3274_v63  ;;  %3736 = vmatprep.subr.mxu0 %v3257_v15  ;;  %v3224_v48 = vld [vmem:[#allocation4] sm:$0xf]  ;;  %v3301_v37 = vld [vmem:[%s6882_s9] sm:$0x1] }
 0x422   : > { %3771 = vmatprep.subr.mxu1 %v3289_v14  ;;  %3737 = vmatpush3.msra.mxu0 %v3241_v4 }
 0x423   : > { %3772 = vmatpush3.msra.mxu1 %v3273_v56  ;;  %3738 = vmatprep.subr.mxu0 %v3256_v50 }
 0x424   : > { %3773 = vmatprep.subr.mxu1 %v3288_v13  ;;  %3739 = vmatpush3.msra.mxu0 %v3240_v62 }
 0x425   : > { %3774 = vmatpush3.msra.mxu1 %v3272_v32  ;;  %3740 = vmatprep.subr.mxu0 %v3255_v38 }
 0x426   : > { %3775 = vmatprep.subr.mxu1 %v3287_v16  ;;  %3741 = vmatpush3.msra.mxu0 %v3239_v17 }
 0x427   : > { %3776 = vmatpush3.msra.mxu1 %v3271_v52  ;;  %3742 = vmatprep.subr.mxu0 %v3254_v31 }
 0x428   : > { %3777 = vmatprep.subr.mxu1 %v3286_v9  ;;  %3743 = vmatpush3.msra.mxu0 %v3238_v3 }
 0x429   : > { %3778 = vmatpush3.msra.mxu1 %v3270_v30  ;;  %3744 = vmatprep.subr.mxu0 %v3253_v6 }
 0x42a   : > { %3779 = vmatprep.subr.mxu1 %v3285_v5  ;;  %3745 = vmatpush3.msra.mxu0 %v3237_v36 }
 0x42b   : > { %3780 = vmatpush3.msra.mxu1 %v3269_v21 }
 0x486   : > { %v3229_v24 = vpop.permute.xlu0 %3228 }
 0x487   : > { %v3234_v28 = vrot.slane %v3229_v24, %v4662_v34 }
 0x489   : > { %4196 = vrcp.f32 %v3234_v28 }
 0x496   : > { %v4197_v54 = vpop.eup %4196 }
 0x497   : > { %v3236_v60 = vmul.f32 %v4197_v54, %v3224_v48 }
 0x499   : > { %v3310_v18 = vrot.slane %v3236_v60, %v7532_v42  ;;  %v3318_v29 = vrot.slane %v3236_v60, %v7534_v46  ;;  %v3306_v40 = vrot.slane %v3236_v60, %v4662_v34  ;;  %v3314_v55 = vrot.slane %v3236_v60, %v7535_v1 }
 0x49b   : > { %3387 = vmatprep.mubr.f32.mxu0 %v3310_v18  ;;  %3457 = vmatprep.mubr.f32.mxu1 %v3318_v29 }
 0x49c   : > { %3388 = vmatmul.mubr.f32.vlgmr.msra.gmra.mxu0 %v3306_v40  ;;  %3458 = vmatmul.mubr.f32.vlgmr.msra.gmra.mxu1 %v3314_v55 }
 0x55c   : > { %v3746_v58 = vpop.f32.mrf.mxu0  ;;  %v3781_v57 = vpop.f32.mrf.mxu1 }
 0x55e   : > { %v3747_v51 = vpop.f32.mrf.mxu0  ;;  %v3782_v49 = vpop.f32.mrf.mxu1 }
 0x55f   : > { %v3748_v35 = vadd.f32 %v3747_v51, %v3746_v58  ;;  %v3783_v53 = vadd.f32 %v3782_v49, %v3781_v57 }
 0x561   : > { %v3390_v23 = vadd.f32 %v3748_v35, %v3301_v37 }
 0x563   : > { %v3460_v34 = vadd.f32 %v3783_v53, %v3390_v23 }
 0x565   : > { %v3465_v12 = vsel %vm3463_vm6, %v3460_v34, -inf  ;;  %3464 = vst.msk [vmem:[#allocation8] sm:$0x1] %vm3463_vm6, %v3460_v34 }
 0x566   : > { %3466 = vmax.xlane.f32.xlu0 %v3465_v12 }
 0x5ef   : > { %v3467_v44 = vpop.xlane.xlu0 %3466 }
 0x5f0   : > { %v3468_v19 = vsub.f32 %v3460_v34, %v3467_v44 }
 0x5f2   : > { %v3469_v25 = vmul.f32 1.442695, %v3468_v19 }
 0x5f4   : > { %4198 = vpow2.f32 %v3469_v25 }
 0x601   : > { %v4199_v0 = vpop.eup %4198 }
 0x602   : > { %v3471_v7 = vsel %vm3463_vm6, %v4199_v0, 0.0 }
 0x603   : > { %3472 = vadd.xlane.f32.xlu1 %v3471_v7 }
 0x68c   : > { %v3473_v59 = vpop.xlane.xlu1 %3472 }
 0x68d   : > { %4200 = vrcp.f32 %v3473_v59 }
 0x69a   : > { %v4201_v45 = vpop.eup %4200 }
 0x69b   : > { %v3475_v33 = vmul.f32 %v4201_v45, %v4199_v0 }
 0x69d   : > { %3476 = vst.msk [vmem:[#allocation10] sm:$0x1] %vm3463_vm6, %v3475_v33 }
 0x69e PF: > { %p3792_p6 = scmp.eq.s32.totalorder %s4345_s22, 1  ;;  %s4271_s30 = smov [#allocation8]  }
 0x69f   : > { %s3484_s12 = sshll.u32 %s4271_s30, 4  ;;  %s4272_s13 = smov [#allocation10]   ;;  %s3485_s12 = int_to_ptr.vmem [resolvable:$true] %s3484_s12 }
 0x6a0   : > { %s3495_s14 = sshll.u32 %s4272_s13, 4  ;;  %s4202_s15 = scalar_lea.vmem %s3485_s12, 16  ;;  %s3496_s14 = int_to_ptr.vmem [resolvable:$true] %s3495_s14 }
 0x6a1   : > { %p4203_p7 = scmp.ne.s32.totalorder %s3485_s12, %s4202_s15  ;;  %s4208_s16 = scalar_lea.vmem %s3485_s12, 32 }
 0x6a2   : > { %p4209_p10 = scmp.lt.s32.totalorder %s3485_s12, %s3485_s12  ;;  %p4210_p11 = scmp.lt.s32.totalorder %s4208_s16, %s4202_s15 }
 0x6a3   : > { %p4204_p8 = pnand %p4203_p7, %p3792_p6 }
 0x6a4   : > { %p4211_p12 = por %p4210_p11, %p4209_p10 }
 0x6a5   : > { %p4205_p9 = pneg %p4204_p8 }
 0x6a7   : > { %p4212_p13 = pnand %p4211_p12, %p4205_p9 }
 0x6a9   : > { %4215 = shalt.err (!%p4212_p13)
}
 0x6aa   : > { %3785 = dma.vmem_to_hbm [thread:$0]  (%p3792_p6), %s3485_s12, 16, %s6883_s10, [#allocation9]  }
 0x6ab   : > { %s4226_s19 = scalar_lea.vmem %s3496_s14, 16  ;;  %s4232_s20 = scalar_lea.vmem %s3496_s14, 32 }
 0x6ac   : > { %p4227_p0 = scmp.ne.s32.totalorder %s3496_s14, %s4226_s19  ;;  %p4233_p3 = scmp.lt.s32.totalorder %s3496_s14, %s3496_s14 }
 0x6ad   : > { %p4234_p4 = scmp.lt.s32.totalorder %s4232_s20, %s4226_s19 }
 0x6ae   : > { %p4228_p1 = pnand %p4227_p0, %p3792_p6 }
 0x6af   : > { %p4235_p5 = por %p4234_p4, %p4233_p3 }
 0x6b0   : > { %p4229_p2 = pneg %p4228_p1 }
 0x6b2   : > { %p4236_p7 = pnand %p4235_p5, %p4229_p2 }
 0x6b4   : > { %4239 = shalt.err (!%p4236_p7)
}
 0x6b5   : > { %3787 = dma.vmem_to_hbm [thread:$0]  (%p3792_p6), %s3496_s14, 16, %s6884_s11, [#allocation11]  }
 0x6b6   : > { %4255 = dma.done.wait (%p3792_p6), [#allocation9], 16  }
 0x6b7   : > { %4257 = vsyncadd (%p3792_p6), [#allocation9], 4294967280 }
 0x6b8   : > { %4259 = dma.done.wait (%p3792_p6), [#allocation11], 16  }
 0x6b9   : > { %4261 = vsyncadd (%p3792_p6), [#allocation11], 4294967280 }
 0x6ba PF: > { %s27_s21 = sadd.s32 1, %s4264_s21  }
 0x6bb   : > { %p24_p8 = scmp.ge.s32.totalorder %s27_s21, 4  }
 0x6bd   :  { %26 = sbr.rel (!%p24_p8) target bundleno = 5 (0x5), region = 99 }
 0x6c2   :  { %3512 = vsyncpa [#allocation9], 1 }
 0x6c3   :  { %3514 = vsyncpa [#allocation9 + $0x1], 1 }
 0x6c4   :  { %3515 = vsyncpa [#allocation11], 1 }

// kernel: tpu_custom_call.1
= control target key start
LH: loop header
LB: loop body
LE: loop exit
PB: predicated region body
PF: predicated region fallthrough
CT: control target
= control target key end

     0   :  { %s6873_s0 = inlined_call_operand.<no memory space> [shape: s32[1], index: 0, kind: input, shape index: {}]   ;;  %s6874_s1 = inlined_call_operand.vmem [shape: bf16[512,32], index: 1, kind: input, shape index: {}]   ;;  %s6875_s2 = inlined_call_operand.vmem [shape: bf16[32,512], index: 2, kind: input, shape index: {}]   ;;  %s6876_s3 = inlined_call_operand.vmem [shape: f32[1,512], index: 3, kind: input, shape index: {}]   ;;  %s6877_s4 = inlined_call_operand.vmem [shape: bf16[512,256], index: 4, kind: input, shape index: {}]   ;;  %s6878_s5 = inlined_call_operand.vmem [shape: f32[1,256], index: 5, kind: input, shape index: {}]   ;;  %s6879_s6 = inlined_call_operand.vmem [shape: f32[1,128], index: 6, kind: input, shape index: {}]   ;;  %s6880_s7 = inlined_call_operand.<no memory space> [shape: f32[1,1], index: 7, kind: input, shape index: {}]   ;;  %s6881_s8 = inlined_call_operand.vmem [shape: f32[512,4], index: 8, kind: input, shape index: {}]   ;;  %s6882_s9 = inlined_call_operand.vmem [shape: f32[1,4], index: 9, kind: input, shape index: {}]   ;;  %s6883_s10 = inlined_call_operand.hbm [shape: f32[1,4], index: 10, kind: output, shape index: {0}]   ;;  %s6884_s11 = inlined_call_operand.hbm [shape: f32[1,4], index: 11, kind: output, shape index: {1}]  }
   0x1   :  { %17 = sst [smem:[#allocation6]] %s6873_s0  ;;  %v18_v0 = vstv %s6880_s7 }
   0x2   :  { %19 = vst [vmem:[#allocation7] sm:$0x1] %v18_v0 }
   0x3   :  { %20 = vsyncpa [#allocation9], 0 }
   0x4   :  { %21 = vsyncpa [#allocation11], 0  ;;  %s4339_s21 = smov 0  }
   0x5 LB: > { %s4345_s22 = sadd.s32 4294967295, %s4264_s21   ;;  %p3548_p0 = scmp.ge.s32.totalorder %s4264_s21, 1  ;;  %s4264_s21 = sphi %s4339_s21, %s27_s21  }
   0x6   : > { %p312_p1 = scmp.lt.s32.totalorder %s4264_s21, 3 }
   0x8   : > { %p313_p2 = pnand %p3548_p0, %p312_p1 }
   0xa   : > { %316 = sbr.rel (%p313_p2) target bundleno = 1722 (0x6ba), region = 56 }
   0xf   : > { %s3549_s0 = sshll.u32 %s4345_s22, 5  ;;  %p3551_p4 = scmp.ne.s32.totalorder %s4345_s22, 0 }
  0x10   : > { %p346_p3 = scmp.lt.s32.totalorder %s3549_s0, 63 }
  0x11   : > { %355 = sbr.rel (%p3551_p4) target bundleno = 26 (0x1a), region = 60 }
  0x12   : > { %s7537_s0 = smov (!%p346_p3, %s3549_s0), 63 }
  0x13   : > { %s3550_s7 = sshll.u32 %s7537_s0, 2 }
  0x14   : > { %s4353_s25 = scalar_lea.vmem %s6874_s1, %s3550_s7 }
  0x16   : > { %vm356_vm0 = vcmask 0   ;;  %v359_v1 = vlaneseq  ;;  %v4266_v2 = vmov -1e+30   ;;  %v4267_v3 = vmov 0.0  }
  0x17   : > { %357 = vst.msk [vmem:[#allocation2] sm:$0x1] %vm356_vm0, %v4266_v2  ;;  %358 = vst.msk [vmem:[#allocation3] sm:$0x1] %vm356_vm0, %v4267_v3 }
  0x18   : > { %vm361_vm1 = vcmp.lt.s32.totalorder %v359_v1, 512 }
  0x19   : > { %363 = vst.msk [vmem:[#allocation4] sm:$0xf] %vm361_vm1, %v4267_v3 }
  0x1a PF: > { %v3813_v4 = vld [vmem:[%s6875_s2 + $0x24] ss:$16 sps:$4 sm:$0xff]   ;;  %v3815_v5 = vld [vmem:[%s6875_s2 + $0x2c] ss:$16 sps:$4 sm:$0xff]   ;;  %v4268_v6 = vmov 0   ;;  %vm546_vm2 = vcmask 261120  }
  0x1b   : > { %627 = vmatprep.mubr.bf16.mxu0 %v4268_v6  ;;  %820 = vmatprep.mubr.bf16.mxu1 %v4268_v6  ;;  %v3817_v7 = vld [vmem:[%s6875_s2 + $0x20] ss:$16 sps:$4 sm:$0xff]   ;;  %v3818_v8 = vld [vmem:[%s6875_s2 + $0x28] ss:$16 sps:$4 sm:$0xff]   ;;  %v3819_v9 = vld [vmem:[%s6875_s2 + $0x4] ss:$16 sps:$4 sm:$0xff]  }
  0x1c   : > { %607 = vmatprep.subr.bf16.mxu0 %v3813_v4  ;;  %3811 = vset.pattern.permute.xlu0 %v4268_v6  ;;  %v3821_v10 = vld [vmem:[%s6875_s2 + $0xc] ss:$16 sps:$4 sm:$0xff]   ;;  %v3823_v11 = vld [vmem:[%s6875_s2] ss:$16 sps:$4 sm:$0xff]   ;;  %v3824_v12 = vld [vmem:[%s6875_s2 + $0x8] ss:$16 sps:$4 sm:$0xff]  }
  0x1d   : > { %800 = vmatprep.subr.bf16.mxu1 %v3815_v5  ;;  %3812 = vset.pattern.permute.xlu1 %v4268_v6  ;;  %v3825_v13 = vld [vmem:[%s4353_s25] sm:$0xff]   ;;  %v3826_v14 = vld [vmem:[%s4353_s25 + $0x8] sm:$0xff]   ;;  %v3837_v15 = vld [vmem:[%s6877_s4 + $0x74] ss:$8 sps:$4 sm:$0xff]   ;;  %s2420_s12 = sld [smem:[#allocation6]]  ;;  %s3706_s13 = sshll.u32 %s4345_s22, 8 }
  0x1e   : > { %608 = vmatpush1.bf16.msra.mxu0 %v3817_v7  ;;  %801 = vmatpush1.bf16.msra.mxu1 %v3818_v8  ;;  %v3835_v16 = vld [vmem:[%s6877_s4 + $0x70] ss:$8 sps:$4 sm:$0xff]   ;;  %v3840_v17 = vld [vmem:[%s6877_s4 + $0x174] ss:$8 sps:$4 sm:$0xff]   ;;  %v3844_v19 = vld [vmem:[%s6877_s4 + $0x64] ss:$8 sps:$4 sm:$0xff]  }
  0x1f   : > { %609 = vmatprep.subr.bf16.mxu0 %v3819_v9  ;;  %802 = vmatprep.subr.bf16.mxu1 %v3821_v10  ;;  %v3838_v18 = vld [vmem:[%s6877_s4 + $0x170] ss:$8 sps:$4 sm:$0xff]   ;;  %v3842_v20 = vld [vmem:[%s6877_s4 + $0x60] ss:$8 sps:$4 sm:$0xff]   ;;  %v3847_v21 = vld [vmem:[%s6877_s4 + $0x164] ss:$8 sps:$4 sm:$0xff]  }
  0x20   : > { %v3845_v22 = vld [vmem:[%s6877_s4 + $0x160] ss:$8 sps:$4 sm:$0xff]   ;;  %v3827_v23 = vld [vmem:[%s4353_s25 + $0x10] sm:$0xff]   ;;  %v3858_v28 = vld [vmem:[%s6877_s4 + $0x44] ss:$8 sps:$4 sm:$0xff]   ;;  %vm2487_vm12 = vcmask 7168  }
  0x21   : > { %v3851_v24 = vld [vmem:[%s6877_s4 + $0x54] ss:$8 sps:$4 sm:$0xff]   ;;  %v3849_v25 = vld [vmem:[%s6877_s4 + $0x50] ss:$8 sps:$4 sm:$0xff]   ;;  %v3861_v29 = vld [vmem:[%s6877_s4 + $0x144] ss:$8 sps:$4 sm:$0xff]  }
  0x22   : > { %610 = vmatpush1.bf16.msra.mxu0 %v3823_v11  ;;  %803 = vmatpush1.bf16.msra.mxu1 %v3824_v12  ;;  %v3854_v26 = vld [vmem:[%s6877_s4 + $0x154] ss:$8 sps:$4 sm:$0xff]   ;;  %v3852_v27 = vld [vmem:[%s6877_s4 + $0x150] ss:$8 sps:$4 sm:$0xff]   ;;  %v3856_v31 = vld [vmem:[%s6877_s4 + $0x40] ss:$8 sps:$4 sm:$0xff]  }
  0x23   : > { %1569 = vmatprep.subr.bf16.mxu0 %v3837_v15  ;;  %1762 = vmatprep.subr.bf16.mxu1 %v3840_v17  ;;  %v3828_v30 = vld [vmem:[%s4353_s25 + $0x18] sm:$0xff]   ;;  %v3859_v32 = vld [vmem:[%s6877_s4 + $0x140] ss:$8 sps:$4 sm:$0xff]   ;;  %v3872_v37 = vld [vmem:[%s6877_s4 + $0x24] ss:$8 sps:$4 sm:$0xff]   ;;  %p3707_p5 = scmp.ne.s32.totalorder %s4345_s22, 1 }
  0x24   : > { %v3865_v33 = vld [vmem:[%s6877_s4 + $0x34] ss:$8 sps:$4 sm:$0xff]   ;;  %v3863_v34 = vld [vmem:[%s6877_s4 + $0x30] ss:$8 sps:$4 sm:$0xff]   ;;  %v3875_v38 = vld [vmem:[%s6877_s4 + $0x124] ss:$8 sps:$4 sm:$0xff]  }
  0x25   : > { %3576 = vmatmul.mubr.msk.bf16.vlgmr.msra.gmra.mxu0 %vm546_vm2, %v3825_v13  ;;  %3592 = vmatmul.mubr.msk.bf16.vlgmr.msra.gmra.mxu1 %vm546_vm2, %v3825_v13  ;;  %v3868_v35 = vld [vmem:[%s6877_s4 + $0x134] ss:$8 sps:$4 sm:$0xff]   ;;  %v3866_v36 = vld [vmem:[%s6877_s4 + $0x130] ss:$8 sps:$4 sm:$0xff]   ;;  %v3870_v39 = vld [vmem:[%s6877_s4 + $0x20] ss:$8 sps:$4 sm:$0xff]  }
  0x26   : > { %637 = vmatprep.mubr.bf16.mxu0 %v4268_v6  ;;  %830 = vmatprep.mubr.bf16.mxu1 %v4268_v6  ;;  %v3873_v40 = vld [vmem:[%s6877_s4 + $0x120] ss:$8 sps:$4 sm:$0xff]   ;;  %v3879_v41 = vld [vmem:[%s6877_s4 + $0x14] ss:$8 sps:$4 sm:$0xff]   ;;  %v3877_v43 = vld [vmem:[%s6877_s4 + $0x10] ss:$8 sps:$4 sm:$0xff]  }
  0x27   : > { %1570 = vmatpush1.bf16.msra.mxu0 %v3835_v16  ;;  %1763 = vmatpush1.bf16.msra.mxu1 %v3838_v18  ;;  %v3829_v42 = vld [vmem:[%s4353_s25 + $0x20] sm:$0xff]   ;;  %v3882_v44 = vld [vmem:[%s6877_s4 + $0x114] ss:$8 sps:$4 sm:$0xff]   ;;  %v3880_v45 = vld [vmem:[%s6877_s4 + $0x110] ss:$8 sps:$4 sm:$0xff]  }
  0x28   : > { %1571 = vmatprep.subr.bf16.mxu0 %v3844_v19  ;;  %1764 = vmatprep.subr.bf16.mxu1 %v3847_v21  ;;  %v3885_v46 = vld [vmem:[%s6877_s4 + $0x4] ss:$8 sps:$4 sm:$0xff]   ;;  %v3883_v48 = vld [vmem:[%s6877_s4] ss:$8 sps:$4 sm:$0xff]   ;;  %v3891_v50 = vld [vmem:[%s6877_s4 + $0xf4] ss:$8 sps:$4 sm:$0xff]  }
  0x29   : > { %v3888_v47 = vld [vmem:[%s6877_s4 + $0x104] ss:$8 sps:$4 sm:$0xff]   ;;  %v3886_v49 = vld [vmem:[%s6877_s4 + $0x100] ss:$8 sps:$4 sm:$0xff]   ;;  %v3889_v52 = vld [vmem:[%s6877_s4 + $0xf0] ss:$8 sps:$4 sm:$0xff]  }
  0x2a   : > { %v3830_v51 = vld [vmem:[%s4353_s25 + $0x28] sm:$0xff]   ;;  %v3894_v53 = vld [vmem:[%s6877_s4 + $0x1f4] ss:$8 sps:$4 sm:$0xff]   ;;  %v3892_v54 = vld [vmem:[%s6877_s4 + $0x1f0] ss:$8 sps:$4 sm:$0xff]  }
  0x2b   : > { %1572 = vmatpush1.bf16.msra.mxu0 %v3842_v20  ;;  %1765 = vmatpush1.bf16.msra.mxu1 %v3845_v22  ;;  %v3897_v55 = vld [vmem:[%s6877_s4 + $0xe4] ss:$8 sps:$4 sm:$0xff]   ;;  %v3895_v57 = vld [vmem:[%s6877_s4 + $0xe0] ss:$8 sps:$4 sm:$0xff]   ;;  %v3903_v59 = vld [vmem:[%s6877_s4 + $0xd4] ss:$8 sps:$4 sm:$0xff]  }
  0x2c   : > { %1573 = vmatprep.subr.bf16.mxu0 %v3851_v24  ;;  %1766 = vmatprep.subr.bf16.mxu1 %v3854_v26  ;;  %v3900_v56 = vld [vmem:[%s6877_s4 + $0x1e4] ss:$8 sps:$4 sm:$0xff]   ;;  %v3898_v58 = vld [vmem:[%s6877_s4 + $0x1e0] ss:$8 sps:$4 sm:$0xff]   ;;  %v3831_v60 = vld [vmem:[%s4353_s25 + $0x30] sm:$0xff]  }
  0x2d   : > { %3577 = vmatmul.mubr.msk.bf16.gmra.mxu0 %vm546_vm2, %v3826_v14  ;;  %3593 = vmatmul.mubr.msk.bf16.gmra.mxu1 %vm546_vm2, %v3826_v14  ;;  %v3901_v61 = vld [vmem:[%s6877_s4 + $0xd0] ss:$8 sps:$4 sm:$0xff]   ;;  %v3906_v62 = vld [vmem:[%s6877_s4 + $0x1d4] ss:$8 sps:$4 sm:$0xff]   ;;  %v3909_v0 = vld [vmem:[%s6877_s4 + $0xc4] ss:$8 sps:$4 sm:$0xff]  }
  0x2e   : > { %647 = vmatprep.mubr.bf16.mxu0 %v4268_v6  ;;  %840 = vmatprep.mubr.bf16.mxu1 %v4268_v6  ;;  %v3904_v63 = vld [vmem:[%s6877_s4 + $0x1d0] ss:$8 sps:$4 sm:$0xff]   ;;  %v3912_v1 = vld [vmem:[%s6877_s4 + $0x1c4] ss:$8 sps:$4 sm:$0xff]   ;;  %v3907_v2 = vld [vmem:[%s6877_s4 + $0xc0] ss:$8 sps:$4 sm:$0xff]  }
  0x2f   : > { %1574 = vmatpush1.bf16.msra.mxu0 %v3849_v25  ;;  %1767 = vmatpush1.bf16.msra.mxu1 %v3852_v27  ;;  %v3910_v3 = vld [vmem:[%s6877_s4 + $0x1c0] ss:$8 sps:$4 sm:$0xff]   ;;  %v3915_v4 = vld [vmem:[%s6877_s4 + $0xb4] ss:$8 sps:$4 sm:$0xff]   ;;  %v3913_v7 = vld [vmem:[%s6877_s4 + $0xb0] ss:$8 sps:$4 sm:$0xff]  }
  0x30   : > { %1575 = vmatprep.subr.bf16.mxu0 %v3858_v28  ;;  %1768 = vmatprep.subr.bf16.mxu1 %v3861_v29  ;;  %v3832_v5 = vld [vmem:[%s4353_s25 + $0x38] sm:$0xff]   ;;  %v3921_v10 = vld [vmem:[%s6877_s4 + $0xa4] ss:$8 sps:$4 sm:$0xff]   ;;  %v3919_v12 = vld [vmem:[%s6877_s4 + $0xa0] ss:$8 sps:$4 sm:$0xff]  }
  0x31   : > { %v3918_v8 = vld [vmem:[%s6877_s4 + $0x1b4] ss:$8 sps:$4 sm:$0xff]   ;;  %v3916_v9 = vld [vmem:[%s6877_s4 + $0x1b0] ss:$8 sps:$4 sm:$0xff]   ;;  %v3924_v11 = vld [vmem:[%s6877_s4 + $0x1a4] ss:$8 sps:$4 sm:$0xff]  }
  0x32   : > { %v3922_v13 = vld [vmem:[%s6877_s4 + $0x1a0] ss:$8 sps:$4 sm:$0xff]   ;;  %v3927_v14 = vld [vmem:[%s6877_s4 + $0x94] ss:$8 sps:$4 sm:$0xff]   ;;  %v3925_v16 = vld [vmem:[%s6877_s4 + $0x90] ss:$8 sps:$4 sm:$0xff]  }
  0x33   : > { %1576 = vmatpush1.bf16.msra.mxu0 %v3856_v31  ;;  %1769 = vmatpush1.bf16.msra.mxu1 %v3859_v32  ;;  %v3833_v15 = vld [vmem:[%s4353_s25 + $0x40] sm:$0xff]   ;;  %v3930_v17 = vld [vmem:[%s6877_s4 + $0x194] ss:$8 sps:$4 sm:$0xff]   ;;  %v3928_v18 = vld [vmem:[%s6877_s4 + $0x190] ss:$8 sps:$4 sm:$0xff]  }
  0x34   : > { %1577 = vmatprep.subr.bf16.mxu0 %v3865_v33  ;;  %1770 = vmatprep.subr.bf16.mxu1 %v3868_v35  ;;  %v3834_v19 = vld [vmem:[%s4353_s25 + $0x48] sm:$0xff]   ;;  %v3841_v24 = vld [vmem:[%s4353_s25 + $0x50] sm:$0xff]   ;;  %v3848_v25 = vld [vmem:[%s4353_s25 + $0x58] sm:$0xff]  }
  0x35   : > { %3578 = vmatmul.mubr.msk.bf16.gmra.mxu0 %vm546_vm2, %v3827_v23  ;;  %3594 = vmatmul.mubr.msk.bf16.gmra.mxu1 %vm546_vm2, %v3827_v23  ;;  %v3933_v20 = vld [vmem:[%s6877_s4 + $0x84] ss:$8 sps:$4 sm:$0xff]   ;;  %v3931_v22 = vld [vmem:[%s6877_s4 + $0x80] ss:$8 sps:$4 sm:$0xff]   ;;  %v3869_v28 = vld [vmem:[%s4353_s25 + $0x70] sm:$0xff]  }
  0x36   : > { %657 = vmatprep.mubr.bf16.mxu0 %v4268_v6  ;;  %850 = vmatprep.mubr.bf16.mxu1 %v4268_v6  ;;  %v3936_v21 = vld [vmem:[%s6877_s4 + $0x184] ss:$8 sps:$4 sm:$0xff]   ;;  %v3934_v23 = vld [vmem:[%s6877_s4 + $0x180] ss:$8 sps:$4 sm:$0xff]   ;;  %v3876_v29 = vld [vmem:[%s4353_s25 + $0x78] sm:$0xff]  }
  0x37   : > { %1578 = vmatpush1.bf16.msra.mxu0 %v3863_v34  ;;  %1771 = vmatpush1.bf16.msra.mxu1 %v3866_v36  ;;  %v3855_v26 = vld [vmem:[%s4353_s25 + $0x60] sm:$0xff]   ;;  %v3862_v27 = vld [vmem:[%s4353_s25 + $0x68] sm:$0xff]  }
  0x38   : > { %1579 = vmatprep.subr.bf16.mxu0 %v3872_v37  ;;  %1772 = vmatprep.subr.bf16.mxu1 %v3875_v38 }
  0x3b   : > { %1580 = vmatpush1.bf16.msra.mxu0 %v3870_v39  ;;  %1773 = vmatpush1.bf16.msra.mxu1 %v3873_v40 }
  0x3c   : > { %1581 = vmatprep.subr.bf16.mxu0 %v3879_v41  ;;  %1774 = vmatprep.subr.bf16.mxu1 %v3882_v44 }
  0x3d   : > { %3579 = vmatmul.mubr.msk.bf16.gmra.mxu0 %vm546_vm2, %v3828_v30  ;;  %3595 = vmatmul.mubr.msk.bf16.gmra.mxu1 %vm546_vm2, %v3828_v30  ;;  %v6887_v30 = vlaneseq }
  0x3e   : > { %667 = vmatprep.mubr.bf16.mxu0 %v4268_v6  ;;  %860 = vmatprep.mubr.bf16.mxu1 %v4268_v6 }
  0x3f   : > { %1582 = vmatpush1.bf16.msra.mxu0 %v3877_v43  ;;  %1775 = vmatpush1.bf16.msra.mxu1 %v3880_v45  ;;  %v4655_v31 = vshrl.u32 %v6887_v30, 7 }
  0x40   : > { %1583 = vmatprep.subr.bf16.mxu0 %v3885_v46  ;;  %1776 = vmatprep.subr.bf16.mxu1 %v3888_v47 }
  0x41   : > { %7126 = vst [vmem:[#allocation14_spill] sm:$0xff] %v4655_v31  ;;  %v4658_v32 = vsub.s32 1, %v4655_v31  ;;  %v6886_v33 = vsub.s32 3, %v4655_v31  ;;  %v4662_v34 = vsub.s32 0, %v4655_v31  ;;  %v6885_v35 = vsub.s32 2, %v4655_v31 }
  0x43   : > { %1584 = vmatpush1.bf16.msra.mxu0 %v3883_v48  ;;  %1777 = vmatpush1.bf16.msra.mxu1 %v3886_v49  ;;  %7127 = vst [vmem:[#allocation15_spill] sm:$0xff] %v4658_v32 }
  0x44   : > { %1585 = vmatprep.subr.bf16.mxu0 %v3891_v50  ;;  %1778 = vmatprep.subr.bf16.mxu1 %v3894_v53 }
  0x45   : > { %3580 = vmatmul.mubr.msk.bf16.gmra.mxu0 %vm546_vm2, %v3829_v42  ;;  %3596 = vmatmul.mubr.msk.bf16.gmra.mxu1 %vm546_vm2, %v3829_v42 }
  0x46   : > { %677 = vmatprep.mubr.bf16.mxu0 %v4268_v6  ;;  %870 = vmatprep.mubr.bf16.mxu1 %v4268_v6 }
  0x47   : > { %1586 = vmatpush2.bf16.msra.mxu0 %v3889_v52  ;;  %1779 = vmatpush2.bf16.msra.mxu1 %v3892_v54 }
  0x48   : > { %1587 = vmatprep.subr.bf16.mxu0 %v3897_v55  ;;  %1780 = vmatprep.subr.bf16.mxu1 %v3900_v56 }
  0x4b   : > { %1588 = vmatpush2.bf16.msra.mxu0 %v3895_v57  ;;  %1781 = vmatpush2.bf16.msra.mxu1 %v3898_v58 }
  0x4c   : > { %1589 = vmatprep.subr.bf16.mxu0 %v3903_v59  ;;  %1782 = vmatprep.subr.bf16.mxu1 %v3906_v62 }
  0x4d   : > { %3581 = vmatmul.mubr.msk.bf16.gmra.mxu0 %vm546_vm2, %v3830_v51  ;;  %3597 = vmatmul.mubr.msk.bf16.gmra.mxu1 %vm546_vm2, %v3830_v51 }
  0x4e   : > { %687 = vmatprep.mubr.bf16.mxu0 %v4268_v6  ;;  %880 = vmatprep.mubr.bf16.mxu1 %v4268_v6 }
  0x4f   : > { %1590 = vmatpush2.bf16.msra.mxu0 %v3901_v61  ;;  %1783 = vmatpush2.bf16.msra.mxu1 %v3904_v63 }
  0x50   : > { %1591 = vmatprep.subr.bf16.mxu0 %v3909_v0  ;;  %1784 = vmatprep.subr.bf16.mxu1 %v3912_v1 }
  0x53   : > { %1592 = vmatpush2.bf16.msra.mxu0 %v3907_v2  ;;  %1785 = vmatpush2.bf16.msra.mxu1 %v3910_v3 }
  0x54   : > { %1593 = vmatprep.subr.bf16.mxu0 %v3915_v4  ;;  %1786 = vmatprep.subr.bf16.mxu1 %v3918_v8 }
  0x55   : > { %3582 = vmatmul.mubr.msk.bf16.gmra.mxu0 %vm546_vm2, %v3831_v60  ;;  %3598 = vmatmul.mubr.msk.bf16.gmra.mxu1 %vm546_vm2, %v3831_v60 }
  0x56   : > { %697 = vmatprep.mubr.bf16.mxu0 %v4268_v6  ;;  %890 = vmatprep.mubr.bf16.mxu1 %v4268_v6 }
  0x57   : > { %1594 = vmatpush2.bf16.msra.mxu0 %v3913_v7  ;;  %1787 = vmatpush2.bf16.msra.mxu1 %v3916_v9 }
  0x58   : > { %1595 = vmatprep.subr.bf16.mxu0 %v3921_v10  ;;  %1788 = vmatprep.subr.bf16.mxu1 %v3924_v11 }
  0x5b   : > { %1596 = vmatpush2.bf16.msra.mxu0 %v3919_v12  ;;  %1789 = vmatpush2.bf16.msra.mxu1 %v3922_v13 }
  0x5c   : > { %1597 = vmatprep.subr.bf16.mxu0 %v3927_v14  ;;  %1790 = vmatprep.subr.bf16.mxu1 %v3930_v17 }
  0x5d   : > { %3583 = vmatmul.mubr.msk.bf16.gmra.mxu0 %vm546_vm2, %v3832_v5  ;;  %3599 = vmatmul.mubr.msk.bf16.gmra.mxu1 %vm546_vm2, %v3832_v5 }
  0x5e   : > { %707 = vmatprep.mubr.bf16.mxu0 %v4268_v6  ;;  %900 = vmatprep.mubr.bf16.mxu1 %v4268_v6 }
  0x5f   : > { %1598 = vmatpush2.bf16.msra.mxu0 %v3925_v16  ;;  %1791 = vmatpush2.bf16.msra.mxu1 %v3928_v18 }
  0x60   : > { %1599 = vmatprep.subr.bf16.mxu0 %v3933_v20  ;;  %1792 = vmatprep.subr.bf16.mxu1 %v3936_v21 }
  0x63   : > { %1600 = vmatpush2.bf16.msra.mxu0 %v3931_v22  ;;  %1793 = vmatpush2.bf16.msra.mxu1 %v3934_v23 }
  0x65   : > { %3584 = vmatmul.mubr.msk.bf16.gmra.mxu0 %vm546_vm2, %v3833_v15  ;;  %3600 = vmatmul.mubr.msk.bf16.gmra.mxu1 %vm546_vm2, %v3833_v15 }
  0x66   : > { %717 = vmatprep.mubr.bf16.mxu0 %v4268_v6  ;;  %910 = vmatprep.mubr.bf16.mxu1 %v4268_v6 }
  0x6d   : > { %3585 = vmatmul.mubr.msk.bf16.gmra.mxu0 %vm546_vm2, %v3834_v19  ;;  %3601 = vmatmul.mubr.msk.bf16.gmra.mxu1 %vm546_vm2, %v3834_v19 }
  0x6e   : > { %727 = vmatprep.mubr.bf16.mxu0 %v4268_v6  ;;  %920 = vmatprep.mubr.bf16.mxu1 %v4268_v6 }
  0x75   : > { %3586 = vmatmul.mubr.msk.bf16.gmra.mxu0 %vm546_vm2, %v3841_v24  ;;  %3602 = vmatmul.mubr.msk.bf16.gmra.mxu1 %vm546_vm2, %v3841_v24 }
  0x76   : > { %737 = vmatprep.mubr.bf16.mxu0 %v4268_v6  ;;  %930 = vmatprep.mubr.bf16.mxu1 %v4268_v6 }
  0x7d   : > { %3587 = vmatmul.mubr.msk.bf16.gmra.mxu0 %vm546_vm2, %v3848_v25  ;;  %3603 = vmatmul.mubr.msk.bf16.gmra.mxu1 %vm546_vm2, %v3848_v25 }
  0x7e   : > { %747 = vmatprep.mubr.bf16.mxu0 %v4268_v6  ;;  %940 = vmatprep.mubr.bf16.mxu1 %v4268_v6 }
  0x85   : > { %3588 = vmatmul.mubr.msk.bf16.gmra.mxu0 %vm546_vm2, %v3855_v26  ;;  %3604 = vmatmul.mubr.msk.bf16.gmra.mxu1 %vm546_vm2, %v3855_v26 }
  0x86   : > { %757 = vmatprep.mubr.bf16.mxu0 %v4268_v6  ;;  %950 = vmatprep.mubr.bf16.mxu1 %v4268_v6 }
  0x8d   : > { %3589 = vmatmul.mubr.msk.bf16.gmra.mxu0 %vm546_vm2, %v3862_v27  ;;  %3605 = vmatmul.mubr.msk.bf16.gmra.mxu1 %vm546_vm2, %v3862_v27 }
  0x8e   : > { %767 = vmatprep.mubr.bf16.mxu0 %v4268_v6  ;;  %960 = vmatprep.mubr.bf16.mxu1 %v4268_v6 }
  0x95   : > { %3590 = vmatmul.mubr.msk.bf16.gmra.mxu0 %vm546_vm2, %v3869_v28  ;;  %3606 = vmatmul.mubr.msk.bf16.gmra.mxu1 %vm546_vm2, %v3869_v28 }
  0x96   : > { %777 = vmatprep.mubr.bf16.mxu0 %v4268_v6  ;;  %970 = vmatprep.mubr.bf16.mxu1 %v4268_v6  ;;  %v404_v6 = vld [vmem:[%s6876_s3] sm:$0xf] }
  0x97   : > { %v4669_v38 = vrot.slane %v404_v6, %v4658_v32  ;;  %v4673_v39 = vrot.slane %v404_v6, %v6886_v33  ;;  %v4676_v40 = vrot.slane %v404_v6, %v4662_v34  ;;  %v4680_v41 = vrot.slane %v404_v6, %v6885_v35 }
  0x9d   : > { %3591 = vmatmul.mubr.msk.bf16.gmra.mxu0 %vm546_vm2, %v3876_v29  ;;  %3607 = vmatmul.mubr.msk.bf16.gmra.mxu1 %vm546_vm2, %v3876_v29 }
  0xe5   : > { %v629_v36 = vpop.f32.mrf.mxu0  ;;  %v822_v37 = vpop.f32.mrf.mxu1 }
  0xe6   : > { %v4695_v50 = vadd.f32 %v629_v36, %v4676_v40  ;;  %v4698_v51 = vadd.f32 %v822_v37, %v4680_v41 }
  0xe7   : > { %v631_v42 = vpop.f32.mrf.mxu0  ;;  %v824_v43 = vpop.f32.mrf.mxu1 }
  0xe8   : > { %v4683_v46 = vadd.f32 %v631_v42, %v4669_v38  ;;  %v4686_v47 = vadd.f32 %v824_v43, %v4673_v39  ;;  %7131 = vst [vmem:[#allocation19_spill] sm:$0xff] %v4695_v50  ;;  %7132 = vst [vmem:[#allocation20_spill] sm:$0xff] %v4698_v51  ;;  %v6915_v0 = vmax.f32 %v4695_v50, 0.0  ;;  %v6913_v1 = vmax.f32 %v4698_v51, 0.0 }
  0xe9   : > { %v633_v44 = vpop.f32.mrf.mxu0  ;;  %v826_v45 = vpop.f32.mrf.mxu1 }
  0xea   : > { %7128 = vst [vmem:[#allocation16_spill] sm:$0xff] %v4683_v46  ;;  %7129 = vst [vmem:[#allocation17_spill] sm:$0xff] %v4686_v47  ;;  %v4689_v48 = vadd.f32 %v633_v44, %v4676_v40  ;;  %v4692_v49 = vadd.f32 %v826_v45, %v4680_v41  ;;  %v6914_v60 = vmax.f32 %v4683_v46, 0.0  ;;  %v6904_v61 = vmax.f32 %v4686_v47, 0.0 }
  0xeb   : > { %v635_v52 = vpop.f32.mrf.mxu0  ;;  %v828_v53 = vpop.f32.mrf.mxu1 }
  0xec   : > { %7130 = vst [vmem:[#allocation18_spill] sm:$0xff] %v4692_v49  ;;  %v4701_v54 = vadd.f32 %v635_v52, %v4669_v38  ;;  %v4704_v55 = vadd.f32 %v828_v53, %v4673_v39  ;;  %v6919_v56 = vmax.f32 %v4689_v48, 0.0  ;;  %v6917_v57 = vmax.f32 %v4692_v49, 0.0 }
  0xed   : > { %v639_v58 = vpop.f32.mrf.mxu0  ;;  %v832_v59 = vpop.f32.mrf.mxu1 }
  0xee   : > { %7133 = vst [vmem:[#allocation21_spill] sm:$0xff] %v4701_v54  ;;  %7134 = vst [vmem:[#allocation22_spill] sm:$0xff] %v4704_v55  ;;  %v6918_v62 = vmax.f32 %v4701_v54, 0.0  ;;  %v6916_v63 = vmax.f32 %v4704_v55, 0.0  ;;  %v1109_v7 = vpack.c.bf16 %v6919_v56, %v6915_v0  ;;  %v1111_v8 = vpack.c.bf16 %v6917_v57, %v6913_v1 }
  0xef   : > { %v641_v2 = vpop.f32.mrf.mxu0  ;;  %v834_v3 = vpop.f32.mrf.mxu1  ;;  %v4743_v15 = vadd.f32 %v639_v58, %v4676_v40  ;;  %v4746_v16 = vadd.f32 %v832_v59, %v4680_v41 }
  0xf0   : > { %v1110_v4 = vpack.c.bf16 %v6918_v62, %v6914_v60  ;;  %v1112_v5 = vpack.c.bf16 %v6916_v63, %v6904_v61  ;;  %v4731_v9 = vadd.f32 %v641_v2, %v4669_v38  ;;  %v4734_v12 = vadd.f32 %v834_v3, %v4673_v39 }
  0xf1   : > { %v643_v10 = vpop.f32.mrf.mxu0  ;;  %v836_v11 = vpop.f32.mrf.mxu1  ;;  %7139 = vst [vmem:[#allocation27_spill] sm:$0xff] %v4743_v15  ;;  %7140 = vst [vmem:[#allocation28_spill] sm:$0xff] %v4746_v16  ;;  %v6903_v29 = vmax.f32 %v4743_v15, 0.0  ;;  %v6901_v6 = vmax.f32 %v4746_v16, 0.0  ;;  %v2384_v15 = vadd.s32 232, %v4655_v31 }
  0xf2   : > { %7135 = vst [vmem:[#allocation23_spill] sm:$0xff] %v4731_v9  ;;  %7136 = vst [vmem:[#allocation24_spill] sm:$0xff] %v4734_v12  ;;  %v4737_v13 = vadd.f32 %v643_v10, %v4676_v40  ;;  %v4740_v14 = vadd.f32 %v836_v11, %v4680_v41  ;;  %1601 = vmatprep.mubr.bf16.mxu0 %v1110_v4  ;;  %1794 = vmatprep.mubr.bf16.mxu1 %v1112_v5  ;;  %v6902_v25 = vmax.f32 %v4731_v9, 0.0 }
  0xf3   : > { %v645_v17 = vpop.f32.mrf.mxu0  ;;  %v838_v18 = vpop.f32.mrf.mxu1  ;;  %1602 = vmatmul.mubr.bf16.vlgmr.msra.gmra.mxu0 %v1109_v7  ;;  %1795 = vmatmul.mubr.bf16.vlgmr.msra.gmra.mxu1 %v1111_v8  ;;  %v6900_v26 = vmax.f32 %v4734_v12, 0.0  ;;  %v2382_v9 = vadd.s32 216, %v4655_v31 }
  0xf4   : > { %7137 = vst [vmem:[#allocation25_spill] sm:$0xff] %v4737_v13  ;;  %7138 = vst [vmem:[#allocation26_spill] sm:$0xff] %v4740_v14  ;;  %v4749_v19 = vadd.f32 %v645_v17, %v4669_v38  ;;  %v4752_v20 = vadd.f32 %v838_v18, %v4673_v39  ;;  %v6899_v21 = vmax.f32 %v4737_v13, 0.0  ;;  %v6897_v22 = vmax.f32 %v4740_v14, 0.0  ;;  %v5838_v14 = vld [vmem:[#allocation7] ss:$0 sm:$0xff] }
  0xf5   : > { %v649_v23 = vpop.f32.mrf.mxu0  ;;  %v842_v24 = vpop.f32.mrf.mxu1 }
  0xf6   : > { %7141 = vst [vmem:[#allocation29_spill] sm:$0xff] %v4749_v19  ;;  %7142 = vst [vmem:[#allocation30_spill] sm:$0xff] %v4752_v20  ;;  %v6898_v27 = vmax.f32 %v4749_v19, 0.0  ;;  %v6888_v28 = vmax.f32 %v4752_v20, 0.0  ;;  %v1113_v44 = vpack.c.bf16 %v6899_v21, %v6903_v29  ;;  %v1115_v45 = vpack.c.bf16 %v6897_v22, %v6901_v6 }
  0xf7   : > { %v651_v36 = vpop.f32.mrf.mxu0  ;;  %v844_v37 = vpop.f32.mrf.mxu1  ;;  %v4791_v4 = vadd.f32 %v649_v23, %v4676_v40  ;;  %v4794_v5 = vadd.f32 %v842_v24, %v4680_v41 }
  0xf8   : > { %v1114_v42 = vpack.c.bf16 %v6898_v27, %v6902_v25  ;;  %v1116_v43 = vpack.c.bf16 %v6888_v28, %v6900_v26  ;;  %v4779_v52 = vadd.f32 %v651_v36, %v4669_v38  ;;  %v4782_v59 = vadd.f32 %v844_v37, %v4673_v39 }
  0xf9   : > { %v653_v53 = vpop.f32.mrf.mxu0  ;;  %v846_v58 = vpop.f32.mrf.mxu1  ;;  %7147 = vst [vmem:[#allocation35_spill] sm:$0xff] %v4791_v4  ;;  %7148 = vst [vmem:[#allocation36_spill] sm:$0xff] %v4794_v5 }
  0xfa   : > { %7143 = vst [vmem:[#allocation31_spill] sm:$0xff] %v4779_v52  ;;  %7144 = vst [vmem:[#allocation32_spill] sm:$0xff] %v4782_v59  ;;  %v4785_v2 = vadd.f32 %v653_v53, %v4676_v40  ;;  %v4788_v3 = vadd.f32 %v846_v58, %v4680_v41  ;;  %1611 = vmatprep.mubr.bf16.mxu0 %v1114_v42  ;;  %1804 = vmatprep.mubr.bf16.mxu1 %v1116_v43  ;;  %v6890_v37 = vmax.f32 %v4779_v52, 0.0 }
  0xfb   : > { %v655_v7 = vpop.f32.mrf.mxu0  ;;  %v848_v8 = vpop.f32.mrf.mxu1  ;;  %1612 = vmatmul.mubr.bf16.gmra.mxu0 %v1113_v44  ;;  %1805 = vmatmul.mubr.bf16.gmra.mxu1 %v1115_v45  ;;  %v6892_v24 = vmax.f32 %v4782_v59, 0.0  ;;  %v6896_v44 = vmax.f32 %v4791_v4, 0.0  ;;  %v6895_v45 = vmax.f32 %v4794_v5, 0.0  ;;  %v2378_v52 = vadd.s32 184, %v4655_v31 }
  0xfc   : > { %7145 = vst [vmem:[#allocation33_spill] sm:$0xff] %v4785_v2  ;;  %7146 = vst [vmem:[#allocation34_spill] sm:$0xff] %v4788_v3  ;;  %v4797_v10 = vadd.f32 %v655_v7, %v4669_v38  ;;  %v4800_v11 = vadd.f32 %v848_v8, %v4673_v39  ;;  %v6893_v17 = vmax.f32 %v4785_v2, 0.0  ;;  %v6894_v18 = vmax.f32 %v4788_v3, 0.0 }
  0xfd   : > { %v659_v36 = vpop.f32.mrf.mxu0  ;;  %v852_v23 = vpop.f32.mrf.mxu1  ;;  %v2375_v3 = vadd.s32 160, %v4655_v31  ;;  %v2377_v2 = vadd.s32 176, %v4655_v31 }
  0xfe   : > { %7149 = vst [vmem:[#allocation37_spill] sm:$0xff] %v4797_v10  ;;  %7150 = vst [vmem:[#allocation38_spill] sm:$0xff] %v4800_v11  ;;  %v6889_v42 = vmax.f32 %v4797_v10, 0.0  ;;  %v6891_v43 = vmax.f32 %v4800_v11, 0.0  ;;  %v1117_v35 = vpack.c.bf16 %v6893_v17, %v6896_v44  ;;  %v1119_v33 = vpack.c.bf16 %v6894_v18, %v6895_v45 }
  0xff   : > { %v661_v53 = vpop.f32.mrf.mxu0  ;;  %v854_v58 = vpop.f32.mrf.mxu1  ;;  %v4839_v17 = vadd.f32 %v659_v36, %v4676_v40  ;;  %v4842_v18 = vadd.f32 %v852_v23, %v4680_v41  ;;  %v2376_v10 = vadd.s32 168, %v4655_v31 }
 0x100   : > { %v1118_v7 = vpack.c.bf16 %v6889_v42, %v6890_v37  ;;  %v1120_v8 = vpack.c.bf16 %v6891_v43, %v6892_v24  ;;  %v4827_v30 = vadd.f32 %v661_v53, %v4669_v38  ;;  %v4830_v37 = vadd.f32 %v854_v58, %v4673_v39 }
 0x101   : > { %v663_v28 = vpop.f32.mrf.mxu0  ;;  %v856_v42 = vpop.f32.mrf.mxu1  ;;  %7155 = vst [vmem:[#allocation43_spill] sm:$0xff] %v4839_v17  ;;  %7156 = vst [vmem:[#allocation44_spill] sm:$0xff] %v4842_v18 }
 0x102   : > { %7151 = vst [vmem:[#allocation39_spill] sm:$0xff] %v4827_v30  ;;  %7152 = vst [vmem:[#allocation40_spill] sm:$0xff] %v4830_v37  ;;  %v4833_v43 = vadd.f32 %v663_v28, %v4676_v40  ;;  %v4836_v24 = vadd.f32 %v856_v42, %v4680_v41  ;;  %1621 = vmatprep.mubr.bf16.mxu0 %v1118_v7  ;;  %1814 = vmatprep.mubr.bf16.mxu1 %v1120_v8  ;;  %v6906_v44 = vmax.f32 %v4827_v30, 0.0 }
 0x103   : > { %v665_v53 = vpop.f32.mrf.mxu0  ;;  %v858_v45 = vpop.f32.mrf.mxu1  ;;  %1622 = vmatmul.mubr.bf16.gmra.mxu0 %v1117_v35  ;;  %1815 = vmatmul.mubr.bf16.gmra.mxu1 %v1119_v33  ;;  %v6908_v23 = vmax.f32 %v4830_v37, 0.0  ;;  %v6912_v35 = vmax.f32 %v4839_v17, 0.0  ;;  %v2373_v30 = vadd.s32 144, %v4655_v31  ;;  %v2374_v17 = vadd.s32 152, %v4655_v31 }
 0x104   : > { %7153 = vst [vmem:[#allocation41_spill] sm:$0xff] %v4833_v43  ;;  %7154 = vst [vmem:[#allocation42_spill] sm:$0xff] %v4836_v24  ;;  %v4845_v58 = vadd.f32 %v665_v53, %v4669_v38  ;;  %v4848_v28 = vadd.f32 %v858_v45, %v4673_v39  ;;  %v6909_v42 = vmax.f32 %v4833_v43, 0.0  ;;  %v6910_v7 = vmax.f32 %v4836_v24, 0.0 }
 0x105   : > { %v669_v8 = vpop.f32.mrf.mxu0  ;;  %v862_v36 = vpop.f32.mrf.mxu1  ;;  %v6911_v53 = vmax.f32 %v4842_v18, 0.0  ;;  %v2371_v18 = vadd.s32 128, %v4655_v31 }
 0x106   : > { %7157 = vst [vmem:[#allocation45_spill] sm:$0xff] %v4845_v58  ;;  %7158 = vst [vmem:[#allocation46_spill] sm:$0xff] %v4848_v28  ;;  %v6905_v22 = vmax.f32 %v4845_v58, 0.0  ;;  %v6907_v33 = vmax.f32 %v4848_v28, 0.0  ;;  %v1121_v6 = vpack.c.bf16 %v6909_v42, %v6912_v35  ;;  %v4887_v42 = vadd.f32 %v669_v8, %v4676_v40 }
 0x107   : > { %v671_v45 = vpop.f32.mrf.mxu0  ;;  %v864_v27 = vpop.f32.mrf.mxu1  ;;  %v1123_v25 = vpack.c.bf16 %v6910_v7, %v6911_v53  ;;  %v4890_v7 = vadd.f32 %v862_v36, %v4680_v41 }
 0x108   : > { %v1122_v21 = vpack.c.bf16 %v6905_v22, %v6906_v44  ;;  %v1124_v26 = vpack.c.bf16 %v6907_v33, %v6908_v23  ;;  %v4875_v29 = vadd.f32 %v671_v45, %v4669_v38  ;;  %v4878_v44 = vadd.f32 %v864_v27, %v4673_v39  ;;  %7163 = vst [vmem:[#allocation51_spill] sm:$0xff] %v4887_v42 }
 0x109   : > { %v673_v61 = vpop.f32.mrf.mxu0  ;;  %v866_v22 = vpop.f32.mrf.mxu1  ;;  %7164 = vst [vmem:[#allocation52_spill] sm:$0xff] %v4890_v7 }
 0x10a   : > { %7159 = vst [vmem:[#allocation47_spill] sm:$0xff] %v4875_v29  ;;  %7160 = vst [vmem:[#allocation48_spill] sm:$0xff] %v4878_v44  ;;  %v4881_v33 = vadd.f32 %v673_v61, %v4676_v40  ;;  %v4884_v23 = vadd.f32 %v866_v22, %v4680_v41  ;;  %1631 = vmatprep.mubr.bf16.mxu0 %v1122_v21  ;;  %1824 = vmatprep.mubr.bf16.mxu1 %v1124_v26  ;;  %v6922_v35 = vmax.f32 %v4875_v29, 0.0 }
 0x10b   : > { %v675_v45 = vpop.f32.mrf.mxu0  ;;  %v868_v53 = vpop.f32.mrf.mxu1  ;;  %1632 = vmatmul.mubr.bf16.gmra.mxu0 %v1121_v6  ;;  %1825 = vmatmul.mubr.bf16.gmra.mxu1 %v1123_v25  ;;  %v6924_v36 = vmax.f32 %v4878_v44, 0.0  ;;  %v6928_v6 = vmax.f32 %v4887_v42, 0.0 }
 0x10c   : > { %7161 = vst [vmem:[#allocation49_spill] sm:$0xff] %v4881_v33  ;;  %7162 = vst [vmem:[#allocation50_spill] sm:$0xff] %v4884_v23  ;;  %v4893_v27 = vadd.f32 %v675_v45, %v4669_v38  ;;  %v4896_v61 = vadd.f32 %v868_v53, %v4673_v39  ;;  %v6925_v22 = vmax.f32 %v4881_v33, 0.0  ;;  %v6926_v21 = vmax.f32 %v4884_v23, 0.0 }
 0x10d   : > { %v679_v26 = vpop.f32.mrf.mxu0  ;;  %v872_v8 = vpop.f32.mrf.mxu1  ;;  %v6927_v45 = vmax.f32 %v4890_v7, 0.0 }
 0x10e   : > { %7165 = vst [vmem:[#allocation53_spill] sm:$0xff] %v4893_v27  ;;  %7166 = vst [vmem:[#allocation54_spill] sm:$0xff] %v4896_v61  ;;  %v6921_v1 = vmax.f32 %v4893_v27, 0.0  ;;  %v6923_v25 = vmax.f32 %v4896_v61, 0.0  ;;  %v1125_v57 = vpack.c.bf16 %v6925_v22, %v6928_v6  ;;  %v4935_v22 = vadd.f32 %v679_v26, %v4676_v40 }
 0x10f   : > { %v681_v53 = vpop.f32.mrf.mxu0  ;;  %v874_v60 = vpop.f32.mrf.mxu1  ;;  %v1127_v62 = vpack.c.bf16 %v6926_v21, %v6927_v45  ;;  %v4938_v21 = vadd.f32 %v872_v8, %v4680_v41 }
 0x110   : > { %v1126_v0 = vpack.c.bf16 %v6921_v1, %v6922_v35  ;;  %v1128_v63 = vpack.c.bf16 %v6923_v25, %v6924_v36  ;;  %v4923_v56 = vadd.f32 %v681_v53, %v4669_v38  ;;  %v4926_v35 = vadd.f32 %v874_v60, %v4673_v39  ;;  %7171 = vst [vmem:[#allocation59_spill] sm:$0xff] %v4935_v22 }
 0x111   : > { %v683_v27 = vpop.f32.mrf.mxu0  ;;  %v876_v1 = vpop.f32.mrf.mxu1  ;;  %7172 = vst [vmem:[#allocation60_spill] sm:$0xff] %v4938_v21 }
 0x112   : > { %7167 = vst [vmem:[#allocation55_spill] sm:$0xff] %v4923_v56  ;;  %7168 = vst [vmem:[#allocation56_spill] sm:$0xff] %v4926_v35  ;;  %v4929_v25 = vadd.f32 %v683_v27, %v4676_v40  ;;  %v4932_v36 = vadd.f32 %v876_v1, %v4680_v41  ;;  %1641 = vmatprep.mubr.bf16.mxu0 %v1126_v0  ;;  %1834 = vmatprep.mubr.bf16.mxu1 %v1128_v63  ;;  %v6938_v6 = vmax.f32 %v4923_v56, 0.0 }
 0x113   : > { %v685_v53 = vpop.f32.mrf.mxu0  ;;  %v878_v45 = vpop.f32.mrf.mxu1  ;;  %1642 = vmatmul.mubr.bf16.gmra.mxu0 %v1125_v57  ;;  %1835 = vmatmul.mubr.bf16.gmra.mxu1 %v1127_v62  ;;  %v6940_v8 = vmax.f32 %v4926_v35, 0.0  ;;  %v6942_v62 = vmax.f32 %v4935_v22, 0.0 }
 0x114   : > { %7169 = vst [vmem:[#allocation57_spill] sm:$0xff] %v4929_v25  ;;  %7170 = vst [vmem:[#allocation58_spill] sm:$0xff] %v4932_v36  ;;  %v4941_v60 = vadd.f32 %v685_v53, %v4669_v38  ;;  %v4944_v27 = vadd.f32 %v878_v45, %v4673_v39  ;;  %v6941_v53 = vmax.f32 %v4938_v21, 0.0  ;;  %v7175_v33 = vmax.f32 %v4929_v25, 0.0 }
 0x115   : > { %v689_v0 = vpop.f32.mrf.mxu0  ;;  %v882_v26 = vpop.f32.mrf.mxu1  ;;  %v7176_v7 = vmax.f32 %v4932_v36, 0.0 }
 0x116   : > { %7173 = vst [vmem:[#allocation61_spill] sm:$0xff] %v4941_v60  ;;  %7174 = vst [vmem:[#allocation62_spill] sm:$0xff] %v4944_v27  ;;  %v6937_v61 = vmax.f32 %v4941_v60, 0.0  ;;  %v6939_v57 = vmax.f32 %v4944_v27, 0.0  ;;  %v1129_v44 = vpack.c.bf16 %v7175_v33, %v6942_v62  ;;  %v4983_v33 = vadd.f32 %v689_v0, %v4676_v40 }
 0x117   : > { %v691_v45 = vpop.f32.mrf.mxu0  ;;  %v884_v23 = vpop.f32.mrf.mxu1  ;;  %v1131_v29 = vpack.c.bf16 %v7176_v7, %v6941_v53  ;;  %v4986_v7 = vadd.f32 %v882_v26, %v4680_v41 }
 0x118   : > { %v1130_v63 = vpack.c.bf16 %v6937_v61, %v6938_v6  ;;  %v1132_v1 = vpack.c.bf16 %v6939_v57, %v6940_v8  ;;  %v4971_v56 = vadd.f32 %v691_v45, %v4669_v38  ;;  %v4974_v6 = vadd.f32 %v884_v23, %v4673_v39  ;;  %7181 = vst [vmem:[#allocation67_spill] sm:$0xff] %v4983_v33 }
 0x119   : > { %v693_v60 = vpop.f32.mrf.mxu0  ;;  %v886_v61 = vpop.f32.mrf.mxu1  ;;  %7182 = vst [vmem:[#allocation68_spill] sm:$0xff] %v4986_v7 }
 0x11a   : > { %7177 = vst [vmem:[#allocation63_spill] sm:$0xff] %v4971_v56  ;;  %7178 = vst [vmem:[#allocation64_spill] sm:$0xff] %v4974_v6  ;;  %v4977_v57 = vadd.f32 %v693_v60, %v4676_v40  ;;  %v4980_v8 = vadd.f32 %v886_v61, %v4680_v41  ;;  %1651 = vmatprep.mubr.bf16.mxu0 %v1130_v63  ;;  %1844 = vmatprep.mubr.bf16.mxu1 %v1132_v1  ;;  %v6952_v62 = vmax.f32 %v4971_v56, 0.0 }
 0x11b   : > { %v695_v45 = vpop.f32.mrf.mxu0  ;;  %v888_v53 = vpop.f32.mrf.mxu1  ;;  %1652 = vmatmul.mubr.bf16.gmra.mxu0 %v1129_v44  ;;  %1845 = vmatmul.mubr.bf16.gmra.mxu1 %v1131_v29  ;;  %v6954_v26 = vmax.f32 %v4974_v6, 0.0  ;;  %v6956_v44 = vmax.f32 %v4983_v33, 0.0 }
 0x11c   : > { %7179 = vst [vmem:[#allocation65_spill] sm:$0xff] %v4977_v57  ;;  %7180 = vst [vmem:[#allocation66_spill] sm:$0xff] %v4980_v8  ;;  %v4989_v23 = vadd.f32 %v695_v45, %v4669_v38  ;;  %v4992_v60 = vadd.f32 %v888_v53, %v4673_v39  ;;  %v6955_v45 = vmax.f32 %v4986_v7, 0.0  ;;  %v7185_v25 = vmax.f32 %v4977_v57, 0.0 }
 0x11d   : > { %v699_v63 = vpop.f32.mrf.mxu0  ;;  %v892_v0 = vpop.f32.mrf.mxu1  ;;  %v7186_v21 = vmax.f32 %v4980_v8, 0.0 }
 0x11e   : > { %7183 = vst [vmem:[#allocation69_spill] sm:$0xff] %v4989_v23  ;;  %7184 = vst [vmem:[#allocation70_spill] sm:$0xff] %v4992_v60  ;;  %v6951_v27 = vmax.f32 %v4989_v23, 0.0  ;;  %v6953_v29 = vmax.f32 %v4992_v60, 0.0  ;;  %v1133_v35 = vpack.c.bf16 %v7185_v25, %v6956_v44  ;;  %v5031_v25 = vadd.f32 %v699_v63, %v4676_v40 }
 0x11f   : > { %v701_v53 = vpop.f32.mrf.mxu0  ;;  %v894_v36 = vpop.f32.mrf.mxu1  ;;  %v1135_v22 = vpack.c.bf16 %v7186_v21, %v6955_v45  ;;  %v5034_v21 = vadd.f32 %v892_v0, %v4680_v41 }
 0x120   : > { %v1134_v1 = vpack.c.bf16 %v6951_v27, %v6952_v62  ;;  %v1136_v61 = vpack.c.bf16 %v6953_v29, %v6954_v26  ;;  %v5019_v56 = vadd.f32 %v701_v53, %v4669_v38  ;;  %v5022_v62 = vadd.f32 %v894_v36, %v4673_v39  ;;  %7191 = vst [vmem:[#allocation75_spill] sm:$0xff] %v5031_v25 }
 0x121   : > { %v703_v23 = vpop.f32.mrf.mxu0  ;;  %v896_v27 = vpop.f32.mrf.mxu1  ;;  %7192 = vst [vmem:[#allocation76_spill] sm:$0xff] %v5034_v21 }
 0x122   : > { %7187 = vst [vmem:[#allocation71_spill] sm:$0xff] %v5019_v56  ;;  %7188 = vst [vmem:[#allocation72_spill] sm:$0xff] %v5022_v62  ;;  %v5025_v29 = vadd.f32 %v703_v23, %v4676_v40  ;;  %v5028_v26 = vadd.f32 %v896_v27, %v4680_v41  ;;  %1661 = vmatprep.mubr.bf16.mxu0 %v1134_v1  ;;  %1854 = vmatprep.mubr.bf16.mxu1 %v1136_v61  ;;  %v6966_v44 = vmax.f32 %v5019_v56, 0.0 }
 0x123   : > { %v705_v53 = vpop.f32.mrf.mxu0  ;;  %v898_v45 = vpop.f32.mrf.mxu1  ;;  %1662 = vmatmul.mubr.bf16.gmra.mxu0 %v1133_v35  ;;  %1855 = vmatmul.mubr.bf16.gmra.mxu1 %v1135_v22  ;;  %v6968_v0 = vmax.f32 %v5022_v62, 0.0  ;;  %v6970_v22 = vmax.f32 %v5031_v25, 0.0 }
 0x124   : > { %7189 = vst [vmem:[#allocation73_spill] sm:$0xff] %v5025_v29  ;;  %7190 = vst [vmem:[#allocation74_spill] sm:$0xff] %v5028_v26  ;;  %v5037_v36 = vadd.f32 %v705_v53, %v4669_v38  ;;  %v5040_v23 = vadd.f32 %v898_v45, %v4673_v39  ;;  %v6969_v53 = vmax.f32 %v5034_v21, 0.0  ;;  %v7195_v57 = vmax.f32 %v5025_v29, 0.0 }
 0x125   : > { %v709_v1 = vpop.f32.mrf.mxu0  ;;  %v902_v63 = vpop.f32.mrf.mxu1  ;;  %v7196_v7 = vmax.f32 %v5028_v26, 0.0 }
 0x126   : > { %7193 = vst [vmem:[#allocation77_spill] sm:$0xff] %v5037_v36  ;;  %7194 = vst [vmem:[#allocation78_spill] sm:$0xff] %v5040_v23  ;;  %v6965_v60 = vmax.f32 %v5037_v36, 0.0  ;;  %v6967_v35 = vmax.f32 %v5040_v23, 0.0  ;;  %v1137_v6 = vpack.c.bf16 %v7195_v57, %v6970_v22  ;;  %v5079_v57 = vadd.f32 %v709_v1, %v4676_v40 }
 0x127   : > { %v711_v45 = vpop.f32.mrf.mxu0  ;;  %v904_v8 = vpop.f32.mrf.mxu1  ;;  %v1139_v33 = vpack.c.bf16 %v7196_v7, %v6969_v53  ;;  %v5082_v7 = vadd.f32 %v902_v63, %v4680_v41 }
 0x128   : > { %v1138_v61 = vpack.c.bf16 %v6965_v60, %v6966_v44  ;;  %v1140_v27 = vpack.c.bf16 %v6967_v35, %v6968_v0  ;;  %v5067_v56 = vadd.f32 %v711_v45, %v4669_v38  ;;  %v5070_v44 = vadd.f32 %v904_v8, %v4673_v39  ;;  %7201 = vst [vmem:[#allocation83_spill] sm:$0xff] %v5079_v57 }
 0x129   : > { %v713_v36 = vpop.f32.mrf.mxu0  ;;  %v906_v60 = vpop.f32.mrf.mxu1  ;;  %7202 = vst [vmem:[#allocation84_spill] sm:$0xff] %v5082_v7 }
 0x12a   : > { %7197 = vst [vmem:[#allocation79_spill] sm:$0xff] %v5067_v56  ;;  %7198 = vst [vmem:[#allocation80_spill] sm:$0xff] %v5070_v44  ;;  %v5073_v35 = vadd.f32 %v713_v36, %v4676_v40  ;;  %v5076_v0 = vadd.f32 %v906_v60, %v4680_v41  ;;  %1671 = vmatprep.mubr.bf16.mxu0 %v1138_v61  ;;  %1864 = vmatprep.mubr.bf16.mxu1 %v1140_v27  ;;  %v6980_v22 = vmax.f32 %v5067_v56, 0.0 }
 0x12b   : > { %v715_v45 = vpop.f32.mrf.mxu0  ;;  %v908_v53 = vpop.f32.mrf.mxu1  ;;  %1672 = vmatmul.mubr.bf16.gmra.mxu0 %v1137_v6  ;;  %1865 = vmatmul.mubr.bf16.gmra.mxu1 %v1139_v33  ;;  %v6982_v63 = vmax.f32 %v5070_v44, 0.0  ;;  %v6984_v33 = vmax.f32 %v5079_v57, 0.0 }
 0x12c   : > { %7199 = vst [vmem:[#allocation81_spill] sm:$0xff] %v5073_v35  ;;  %7200 = vst [vmem:[#allocation82_spill] sm:$0xff] %v5076_v0  ;;  %v5085_v8 = vadd.f32 %v715_v45, %v4669_v38  ;;  %v5088_v36 = vadd.f32 %v908_v53, %v4673_v39  ;;  %v6983_v45 = vmax.f32 %v5082_v7, 0.0  ;;  %v7205_v29 = vmax.f32 %v5073_v35, 0.0 }
 0x12d   : > { %v719_v61 = vpop.f32.mrf.mxu0  ;;  %v912_v1 = vpop.f32.mrf.mxu1  ;;  %v7206_v21 = vmax.f32 %v5076_v0, 0.0 }
 0x12e   : > { %7203 = vst [vmem:[#allocation85_spill] sm:$0xff] %v5085_v8  ;;  %7204 = vst [vmem:[#allocation86_spill] sm:$0xff] %v5088_v36  ;;  %v6979_v23 = vmax.f32 %v5085_v8, 0.0  ;;  %v6981_v6 = vmax.f32 %v5088_v36, 0.0  ;;  %v1141_v62 = vpack.c.bf16 %v7205_v29, %v6984_v33  ;;  %v5127_v29 = vadd.f32 %v719_v61, %v4676_v40 }
 0x12f   : > { %v721_v53 = vpop.f32.mrf.mxu0  ;;  %v914_v26 = vpop.f32.mrf.mxu1  ;;  %v1143_v25 = vpack.c.bf16 %v7206_v21, %v6983_v45  ;;  %v5130_v21 = vadd.f32 %v912_v1, %v4680_v41 }
 0x130   : > { %v1142_v27 = vpack.c.bf16 %v6979_v23, %v6980_v22  ;;  %v1144_v60 = vpack.c.bf16 %v6981_v6, %v6982_v63  ;;  %v5115_v56 = vadd.f32 %v721_v53, %v4669_v38  ;;  %v5118_v22 = vadd.f32 %v914_v26, %v4673_v39  ;;  %7211 = vst [vmem:[#allocation91_spill] sm:$0xff] %v5127_v29 }
 0x131   : > { %v723_v8 = vpop.f32.mrf.mxu0  ;;  %v916_v23 = vpop.f32.mrf.mxu1  ;;  %7212 = vst [vmem:[#allocation92_spill] sm:$0xff] %v5130_v21 }
 0x132   : > { %7207 = vst [vmem:[#allocation87_spill] sm:$0xff] %v5115_v56  ;;  %7208 = vst [vmem:[#allocation88_spill] sm:$0xff] %v5118_v22  ;;  %v5121_v6 = vadd.f32 %v723_v8, %v4676_v40  ;;  %v5124_v63 = vadd.f32 %v916_v23, %v4680_v41  ;;  %1681 = vmatprep.mubr.bf16.mxu0 %v1142_v27  ;;  %1874 = vmatprep.mubr.bf16.mxu1 %v1144_v60  ;;  %v6994_v33 = vmax.f32 %v5115_v56, 0.0 }
 0x133   : > { %v725_v53 = vpop.f32.mrf.mxu0  ;;  %v918_v45 = vpop.f32.mrf.mxu1  ;;  %1682 = vmatmul.mubr.bf16.gmra.mxu0 %v1141_v62  ;;  %1875 = vmatmul.mubr.bf16.gmra.mxu1 %v1143_v25  ;;  %v6996_v1 = vmax.f32 %v5118_v22, 0.0  ;;  %v6998_v25 = vmax.f32 %v5127_v29, 0.0 }
 0x134   : > { %7209 = vst [vmem:[#allocation89_spill] sm:$0xff] %v5121_v6  ;;  %7210 = vst [vmem:[#allocation90_spill] sm:$0xff] %v5124_v63  ;;  %v5133_v26 = vadd.f32 %v725_v53, %v4669_v38  ;;  %v5136_v8 = vadd.f32 %v918_v45, %v4673_v39  ;;  %v6997_v53 = vmax.f32 %v5130_v21, 0.0  ;;  %v7215_v35 = vmax.f32 %v5121_v6, 0.0 }
 0x135   : > { %v729_v27 = vpop.f32.mrf.mxu0  ;;  %v922_v61 = vpop.f32.mrf.mxu1  ;;  %v7216_v7 = vmax.f32 %v5124_v63, 0.0 }
 0x136   : > { %7213 = vst [vmem:[#allocation93_spill] sm:$0xff] %v5133_v26  ;;  %7214 = vst [vmem:[#allocation94_spill] sm:$0xff] %v5136_v8  ;;  %v6993_v36 = vmax.f32 %v5133_v26, 0.0  ;;  %v6995_v62 = vmax.f32 %v5136_v8, 0.0  ;;  %v1145_v44 = vpack.c.bf16 %v7215_v35, %v6998_v25  ;;  %v5175_v35 = vadd.f32 %v729_v27, %v4676_v40 }
 0x137   : > { %v731_v45 = vpop.f32.mrf.mxu0  ;;  %v924_v0 = vpop.f32.mrf.mxu1  ;;  %v1147_v57 = vpack.c.bf16 %v7216_v7, %v6997_v53  ;;  %v5178_v7 = vadd.f32 %v922_v61, %v4680_v41 }
 0x138   : > { %v1146_v60 = vpack.c.bf16 %v6993_v36, %v6994_v33  ;;  %v1148_v23 = vpack.c.bf16 %v6995_v62, %v6996_v1  ;;  %v5163_v56 = vadd.f32 %v731_v45, %v4669_v38  ;;  %v5166_v33 = vadd.f32 %v924_v0, %v4673_v39  ;;  %7221 = vst [vmem:[#allocation99_spill] sm:$0xff] %v5175_v35 }
 0x139   : > { %v733_v26 = vpop.f32.mrf.mxu0  ;;  %v926_v36 = vpop.f32.mrf.mxu1  ;;  %7222 = vst [vmem:[#allocation100_spill] sm:$0xff] %v5178_v7 }
 0x13a   : > { %7217 = vst [vmem:[#allocation95_spill] sm:$0xff] %v5163_v56  ;;  %7218 = vst [vmem:[#allocation96_spill] sm:$0xff] %v5166_v33  ;;  %v5169_v62 = vadd.f32 %v733_v26, %v4676_v40  ;;  %v5172_v1 = vadd.f32 %v926_v36, %v4680_v41  ;;  %1691 = vmatprep.mubr.bf16.mxu0 %v1146_v60  ;;  %1884 = vmatprep.mubr.bf16.mxu1 %v1148_v23  ;;  %v7008_v25 = vmax.f32 %v5163_v56, 0.0 }
 0x13b   : > { %v735_v45 = vpop.f32.mrf.mxu0  ;;  %v928_v53 = vpop.f32.mrf.mxu1  ;;  %1692 = vmatmul.mubr.bf16.gmra.mxu0 %v1145_v44  ;;  %1885 = vmatmul.mubr.bf16.gmra.mxu1 %v1147_v57  ;;  %v7010_v61 = vmax.f32 %v5166_v33, 0.0  ;;  %v7012_v57 = vmax.f32 %v5175_v35, 0.0 }
 0x13c   : > { %7219 = vst [vmem:[#allocation97_spill] sm:$0xff] %v5169_v62  ;;  %7220 = vst [vmem:[#allocation98_spill] sm:$0xff] %v5172_v1  ;;  %v5181_v0 = vadd.f32 %v735_v45, %v4669_v38  ;;  %v5184_v26 = vadd.f32 %v928_v53, %v4673_v39  ;;  %v7011_v45 = vmax.f32 %v5178_v7, 0.0  ;;  %v7225_v6 = vmax.f32 %v5169_v62, 0.0 }
 0x13d   : > { %v739_v60 = vpop.f32.mrf.mxu0  ;;  %v932_v27 = vpop.f32.mrf.mxu1  ;;  %v7226_v21 = vmax.f32 %v5172_v1, 0.0 }
 0x13e   : > { %7223 = vst [vmem:[#allocation101_spill] sm:$0xff] %v5181_v0  ;;  %7224 = vst [vmem:[#allocation102_spill] sm:$0xff] %v5184_v26  ;;  %v7007_v8 = vmax.f32 %v5181_v0, 0.0  ;;  %v7009_v44 = vmax.f32 %v5184_v26, 0.0  ;;  %v1149_v22 = vpack.c.bf16 %v7225_v6, %v7012_v57  ;;  %v5223_v6 = vadd.f32 %v739_v60, %v4676_v40 }
 0x13f   : > { %v741_v53 = vpop.f32.mrf.mxu0  ;;  %v934_v63 = vpop.f32.mrf.mxu1  ;;  %v1151_v29 = vpack.c.bf16 %v7226_v21, %v7011_v45  ;;  %v5226_v21 = vadd.f32 %v932_v27, %v4680_v41 }
 0x140   : > { %v1150_v23 = vpack.c.bf16 %v7007_v8, %v7008_v25  ;;  %v1152_v36 = vpack.c.bf16 %v7009_v44, %v7010_v61  ;;  %v5211_v56 = vadd.f32 %v741_v53, %v4669_v38  ;;  %v5214_v25 = vadd.f32 %v934_v63, %v4673_v39  ;;  %7231 = vst [vmem:[#allocation107_spill] sm:$0xff] %v5223_v6 }
 0x141   : > { %v743_v0 = vpop.f32.mrf.mxu0  ;;  %v936_v8 = vpop.f32.mrf.mxu1  ;;  %7232 = vst [vmem:[#allocation108_spill] sm:$0xff] %v5226_v21 }
 0x142   : > { %7227 = vst [vmem:[#allocation103_spill] sm:$0xff] %v5211_v56  ;;  %7228 = vst [vmem:[#allocation104_spill] sm:$0xff] %v5214_v25  ;;  %v5217_v44 = vadd.f32 %v743_v0, %v4676_v40  ;;  %v5220_v61 = vadd.f32 %v936_v8, %v4680_v41  ;;  %1701 = vmatprep.mubr.bf16.mxu0 %v1150_v23  ;;  %1894 = vmatprep.mubr.bf16.mxu1 %v1152_v36  ;;  %v7022_v57 = vmax.f32 %v5211_v56, 0.0 }
 0x143   : > { %v745_v53 = vpop.f32.mrf.mxu0  ;;  %v938_v45 = vpop.f32.mrf.mxu1  ;;  %1702 = vmatmul.mubr.bf16.gmra.mxu0 %v1149_v22  ;;  %1895 = vmatmul.mubr.bf16.gmra.mxu1 %v1151_v29  ;;  %v7024_v27 = vmax.f32 %v5214_v25, 0.0  ;;  %v7026_v29 = vmax.f32 %v5223_v6, 0.0 }
 0x144   : > { %7229 = vst [vmem:[#allocation105_spill] sm:$0xff] %v5217_v44  ;;  %7230 = vst [vmem:[#allocation106_spill] sm:$0xff] %v5220_v61  ;;  %v5229_v63 = vadd.f32 %v745_v53, %v4669_v38  ;;  %v5232_v0 = vadd.f32 %v938_v45, %v4673_v39  ;;  %v7025_v53 = vmax.f32 %v5226_v21, 0.0  ;;  %v7235_v62 = vmax.f32 %v5217_v44, 0.0 }
 0x145   : > { %v749_v23 = vpop.f32.mrf.mxu0  ;;  %v942_v60 = vpop.f32.mrf.mxu1  ;;  %v7236_v7 = vmax.f32 %v5220_v61, 0.0 }
 0x146   : > { %7233 = vst [vmem:[#allocation109_spill] sm:$0xff] %v5229_v63  ;;  %7234 = vst [vmem:[#allocation110_spill] sm:$0xff] %v5232_v0  ;;  %v7021_v26 = vmax.f32 %v5229_v63, 0.0  ;;  %v7023_v22 = vmax.f32 %v5232_v0, 0.0  ;;  %v1153_v33 = vpack.c.bf16 %v7235_v62, %v7026_v29  ;;  %v5271_v62 = vadd.f32 %v749_v23, %v4676_v40 }
 0x147   : > { %v751_v45 = vpop.f32.mrf.mxu0  ;;  %v944_v1 = vpop.f32.mrf.mxu1  ;;  %v1155_v35 = vpack.c.bf16 %v7236_v7, %v7025_v53  ;;  %v5274_v7 = vadd.f32 %v942_v60, %v4680_v41 }
 0x148   : > { %v1154_v36 = vpack.c.bf16 %v7021_v26, %v7022_v57  ;;  %v1156_v8 = vpack.c.bf16 %v7023_v22, %v7024_v27  ;;  %v5259_v56 = vadd.f32 %v751_v45, %v4669_v38  ;;  %v5262_v57 = vadd.f32 %v944_v1, %v4673_v39  ;;  %7241 = vst [vmem:[#allocation115_spill] sm:$0xff] %v5271_v62 }
 0x149   : > { %v753_v63 = vpop.f32.mrf.mxu0  ;;  %v946_v26 = vpop.f32.mrf.mxu1  ;;  %7242 = vst [vmem:[#allocation116_spill] sm:$0xff] %v5274_v7 }
 0x14a   : > { %7237 = vst [vmem:[#allocation111_spill] sm:$0xff] %v5259_v56  ;;  %7238 = vst [vmem:[#allocation112_spill] sm:$0xff] %v5262_v57  ;;  %v5265_v22 = vadd.f32 %v753_v63, %v4676_v40  ;;  %v5268_v27 = vadd.f32 %v946_v26, %v4680_v41  ;;  %1711 = vmatprep.mubr.bf16.mxu0 %v1154_v36  ;;  %1904 = vmatprep.mubr.bf16.mxu1 %v1156_v8  ;;  %v7036_v29 = vmax.f32 %v5259_v56, 0.0 }
 0x14b   : > { %v755_v45 = vpop.f32.mrf.mxu0  ;;  %v948_v53 = vpop.f32.mrf.mxu1  ;;  %1712 = vmatmul.mubr.bf16.gmra.mxu0 %v1153_v33  ;;  %1905 = vmatmul.mubr.bf16.gmra.mxu1 %v1155_v35  ;;  %v7038_v60 = vmax.f32 %v5262_v57, 0.0  ;;  %v7040_v35 = vmax.f32 %v5271_v62, 0.0 }
 0x14c   : > { %7239 = vst [vmem:[#allocation113_spill] sm:$0xff] %v5265_v22  ;;  %7240 = vst [vmem:[#allocation114_spill] sm:$0xff] %v5268_v27  ;;  %v5277_v1 = vadd.f32 %v755_v45, %v4669_v38  ;;  %v5280_v63 = vadd.f32 %v948_v53, %v4673_v39  ;;  %v7039_v45 = vmax.f32 %v5274_v7, 0.0  ;;  %v7245_v44 = vmax.f32 %v5265_v22, 0.0 }
 0x14d   : > { %v759_v36 = vpop.f32.mrf.mxu0  ;;  %v952_v23 = vpop.f32.mrf.mxu1  ;;  %v7246_v21 = vmax.f32 %v5268_v27, 0.0 }
 0x14e   : > { %7243 = vst [vmem:[#allocation117_spill] sm:$0xff] %v5277_v1  ;;  %7244 = vst [vmem:[#allocation118_spill] sm:$0xff] %v5280_v63  ;;  %v7035_v0 = vmax.f32 %v5277_v1, 0.0  ;;  %v7037_v33 = vmax.f32 %v5280_v63, 0.0  ;;  %v1157_v25 = vpack.c.bf16 %v7245_v44, %v7040_v35  ;;  %v5319_v44 = vadd.f32 %v759_v36, %v4676_v40 }
 0x14f   : > { %v761_v53 = vpop.f32.mrf.mxu0  ;;  %v954_v61 = vpop.f32.mrf.mxu1  ;;  %v1159_v6 = vpack.c.bf16 %v7246_v21, %v7039_v45  ;;  %v5322_v21 = vadd.f32 %v952_v23, %v4680_v41 }
 0x150   : > { %v1158_v8 = vpack.c.bf16 %v7035_v0, %v7036_v29  ;;  %v1160_v26 = vpack.c.bf16 %v7037_v33, %v7038_v60  ;;  %v5307_v56 = vadd.f32 %v761_v53, %v4669_v38  ;;  %v5310_v29 = vadd.f32 %v954_v61, %v4673_v39  ;;  %7251 = vst [vmem:[#allocation123_spill] sm:$0xff] %v5319_v44 }
 0x151   : > { %v763_v1 = vpop.f32.mrf.mxu0  ;;  %v956_v0 = vpop.f32.mrf.mxu1  ;;  %7252 = vst [vmem:[#allocation124_spill] sm:$0xff] %v5322_v21 }
 0x152   : > { %7247 = vst [vmem:[#allocation119_spill] sm:$0xff] %v5307_v56  ;;  %7248 = vst [vmem:[#allocation120_spill] sm:$0xff] %v5310_v29  ;;  %v5313_v33 = vadd.f32 %v763_v1, %v4676_v40  ;;  %v5316_v60 = vadd.f32 %v956_v0, %v4680_v41  ;;  %1721 = vmatprep.mubr.bf16.mxu0 %v1158_v8  ;;  %1914 = vmatprep.mubr.bf16.mxu1 %v1160_v26  ;;  %v7050_v35 = vmax.f32 %v5307_v56, 0.0 }
 0x153   : > { %v765_v53 = vpop.f32.mrf.mxu0  ;;  %v958_v45 = vpop.f32.mrf.mxu1  ;;  %1722 = vmatmul.mubr.bf16.gmra.mxu0 %v1157_v25  ;;  %1915 = vmatmul.mubr.bf16.gmra.mxu1 %v1159_v6  ;;  %v7052_v23 = vmax.f32 %v5310_v29, 0.0  ;;  %v7054_v6 = vmax.f32 %v5319_v44, 0.0 }
 0x154   : > { %7249 = vst [vmem:[#allocation121_spill] sm:$0xff] %v5313_v33  ;;  %7250 = vst [vmem:[#allocation122_spill] sm:$0xff] %v5316_v60  ;;  %v5325_v61 = vadd.f32 %v765_v53, %v4669_v38  ;;  %v5328_v1 = vadd.f32 %v958_v45, %v4673_v39  ;;  %v7053_v53 = vmax.f32 %v5322_v21, 0.0  ;;  %v7255_v22 = vmax.f32 %v5313_v33, 0.0 }
 0x155   : > { %v769_v8 = vpop.f32.mrf.mxu0  ;;  %v962_v36 = vpop.f32.mrf.mxu1  ;;  %v7256_v7 = vmax.f32 %v5316_v60, 0.0 }
 0x156   : > { %7253 = vst [vmem:[#allocation125_spill] sm:$0xff] %v5325_v61  ;;  %7254 = vst [vmem:[#allocation126_spill] sm:$0xff] %v5328_v1  ;;  %v7049_v63 = vmax.f32 %v5325_v61, 0.0  ;;  %v7051_v25 = vmax.f32 %v5328_v1, 0.0  ;;  %v1161_v57 = vpack.c.bf16 %v7255_v22, %v7054_v6  ;;  %v5367_v22 = vadd.f32 %v769_v8, %v4676_v40 }
 0x157   : > { %v771_v45 = vpop.f32.mrf.mxu0  ;;  %v964_v27 = vpop.f32.mrf.mxu1  ;;  %v1163_v62 = vpack.c.bf16 %v7256_v7, %v7053_v53  ;;  %v5370_v7 = vadd.f32 %v962_v36, %v4680_v41 }
 0x158   : > { %v1162_v26 = vpack.c.bf16 %v7049_v63, %v7050_v35  ;;  %v1164_v0 = vpack.c.bf16 %v7051_v25, %v7052_v23  ;;  %v5355_v56 = vadd.f32 %v771_v45, %v4669_v38  ;;  %v5358_v35 = vadd.f32 %v964_v27, %v4673_v39  ;;  %7261 = vst [vmem:[#allocation131_spill] sm:$0xff] %v5367_v22 }
 0x159   : > { %v773_v61 = vpop.f32.mrf.mxu0  ;;  %v966_v63 = vpop.f32.mrf.mxu1  ;;  %7262 = vst [vmem:[#allocation132_spill] sm:$0xff] %v5370_v7 }
 0x15a   : > { %7257 = vst [vmem:[#allocation127_spill] sm:$0xff] %v5355_v56  ;;  %7258 = vst [vmem:[#allocation128_spill] sm:$0xff] %v5358_v35  ;;  %v5361_v25 = vadd.f32 %v773_v61, %v4676_v40  ;;  %v5364_v23 = vadd.f32 %v966_v63, %v4680_v41  ;;  %1731 = vmatprep.mubr.bf16.mxu0 %v1162_v26  ;;  %1924 = vmatprep.mubr.bf16.mxu1 %v1164_v0  ;;  %v7064_v6 = vmax.f32 %v5355_v56, 0.0 }
 0x15b   : > { %v775_v45 = vpop.f32.mrf.mxu0  ;;  %v968_v53 = vpop.f32.mrf.mxu1  ;;  %1732 = vmatmul.mubr.bf16.gmra.mxu0 %v1161_v57  ;;  %1925 = vmatmul.mubr.bf16.gmra.mxu1 %v1163_v62  ;;  %v7066_v36 = vmax.f32 %v5358_v35, 0.0  ;;  %v7074_v62 = vmax.f32 %v5367_v22, 0.0 }
 0x15c   : > { %7259 = vst [vmem:[#allocation129_spill] sm:$0xff] %v5361_v25  ;;  %7260 = vst [vmem:[#allocation130_spill] sm:$0xff] %v5364_v23  ;;  %v5373_v27 = vadd.f32 %v775_v45, %v4669_v38  ;;  %v5376_v61 = vadd.f32 %v968_v53, %v4673_v39  ;;  %v7067_v45 = vmax.f32 %v5370_v7, 0.0  ;;  %v7265_v33 = vmax.f32 %v5361_v25, 0.0 }
 0x15d   : > { %v779_v26 = vpop.f32.mrf.mxu0  ;;  %v972_v8 = vpop.f32.mrf.mxu1  ;;  %v7266_v21 = vmax.f32 %v5364_v23, 0.0 }
 0x15e   : > { %7263 = vst [vmem:[#allocation133_spill] sm:$0xff] %v5373_v27  ;;  %7264 = vst [vmem:[#allocation134_spill] sm:$0xff] %v5376_v61  ;;  %v7063_v1 = vmax.f32 %v5373_v27, 0.0  ;;  %v7065_v57 = vmax.f32 %v5376_v61, 0.0  ;;  %v1165_v29 = vpack.c.bf16 %v7265_v33, %v7074_v62  ;;  %v5415_v33 = vadd.f32 %v779_v26, %v4676_v40 }
 0x15f   : > { %v781_v53 = vpop.f32.mrf.mxu0  ;;  %v974_v60 = vpop.f32.mrf.mxu1  ;;  %v1167_v44 = vpack.c.bf16 %v7266_v21, %v7067_v45  ;;  %v5418_v21 = vadd.f32 %v972_v8, %v4680_v41 }
 0x160   : > { %v1166_v0 = vpack.c.bf16 %v7063_v1, %v7064_v6  ;;  %v1168_v63 = vpack.c.bf16 %v7065_v57, %v7066_v36  ;;  %v5403_v56 = vadd.f32 %v781_v53, %v4669_v38  ;;  %v5406_v6 = vadd.f32 %v974_v60, %v4673_v39  ;;  %7271 = vst [vmem:[#allocation139_spill] sm:$0xff] %v5415_v33 }
 0x161   : > { %v783_v27 = vpop.f32.mrf.mxu0  ;;  %v976_v1 = vpop.f32.mrf.mxu1  ;;  %7272 = vst [vmem:[#allocation140_spill] sm:$0xff] %v5418_v21 }
 0x162   : > { %7267 = vst [vmem:[#allocation135_spill] sm:$0xff] %v5403_v56  ;;  %7268 = vst [vmem:[#allocation136_spill] sm:$0xff] %v5406_v6  ;;  %v5409_v57 = vadd.f32 %v783_v27, %v4676_v40  ;;  %v5412_v36 = vadd.f32 %v976_v1, %v4680_v41  ;;  %1741 = vmatprep.mubr.bf16.mxu0 %v1166_v0  ;;  %1934 = vmatprep.mubr.bf16.mxu1 %v1168_v63  ;;  %v7071_v40 = vmax.f32 %v5403_v56, 0.0 }
 0x163   : > { %v785_v53 = vpop.f32.mrf.mxu0  ;;  %v978_v45 = vpop.f32.mrf.mxu1  ;;  %1742 = vmatmul.mubr.bf16.gmra.mxu0 %v1165_v29  ;;  %1935 = vmatmul.mubr.bf16.gmra.mxu1 %v1167_v44  ;;  %v7070_v0 = vmax.f32 %v5406_v6, 0.0  ;;  %v7073_v29 = vmax.f32 %v5415_v33, 0.0 }
 0x164   : > { %7269 = vst [vmem:[#allocation137_spill] sm:$0xff] %v5409_v57  ;;  %7270 = vst [vmem:[#allocation138_spill] sm:$0xff] %v5412_v36  ;;  %v5421_v60 = vadd.f32 %v785_v53, %v4669_v38  ;;  %v5424_v27 = vadd.f32 %v978_v45, %v4673_v39  ;;  %v7072_v1 = vmax.f32 %v5409_v57, 0.0  ;;  %v7076_v63 = vmax.f32 %v5412_v36, 0.0  ;;  %v1237_v53 = vld [vmem:[%s6878_s5] sm:$0x3] }
 0x165   : > { %v7077_v38 = vmax.f32 %v5418_v21, 0.0  ;;  %v5460_v56 = vrot.slane %v1237_v53, %v4662_v34 }
 0x166   : > { %7273 = vst [vmem:[#allocation141_spill] sm:$0xff] %v5421_v60  ;;  %7274 = vst [vmem:[#allocation142_spill] sm:$0xff] %v5424_v27  ;;  %v7069_v41 = vmax.f32 %v5421_v60, 0.0  ;;  %v7068_v26 = vmax.f32 %v5424_v27, 0.0  ;;  %v1169_v8 = vpack.c.bf16 %v7072_v1, %v7073_v29 }
 0x167   : > { %v1171_v45 = vpack.c.bf16 %v7076_v63, %v7077_v38 }
 0x168   : > { %v1170_v39 = vpack.c.bf16 %v7069_v41, %v7071_v40  ;;  %v1172_v44 = vpack.c.bf16 %v7068_v26, %v7070_v0  ;;  %v5454_v26 = vrot.slane %v1237_v53, %v4658_v32 }
 0x16a   : > { %1751 = vmatprep.mubr.bf16.mxu0 %v1170_v39  ;;  %1944 = vmatprep.mubr.bf16.mxu1 %v1172_v44 }
 0x16b   : > { %1752 = vmatmul.mubr.bf16.gmra.mxu0 %v1169_v8  ;;  %1945 = vmatmul.mubr.bf16.gmra.mxu1 %v1171_v45 }
 0x1b3   : > { %v1603_v41 = vpop.f32.mrf.mxu0  ;;  %v1796_v0 = vpop.f32.mrf.mxu1 }
 0x1b5   : > { %v1605_v40 = vpop.f32.mrf.mxu0  ;;  %v1798_v1 = vpop.f32.mrf.mxu1 }
 0x1b6   : > { %v1606_v29 = vadd.f32 %v1605_v40, %v5454_v26 }
 0x1b7   : > { %v1607_v62 = vpop.f32.mrf.mxu0  ;;  %v1800_v27 = vpop.f32.mrf.mxu1 }
 0x1b8   : > { %v1799_v63 = vadd.f32 %v1798_v1, %v1606_v29 }
 0x1b9   : > { %v1609_v39 = vpop.f32.mrf.mxu0  ;;  %v1802_v44 = vpop.f32.mrf.mxu1 }
 0x1ba   : > { %v3672_v8 = vmul.f32 -1.442695, %v1799_v63  ;;  %v1610_v45 = vadd.f32 %v1609_v39, %v5454_v26 }
 0x1bb   : > { %v1613_v38 = vpop.f32.mrf.mxu0  ;;  %v1806_v36 = vpop.f32.mrf.mxu1 }
 0x1bc   : > { %3937 = vpow2.f32 %v3672_v8  ;;  %v1803_v60 = vadd.f32 %v1802_v44, %v1610_v45  ;;  %v1604_v8 = vadd.f32 %v1603_v41, %v5460_v56 }
 0x1bd   : > { %v1615_v32 = vpop.f32.mrf.mxu0  ;;  %v1808_v57 = vpop.f32.mrf.mxu1 }
 0x1be   : > { %v3673_v6 = vmul.f32 -1.442695, %v1803_v60  ;;  %v1616_v21 = vadd.f32 %v1615_v32, %v5454_v26  ;;  %v1797_v35 = vadd.f32 %v1796_v0, %v1604_v8 }
 0x1bf   : > { %v1617_v40 = vpop.f32.mrf.mxu0  ;;  %v1810_v33 = vpop.f32.mrf.mxu1 }
 0x1c0   : > { %3939 = vpow2.f32 %v3673_v6  ;;  %v1809_v1 = vadd.f32 %v1808_v57, %v1616_v21  ;;  %v1608_v6 = vadd.f32 %v1607_v62, %v5460_v56 }
 0x1c1   : > { %v1619_v29 = vpop.f32.mrf.mxu0  ;;  %v1812_v63 = vpop.f32.mrf.mxu1 }
 0x1c2   : > { %v3674_v61 = vmul.f32 -1.442695, %v1809_v1  ;;  %v1620_v39 = vadd.f32 %v1619_v29, %v5454_v26 }
 0x1c3   : > { %v1623_v44 = vpop.f32.mrf.mxu0  ;;  %v1816_v45 = vpop.f32.mrf.mxu1 }
 0x1c4   : > { %3941 = vpow2.f32 %v3674_v61  ;;  %v1813_v60 = vadd.f32 %v1812_v63, %v1620_v39  ;;  %v1801_v63 = vadd.f32 %v1800_v27, %v1608_v6  ;;  %v1614_v39 = vadd.f32 %v1613_v38, %v5460_v56 }
 0x1c5   : > { %v1625_v23 = vpop.f32.mrf.mxu0  ;;  %v1818_v32 = vpop.f32.mrf.mxu1 }
 0x1c6   : > { %v3675_v25 = vmul.f32 -1.442695, %v1813_v60  ;;  %v1626_v53 = vadd.f32 %v1625_v23, %v5454_v26 }
 0x1c7   : > { %v1627_v57 = vpop.f32.mrf.mxu0  ;;  %v1820_v21 = vpop.f32.mrf.mxu1 }
 0x1c8   : > { %3943 = vpow2.f32 %v3675_v25  ;;  %v1819_v1 = vadd.f32 %v1818_v32, %v1626_v53 }
 0x1c9   : > { %v3938_v7 = vpop.eup %3937  ;;  %v1629_v29 = vpop.f32.mrf.mxu0  ;;  %3945 = vtanh.f32 %v1797_v35 }
 0x1ca   : > { %v1822_v22 = vpop.f32.mrf.mxu1  ;;  %v2083_v41 = vadd.f32 1.0, %v3938_v7  ;;  %v3676_v42 = vmul.f32 -1.442695, %v1819_v1  ;;  %v1630_v61 = vadd.f32 %v1629_v29, %v5454_v26  ;;  %v1807_v7 = vadd.f32 %v1806_v36, %v1614_v39 }
 0x1cb   : > { %v1633_v60 = vpop.f32.mrf.mxu0  ;;  %v1618_v1 = vadd.f32 %v1617_v40, %v5460_v56  ;;  %v1624_v36 = vadd.f32 %v1623_v44, %v5460_v56 }
 0x1cc   : > { %v5468_v23 = vpop.f32.mrf.mxu1  ;;  %3947 = vrcp.f32 %v2083_v41  ;;  %v1823_v62 = vadd.f32 %v1822_v22, %v1630_v61 }
 0x1cd   : > { %v3940_v0 = vpop.eup %3939  ;;  %3949 = vpow2.f32 %v3676_v42  ;;  %v1635_v25 = vpop.f32.mrf.mxu0 }
 0x1ce   : > { %v1828_v8 = vpop.f32.mrf.mxu1  ;;  %v2084_v32 = vadd.f32 1.0, %v3940_v0  ;;  %v3677_v53 = vmul.f32 -1.442695, %v1823_v62  ;;  %3951 = vtanh.f32 %v1801_v63  ;;  %v1636_v35 = vadd.f32 %v1635_v25, %v5454_v26 }
 0x1cf   : > { %v5472_v27 = vpop.f32.mrf.mxu0  ;;  %v1811_v63 = vadd.f32 %v1810_v33, %v1618_v1  ;;  %v1628_v0 = vadd.f32 %v1627_v57, %v5460_v56 }
 0x1d0   : > { %v5474_v38 = vpop.f32.mrf.mxu1  ;;  %3953 = vrcp.f32 %v2084_v32  ;;  %v1829_v22 = vadd.f32 %v1828_v8, %v1636_v35 }
 0x1d1   : > { %v3942_v6 = vpop.eup %3941  ;;  %3955 = vpow2.f32 %v3677_v53  ;;  %v1639_v29 = vpop.f32.mrf.mxu0 }
 0x1d2   : > { %v1832_v42 = vpop.f32.mrf.mxu1  ;;  %v2085_v41 = vadd.f32 1.0, %v3942_v6  ;;  %v1640_v61 = vadd.f32 %v1639_v29, %v5454_v26  ;;  %3957 = vtanh.f32 %v1807_v7  ;;  %v3678_v40 = vmul.f32 -1.442695, %v1829_v22 }
 0x1d3   : > { %v5478_v39 = vpop.f32.mrf.mxu0  ;;  %v1817_v7 = vadd.f32 %v1816_v45, %v1624_v36  ;;  %v1821_v29 = vadd.f32 %v1820_v21, %v1628_v0 }
 0x1d4   : > { %v5480_v62 = vpop.f32.mrf.mxu1  ;;  %3959 = vrcp.f32 %v2085_v41  ;;  %v1833_v25 = vadd.f32 %v1832_v42, %v1640_v61 }
 0x1d5   : > { %v3944_v32 = vpop.eup %3943  ;;  %3961 = vpow2.f32 %v3678_v40  ;;  %v1645_v8 = vpop.f32.mrf.mxu0  ;;  %v5491_v40 = vld [vmem:[%s6879_s6] ss:$0 sm:$0xff] }
 0x1d6   : > { %v1838_v53 = vpop.f32.mrf.mxu1  ;;  %v2086_v35 = vadd.f32 1.0, %v3944_v32  ;;  %v3679_v6 = vmul.f32 -1.442695, %v1833_v25  ;;  %3963 = vtanh.f32 %v1811_v63  ;;  %v1646_v33 = vadd.f32 %v1645_v8, %v5454_v26  ;;  %v3946_v22 = vpop.eup %3945 }
 0x1d7   : > { %v5484_v44 = vpop.f32.mrf.mxu0  ;;  %v1634_v32 = vadd.f32 %v1633_v60, %v5460_v56 }
 0x1d8   : > { %v5486_v1 = vpop.f32.mrf.mxu1  ;;  %3965 = vrcp.f32 %v2086_v35  ;;  %v1839_v57 = vadd.f32 %v1838_v53, %v1646_v33 }
 0x1d9   : > { %v3948_v41 = vpop.eup %3947  ;;  %3967 = vpow2.f32 %v3679_v6  ;;  %v1649_v42 = vpop.f32.mrf.mxu0 }
 0x1da   : > { %v1842_v61 = vpop.f32.mrf.mxu1  ;;  %v3950_v45 = vpop.eup %3949  ;;  %v1650_v63 = vadd.f32 %v1649_v42, %v5454_v26  ;;  %v2179_v36 = vmul.f32 %v3948_v41, %v3946_v22  ;;  %3969 = vtanh.f32 %v1817_v7  ;;  %v3680_v8 = vmul.f32 -1.442695, %v1839_v57 }
 0x1db   : > { %v2087_v25 = vadd.f32 1.0, %v3950_v45  ;;  %v5495_v21 = vpop.f32.mrf.mxu0  ;;  %v3952_v53 = vpop.eup %3951  ;;  %3971 = vtanh.f32 %v1821_v29  ;;  %v1827_v41 = vadd.f32 %v5468_v23, %v1634_v32  ;;  %v1638_v57 = vadd.f32 %v5472_v27, %v5460_v56 }
 0x1dc   : > { %v5497_v0 = vpop.f32.mrf.mxu1  ;;  %v1843_v35 = vadd.f32 %v1842_v61, %v1650_v63  ;;  %v2218_v6 = vmul.f32 %v5491_v40, %v2179_v36 }
 0x1dd   : > { %v3954_v33 = vpop.eup %3953  ;;  %3973 = vrcp.f32 %v2087_v25  ;;  %v1655_v28 = vpop.f32.mrf.mxu0  ;;  %v1831_v32 = vadd.f32 %v5474_v38, %v1638_v57 }
 0x1de   : > { %v1848_v24 = vpop.f32.mrf.mxu1  ;;  %v3956_v42 = vpop.eup %3955  ;;  %3975 = vpow2.f32 %v3680_v8  ;;  %v3681_v7 = vmul.f32 -1.442695, %v1843_v35  ;;  %v1656_v22 = vadd.f32 %v1655_v28, %v5454_v26  ;;  %2250 = vadd.xlane.f32.xlu0 %v2218_v6  ;;  %v2180_v45 = vmul.f32 %v3954_v33, %v3952_v53 }
 0x1df   : > { %v2088_v60 = vadd.f32 1.0, %v3956_v42  ;;  %v5504_v29 = vpop.f32.mrf.mxu0  ;;  %v3958_v63 = vpop.eup %3957 }
 0x1e0   : > { %v5506_v61 = vpop.f32.mrf.mxu1  ;;  %3977 = vpow2.f32 %v3681_v7  ;;  %v1849_v36 = vadd.f32 %v1848_v24, %v1656_v22  ;;  %v2219_v28 = vmul.f32 %v5491_v40, %v2180_v45 }
 0x1e1   : > { %v3960_v25 = vpop.eup %3959  ;;  %3979 = vrcp.f32 %v2088_v60  ;;  %v1659_v8 = vpop.f32.mrf.mxu0  ;;  %v1644_v60 = vadd.f32 %v5478_v39, %v5460_v56 }
 0x1e2   : > { %v1852_v35 = vpop.f32.mrf.mxu1  ;;  %v3962_v6 = vpop.eup %3961  ;;  %v3682_v42 = vmul.f32 -1.442695, %v1849_v36  ;;  %v1660_v23 = vadd.f32 %v1659_v8, %v5454_v26  ;;  %3981 = vtanh.f32 %v1827_v41  ;;  %2252 = vadd.xlane.f32.xlu0 %v2219_v28  ;;  %v2181_v24 = vmul.f32 %v3960_v25, %v3958_v63 }
 0x1e3   : > { %v2089_v27 = vadd.f32 1.0, %v3962_v6  ;;  %v5511_v58 = vpop.f32.mrf.mxu0  ;;  %v3964_v33 = vpop.eup %3963  ;;  %v1648_v63 = vadd.f32 %v5484_v44, %v5460_v56  ;;  %v1654_v44 = vadd.f32 %v5495_v21, %v5460_v56 }
 0x1e4   : > { %v5513_v53 = vpop.f32.mrf.mxu1  ;;  %3983 = vpow2.f32 %v3682_v42  ;;  %v1853_v7 = vadd.f32 %v1852_v35, %v1660_v23  ;;  %v2220_v41 = vmul.f32 %v5491_v40, %v2181_v24 }
 0x1e5   : > { %v3966_v22 = vpop.eup %3965  ;;  %3985 = vrcp.f32 %v2089_v27  ;;  %v1665_v45 = vpop.f32.mrf.mxu0  ;;  %v1837_v27 = vadd.f32 %v5480_v62, %v1644_v60 }
 0x1e6   : > { %v1858_v36 = vpop.f32.mrf.mxu1  ;;  %v3968_v8 = vpop.eup %3967  ;;  %v3683_v38 = vmul.f32 -1.442695, %v1853_v7  ;;  %v1666_v57 = vadd.f32 %v1665_v45, %v5454_v26  ;;  %3987 = vtanh.f32 %v1831_v32  ;;  %2254 = vadd.xlane.f32.xlu1 %v2220_v41  ;;  %v2182_v6 = vmul.f32 %v3966_v22, %v3964_v33 }
 0x1e7   : > { %v2090_v28 = vadd.f32 1.0, %v3968_v8  ;;  %v5521_v25 = vpop.f32.mrf.mxu0  ;;  %v3970_v39 = vpop.eup %3969  ;;  %v1841_v33 = vadd.f32 %v5486_v1, %v1648_v63  ;;  %v1847_v1 = vadd.f32 %v5497_v0, %v1654_v44 }
 0x1e8   : > { %v5523_v35 = vpop.f32.mrf.mxu1  ;;  %3989 = vpow2.f32 %v3683_v38  ;;  %v1859_v42 = vadd.f32 %v1858_v36, %v1666_v57  ;;  %v3972_v23 = vpop.eup %3971  ;;  %v2221_v32 = vmul.f32 %v5491_v40, %v2182_v6 }
 0x1e9   : > { %3991 = vrcp.f32 %v2090_v28  ;;  %v1669_v24 = vpop.f32.mrf.mxu0 }
 0x1ea   : > { %v1862_v7 = vpop.f32.mrf.mxu1  ;;  %v3974_v45 = vpop.eup %3973  ;;  %v3684_v41 = vmul.f32 -1.442695, %v1859_v42  ;;  %v1670_v8 = vadd.f32 %v1669_v24, %v5454_v26  ;;  %2256 = vadd.xlane.f32.xlu1 %v2221_v32  ;;  %v1658_v32 = vadd.f32 %v5504_v29, %v5460_v56 }
 0x1eb   : > { %v3976_v43 = vpop.eup %3975  ;;  %v5531_v22 = vpop.f32.mrf.mxu0  ;;  %v2183_v62 = vmul.f32 %v3974_v45, %v3970_v39 }
 0x1ec   : > { %v5533_v36 = vpop.f32.mrf.mxu1  ;;  %v2091_v60 = vadd.f32 1.0, %v3976_v43  ;;  %3993 = vpow2.f32 %v3684_v41  ;;  %v1863_v38 = vadd.f32 %v1862_v7, %v1670_v8 }
 0x1ed   : > { %v3978_v57 = vpop.eup %3977  ;;  %3995 = vtanh.f32 %v1837_v27  ;;  %v1675_v28 = vpop.f32.mrf.mxu0  ;;  %v2222_v21 = vmul.f32 %v5491_v40, %v2183_v62 }
 0x1ee   : > { %v1868_v6 = vpop.f32.mrf.mxu1  ;;  %v3980_v42 = vpop.eup %3979  ;;  %3997 = vrcp.f32 %v2091_v60  ;;  %v2092_v24 = vadd.f32 1.0, %v3978_v57  ;;  %v3685_v63 = vmul.f32 -1.442695, %v1863_v38  ;;  %v1676_v43 = vadd.f32 %v1675_v28, %v5454_v26 }
 0x1ef   : > { %3999 = vtanh.f32 %v1841_v33  ;;  %2258 = vadd.xlane.f32.xlu0 %v2222_v21  ;;  %v5540_v39 = vpop.f32.mrf.mxu0  ;;  %v2184_v7 = vmul.f32 %v3980_v42, %v3972_v23  ;;  %v3982_v45 = vpop.eup %3981  ;;  %v1851_v38 = vadd.f32 %v5506_v61, %v1658_v32  ;;  %v1664_v57 = vadd.f32 %v5511_v58, %v5460_v56 }
 0x1f0   : > { %v5542_v27 = vpop.f32.mrf.mxu1  ;;  %4001 = vrcp.f32 %v2092_v24  ;;  %v1869_v8 = vadd.f32 %v1868_v6, %v1676_v43  ;;  %v1668_v58 = vadd.f32 %v5521_v25, %v5460_v56 }
 0x1f1   : > { %v3984_v41 = vpop.eup %3983  ;;  %4003 = vpow2.f32 %v3685_v63  ;;  %v1679_v62 = vpop.f32.mrf.mxu0  ;;  %v2223_v44 = vmul.f32 %v5491_v40, %v2184_v7 }
 0x1f2   : > { %v1872_v0 = vpop.f32.mrf.mxu1  ;;  %v3986_v33 = vpop.eup %3985  ;;  %4005 = vtanh.f32 %v1847_v1  ;;  %v2093_v29 = vadd.f32 1.0, %v3984_v41  ;;  %v1680_v60 = vadd.f32 %v1679_v62, %v5454_v26  ;;  %v3686_v23 = vmul.f32 -1.442695, %v1869_v8 }
 0x1f3   : > { %2260 = vadd.xlane.f32.xlu1 %v2223_v44  ;;  %v5549_v28 = vpop.f32.mrf.mxu0  ;;  %v2185_v6 = vmul.f32 %v3986_v33, %v3982_v45  ;;  %v3988_v42 = vpop.eup %3987  ;;  %v1857_v8 = vadd.f32 %v5513_v53, %v1664_v57  ;;  %v1861_v53 = vadd.f32 %v5523_v35, %v1668_v58  ;;  %v1674_v57 = vadd.f32 %v5531_v22, %v5460_v56 }
 0x1f4   : > { %v5551_v21 = vpop.f32.mrf.mxu1  ;;  %4007 = vrcp.f32 %v2093_v29  ;;  %v1873_v24 = vadd.f32 %v1872_v0, %v1680_v60 }
 0x1f5   : > { %v3990_v63 = vpop.eup %3989  ;;  %4009 = vpow2.f32 %v3686_v23  ;;  %v1685_v1 = vpop.f32.mrf.mxu0  ;;  %v2224_v7 = vmul.f32 %v5491_v40, %v2185_v6  ;;  %v1867_v22 = vadd.f32 %v5533_v36, %v1674_v57 }
 0x1f6   : > { %v1878_v43 = vpop.f32.mrf.mxu1  ;;  %v3992_v61 = vpop.eup %3991  ;;  %v2094_v32 = vadd.f32 1.0, %v3990_v63  ;;  %v3687_v41 = vmul.f32 -1.442695, %v1873_v24  ;;  %4011 = vtanh.f32 %v1851_v38  ;;  %v1686_v45 = vadd.f32 %v1685_v1, %v5454_v26 }
 0x1f7   : > { %2262 = vadd.xlane.f32.xlu0 %v2224_v7  ;;  %v5558_v62 = vpop.f32.mrf.mxu0  ;;  %v2186_v44 = vmul.f32 %v3992_v61, %v3988_v42 }
 0x1f8   : > { %v5560_v0 = vpop.f32.mrf.mxu1  ;;  %4013 = vrcp.f32 %v2094_v32  ;;  %v1879_v29 = vadd.f32 %v1878_v43, %v1686_v45 }
 0x1f9   : > { %v3994_v33 = vpop.eup %3993  ;;  %4015 = vpow2.f32 %v3687_v41  ;;  %v1689_v60 = vpop.f32.mrf.mxu0  ;;  %v2225_v25 = vmul.f32 %v5491_v40, %v2186_v44 }
 0x1fa   : > { %v1882_v23 = vpop.f32.mrf.mxu1  ;;  %v3996_v6 = vpop.eup %3995  ;;  %v2095_v38 = vadd.f32 1.0, %v3994_v33  ;;  %v1690_v24 = vadd.f32 %v1689_v60, %v5454_v26  ;;  %4017 = vtanh.f32 %v1857_v8  ;;  %v3688_v42 = vmul.f32 -1.442695, %v1879_v29 }
 0x1fb   : > { %v3998_v63 = vpop.eup %3997  ;;  %2264 = vadd.xlane.f32.xlu1 %v2225_v25  ;;  %v5567_v1 = vpop.f32.mrf.mxu0  ;;  %v1678_v60 = vadd.f32 %v5540_v39, %v5460_v56 }
 0x1fc   : > { %v5569_v43 = vpop.f32.mrf.mxu1  ;;  %v4000_v7 = vpop.eup %3999  ;;  %4019 = vrcp.f32 %v2095_v38  ;;  %v1883_v61 = vadd.f32 %v1882_v23, %v1690_v24  ;;  %v2187_v32 = vmul.f32 %v3998_v63, %v3996_v6 }
 0x1fd   : > { %v4002_v41 = vpop.eup %4001  ;;  %4021 = vpow2.f32 %v3688_v42  ;;  %v1695_v35 = vpop.f32.mrf.mxu0 }
 0x1fe   : > { %v1888_v58 = vpop.f32.mrf.mxu1  ;;  %v4004_v45 = vpop.eup %4003  ;;  %4023 = vtanh.f32 %v1861_v53  ;;  %v3689_v44 = vmul.f32 -1.442695, %v1883_v61  ;;  %v1696_v8 = vadd.f32 %v1695_v35, %v5454_v26  ;;  %v2226_v25 = vmul.f32 %v5491_v40, %v2187_v32 }
 0x1ff   : > { %v4006_v33 = vpop.eup %4005  ;;  %v2096_v29 = vadd.f32 1.0, %v4004_v45  ;;  %v5576_v23 = vpop.f32.mrf.mxu0  ;;  %v2188_v38 = vmul.f32 %v4002_v41, %v4000_v7  ;;  %v1871_v35 = vadd.f32 %v5542_v27, %v1678_v60  ;;  %v1684_v7 = vadd.f32 %v5549_v28, %v5460_v56 }
 0x200   : > { %v5578_v6 = vpop.f32.mrf.mxu1  ;;  %4025 = vpow2.f32 %v3689_v44  ;;  %v1889_v24 = vadd.f32 %v1888_v58, %v1696_v8  ;;  %2266 = vadd.xlane.f32.xlu0 %v2226_v25  ;;  %v1688_v27 = vadd.f32 %v5558_v62, %v5460_v56 }
 0x201   : > { %v4008_v53 = vpop.eup %4007  ;;  %4027 = vrcp.f32 %v2096_v29  ;;  %v1699_v36 = vpop.f32.mrf.mxu0  ;;  %v2227_v63 = vmul.f32 %v5491_v40, %v2188_v38 }
 0x202   : > { %v1892_v57 = vpop.f32.mrf.mxu1  ;;  %v4010_v42 = vpop.eup %4009  ;;  %4029 = vtanh.f32 %v1867_v22  ;;  %v3690_v61 = vmul.f32 -1.442695, %v1889_v24  ;;  %v1700_v39 = vadd.f32 %v1699_v36, %v5454_v26  ;;  %v2189_v45 = vmul.f32 %v4008_v53, %v4006_v33 }
 0x203   : > { %v2097_v32 = vadd.f32 1.0, %v4010_v42  ;;  %2268 = vadd.xlane.f32.xlu1 %v2227_v63  ;;  %v5585_v41 = vpop.f32.mrf.mxu0  ;;  %v4012_v44 = vpop.eup %4011  ;;  %v1877_v33 = vadd.f32 %v5551_v21, %v1684_v7 }
 0x204   : > { %v5587_v58 = vpop.f32.mrf.mxu1  ;;  %4031 = vpow2.f32 %v3690_v61  ;;  %v1893_v8 = vadd.f32 %v1892_v57, %v1700_v39  ;;  %v2228_v38 = vmul.f32 %v5491_v40, %v2189_v45 }
 0x205   : > { %v4014_v29 = vpop.eup %4013  ;;  %4033 = vrcp.f32 %v2097_v32  ;;  %v1705_v22 = vpop.f32.mrf.mxu0 }
 0x206   : > { %v1898_v25 = vpop.f32.mrf.mxu1  ;;  %v4016_v24 = vpop.eup %4015  ;;  %v3691_v28 = vmul.f32 -1.442695, %v1893_v8  ;;  %v1706_v60 = vadd.f32 %v1705_v22, %v5454_v26  ;;  %4035 = vtanh.f32 %v1871_v35  ;;  %2270 = vadd.xlane.f32.xlu0 %v2228_v38  ;;  %v2190_v63 = vmul.f32 %v4014_v29, %v4012_v44 }
 0x207   : > { %v2098_v36 = vadd.f32 1.0, %v4016_v24  ;;  %v5594_v53 = vpop.f32.mrf.mxu0  ;;  %v4018_v42 = vpop.eup %4017  ;;  %v1881_v35 = vadd.f32 %v5560_v0, %v1688_v27  ;;  %v1694_v44 = vadd.f32 %v5567_v1, %v5460_v56 }
 0x208   : > { %v5596_v57 = vpop.f32.mrf.mxu1  ;;  %4037 = vpow2.f32 %v3691_v28  ;;  %v1899_v61 = vadd.f32 %v1898_v25, %v1706_v60  ;;  %v2229_v45 = vmul.f32 %v5491_v40, %v2190_v63 }
 0x209   : > { %v4020_v39 = vpop.eup %4019  ;;  %4039 = vrcp.f32 %v2098_v36  ;;  %v1709_v32 = vpop.f32.mrf.mxu0  ;;  %v1887_v1 = vadd.f32 %v5569_v43, %v1694_v44 }
 0x20a   : > { %v1902_v62 = vpop.f32.mrf.mxu1  ;;  %v4022_v8 = vpop.eup %4021  ;;  %v3692_v22 = vmul.f32 -1.442695, %v1899_v61  ;;  %v1710_v21 = vadd.f32 %v1709_v32, %v5454_v26  ;;  %4041 = vtanh.f32 %v1877_v33  ;;  %2272 = vadd.xlane.f32.xlu1 %v2229_v45  ;;  %v2191_v24 = vmul.f32 %v4020_v39, %v4018_v42 }
 0x20b   : > { %v4024_v7 = vpop.eup %4023  ;;  %v2099_v38 = vadd.f32 1.0, %v4022_v8  ;;  %v5603_v29 = vpop.f32.mrf.mxu0  ;;  %v1698_v45 = vadd.f32 %v5576_v23, %v5460_v56  ;;  %v1704_v23 = vadd.f32 %v5585_v41, %v5460_v56 }
 0x20c   : > { %v5605_v25 = vpop.f32.mrf.mxu1  ;;  %4043 = vpow2.f32 %v3692_v22  ;;  %v1903_v28 = vadd.f32 %v1902_v62, %v1710_v21  ;;  %v2230_v36 = vmul.f32 %v5491_v40, %v2191_v24 }
 0x20d   : > { %v4026_v60 = vpop.eup %4025  ;;  %4045 = vrcp.f32 %v2099_v38  ;;  %v1715_v0 = vpop.f32.mrf.mxu0 }
 0x20e   : > { %v1908_v27 = vpop.f32.mrf.mxu1  ;;  %v4028_v63 = vpop.eup %4027  ;;  %4047 = vtanh.f32 %v1881_v35  ;;  %v2100_v33 = vadd.f32 1.0, %v4026_v60  ;;  %v3693_v61 = vmul.f32 -1.442695, %v1903_v28  ;;  %v1716_v42 = vadd.f32 %v1715_v0, %v5454_v26  ;;  %2274 = vadd.xlane.f32.xlu0 %v2230_v36 }
 0x20f   : > { %v4030_v32 = vpop.eup %4029  ;;  %v5612_v39 = vpop.f32.mrf.mxu0  ;;  %v2192_v8 = vmul.f32 %v4028_v63, %v4024_v7  ;;  %v1891_v60 = vadd.f32 %v5578_v6, %v1698_v45  ;;  %v1897_v6 = vadd.f32 %v5587_v58, %v1704_v23 }
 0x210   : > { %v5614_v62 = vpop.f32.mrf.mxu1  ;;  %4049 = vrcp.f32 %v2100_v33  ;;  %v1909_v35 = vadd.f32 %v1908_v27, %v1716_v42 }
 0x211   : > { %v4032_v22 = vpop.eup %4031  ;;  %4051 = vpow2.f32 %v3693_v61  ;;  %v1719_v21 = vpop.f32.mrf.mxu0  ;;  %v2231_v24 = vmul.f32 %v5491_v40, %v2192_v8 }
 0x212   : > { %v1912_v38 = vpop.f32.mrf.mxu1  ;;  %v4034_v43 = vpop.eup %4033  ;;  %v2101_v44 = vadd.f32 1.0, %v4032_v22  ;;  %v1720_v28 = vadd.f32 %v1719_v21, %v5454_v26  ;;  %4053 = vtanh.f32 %v1887_v1  ;;  %v3694_v0 = vmul.f32 -1.442695, %v1909_v35 }
 0x213   : > { %2276 = vadd.xlane.f32.xlu1 %v2231_v24  ;;  %v5621_v7 = vpop.f32.mrf.mxu0  ;;  %v2193_v27 = vmul.f32 %v4034_v43, %v4030_v32  ;;  %v4036_v63 = vpop.eup %4035  ;;  %v1708_v35 = vadd.f32 %v5594_v53, %v5460_v56 }
 0x214   : > { %v5623_v36 = vpop.f32.mrf.mxu1  ;;  %4055 = vrcp.f32 %v2101_v44  ;;  %v1913_v33 = vadd.f32 %v1912_v38, %v1720_v28 }
 0x215   : > { %v4038_v61 = vpop.eup %4037  ;;  %4057 = vpow2.f32 %v3694_v0  ;;  %v1725_v42 = vpop.f32.mrf.mxu0  ;;  %v2232_v41 = vmul.f32 %v5491_v40, %v2193_v27 }
 0x216   : > { %v1918_v8 = vpop.f32.mrf.mxu1  ;;  %v4040_v22 = vpop.eup %4039  ;;  %v2102_v1 = vadd.f32 1.0, %v4038_v61  ;;  %v3695_v45 = vmul.f32 -1.442695, %v1913_v33  ;;  %4059 = vtanh.f32 %v1891_v60  ;;  %v1726_v32 = vadd.f32 %v1725_v42, %v5454_v26 }
 0x217   : > { %2278 = vadd.xlane.f32.xlu0 %v2232_v41  ;;  %v5630_v21 = vpop.f32.mrf.mxu0  ;;  %v2194_v24 = vmul.f32 %v4040_v22, %v4036_v63  ;;  %v4042_v43 = vpop.eup %4041  ;;  %v1901_v61 = vadd.f32 %v5596_v57, %v1708_v35  ;;  %v1714_v63 = vadd.f32 %v5603_v29, %v5460_v56  ;;  %v1718_v57 = vadd.f32 %v5612_v39, %v5460_v56 }
 0x218   : > { %v5632_v38 = vpop.f32.mrf.mxu1  ;;  %4061 = vrcp.f32 %v2102_v1  ;;  %v1919_v28 = vadd.f32 %v1918_v8, %v1726_v32 }
 0x219   : > { %v4044_v44 = vpop.eup %4043  ;;  %4063 = vpow2.f32 %v3695_v45  ;;  %v1729_v0 = vpop.f32.mrf.mxu0  ;;  %v2233_v23 = vmul.f32 %v5491_v40, %v2194_v24 }
 0x21a   : > { %v1922_v58 = vpop.f32.mrf.mxu1  ;;  %v4046_v60 = vpop.eup %4045  ;;  %4065 = vtanh.f32 %v1897_v6  ;;  %v2103_v53 = vadd.f32 1.0, %v4044_v44  ;;  %v1730_v27 = vadd.f32 %v1729_v0, %v5454_v26  ;;  %v3696_v42 = vmul.f32 -1.442695, %v1919_v28 }
 0x21b   : > { %v4048_v33 = vpop.eup %4047  ;;  %2280 = vadd.xlane.f32.xlu1 %v2233_v23  ;;  %v5639_v41 = vpop.f32.mrf.mxu0  ;;  %v2195_v22 = vmul.f32 %v4046_v60, %v4042_v43  ;;  %v1907_v0 = vadd.f32 %v5605_v25, %v1714_v63 }
 0x21c   : > { %v5641_v8 = vpop.f32.mrf.mxu1  ;;  %4067 = vrcp.f32 %v2103_v53  ;;  %v1923_v1 = vadd.f32 %v1922_v58, %v1730_v27 }
 0x21d   : > { %v4050_v45 = vpop.eup %4049  ;;  %4069 = vpow2.f32 %v3696_v42  ;;  %v1735_v6 = vpop.f32.mrf.mxu0  ;;  %v2234_v24 = vmul.f32 %v5491_v40, %v2195_v22 }
 0x21e   : > { %v1928_v32 = vpop.f32.mrf.mxu1  ;;  %v4052_v44 = vpop.eup %4051  ;;  %v3697_v29 = vmul.f32 -1.442695, %v1923_v1  ;;  %v1736_v35 = vadd.f32 %v1735_v6, %v5454_v26  ;;  %4071 = vtanh.f32 %v1901_v61  ;;  %v2196_v23 = vmul.f32 %v4050_v45, %v4048_v33 }
 0x21f   : > { %v2104_v28 = vadd.f32 1.0, %v4052_v44  ;;  %2282 = vadd.xlane.f32.xlu0 %v2234_v24  ;;  %v5648_v43 = vpop.f32.mrf.mxu0  ;;  %v4054_v60 = vpop.eup %4053  ;;  %v1911_v61 = vadd.f32 %v5614_v62, %v1718_v57  ;;  %v1724_v33 = vadd.f32 %v5621_v7, %v5460_v56 }
 0x220   : > { %v5650_v58 = vpop.f32.mrf.mxu1  ;;  %4073 = vpow2.f32 %v3697_v29  ;;  %v1929_v53 = vadd.f32 %v1928_v32, %v1736_v35  ;;  %v2235_v22 = vmul.f32 %v5491_v40, %v2196_v23 }
 0x221   : > { %v4056_v27 = vpop.eup %4055  ;;  %4075 = vrcp.f32 %v2104_v28  ;;  %v1739_v42 = vpop.f32.mrf.mxu0 }
 0x222   : > { %v1932_v39 = vpop.f32.mrf.mxu1  ;;  %v4058_v1 = vpop.eup %4057  ;;  %v3698_v6 = vmul.f32 -1.442695, %v1929_v53  ;;  %v1740_v25 = vadd.f32 %v1739_v42, %v5454_v26  ;;  %4077 = vtanh.f32 %v1907_v0  ;;  %2284 = vadd.xlane.f32.xlu1 %v2235_v22  ;;  %v2197_v24 = vmul.f32 %v4056_v27, %v4054_v60 }
 0x223   : > { %v2105_v63 = vadd.f32 1.0, %v4058_v1  ;;  %v5657_v45 = vpop.f32.mrf.mxu0  ;;  %v4060_v44 = vpop.eup %4059  ;;  %v1917_v22 = vadd.f32 %v5623_v36, %v1724_v33  ;;  %v1728_v60 = vadd.f32 %v5630_v21, %v5460_v56  ;;  %v1734_v36 = vadd.f32 %v5639_v41, %v5460_v56 }
 0x224   : > { %v5659_v32 = vpop.f32.mrf.mxu1  ;;  %4079 = vpow2.f32 %v3698_v6  ;;  %v1933_v29 = vadd.f32 %v1932_v39, %v1740_v25  ;;  %v2236_v28 = vmul.f32 %v5491_v40, %v2197_v24 }
 0x225   : > { %v4062_v35 = vpop.eup %4061  ;;  %4081 = vrcp.f32 %v2105_v63  ;;  %v1745_v62 = vpop.f32.mrf.mxu0 }
 0x226   : > { %v1938_v57 = vpop.f32.mrf.mxu1  ;;  %v4064_v0 = vpop.eup %4063  ;;  %4083 = vtanh.f32 %v1911_v61  ;;  %v3699_v23 = vmul.f32 -1.442695, %v1933_v29  ;;  %v1746_v7 = vadd.f32 %v1745_v62, %v5454_v26  ;;  %2286 = vadd.xlane.f32.xlu0 %v2236_v28  ;;  %v2198_v1 = vmul.f32 %v4062_v35, %v4060_v44 }
 0x227   : > { %v4066_v53 = vpop.eup %4065  ;;  %v2106_v42 = vadd.f32 1.0, %v4064_v0  ;;  %v5666_v27 = vpop.f32.mrf.mxu0  ;;  %v1921_v28 = vadd.f32 %v5632_v38, %v1728_v60  ;;  %v1738_v60 = vadd.f32 %v5648_v43, %v5460_v56 }
 0x228   : > { %v5668_v39 = vpop.f32.mrf.mxu1  ;;  %4085 = vpow2.f32 %v3699_v23  ;;  %v1939_v6 = vadd.f32 %v1938_v57, %v1746_v7  ;;  %v2237_v24 = vmul.f32 %v5491_v40, %v2198_v1 }
 0x229   : > { %v4068_v25 = vpop.eup %4067  ;;  %4087 = vrcp.f32 %v2106_v42  ;;  %v1749_v61 = vpop.f32.mrf.mxu0 }
 0x22a   : > { %v1942_v63 = vpop.f32.mrf.mxu1  ;;  %v4070_v29 = vpop.eup %4069  ;;  %v3700_v33 = vmul.f32 -1.442695, %v1939_v6  ;;  %v1750_v21 = vadd.f32 %v1749_v61, %v5454_v26  ;;  %4089 = vtanh.f32 %v1917_v22  ;;  %2288 = vadd.xlane.f32.xlu1 %v2237_v24  ;;  %v2199_v57 = vmul.f32 %v4068_v25, %v4066_v53 }
 0x22b   : > { %v2107_v62 = vadd.f32 1.0, %v4070_v29  ;;  %v5675_v44 = vpop.f32.mrf.mxu0  ;;  %v4072_v0 = vpop.eup %4071  ;;  %v1927_v61 = vadd.f32 %v5641_v8, %v1734_v36 }
 0x22c   : > { %v5677_v35 = vpop.f32.mrf.mxu1  ;;  %4091 = vpow2.f32 %v3700_v33  ;;  %v1943_v23 = vadd.f32 %v1942_v63, %v1750_v21  ;;  %v2238_v1 = vmul.f32 %v5491_v40, %v2199_v57 }
 0x22d   : > { %v4074_v7 = vpop.eup %4073  ;;  %4093 = vrcp.f32 %v2107_v62  ;;  %v1755_v42 = vpop.f32.mrf.mxu0 }
 0x22e   : > { %v1948_v41 = vpop.f32.mrf.mxu1  ;;  %v4076_v6 = vpop.eup %4075  ;;  %v2108_v22 = vadd.f32 1.0, %v4074_v7  ;;  %v3701_v38 = vmul.f32 -1.442695, %v1943_v23  ;;  %4095 = vtanh.f32 %v1921_v28  ;;  %v1756_v53 = vadd.f32 %v1755_v42, %v5454_v26  ;;  %2290 = vadd.xlane.f32.xlu0 %v2238_v1 }
 0x22f   : > { %v1757_v25 = vpop.f32.mrf.mxu0  ;;  %v2200_v24 = vmul.f32 %v4076_v6, %v4072_v0  ;;  %v4078_v29 = vpop.eup %4077  ;;  %v1931_v23 = vadd.f32 %v5650_v58, %v1738_v60  ;;  %v1744_v7 = vadd.f32 %v5657_v45, %v5460_v56  ;;  %v1748_v45 = vadd.f32 %v5666_v27, %v5460_v56 }
 0x230   : > { %v5684_v63 = vpop.f32.mrf.mxu1  ;;  %4097 = vrcp.f32 %v2108_v22  ;;  %v1949_v21 = vadd.f32 %v1948_v41, %v1756_v53 }
 0x231   : > { %v4080_v33 = vpop.eup %4079  ;;  %4099 = vpow2.f32 %v3701_v38  ;;  %v1759_v62 = vpop.f32.mrf.mxu0  ;;  %v2239_v8 = vmul.f32 %v5491_v40, %v2200_v24 }
 0x232   : > { %v4082_v36 = vpop.eup %4081  ;;  %4101 = vtanh.f32 %v1927_v61  ;;  %v2109_v28 = vadd.f32 1.0, %v4080_v33  ;;  %v1760_v43 = vadd.f32 %v1759_v62, %v5454_v26  ;;  %v3702_v0 = vmul.f32 -1.442695, %v1949_v21  ;;  %v1952_v42 = vpop.f32.mrf.mxu1 }
 0x233   : > { %v4084_v57 = vpop.eup %4083  ;;  %2292 = vadd.xlane.f32.xlu1 %v2239_v8  ;;  %v2201_v1 = vmul.f32 %v4082_v36, %v4078_v29  ;;  %v1937_v26 = vadd.f32 %v5659_v32, %v1744_v7  ;;  %v1941_v32 = vadd.f32 %v5668_v39, %v1748_v45  ;;  %v1754_v36 = vadd.f32 %v5675_v44, %v5460_v56 }
 0x234   : > { %4103 = vrcp.f32 %v2109_v28  ;;  %v1953_v41 = vadd.f32 %v1952_v42, %v1760_v43  ;;  %v1758_v42 = vadd.f32 %v1757_v25, %v5460_v56 }
 0x235   : > { %v4086_v6 = vpop.eup %4085  ;;  %4105 = vpow2.f32 %v3702_v0  ;;  %v2240_v22 = vmul.f32 %v5491_v40, %v2201_v1  ;;  %v1947_v0 = vadd.f32 %v5677_v35, %v1754_v36 }
 0x236   : > { %v4088_v61 = vpop.eup %4087  ;;  %v2110_v38 = vadd.f32 1.0, %v4086_v6  ;;  %v3703_v53 = vmul.f32 -1.442695, %v1953_v41  ;;  %4107 = vtanh.f32 %v1931_v23 }
 0x237   : > { %2294 = vadd.xlane.f32.xlu0 %v2240_v22  ;;  %v2202_v58 = vmul.f32 %v4088_v61, %v4084_v57  ;;  %v4090_v60 = vpop.eup %4089  ;;  %v1951_v61 = vadd.f32 %v5684_v63, %v1758_v42 }
 0x238   : > { %4109 = vrcp.f32 %v2110_v38 }
 0x239   : > { %v4092_v24 = vpop.eup %4091  ;;  %4111 = vpow2.f32 %v3703_v53  ;;  %v2241_v29 = vmul.f32 %v5491_v40, %v2202_v58 }
 0x23a   : > { %v4094_v33 = vpop.eup %4093  ;;  %v2111_v21 = vadd.f32 1.0, %v4092_v24  ;;  %4113 = vtanh.f32 %v1937_v26 }
 0x23b   : > { %2296 = vadd.xlane.f32.xlu1 %v2241_v29  ;;  %v2203_v62 = vmul.f32 %v4094_v33, %v4090_v60  ;;  %v4096_v8 = vpop.eup %4095 }
 0x23c   : > { %4115 = vrcp.f32 %v2111_v21 }
 0x23d   : > { %v4098_v28 = vpop.eup %4097  ;;  %v2242_v43 = vmul.f32 %v5491_v40, %v2203_v62  ;;  %4117 = vtanh.f32 %v1941_v32 }
 0x23e   : > { %v4100_v27 = vpop.eup %4099  ;;  %v2204_v57 = vmul.f32 %v4098_v28, %v4096_v8 }
 0x23f   : > { %v4102_v23 = vpop.eup %4101  ;;  %v2112_v7 = vadd.f32 1.0, %v4100_v27  ;;  %2298 = vadd.xlane.f32.xlu0 %v2242_v43 }
 0x240   : > { %v2243_v1 = vmul.f32 %v5491_v40, %v2204_v57 }
 0x241   : > { %v4104_v41 = vpop.eup %4103  ;;  %4119 = vrcp.f32 %v2112_v7 }
 0x242   : > { %v4106_v39 = vpop.eup %4105  ;;  %2300 = vadd.xlane.f32.xlu1 %v2243_v1  ;;  %v2205_v44 = vmul.f32 %v4104_v41, %v4102_v23  ;;  %4121 = vtanh.f32 %v1947_v0 }
 0x243   : > { %v2113_v6 = vadd.f32 1.0, %v4106_v39  ;;  %v4108_v22 = vpop.eup %4107 }
 0x244   : > { %v2244_v38 = vmul.f32 %v5491_v40, %v2205_v44 }
 0x245   : > { %v4110_v53 = vpop.eup %4109  ;;  %4123 = vrcp.f32 %v2113_v6 }
 0x246   : > { %v4112_v26 = vpop.eup %4111  ;;  %2302 = vadd.xlane.f32.xlu0 %v2244_v38  ;;  %v2206_v35 = vmul.f32 %v4110_v53, %v4108_v22  ;;  %4125 = vtanh.f32 %v1951_v61  ;;  %v5731_v22 = vstv %s3706_s13  ;;  %v2356_v61 = vadd.s32 8, %v4655_v31 }
 0x247   : > { %v2114_v56 = vadd.f32 1.0, %v4112_v26  ;;  %v4114_v25 = vpop.eup %4113  ;;  %v2357_v38 = vadd.s32 16, %v4655_v31  ;;  %v2358_v53 = vadd.s32 24, %v4655_v31  ;;  %v5857_v12 = vadd.s32 %v5731_v22, %v2375_v3 }
 0x248   : > { %v2245_v58 = vmul.f32 %v5491_v40, %v2206_v35  ;;  %v5860_v16 = vadd.s32 %v5731_v22, %v2376_v10  ;;  %v2383_v3 = vadd.s32 224, %v4655_v31  ;;  %v5916_v54 = vadd.s32 %v5731_v22, %v2382_v9 }
 0x249   : > { %v4116_v60 = vpop.eup %4115  ;;  %4127 = vrcp.f32 %v2114_v56  ;;  %v2359_v56 = vadd.s32 32, %v4655_v31  ;;  %v2386_v9 = vadd.s32 248, %v4655_v31 }
 0x24a   : > { %2304 = vadd.xlane.f32.xlu1 %v2245_v58  ;;  %v2207_v45 = vmul.f32 %v4116_v60, %v4114_v25  ;;  %v4118_v29 = vpop.eup %4117  ;;  %v2360_v25 = vadd.s32 40, %v4655_v31  ;;  %v2361_v58 = vadd.s32 48, %v4655_v31  ;;  %v2362_v60 = vadd.s32 56, %v4655_v31 }
 0x24c   : > { %v2246_v24 = vmul.f32 %v5491_v40, %v2207_v45  ;;  %v5746_v45 = vadd.s32 %v5731_v22, %v4655_v31 }
 0x24e   : > { %v4120_v63 = vpop.eup %4119  ;;  %2306 = vadd.xlane.f32.xlu0 %v2246_v24  ;;  %v2363_v24 = vadd.s32 64, %v4655_v31 }
 0x24f   : > { %v2208_v33 = vmul.f32 %v4120_v63, %v4118_v29  ;;  %v4122_v21 = vpop.eup %4121  ;;  %v5749_v29 = vstv %s2420_s12  ;;  %v5752_v63 = vadd.s32 %v5731_v22, %v2356_v61  ;;  %v2366_v61 = vadd.s32 88, %v4655_v31 }
 0x250   : > { %vm2422_vm3 = vcmp.lt.s32.totalorder %v5746_v45, %v5749_v29 }
 0x251   : > { %v2247_v62 = vmul.f32 %v5491_v40, %v2208_v33  ;;  %v5755_v33 = vadd.s32 %v5731_v22, %v2357_v38  ;;  %v2367_v38 = vadd.s32 96, %v4655_v31  ;;  %vm2423_vm4 = vcmp.lt.s32.totalorder %v5752_v63, %v5749_v29 }
 0x252   : > { %v4124_v8 = vpop.eup %4123 }
 0x253   : > { %2308 = vadd.xlane.f32.xlu1 %v2247_v62  ;;  %v2209_v32 = vmul.f32 %v4124_v8, %v4122_v21  ;;  %v4126_v36 = vpop.eup %4125  ;;  %v5758_v21 = vadd.s32 %v5731_v22, %v2358_v53  ;;  %v5781_v53 = vadd.s32 %v5731_v22, %v2363_v24  ;;  %v2372_v24 = vadd.s32 136, %v4655_v31 }
 0x254   : > { %vm2424_vm5 = vcmp.lt.s32.totalorder %v5755_v33, %v5749_v29  ;;  %v5823_v5 = vadd.s32 %v5731_v22, %v2367_v38  ;;  %v5841_v38 = vadd.s32 %v5731_v22, %v2371_v18  ;;  %v5863_v18 = vadd.s32 %v5731_v22, %v2377_v2 }
 0x255   : > { %v2248_v28 = vmul.f32 %v5491_v40, %v2209_v32  ;;  %v5765_v32 = vadd.s32 %v5731_v22, %v2359_v56  ;;  %v2368_v56 = vadd.s32 104, %v4655_v31  ;;  %vm2425_vm6 = vcmp.lt.s32.totalorder %v5758_v21, %v5749_v29 }
 0x256   : > { %v4128_v43 = vpop.eup %4127  ;;  %vm2430_vm11 = vcmp.lt.s32.totalorder %v5781_v53, %v5749_v29  ;;  %v5846_v13 = vadd.s32 %v5731_v22, %v2372_v24  ;;  %v2380_v24 = vadd.s32 200, %v4655_v31  ;;  %vm2434_vm0 = vcmp.lt.s32.totalorder %v5823_v5, %v5749_v29 }
 0x257   : > { %2310 = vadd.xlane.f32.xlu0 %v2248_v28  ;;  %v2210_v27 = vmul.f32 %v4128_v43, %v4126_v36  ;;  %v5768_v36 = vadd.s32 %v5731_v22, %v2360_v25  ;;  %v5771_v28 = vadd.s32 %v5731_v22, %v2361_v58  ;;  %v2364_v43 = vadd.s32 72, %v4655_v31 }
 0x258   : > { %v2369_v25 = vadd.s32 112, %v4655_v31  ;;  %v2370_v58 = vadd.s32 120, %v4655_v31  ;;  %vm2426_vm7 = vcmp.lt.s32.totalorder %v5765_v32, %v5749_v29  ;;  %v5829_v4 = vadd.s32 %v5731_v22, %v2368_v56 }
 0x259   : > { %v2249_v57 = vmul.f32 %v5491_v40, %v2210_v27  ;;  %v5775_v27 = vadd.s32 %v5731_v22, %v2362_v60  ;;  %v5805_v11 = vadd.s32 %v5731_v22, %v2364_v43  ;;  %vm2427_vm8 = vcmp.lt.s32.totalorder %v5768_v36, %v5749_v29 }
 0x25a   : > { %vm2428_vm9 = vcmp.lt.s32.totalorder %v5771_v28, %v5749_v29  ;;  %v5820_v43 = vadd.s32 %v5731_v22, %v2366_v61  ;;  %v5832_v20 = vadd.s32 %v5731_v22, %v2369_v25  ;;  %v2379_v61 = vadd.s32 192, %v4655_v31 }
 0x25b   : > { %2312 = vadd.xlane.f32.xlu1 %v2249_v57  ;;  %v2365_v57 = vadd.s32 80, %v4655_v31  ;;  %vm2429_vm10 = vcmp.lt.s32.totalorder %v5775_v27, %v5749_v29  ;;  %v5851_v25 = vadd.s32 %v5731_v22, %v2373_v30  ;;  %vm2431_vm13 = vcmp.lt.s32.totalorder %v5805_v11, %v5749_v29 }
 0x25c   : > { %v5869_v30 = vadd.s32 %v5731_v22, %v2378_v52  ;;  %vm2433_vm15 = vcmp.lt.s32.totalorder %v5820_v43, %v5749_v29  ;;  %v5885_v52 = vadd.s32 %v5731_v22, %v2379_v61  ;;  %vm2435_vm1 = vcmp.lt.s32.totalorder %v5829_v4, %v5749_v29 }
 0x25d   : > { %v5817_v59 = vadd.s32 %v5731_v22, %v2365_v57  ;;  %v5835_v57 = vadd.s32 %v5731_v22, %v2370_v58  ;;  %v5854_v58 = vadd.s32 %v5731_v22, %v2374_v17  ;;  %v2381_v17 = vadd.s32 208, %v4655_v31 }
 0x25e   : > { %v2385_v61 = vadd.s32 240, %v4655_v31  ;;  %vm2436_vm2 = vcmp.lt.s32.totalorder %v5832_v20, %v5749_v29 }
 0x25f   : > { %vm2432_vm14 = vcmp.lt.s32.totalorder %v5817_v59, %v5749_v29  ;;  %v5913_v49 = vadd.s32 %v5731_v22, %v2381_v17 }
 0x260   : > { %v5963_v21 = vadd.s32 %v5731_v22, %v2385_v61 }
 0x267   : > { %v5710_v23 = vpop.xlane.xlu0 %2250 }
 0x268   : > { %v2321_v10 = vadd.f32 %v5838_v14, %v5710_v23 }
 0x26b   : > { %v5714_v0 = vpop.xlane.xlu0 %2252 }
 0x26c   : > { %v2322_v2 = vadd.f32 %v5838_v14, %v5714_v0 }
 0x26f   : > { %v5712_v7 = vpop.xlane.xlu1 %2254 }
 0x270   : > { %v2323_v23 = vadd.f32 %v5838_v14, %v5712_v7 }
 0x273   : > { %v5716_v42 = vpop.xlane.xlu1 %2256 }
 0x274   : > { %v2324_v0 = vadd.f32 %v5838_v14, %v5716_v42 }
 0x276   : > { %v5945_v45 = vsel %vm2425_vm6, %v2324_v0, -1e+30  ;;  %vm2440_vm6 = vcmp.lt.s32.totalorder %v5851_v25, %v5749_v29 }
 0x278   : > { %v5718_v1 = vpop.xlane.xlu0 %2258 }
 0x279   : > { %v2325_v47 = vadd.f32 %v5838_v14, %v5718_v1  ;;  %v5908_v1 = vadd.s32 %v5731_v22, %v2380_v24  ;;  %v5940_v24 = vsel %vm2424_vm5, %v2323_v23, -1e+30  ;;  %vm2439_vm5 = vcmp.lt.s32.totalorder %v5846_v13, %v5749_v29 }
 0x27b   : > { %v5950_v63 = vsel %vm2426_vm7, %v2325_v47, -1e+30  ;;  %vm2441_vm7 = vcmp.lt.s32.totalorder %v5854_v58, %v5749_v29 }
 0x27c   : > { %v5720_v41 = vpop.xlane.xlu1 %2260  ;;  %v2492_v53 = vsel %vm2487_vm12, %v5950_v63, -inf }
 0x27d   : > { %v2326_v50 = vadd.f32 %v5838_v14, %v5720_v41  ;;  %v5919_v41 = vadd.s32 %v5731_v22, %v2383_v3 }
 0x27f   : > { %v5968_v47 = vsel %vm2427_vm8, %v2326_v50, -1e+30  ;;  %vm2442_vm8 = vcmp.lt.s32.totalorder %v5857_v12, %v5749_v29 }
 0x280   : > { %v5722_v39 = vpop.xlane.xlu0 %2262 }
 0x281   : > { %v2327_v7 = vadd.f32 %v5838_v14, %v5722_v39  ;;  %v5924_v39 = vsel %vm2422_vm3, %v2321_v10, -1e+30  ;;  %vm2437_vm3 = vcmp.lt.s32.totalorder %v5835_v57, %v5749_v29 }
 0x283   : > { %v5973_v32 = vsel %vm2428_vm9, %v2327_v7, -1e+30  ;;  %vm2443_vm9 = vcmp.lt.s32.totalorder %v5860_v16, %v5749_v29 }
 0x284   : > { %v5724_v44 = vpop.xlane.xlu1 %2264 }
 0x285   : > { %v2328_v42 = vadd.f32 %v5838_v14, %v5724_v44  ;;  %v5929_v44 = vsel %vm2423_vm4, %v2322_v2, -1e+30  ;;  %vm2438_vm4 = vcmp.lt.s32.totalorder %v5841_v38, %v5749_v29  ;;  %v2494_v2 = vsel %vm2487_vm12, %v5968_v47, -inf }
 0x286   : > { %v2489_v27 = vsel %vm2487_vm12, %v5929_v44, -inf }
 0x287   : > { %v5978_v17 = vsel %vm2429_vm10, %v2328_v42, -1e+30  ;;  %vm2444_vm10 = vcmp.lt.s32.totalorder %v5863_v18, %v5749_v29 }
 0x288   : > { %v2498_v0 = vsel %vm2487_vm12, %v5978_v17, -inf }
 0x289   : > { %v5726_v6 = vpop.xlane.xlu0 %2266 }
 0x28a   : > { %v2329_v55 = vadd.f32 %v5838_v14, %v5726_v6  ;;  %v5934_v6 = vadd.s32 %v5731_v22, %v2384_v15 }
 0x28c   : > { %v5728_v40 = vpop.xlane.xlu1 %2268  ;;  %v5985_v10 = vsel %vm2430_vm11, %v2329_v55, -1e+30  ;;  %vm2445_vm11 = vcmp.lt.s32.totalorder %v5869_v30, %v5749_v29 }
 0x28d   : > { %v2330_v3 = vadd.f32 %v5838_v14, %v5728_v40  ;;  %v2488_v40 = vsel %vm2487_vm12, %v5924_v39, -inf  ;;  %v2500_v61 = vsel %vm2487_vm12, %v5985_v10, -inf }
 0x28f   : > { %v5736_v26 = vpop.xlane.xlu0 %2270  ;;  %v6023_v7 = vsel %vm2431_vm13, %v2330_v3, -1e+30  ;;  %vm2447_vm13 = vcmp.lt.s32.totalorder %v5908_v1, %v5749_v29 }
 0x290   : > { %v2331_v50 = vadd.f32 %v5838_v14, %v5736_v26  ;;  %v6002_v26 = vadd.s32 %v5731_v22, %v2386_v9  ;;  %v2496_v22 = vsel %vm2487_vm12, %v5973_v32, -inf }
 0x292   : > { %v6030_v42 = vsel %vm2432_vm14, %v2331_v50, -1e+30  ;;  %v2493_v50 = vmax.f32 %v2488_v40, %v2492_v53  ;;  %vm2446_vm14 = vcmp.lt.s32.totalorder %v5885_v52, %v5749_v29 }
 0x293   : > { %v5738_v35 = vpop.xlane.xlu1 %2272 }
 0x294   : > { %v2332_v36 = vadd.f32 %v5838_v14, %v5738_v35  ;;  %v2490_v35 = vsel %vm2487_vm12, %v5940_v24, -inf }
 0x296   : > { %v6035_v9 = vsel %vm2433_vm15, %v2332_v36, -1e+30  ;;  %v2495_v36 = vmax.f32 %v2489_v27, %v2494_v2  ;;  %vm2448_vm15 = vcmp.lt.s32.totalorder %v5913_v49, %v5749_v29 }
 0x297   : > { %v5760_v62 = vpop.xlane.xlu0 %2274  ;;  %v2506_v40 = vsel %vm2487_vm12, %v6035_v9, -inf }
 0x298   : > { %v2333_v28 = vadd.f32 %v5838_v14, %v5760_v62  ;;  %v2491_v62 = vsel %vm2487_vm12, %v5945_v45, -inf }
 0x29a   : > { %v6040_v31 = vsel %vm2434_vm0, %v2333_v28, -1e+30  ;;  %v2499_v28 = vmax.f32 %v2491_v62, %v2498_v0  ;;  %vm2449_vm0 = vcmp.lt.s32.totalorder %v5916_v54, %v5749_v29 }
 0x29c   : > { %v5762_v8 = vpop.xlane.xlu1 %2276 }
 0x29d   : > { %v2334_v55 = vadd.f32 %v5838_v14, %v5762_v8 }
 0x29f   : > { %v6049_v59 = vsel %vm2435_vm1, %v2334_v55, -1e+30  ;;  %v2501_v55 = vmax.f32 %v2493_v50, %v2500_v61  ;;  %vm2451_vm1 = vcmp.lt.s32.totalorder %v5934_v6, %v5749_v29 }
 0x2a0   : > { %v5790_v60 = vpop.xlane.xlu0 %2278  ;;  %v2510_v62 = vsel %vm2487_vm12, %v6049_v59, -inf }
 0x2a1   : > { %v2335_v11 = vadd.f32 %v5838_v14, %v5790_v60  ;;  %v2497_v60 = vmax.f32 %v2490_v35, %v2496_v22  ;;  %v2508_v35 = vsel %vm2487_vm12, %v6040_v31, -inf }
 0x2a2   : > { %v2509_v13 = vmax.f32 %v2501_v55, %v2508_v35 }
 0x2a3   : > { %v6080_v53 = vsel %vm2436_vm2, %v2335_v11, -1e+30  ;;  %v2507_v11 = vmax.f32 %v2499_v28, %v2506_v40  ;;  %vm2450_vm2 = vcmp.lt.s32.totalorder %v5919_v41, %v5749_v29 }
 0x2a4   : > { %v5792_v37 = vpop.xlane.xlu1 %2280  ;;  %v2512_v38 = vsel %vm2487_vm12, %v6080_v53, -inf }
 0x2a5   : > { %v2336_v43 = vadd.f32 %v5838_v14, %v5792_v37 }
 0x2a8   : > { %v5843_v19 = vpop.xlane.xlu0 %2282 }
 0x2a9   : > { %v2337_v3 = vadd.f32 %v5838_v14, %v5843_v19  ;;  %v2502_v19 = vsel %vm2487_vm12, %v6023_v7, -inf }
 0x2aa   : > { %v2503_v0 = vmax.f32 %v2495_v36, %v2502_v19 }
 0x2ab   : > { %v5848_v56 = vpop.xlane.xlu1 %2284  ;;  %v6096_v20 = vsel %vm2438_vm4, %v2337_v3, -1e+30  ;;  %vm2453_vm4 = vcmp.lt.s32.totalorder %v6002_v26, %v5749_v29 }
 0x2ac   : > { %v2338_v5 = vadd.f32 %v5838_v14, %v5848_v56  ;;  %v2504_v56 = vsel %vm2487_vm12, %v6030_v42, -inf  ;;  %v2511_v3 = vmax.f32 %v2503_v0, %v2510_v62  ;;  %v2516_v36 = vsel %vm2487_vm12, %v6096_v20, -inf }
 0x2ad   : > { %v2505_v61 = vmax.f32 %v2497_v60, %v2504_v56 }
 0x2ae   : > { %v6101_v2 = vsel %vm2439_vm5, %v2338_v5, -1e+30  ;;  %vm2735_vm5 = vcmask 0  }
 0x2af   : > { %v5896_v51 = vpop.xlane.xlu0 %2286  ;;  %v2518_v60 = vsel %vm2487_vm12, %v6101_v2, -inf  ;;  %v2513_v56 = vmax.f32 %v2505_v61, %v2512_v38 }
 0x2b0   : > { %v2339_v27 = vadd.f32 %v5838_v14, %v5896_v51  ;;  %v6091_v51 = vsel %vm2437_vm3, %v2336_v43, -1e+30  ;;  %vm2452_vm3 = vcmp.lt.s32.totalorder %v5963_v21, %v5749_v29  ;;  %v2519_v0 = vmax.f32 %v2511_v3, %v2518_v60 }
 0x2b1   : > { %v2514_v5 = vsel %vm2487_vm12, %v6091_v51, -inf }
 0x2b2   : > { %v2515_v62 = vmax.f32 %v2507_v11, %v2514_v5 }
 0x2b3   : > { %v5898_v46 = vpop.xlane.xlu1 %2288 }
 0x2b4   : > { %v2340_v22 = vadd.f32 %v5838_v14, %v5898_v46  ;;  %v6116_v46 = vsel %vm2440_vm6, %v2339_v27, -1e+30 }
 0x2b5   : > { %v2520_v40 = vsel %vm2487_vm12, %v6116_v46, -inf }
 0x2b6   : > { %v6129_v28 = vsel %vm2441_vm7, %v2340_v22, -1e+30  ;;  %v2517_v22 = vmax.f32 %v2509_v13, %v2516_v36 }
 0x2b7   : > { %v5958_v15 = vpop.xlane.xlu0 %2290 }
 0x2b8   : > { %v2341_v57 = vadd.f32 %v5838_v14, %v5958_v15 }
 0x2ba   : > { %v6139_v27 = vsel %vm2442_vm8, %v2341_v57, -1e+30 }
 0x2bc   : > { %v5960_v33 = vpop.xlane.xlu1 %2292 }
 0x2bd   : > { %v2342_v15 = vadd.f32 %v5838_v14, %v5960_v33 }
 0x2c0   : > { %v2295_v23 = vpop.xlane.xlu0 %2294 }
 0x2c1   : > { %v2343_v25 = vadd.f32 %v5838_v14, %v2295_v23  ;;  %v6147_v23 = vsel %vm2443_vm9, %v2342_v15, -1e+30 }
 0x2c2   : > { %v2526_v18 = vsel %vm2487_vm12, %v6147_v23, -inf }
 0x2c3   : > { %v6157_v61 = vsel %vm2444_vm10, %v2343_v25, -1e+30  ;;  %v2527_v54 = vmax.f32 %v2519_v0, %v2526_v18 }
 0x2c4   : > { %v2297_v8 = vpop.xlane.xlu1 %2296  ;;  %v2528_v5 = vsel %vm2487_vm12, %v6157_v61, -inf }
 0x2c5   : > { %v2344_v19 = vadd.f32 %v5838_v14, %v2297_v8 }
 0x2c7   : > { %v6162_v16 = vsel %vm2445_vm11, %v2344_v19, -1e+30 }
 0x2c8   : > { %v2299_v4 = vpop.xlane.xlu0 %2298  ;;  %v2530_v49 = vsel %vm2487_vm12, %v6162_v16, -inf }
 0x2c9   : > { %v2345_v55 = vadd.f32 %v5838_v14, %v2299_v4  ;;  %v2522_v4 = vsel %vm2487_vm12, %v6129_v28, -inf }
 0x2ca   : > { %v2523_v3 = vmax.f32 %v2515_v62, %v2522_v4 }
 0x2cb   : > { %v2301_v37 = vpop.xlane.xlu1 %2300  ;;  %v6177_v30 = vsel %vm2446_vm14, %v2345_v55, -1e+30 }
 0x2cc   : > { %v2346_v33 = vadd.f32 %v5838_v14, %v2301_v37  ;;  %v2532_v60 = vsel %vm2487_vm12, %v6177_v30, -inf  ;;  %v2531_v41 = vmax.f32 %v2523_v3, %v2530_v49 }
 0x2ce   : > { %v6167_v57 = vsel %vm2447_vm13, %v2346_v33, -1e+30 }
 0x2cf   : > { %v2303_v43 = vpop.xlane.xlu0 %2302  ;;  %v2534_v36 = vsel %vm2487_vm12, %v6167_v57, -inf }
 0x2d0   : > { %v2347_v8 = vadd.f32 %v5838_v14, %v2303_v43  ;;  %v2521_v43 = vmax.f32 %v2513_v56, %v2520_v40 }
 0x2d2   : > { %v6182_v1 = vsel %vm2448_vm15, %v2347_v8, -1e+30 }
 0x2d3   : > { %v2305_v50 = vpop.xlane.xlu1 %2304  ;;  %v2536_v33 = vsel %vm2487_vm12, %v6182_v1, -inf }
 0x2d4   : > { %v2348_v37 = vadd.f32 %v5838_v14, %v2305_v50  ;;  %v2524_v50 = vsel %vm2487_vm12, %v6139_v27, -inf }
 0x2d5   : > { %v2525_v19 = vmax.f32 %v2517_v22, %v2524_v50 }
 0x2d6   : > { %v6187_v38 = vsel %vm2449_vm0, %v2348_v37, -1e+30 }
 0x2d7   : > { %v2307_v58 = vpop.xlane.xlu0 %2306  ;;  %v2538_v56 = vsel %vm2487_vm12, %v6187_v38, -inf  ;;  %v2533_v37 = vmax.f32 %v2525_v19, %v2532_v60  ;;  %v2486_v60 = vld [vmem:[#allocation2] sm:$0x1] }
 0x2d8   : > { %v2349_v11 = vadd.f32 %v5838_v14, %v2307_v58  ;;  %v2529_v58 = vmax.f32 %v2521_v43, %v2528_v5  ;;  %v2539_v22 = vmax.f32 %v2531_v41, %v2538_v56 }
 0x2da   : > { %v6206_v6 = vsel %vm2450_vm2, %v2349_v11, -1e+30  ;;  %v2537_v62 = vmax.f32 %v2529_v58, %v2536_v33 }
 0x2db   : > { %v2540_v21 = vsel %vm2487_vm12, %v6206_v6, -inf }
 0x2dc   : > { %v2309_v35 = vpop.xlane.xlu1 %2308  ;;  %v2541_v43 = vmax.f32 %v2533_v37, %v2540_v21 }
 0x2dd   : > { %v2350_v12 = vadd.f32 %v5838_v14, %v2309_v35  ;;  %v2535_v35 = vmax.f32 %v2527_v54, %v2534_v36 }
 0x2df   : > { %v6192_v15 = vsel %vm2451_vm1, %v2350_v12, -1e+30 }
 0x2e0   : > { %v2311_v13 = vpop.xlane.xlu0 %2310  ;;  %v2542_v40 = vsel %vm2487_vm12, %v6192_v15, -inf }
 0x2e1   : > { %v2351_v52 = vadd.f32 %v5838_v14, %v2311_v13  ;;  %v2543_v0 = vmax.f32 %v2535_v35, %v2542_v40 }
 0x2e3   : > { %v6211_v25 = vsel %vm2452_vm3, %v2351_v52, -1e+30  ;;  %v2548_v18 = vmax.f32 %v2541_v43, %v2543_v0 }
 0x2e4   : > { %v2313_v55 = vpop.xlane.xlu1 %2312  ;;  %v2544_v12 = vsel %vm2487_vm12, %v6211_v25, -inf }
 0x2e5   : > { %v2352_v8 = vadd.f32 %v5838_v14, %v2313_v55  ;;  %v2545_v14 = vmax.f32 %v2537_v62, %v2544_v12 }
 0x2e7   : > { %v6227_v4 = vsel %vm2453_vm4, %v2352_v8, -1e+30 }
 0x2e8   : > { %v2546_v11 = vsel %vm2487_vm12, %v6227_v4, -inf }
 0x2e9   : > { %v2547_v50 = vmax.f32 %v2539_v22, %v2546_v11 }
 0x2eb   : > { %v2549_v13 = vmax.f32 %v2545_v14, %v2547_v50 }
 0x2ed   : > { %v2550_v52 = vmax.f32 %v2548_v18, %v2549_v13 }
 0x2ef   : > { %v2551_v3 = vrot.slane %v2550_v52, 4 }
 0x2f1   : > { %v2552_v5 = vmax.f32 %v2550_v52, %v2551_v3 }
 0x2f3   : > { %v2553_v49 = vrot.slane %v2552_v5, 2 }
 0x2f5   : > { %v2554_v36 = vmax.f32 %v2552_v5, %v2553_v49 }
 0x2f7   : > { %v2555_v54 = vrot.slane %v2554_v36, 1 }
 0x2f9   : > { %v2556_v19 = vmax.f32 %v2554_v36, %v2555_v54 }
 0x2fb   : > { %v2557_v29 = vmax.f32 %v2486_v60, %v2556_v19 }
 0x2fd   : > { %v2558_v26 = vsub.f32 %v2486_v60, %v2557_v29  ;;  %3219 = vst.msk [vmem:[#allocation2] sm:$0x1] %vm2735_vm5, %v2557_v29  ;;  %v6233_v56 = vrot.slane %v2557_v29, %v4662_v34 }
 0x2ff   : > { %v2559_v33 = vmul.f32 1.442695, %v2558_v26  ;;  %v2567_v40 = vsub.f32 %v5924_v39, %v6233_v56  ;;  %v2568_v55 = vsub.f32 %v5929_v44, %v6233_v56  ;;  %v2569_v58 = vsub.f32 %v5940_v24, %v6233_v56 }
 0x300   : > { %v2570_v41 = vsub.f32 %v5945_v45, %v6233_v56  ;;  %v2571_v35 = vsub.f32 %v5950_v63, %v6233_v56  ;;  %v2572_v21 = vsub.f32 %v5968_v47, %v6233_v56  ;;  %v2575_v39 = vsub.f32 %v5985_v10, %v6233_v56 }
 0x301   : > { %4129 = vpow2.f32 %v2559_v33  ;;  %v2599_v8 = vmul.f32 1.442695, %v2567_v40  ;;  %v2601_v37 = vmul.f32 1.442695, %v2568_v55  ;;  %v2603_v12 = vmul.f32 1.442695, %v2569_v58 }
 0x302   : > { %v2605_v62 = vmul.f32 1.442695, %v2570_v41  ;;  %v2573_v44 = vsub.f32 %v5973_v32, %v6233_v56  ;;  %v2607_v24 = vmul.f32 1.442695, %v2571_v35  ;;  %v2574_v45 = vsub.f32 %v5978_v17, %v6233_v56 }
 0x303   : > { %4131 = vpow2.f32 %v2599_v8  ;;  %v2609_v63 = vmul.f32 1.442695, %v2572_v21  ;;  %v2577_v47 = vsub.f32 %v6030_v42, %v6233_v56  ;;  %v2615_v22 = vmul.f32 1.442695, %v2575_v39 }
 0x304   : > { %4133 = vpow2.f32 %v2601_v37  ;;  %v2611_v10 = vmul.f32 1.442695, %v2573_v44  ;;  %v2576_v32 = vsub.f32 %v6023_v7, %v6233_v56  ;;  %v2613_v11 = vmul.f32 1.442695, %v2574_v45 }
 0x305   : > { %4135 = vpow2.f32 %v2603_v12  ;;  %v2579_v17 = vsub.f32 %v6040_v31, %v6233_v56  ;;  %v2619_v43 = vmul.f32 1.442695, %v2577_v47  ;;  %v2578_v42 = vsub.f32 %v6035_v9, %v6233_v56 }
 0x306   : > { %4137 = vpow2.f32 %v2605_v62  ;;  %v2617_v14 = vmul.f32 1.442695, %v2576_v32  ;;  %v2581_v50 = vsub.f32 %v6080_v53, %v6233_v56  ;;  %v2580_v31 = vsub.f32 %v6049_v59, %v6233_v56 }
 0x307   : > { %4139 = vpow2.f32 %v2607_v24  ;;  %v2623_v18 = vmul.f32 1.442695, %v2579_v17  ;;  %v2621_v5 = vmul.f32 1.442695, %v2578_v42  ;;  %v2583_v36 = vsub.f32 %v6096_v20, %v6233_v56 }
 0x308   : > { %4141 = vpow2.f32 %v2609_v63  ;;  %v2627_v53 = vmul.f32 1.442695, %v2581_v50  ;;  %v2582_v26 = vsub.f32 %v6091_v51, %v6233_v56  ;;  %v2625_v59 = vmul.f32 1.442695, %v2580_v31 }
 0x309   : > { %4143 = vpow2.f32 %v2615_v22  ;;  %v2585_v55 = vsub.f32 %v6116_v46, %v6233_v56  ;;  %v2631_v20 = vmul.f32 1.442695, %v2583_v36  ;;  %v2584_v51 = vsub.f32 %v6101_v2, %v6233_v56 }
 0x30a   : > { %4145 = vpow2.f32 %v2611_v10  ;;  %v2629_v21 = vmul.f32 1.442695, %v2582_v26  ;;  %v2587_v46 = vsub.f32 %v6139_v27, %v6233_v56  ;;  %v2586_v2 = vsub.f32 %v6129_v28, %v6233_v56 }
 0x30b   : > { %4147 = vpow2.f32 %v2613_v11  ;;  %v2635_v39 = vmul.f32 1.442695, %v2585_v55  ;;  %v2633_v47 = vmul.f32 1.442695, %v2584_v51  ;;  %v2589_v27 = vsub.f32 %v6157_v61, %v6233_v56 }
 0x30c   : > { %4149 = vpow2.f32 %v2619_v43  ;;  %v2639_v32 = vmul.f32 1.442695, %v2587_v46  ;;  %v2588_v28 = vsub.f32 %v6147_v23, %v6233_v56  ;;  %v2591_v61 = vsub.f32 %v6177_v30, %v6233_v56 }
 0x30d   : > { %4151 = vpow2.f32 %v2617_v14  ;;  %v2637_v14 = vmul.f32 1.442695, %v2586_v2  ;;  %v2590_v23 = vsub.f32 %v6162_v16, %v6233_v56  ;;  %v2593_v30 = vsub.f32 %v6182_v1, %v6233_v56 }
 0x30e   : > { %v6255_v0 = vpop.eup %4129  ;;  %4153 = vpow2.f32 %v2623_v18  ;;  %v2647_v36 = vmul.f32 1.442695, %v2591_v61  ;;  %v2592_v16 = vsub.f32 %v6167_v57, %v6233_v56  ;;  %v2595_v1 = vsub.f32 %v6206_v6, %v6233_v56 }
 0x30f   : > { %2740 = vperm.xlu0 %3811, %v6255_v0   ;;  %4155 = vpow2.f32 %v2621_v5  ;;  %v2641_v5 = vmul.f32 1.442695, %v2588_v28  ;;  %v2594_v57 = vsub.f32 %v6187_v38, %v6233_v56  ;;  %v2597_v6 = vsub.f32 %v6211_v25, %v6233_v56 }
 0x310   : > { %v4132_v13 = vpop.eup %4131  ;;  %4157 = vpow2.f32 %v2627_v53  ;;  %v2596_v38 = vsub.f32 %v6192_v15, %v6233_v56 }
 0x311   : > { %v4134_v7 = vpop.eup %4133  ;;  %v2665_v52 = vsel %vm2487_vm12, %v4132_v13, 0.0  ;;  %2750 = vperm.xlu1 %3812, %v4132_v13   ;;  %4159 = vpow2.f32 %v2625_v59  ;;  %v2643_v13 = vmul.f32 1.442695, %v2589_v27  ;;  %v2659_v25 = vmul.f32 1.442695, %v2597_v6 }
 0x312   : > { %v4136_v3 = vpop.eup %4135  ;;  %v2666_v9 = vsel %vm2487_vm12, %v4134_v7, 0.0  ;;  %4161 = vpow2.f32 %v2631_v20  ;;  %v2657_v15 = vmul.f32 1.442695, %v2596_v38 }
 0x313   : > { %v4138_v49 = vpop.eup %4137  ;;  %v2667_v54 = vadd.f32 %v2666_v9, %v2665_v52  ;;  %v2668_v60 = vsel %vm2487_vm12, %v4136_v3, 0.0  ;;  %4163 = vpow2.f32 %v2629_v21 }
 0x314   : > { %v4140_v19 = vpop.eup %4139  ;;  %v2670_v33 = vsel %vm2487_vm12, %v4138_v49, 0.0  ;;  %4165 = vpow2.f32 %v2635_v39 }
 0x315   : > { %v2669_v29 = vadd.f32 %v2668_v60, %v2667_v54  ;;  %2755 = vperm.xlu1 %3812, %v4134_v7   ;;  %v4142_v40 = vpop.eup %4141  ;;  %v2672_v35 = vsel %vm2487_vm12, %v4140_v19, 0.0  ;;  %4167 = vpow2.f32 %v2633_v47  ;;  %v2598_v47 = vsub.f32 %v6227_v4, %v6233_v56 }
 0x316   : > { %v4144_v41 = vpop.eup %4143  ;;  %v2674_v12 = vsel %vm2487_vm12, %v4142_v40, 0.0  ;;  %4169 = vpow2.f32 %v2639_v32 }
 0x317   : > { %v2671_v58 = vadd.f32 %v2670_v33, %v2669_v29  ;;  %v4146_v8 = vpop.eup %4145  ;;  %2790 = vperm.xlu0 %3811, %v4144_v41   ;;  %v2680_v43 = vsel %vm2487_vm12, %v4144_v41, 0.0  ;;  %4171 = vpow2.f32 %v2637_v14  ;;  %v2645_v29 = vmul.f32 1.442695, %v2590_v23 }
 0x318   : > { %v6282_v62 = vpop.eup %4147  ;;  %v2676_v45 = vsel %vm2487_vm12, %v4146_v8, 0.0  ;;  %4173 = vpow2.f32 %v2643_v13  ;;  %v2651_v33 = vmul.f32 1.442695, %v2593_v30  ;;  %v2649_v41 = vmul.f32 1.442695, %v2592_v16 }
 0x319   : > { %v2673_v37 = vadd.f32 %v2672_v35, %v2671_v58  ;;  %2760 = vperm.xlu1 %3812, %v4136_v3   ;;  %v4150_v24 = vpop.eup %4149  ;;  %v2678_v22 = vsel %vm2487_vm12, %v6282_v62, 0.0  ;;  %4175 = vpow2.f32 %v2641_v5 }
 0x31a   : > { %v6291_v10 = vpop.eup %4151  ;;  %v2684_v3 = vsel %vm2487_vm12, %v4150_v24, 0.0  ;;  %4177 = vpow2.f32 %v2647_v36 }
 0x31b   : > { %v2675_v44 = vadd.f32 %v2674_v12, %v2673_v37  ;;  %2800 = vperm.xlu0 %3811, %v4150_v24   ;;  %v4154_v17 = vpop.eup %4153  ;;  %v2682_v50 = vsel %vm2487_vm12, %v6291_v10, 0.0  ;;  %4179 = vpow2.f32 %v2645_v29  ;;  %v2655_v37 = vmul.f32 1.442695, %v2595_v1 }
 0x31c   : > { %v6300_v18 = vpop.eup %4155  ;;  %v2688_v60 = vsel %vm2487_vm12, %v4154_v17, 0.0  ;;  %4181 = vpow2.f32 %v2651_v33 }
 0x31d   : > { %v2677_v63 = vadd.f32 %v2676_v45, %v2675_v44  ;;  %2765 = vperm.xlu1 %3812, %v4138_v49   ;;  %v4158_v52 = vpop.eup %4157  ;;  %v2686_v9 = vsel %vm2487_vm12, %v6300_v18, 0.0  ;;  %4183 = vpow2.f32 %v2649_v41  ;;  %v2663_v41 = vld [vmem:[#allocation3] sm:$0x1] }
 0x31e   : > { %v4160_v49 = vpop.eup %4159  ;;  %v2692_v20 = vsel %vm2487_vm12, %v4158_v52, 0.0  ;;  %4185 = vpow2.f32 %v2655_v37 }
 0x31f   : > { %v2679_v11 = vadd.f32 %v2678_v22, %v2677_v63  ;;  %2810 = vperm.xlu0 %3811, %v4154_v17   ;;  %v4162_v54 = vpop.eup %4161  ;;  %v2690_v26 = vsel %vm2487_vm12, %v4160_v49, 0.0 }
 0x320   : > { %v4164_v59 = vpop.eup %4163  ;;  %v2696_v12 = vsel %vm2487_vm12, %v4162_v54, 0.0 }
 0x321   : > { %v2681_v42 = vadd.f32 %v2680_v43, %v2679_v11  ;;  %2770 = vperm.xlu1 %3812, %v4140_v19   ;;  %v4166_v55 = vpop.eup %4165  ;;  %v2694_v35 = vsel %vm2487_vm12, %v4164_v59, 0.0  ;;  %v2661_v43 = vmul.f32 1.442695, %v2598_v47 }
 0x322   : > { %v2700_v63 = vsel %vm2487_vm12, %v4166_v55, 0.0 }
 0x323   : > { %v2683_v7 = vadd.f32 %v2682_v50, %v2681_v42  ;;  %2820 = vperm.xlu0 %3811, %v4158_v52  }
 0x325   : > { %v2685_v31 = vadd.f32 %v2684_v3, %v2683_v7  ;;  %2775 = vperm.xlu1 %3812, %v4142_v40  }
 0x327   : > { %v2687_v53 = vadd.f32 %v2686_v9, %v2685_v31  ;;  %2830 = vperm.xlu0 %3811, %v4162_v54  }
 0x329   : > { %v2689_v19 = vadd.f32 %v2688_v60, %v2687_v53  ;;  %2780 = vperm.xlu1 %3812, %v4146_v8   ;;  %v4168_v8 = vpop.eup %4167 }
 0x32a   : > { %v4170_v21 = vpop.eup %4169  ;;  %v2698_v39 = vsel %vm2487_vm12, %v4168_v8, 0.0 }
 0x32b   : > { %v2691_v40 = vadd.f32 %v2690_v26, %v2689_v19  ;;  %2840 = vperm.xlu0 %3811, %v4166_v55   ;;  %v4172_v44 = vpop.eup %4171  ;;  %v2704_v11 = vsel %vm2487_vm12, %v4170_v21, 0.0 }
 0x32c   : > { %v4174_v45 = vpop.eup %4173  ;;  %v2702_v22 = vsel %vm2487_vm12, %v4172_v44, 0.0 }
 0x32d   : > { %v2693_v58 = vadd.f32 %v2692_v20, %v2691_v40  ;;  %2785 = vperm.xlu1 %3812, %v6282_v62   ;;  %v2653_v62 = vmul.f32 1.442695, %v2594_v57  ;;  %v2708_v56 = vsel %vm2487_vm12, %v4174_v45, 0.0 }
 0x32f   : > { %v2695_v51 = vadd.f32 %v2694_v35, %v2693_v58  ;;  %2850 = vperm.xlu0 %3811, %v4170_v21   ;;  %4187 = vpow2.f32 %v2653_v62 }
 0x330   : > { %4189 = vpow2.f32 %v2659_v25 }
 0x331   : > { %v2697_v46 = vadd.f32 %v2696_v12, %v2695_v51  ;;  %2795 = vperm.xlu1 %3812, %v6291_v10   ;;  %v4176_v10 = vpop.eup %4175  ;;  %4191 = vpow2.f32 %v2657_v15  ;;  %v7280_v15 = vld [vmem:[#allocation22_spill] sm:$0xff] }
 0x332   : > { %v4178_v32 = vpop.eup %4177  ;;  %v2706_v42 = vsel %vm2487_vm12, %v4176_v10, 0.0  ;;  %4193 = vpow2.f32 %v2661_v43 }
 0x333   : > { %v2699_v24 = vadd.f32 %v2698_v39, %v2697_v46  ;;  %2860 = vperm.xlu0 %3811, %v4174_v45   ;;  %v4180_v28 = vpop.eup %4179  ;;  %v2712_v52 = vsel %vm2487_vm12, %v4178_v32, 0.0 }
 0x334   : > { %v4182_v4 = vpop.eup %4181 }
 0x335   : > { %v2701_v2 = vadd.f32 %v2700_v63, %v2699_v24  ;;  %2805 = vperm.xlu1 %3812, %v6300_v18   ;;  %v2710_v18 = vsel %vm2487_vm12, %v4180_v28, 0.0  ;;  %v4184_v61 = vpop.eup %4183  ;;  %v7276_v24 = vld [vmem:[#allocation21_spill] sm:$0xff]  ;;  %v7278_v63 = vld [vmem:[#allocation18_spill] sm:$0xff] }
 0x336   : > { %v4186_v7 = vpop.eup %4185  ;;  %v2714_v31 = vsel %vm2487_vm12, %v4184_v61, 0.0 }
 0x337   : > { %v2703_v27 = vadd.f32 %v2702_v22, %v2701_v2  ;;  %2870 = vperm.xlu0 %3811, %v4178_v32   ;;  %v2720_v60 = vsel %vm2487_vm12, %v4186_v7, 0.0  ;;  %v7279_v2 = vmax.f32 %v7278_v63, 0.0  ;;  %v7281_v22 = vmax.f32 %v7280_v15, 0.0  ;;  %v7310_v63 = vld [vmem:[#allocation36_spill] sm:$0xff] }
 0x338   : > { %v7312_v15 = vld [vmem:[#allocation32_spill] sm:$0xff] }
 0x339   : > { %v2705_v17 = vadd.f32 %v2704_v11, %v2703_v27  ;;  %2815 = vperm.xlu1 %3812, %v4160_v49   ;;  %v2716_v49 = vsel %vm2487_vm12, %v4182_v4, 0.0  ;;  %v7282_v27 = vld [vmem:[#allocation19_spill] sm:$0xff] }
 0x33a   : > { %v7283_v32 = vmax.f32 %v7282_v27, 0.0 }
 0x33b   : > { %v2707_v14 = vadd.f32 %v2706_v42, %v2705_v17  ;;  %2880 = vperm.xlu0 %3811, %v4182_v4   ;;  %v7284_v17 = vld [vmem:[#allocation16_spill] sm:$0xff] }
 0x33c   : > { %v4188_v23 = vpop.eup %4187  ;;  %v7285_v43 = vmax.f32 %v7284_v17, 0.0  ;;  %v7314_v17 = vld [vmem:[#allocation33_spill] sm:$0xff] }
 0x33d   : > { %v2709_v50 = vadd.f32 %v2708_v56, %v2707_v14  ;;  %2825 = vperm.xlu1 %3812, %v4164_v59   ;;  %v4190_v9 = vpop.eup %4189  ;;  %v2718_v36 = vsel %vm2487_vm12, %v4188_v23, 0.0 }
 0x33e   : > { %v4192_v53 = vpop.eup %4191  ;;  %v2724_v59 = vsel %vm2487_vm12, %v4190_v9, 0.0 }
 0x33f   : > { %v2711_v13 = vadd.f32 %v2710_v18, %v2709_v50  ;;  %2890 = vperm.xlu0 %3811, %v4186_v7   ;;  %v2722_v16 = vsel %vm2487_vm12, %v4192_v53, 0.0  ;;  %v4194_v29 = vpop.eup %4193  ;;  %v7290_v18 = vld [vmem:[#allocation27_spill] sm:$0xff] }
 0x340   : > { %v2726_v33 = vsel %vm2487_vm12, %v4194_v29, 0.0  ;;  %v7292_v7 = vld [vmem:[#allocation23_spill] sm:$0xff] }
 0x341   : > { %v2713_v3 = vadd.f32 %v2712_v52, %v2711_v13  ;;  %2835 = vperm.xlu1 %3812, %v4168_v8   ;;  %v2664_v8 = vmul.f32 %v6255_v0, %v2663_v41  ;;  %v7277_v0 = vmax.f32 %v7276_v24, 0.0  ;;  %v7293_v52 = vmax.f32 %v7292_v7, 0.0  ;;  %v7308_v24 = vld [vmem:[#allocation31_spill] sm:$0xff] }
 0x343   : > { %v2715_v5 = vadd.f32 %v2714_v31, %v2713_v3  ;;  %2900 = vperm.xlu0 %3811, %v4190_v9   ;;  %v7294_v31 = vld [vmem:[#allocation28_spill] sm:$0xff] }
 0x344   : > { %v7296_v9 = vld [vmem:[#allocation24_spill] sm:$0xff] }
 0x345   : > { %v2717_v30 = vadd.f32 %v2716_v49, %v2715_v5  ;;  %2845 = vperm.xlu1 %3812, %v4172_v44   ;;  %v7275_v44 = vmax.f32 %v4689_v48, 0.0  ;;  %v7288_v48 = vld [vmem:[#allocation17_spill] sm:$0xff]  ;;  %v7297_v49 = vmax.f32 %v7296_v9, 0.0  ;;  %v7322_v9 = vld [vmem:[#allocation43_spill] sm:$0xff] }
 0x346   : > { %v7289_v56 = vmax.f32 %v7288_v48, 0.0  ;;  %v7318_v48 = vld [vmem:[#allocation34_spill] sm:$0xff] }
 0x347   : > { %v2719_v54 = vadd.f32 %v2718_v36, %v2717_v30 }
 0x349   : > { %v2721_v19 = vadd.f32 %v2720_v60, %v2719_v54  ;;  %2855 = vperm.xlu1 %3812, %v4176_v10  }
 0x34b   : > { %v2723_v26 = vadd.f32 %v2722_v16, %v2721_v19 }
 0x34d   : > { %v2725_v1 = vadd.f32 %v2724_v59, %v2723_v26  ;;  %2865 = vperm.xlu1 %3812, %v4180_v28   ;;  %v7286_v28 = vld [vmem:[#allocation20_spill] sm:$0xff] }
 0x34e   : > { %v7287_v14 = vmax.f32 %v7286_v28, 0.0  ;;  %v7316_v28 = vld [vmem:[#allocation37_spill] sm:$0xff] }
 0x34f   : > { %v2727_v40 = vadd.f32 %v2726_v33, %v2725_v1  ;;  %v7300_v1 = vld [vmem:[#allocation29_spill] sm:$0xff] }
 0x350   : > { %v7301_v33 = vmax.f32 %v7300_v1, 0.0 }
 0x351   : > { %v2728_v55 = vrot.slane %v2727_v40, 4  ;;  %2875 = vperm.xlu1 %3812, %v4184_v61   ;;  %v7291_v61 = vmax.f32 %v7290_v18, 0.0  ;;  %v7320_v18 = vld [vmem:[#allocation38_spill] sm:$0xff] }
 0x353   : > { %v2729_v20 = vadd.f32 %v2728_v55, %v2727_v40  ;;  %v7302_v55 = vld [vmem:[#allocation26_spill] sm:$0xff] }
 0x355   : > { %v2730_v58 = vrot.slane %v2729_v20, 2  ;;  %2885 = vperm.xlu1 %3812, %v4188_v23   ;;  %v7295_v23 = vmax.f32 %v7294_v31, 0.0 }
 0x357   : > { %v2731_v57 = vadd.f32 %v2730_v58, %v2729_v20  ;;  %v7303_v20 = vmax.f32 %v7302_v55, 0.0 }
 0x359   : > { %v2732_v35 = vrot.slane %v2731_v57, 1  ;;  %2895 = vperm.xlu1 %3812, %v4192_v53  }
 0x35b   : > { %v2733_v6 = vadd.f32 %v2732_v35, %v2731_v57  ;;  %v7304_v57 = vld [vmem:[#allocation30_spill] sm:$0xff] }
 0x35c   : > { %v7305_v41 = vmax.f32 %v7304_v57, 0.0 }
 0x35d   : > { %v2734_v37 = vadd.f32 %v2733_v6, %v2664_v8  ;;  %2905 = vperm.xlu1 %3812, %v4194_v29   ;;  %v7298_v29 = vld [vmem:[#allocation25_spill] sm:$0xff] }
 0x35e   : > { %v7299_v26 = vmax.f32 %v7298_v29, 0.0 }
 0x35f   : > { %2736 = vst.msk [vmem:[#allocation3] sm:$0x1] %vm2735_vm5, %v2734_v37 }
 0x38a   : > { %v6348_v21 = vpop.permute.xlu0 %2740 }
 0x38c   : > { %v2751_v51 = vpop.permute.xlu1 %2750 }
 0x38d   : > { %v2908_v11 = vmul.f32 %v2751_v51, %v7283_v32  ;;  %v2909_v42 = vmul.f32 %v2751_v51, %v7285_v43  ;;  %v2910_v4 = vmul.f32 %v2751_v51, %v7287_v14  ;;  %v2911_v50 = vmul.f32 %v2751_v51, %v7289_v56 }
 0x38e   : > { %v7315_v43 = vmax.f32 %v7314_v17, 0.0  ;;  %v7317_v14 = vmax.f32 %v7316_v28, 0.0  ;;  %v7319_v56 = vmax.f32 %v7318_v48, 0.0 }
 0x390   : > { %v2756_v12 = vpop.permute.xlu1 %2755 }
 0x391   : > { %v2912_v25 = vmul.f32 %v2756_v12, %v7275_v44  ;;  %v2913_v45 = vmul.f32 %v2756_v12, %v7277_v0  ;;  %v2914_v47 = vmul.f32 %v2756_v12, %v7279_v2  ;;  %v2915_v10 = vmul.f32 %v2756_v12, %v7281_v22 }
 0x392   : > { %v6350_v46 = vpop.permute.xlu0 %2790  ;;  %v7309_v0 = vmax.f32 %v7308_v24, 0.0  ;;  %v7311_v2 = vmax.f32 %v7310_v63, 0.0  ;;  %v7313_v22 = vmax.f32 %v7312_v15, 0.0  ;;  %v7334_v24 = vld [vmem:[#allocation42_spill] sm:$0xff] }
 0x393   : > { %v3036_v53 = vadd.f32 %v2912_v25, %v2908_v11  ;;  %v3073_v54 = vadd.f32 %v2913_v45, %v2909_v42  ;;  %v3110_v60 = vadd.f32 %v2914_v47, %v2910_v4  ;;  %v3147_v19 = vadd.f32 %v2915_v10, %v2911_v50  ;;  %v7336_v63 = vld [vmem:[#allocation46_spill] sm:$0xff] }
 0x394   : > { %v2761_v38 = vpop.permute.xlu1 %2760 }
 0x395   : > { %v2916_v13 = vmul.f32 %v2761_v38, %v7291_v61  ;;  %v2917_v3 = vmul.f32 %v2761_v38, %v7293_v52  ;;  %v2918_v5 = vmul.f32 %v2761_v38, %v7295_v23  ;;  %v2919_v30 = vmul.f32 %v2761_v38, %v7297_v49  ;;  %v7306_v38 = vld [vmem:[#allocation35_spill] sm:$0xff] }
 0x396   : > { %v6352_v62 = vpop.permute.xlu0 %2800  ;;  %v7307_v44 = vmax.f32 %v7306_v38, 0.0  ;;  %v7321_v61 = vmax.f32 %v7320_v18, 0.0  ;;  %v7323_v49 = vmax.f32 %v7322_v9, 0.0  ;;  %v7332_v38 = vld [vmem:[#allocation45_spill] sm:$0xff] }
 0x397   : > { %v3037_v8 = vadd.f32 %v3036_v53, %v2916_v13  ;;  %v3074_v6 = vadd.f32 %v3073_v54, %v2917_v3  ;;  %v3111_v37 = vadd.f32 %v3110_v60, %v2918_v5  ;;  %v3148_v51 = vadd.f32 %v3147_v19, %v2919_v30  ;;  %v7326_v60 = vld [vmem:[#allocation44_spill] sm:$0xff] }
 0x398   : > { %v2766_v39 = vpop.permute.xlu1 %2765  ;;  %v7327_v19 = vmax.f32 %v7326_v60, 0.0 }
 0x399   : > { %v2920_v59 = vmul.f32 %v2766_v39, %v7299_v26  ;;  %v2921_v40 = vmul.f32 %v2766_v39, %v7301_v33  ;;  %v2922_v58 = vmul.f32 %v2766_v39, %v7303_v20  ;;  %v2923_v35 = vmul.f32 %v2766_v39, %v7305_v41  ;;  %v7328_v26 = vld [vmem:[#allocation40_spill] sm:$0xff] }
 0x39a   : > { %v6378_v16 = vpop.permute.xlu0 %2810 }
 0x39b   : > { %v3038_v27 = vadd.f32 %v3037_v8, %v2920_v59  ;;  %v3075_v32 = vadd.f32 %v3074_v6, %v2921_v40  ;;  %v3112_v39 = vadd.f32 %v3111_v37, %v2922_v58  ;;  %v3149_v11 = vadd.f32 %v3148_v51, %v2923_v35  ;;  %v7330_v37 = vld [vmem:[#allocation41_spill] sm:$0xff] }
 0x39c   : > { %v2771_v36 = vpop.permute.xlu1 %2770  ;;  %v7329_v59 = vmax.f32 %v7328_v26, 0.0  ;;  %v7331_v51 = vmax.f32 %v7330_v37, 0.0  ;;  %v7354_v26 = vld [vmem:[#allocation59_spill] sm:$0xff] }
 0x39d   : > { %v2924_v25 = vmul.f32 %v2771_v36, %v7307_v44  ;;  %v2925_v45 = vmul.f32 %v2771_v36, %v7309_v0  ;;  %v2926_v47 = vmul.f32 %v2771_v36, %v7311_v2  ;;  %v2927_v10 = vmul.f32 %v2771_v36, %v7313_v22  ;;  %v7324_v36 = vld [vmem:[#allocation39_spill] sm:$0xff] }
 0x39e   : > { %v6404_v7 = vpop.permute.xlu0 %2820  ;;  %v7325_v53 = vmax.f32 %v7324_v36, 0.0  ;;  %v7333_v44 = vmax.f32 %v7332_v38, 0.0  ;;  %v7335_v0 = vmax.f32 %v7334_v24, 0.0  ;;  %v7337_v2 = vmax.f32 %v7336_v63, 0.0 }
 0x39f   : > { %v3039_v3 = vadd.f32 %v3038_v27, %v2924_v25  ;;  %v3076_v31 = vadd.f32 %v3075_v32, %v2925_v45  ;;  %v3113_v23 = vadd.f32 %v3112_v39, %v2926_v47  ;;  %v3150_v5 = vadd.f32 %v3149_v11, %v2927_v10  ;;  %v7338_v39 = vld [vmem:[#allocation51_spill] sm:$0xff] }
 0x3a0   : > { %v2776_v12 = vpop.permute.xlu1 %2775  ;;  %v7339_v11 = vmax.f32 %v7338_v39, 0.0 }
 0x3a1   : > { %v2928_v42 = vmul.f32 %v2776_v12, %v7315_v43  ;;  %v2929_v4 = vmul.f32 %v2776_v12, %v7317_v14  ;;  %v2930_v50 = vmul.f32 %v2776_v12, %v7319_v56  ;;  %v2931_v13 = vmul.f32 %v2776_v12, %v7321_v61  ;;  %v7340_v43 = vld [vmem:[#allocation47_spill] sm:$0xff]  ;;  %v7342_v14 = vld [vmem:[#allocation52_spill] sm:$0xff]  ;;  %v7346_v61 = vld [vmem:[#allocation49_spill] sm:$0xff] }
 0x3a2   : > { %v6414_v6 = vpop.permute.xlu0 %2830  ;;  %v2940_v17 = vmul.f32 %v6350_v46, %v7339_v11  ;;  %v7344_v56 = vld [vmem:[#allocation48_spill] sm:$0xff] }
 0x3a3   : > { %v3040_v33 = vadd.f32 %v3039_v3, %v2928_v42  ;;  %v3077_v40 = vadd.f32 %v3076_v31, %v2929_v4  ;;  %v3114_v55 = vadd.f32 %v3113_v23, %v2930_v50  ;;  %v3151_v20 = vadd.f32 %v3150_v5, %v2931_v13  ;;  %v7348_v3 = vld [vmem:[#allocation53_spill] sm:$0xff]  ;;  %v7350_v5 = vld [vmem:[#allocation50_spill] sm:$0xff] }
 0x3a4   : > { %v2781_v52 = vpop.permute.xlu1 %2780  ;;  %v7341_v42 = vmax.f32 %v7340_v43, 0.0  ;;  %v7343_v4 = vmax.f32 %v7342_v14, 0.0  ;;  %v7345_v50 = vmax.f32 %v7344_v56, 0.0  ;;  %v7347_v13 = vmax.f32 %v7346_v61, 0.0 }
 0x3a5   : > { %v2932_v30 = vmul.f32 %v2781_v52, %v7323_v49  ;;  %v2933_v54 = vmul.f32 %v2781_v52, %v7325_v53  ;;  %v2934_v29 = vmul.f32 %v2781_v52, %v7327_v19  ;;  %v2935_v1 = vmul.f32 %v2781_v52, %v7329_v59 }
 0x3a6   : > { %v2941_v28 = vmul.f32 %v6350_v46, %v7341_v42  ;;  %v2942_v48 = vmul.f32 %v6350_v46, %v7343_v4  ;;  %v2943_v18 = vmul.f32 %v6350_v46, %v7345_v50  ;;  %v7349_v31 = vmax.f32 %v7348_v3, 0.0  ;;  %v7378_v3 = vld [vmem:[#allocation75_spill] sm:$0xff] }
 0x3a7   : > { %v3041_v57 = vadd.f32 %v3040_v33, %v2932_v30  ;;  %v3078_v41 = vadd.f32 %v3077_v40, %v2933_v54  ;;  %v3115_v35 = vadd.f32 %v3114_v55, %v2934_v29  ;;  %v3152_v8 = vadd.f32 %v3151_v20, %v2935_v1  ;;  %v7352_v30 = vld [vmem:[#allocation54_spill] sm:$0xff]  ;;  %v7356_v1 = vld [vmem:[#allocation55_spill] sm:$0xff]  ;;  %v7358_v55 = vld [vmem:[#allocation60_spill] sm:$0xff] }
 0x3a8   : > { %v2786_v58 = vpop.permute.xlu1 %2785  ;;  %v7351_v9 = vmax.f32 %v7350_v5, 0.0  ;;  %v7353_v36 = vmax.f32 %v7352_v30, 0.0  ;;  %v7355_v59 = vmax.f32 %v7354_v26, 0.0  ;;  %v7357_v33 = vmax.f32 %v7356_v1, 0.0  ;;  %v7380_v5 = vld [vmem:[#allocation71_spill] sm:$0xff]  ;;  %v7382_v30 = vld [vmem:[#allocation76_spill] sm:$0xff] }
 0x3a9   : > { %v2936_v12 = vmul.f32 %v2786_v58, %v7331_v51  ;;  %v2937_v25 = vmul.f32 %v2786_v58, %v7333_v44  ;;  %v2938_v45 = vmul.f32 %v2786_v58, %v7335_v0  ;;  %v2939_v47 = vmul.f32 %v2786_v58, %v7337_v2  ;;  %v7362_v51 = vld [vmem:[#allocation67_spill] sm:$0xff]  ;;  %v7366_v0 = vld [vmem:[#allocation68_spill] sm:$0xff] }
 0x3aa   : > { %v2948_v46 = vmul.f32 %v6352_v62, %v7355_v59  ;;  %v2949_v40 = vmul.f32 %v6352_v62, %v7357_v33  ;;  %v7359_v20 = vmax.f32 %v7358_v55, 0.0  ;;  %v7364_v44 = vld [vmem:[#allocation63_spill] sm:$0xff]  ;;  %v7368_v2 = vld [vmem:[#allocation64_spill] sm:$0xff]  ;;  %v7386_v33 = vld [vmem:[#allocation65_spill] sm:$0xff] }
 0x3ab   : > { %v3042_v15 = vadd.f32 %v3041_v57, %v2936_v12  ;;  %v3079_v22 = vadd.f32 %v3078_v41, %v2937_v25  ;;  %v3116_v10 = vadd.f32 %v3115_v35, %v2938_v45  ;;  %v3153_v27 = vadd.f32 %v3152_v8, %v2939_v47  ;;  %v7360_v57 = vld [vmem:[#allocation56_spill] sm:$0xff]  ;;  %v2841_v8 = vpop.permute.xlu0 %2840 }
 0x3ac   : > { %v2796_v32 = vpop.permute.xlu1 %2795  ;;  %v2950_v58 = vmul.f32 %v6352_v62, %v7359_v20  ;;  %v7361_v41 = vmax.f32 %v7360_v57, 0.0  ;;  %v7363_v12 = vmax.f32 %v7362_v51, 0.0  ;;  %v7365_v25 = vmax.f32 %v7364_v44, 0.0  ;;  %v7388_v20 = vld [vmem:[#allocation69_spill] sm:$0xff]  ;;  %v7392_v51 = vld [vmem:[#allocation70_spill] sm:$0xff] }
 0x3ad   : > { %v2944_v52 = vmul.f32 %v2796_v32, %v7347_v13  ;;  %v2945_v23 = vmul.f32 %v2796_v32, %v7349_v31  ;;  %v2946_v49 = vmul.f32 %v2796_v32, %v7351_v9  ;;  %v2947_v53 = vmul.f32 %v2796_v32, %v7353_v36  ;;  %v7370_v32 = vld [vmem:[#allocation57_spill] sm:$0xff] }
 0x3ae   : > { %v3043_v54 = vadd.f32 %v3042_v15, %v2940_v17  ;;  %v3080_v60 = vadd.f32 %v3079_v22, %v2941_v28  ;;  %v3117_v19 = vadd.f32 %v3116_v10, %v2942_v48  ;;  %v3154_v29 = vadd.f32 %v3153_v27, %v2943_v18  ;;  %v7372_v17 = vld [vmem:[#allocation61_spill] sm:$0xff]  ;;  %v7374_v28 = vld [vmem:[#allocation58_spill] sm:$0xff] }
 0x3af   : > { %v2951_v35 = vmul.f32 %v6352_v62, %v7361_v41  ;;  %v2956_v38 = vmul.f32 %v6378_v16, %v7363_v12  ;;  %v2957_v24 = vmul.f32 %v6378_v16, %v7365_v25  ;;  %v7367_v45 = vmax.f32 %v7366_v0, 0.0  ;;  %v7376_v48 = vld [vmem:[#allocation62_spill] sm:$0xff] }
 0x3b0   : > { %v2806_v37 = vpop.permute.xlu1 %2805  ;;  %v7369_v47 = vmax.f32 %v7368_v2, 0.0  ;;  %v3044_v22 = vadd.f32 %v3043_v54, %v2944_v52  ;;  %v3081_v62 = vadd.f32 %v3080_v60, %v2945_v23  ;;  %v3118_v10 = vadd.f32 %v3117_v19, %v2946_v49  ;;  %v7384_v54 = vld [vmem:[#allocation72_spill] sm:$0xff]  ;;  %v7390_v41 = vld [vmem:[#allocation66_spill] sm:$0xff] }
 0x3b1   : > { %v2958_v63 = vmul.f32 %v6378_v16, %v7367_v45  ;;  %v3155_v27 = vadd.f32 %v3154_v29, %v2947_v53  ;;  %v7371_v39 = vmax.f32 %v7370_v32, 0.0  ;;  %v7373_v43 = vmax.f32 %v7372_v17, 0.0  ;;  %v2851_v29 = vpop.permute.xlu0 %2850 }
 0x3b2   : > { %v2959_v15 = vmul.f32 %v6378_v16, %v7369_v47  ;;  %v7375_v14 = vmax.f32 %v7374_v28, 0.0  ;;  %v7377_v56 = vmax.f32 %v7376_v48, 0.0  ;;  %v3045_v18 = vadd.f32 %v3044_v22, %v2948_v46  ;;  %v7394_v47 = vld [vmem:[#allocation83_spill] sm:$0xff] }
 0x3b3   : > { %v2952_v11 = vmul.f32 %v2806_v37, %v7371_v39  ;;  %v2953_v42 = vmul.f32 %v2806_v37, %v7373_v43  ;;  %v3082_v61 = vadd.f32 %v3081_v62, %v2949_v40  ;;  %v3119_v13 = vadd.f32 %v3118_v10, %v2950_v58  ;;  %v7396_v10 = vld [vmem:[#allocation79_spill] sm:$0xff]  ;;  %v7398_v39 = vld [vmem:[#allocation84_spill] sm:$0xff] }
 0x3b4   : > { %v2954_v4 = vmul.f32 %v2806_v37, %v7375_v14  ;;  %v2955_v50 = vmul.f32 %v2806_v37, %v7377_v56  ;;  %v3156_v16 = vadd.f32 %v3155_v27, %v2951_v35  ;;  %v2816_v52 = vpop.permute.xlu1 %2815  ;;  %v7379_v31 = vmax.f32 %v7378_v3, 0.0  ;;  %v7400_v43 = vld [vmem:[#allocation80_spill] sm:$0xff]  ;;  %v7402_v14 = vld [vmem:[#allocation73_spill] sm:$0xff] }
 0x3b5   : > { %v7381_v9 = vmax.f32 %v7380_v5, 0.0  ;;  %v7383_v36 = vmax.f32 %v7382_v30, 0.0  ;;  %v7385_v60 = vmax.f32 %v7384_v54, 0.0  ;;  %v3046_v26 = vadd.f32 %v3045_v18, %v2952_v11  ;;  %v7404_v56 = vld [vmem:[#allocation77_spill] sm:$0xff]  ;;  %v2861_v5 = vpop.permute.xlu0 %2860 }
 0x3b6   : > { %v2964_v23 = vmul.f32 %v6404_v7, %v7379_v31  ;;  %v3083_v59 = vadd.f32 %v3082_v61, %v2953_v42  ;;  %v3120_v46 = vadd.f32 %v3119_v13, %v2954_v4  ;;  %v3157_v1 = vadd.f32 %v3156_v16, %v2955_v50  ;;  %v7406_v61 = vld [vmem:[#allocation74_spill] sm:$0xff] }
 0x3b7   : > { %v2965_v49 = vmul.f32 %v6404_v7, %v7381_v9  ;;  %v2966_v53 = vmul.f32 %v6404_v7, %v7383_v36  ;;  %v2967_v19 = vmul.f32 %v6404_v7, %v7385_v60  ;;  %v7387_v40 = vmax.f32 %v7386_v33, 0.0  ;;  %v7410_v60 = vld [vmem:[#allocation91_spill] sm:$0xff] }
 0x3b8   : > { %v7389_v58 = vmax.f32 %v7388_v20, 0.0  ;;  %v7391_v35 = vmax.f32 %v7390_v41, 0.0  ;;  %v7393_v12 = vmax.f32 %v7392_v51, 0.0  ;;  %v3047_v25 = vadd.f32 %v3046_v26, %v2956_v38  ;;  %v2826_v2 = vpop.permute.xlu1 %2825 }
 0x3b9   : > { %v2960_v55 = vmul.f32 %v2816_v52, %v7387_v40  ;;  %v3084_v0 = vadd.f32 %v3083_v59, %v2957_v24  ;;  %v3121_v7 = vadd.f32 %v3120_v46, %v2958_v63  ;;  %v3158_v45 = vadd.f32 %v3157_v1, %v2959_v15  ;;  %v7412_v46 = vld [vmem:[#allocation87_spill] sm:$0xff]  ;;  %v7414_v40 = vld [vmem:[#allocation92_spill] sm:$0xff] }
 0x3ba   : > { %v2961_v57 = vmul.f32 %v2816_v52, %v7389_v58  ;;  %v2962_v37 = vmul.f32 %v2816_v52, %v7391_v35  ;;  %v2963_v44 = vmul.f32 %v2816_v52, %v7393_v12  ;;  %v7395_v22 = vmax.f32 %v7394_v47, 0.0  ;;  %v7408_v52 = vld [vmem:[#allocation78_spill] sm:$0xff]  ;;  %v7416_v58 = vld [vmem:[#allocation88_spill] sm:$0xff]  ;;  %v7420_v12 = vld [vmem:[#allocation85_spill] sm:$0xff] }
 0x3bb   : > { %v7397_v27 = vmax.f32 %v7396_v10, 0.0  ;;  %v7399_v11 = vmax.f32 %v7398_v39, 0.0  ;;  %v7401_v42 = vmax.f32 %v7400_v43, 0.0  ;;  %v3048_v24 = vadd.f32 %v3047_v25, %v2960_v55  ;;  %v7426_v43 = vld [vmem:[#allocation99_spill] sm:$0xff] }
 0x3bc   : > { %v2972_v62 = vmul.f32 %v6414_v6, %v7395_v22  ;;  %v3085_v63 = vadd.f32 %v3084_v0, %v2961_v57  ;;  %v3122_v15 = vadd.f32 %v3121_v7, %v2962_v37  ;;  %v3159_v28 = vadd.f32 %v3158_v45, %v2963_v44  ;;  %v2836_v54 = vpop.permute.xlu1 %2835  ;;  %v7422_v0 = vld [vmem:[#allocation82_spill] sm:$0xff] }
 0x3bd   : > { %v2973_v32 = vmul.f32 %v6414_v6, %v7397_v27  ;;  %v2974_v17 = vmul.f32 %v6414_v6, %v7399_v11  ;;  %v2975_v38 = vmul.f32 %v6414_v6, %v7401_v42  ;;  %v7403_v4 = vmax.f32 %v7402_v14, 0.0  ;;  %v7430_v14 = vld [vmem:[#allocation100_spill] sm:$0xff] }
 0x3be   : > { %v7405_v50 = vmax.f32 %v7404_v56, 0.0  ;;  %v7407_v13 = vmax.f32 %v7406_v61, 0.0  ;;  %v7409_v3 = vmax.f32 %v7408_v52, 0.0  ;;  %v3049_v9 = vadd.f32 %v3048_v24, %v2964_v23  ;;  %v7432_v56 = vld [vmem:[#allocation96_spill] sm:$0xff]  ;;  %v2871_v61 = vpop.permute.xlu0 %2870 }
 0x3bf   : > { %v2968_v48 = vmul.f32 %v2826_v2, %v7403_v4  ;;  %v3086_v30 = vadd.f32 %v3085_v63, %v2965_v49  ;;  %v3123_v6 = vadd.f32 %v3122_v15, %v2966_v53  ;;  %v3160_v36 = vadd.f32 %v3159_v28, %v2967_v19  ;;  %v7418_v49 = vld [vmem:[#allocation81_spill] sm:$0xff]  ;;  %v7428_v63 = vld [vmem:[#allocation95_spill] sm:$0xff] }
 0x3c0   : > { %v2969_v18 = vmul.f32 %v2826_v2, %v7405_v50  ;;  %v2970_v16 = vmul.f32 %v2826_v2, %v7407_v13  ;;  %v2971_v31 = vmul.f32 %v2826_v2, %v7409_v3  ;;  %v7411_v26 = vmax.f32 %v7410_v60, 0.0  ;;  %v7424_v2 = vld [vmem:[#allocation86_spill] sm:$0xff]  ;;  %v2846_v11 = vpop.permute.xlu1 %2845  ;;  %v7436_v3 = vld [vmem:[#allocation93_spill] sm:$0xff] }
 0x3c1   : > { %v7413_v1 = vmax.f32 %v7412_v46, 0.0  ;;  %v7415_v55 = vmax.f32 %v7414_v40, 0.0  ;;  %v7417_v57 = vmax.f32 %v7416_v58, 0.0  ;;  %v3050_v35 = vadd.f32 %v3049_v9, %v2968_v48  ;;  %v7442_v58 = vld [vmem:[#allocation97_spill] sm:$0xff] }
 0x3c2   : > { %v2980_v59 = vmul.f32 %v2841_v8, %v7411_v26  ;;  %v3087_v37 = vadd.f32 %v3086_v30, %v2969_v18  ;;  %v3124_v51 = vadd.f32 %v3123_v6, %v2970_v16  ;;  %v3161_v23 = vadd.f32 %v3160_v36, %v2971_v31  ;;  %v7438_v30 = vld [vmem:[#allocation90_spill] sm:$0xff] }
 0x3c3   : > { %v2981_v33 = vmul.f32 %v2841_v8, %v7413_v1  ;;  %v2982_v20 = vmul.f32 %v2841_v8, %v7415_v55  ;;  %v2983_v41 = vmul.f32 %v2841_v8, %v7417_v57  ;;  %v7419_v53 = vmax.f32 %v7418_v49, 0.0  ;;  %v7446_v49 = vld [vmem:[#allocation98_spill] sm:$0xff] }
 0x3c4   : > { %v7421_v44 = vmax.f32 %v7420_v12, 0.0  ;;  %v7423_v7 = vmax.f32 %v7422_v0, 0.0  ;;  %v7425_v47 = vmax.f32 %v7424_v2, 0.0  ;;  %v3051_v10 = vadd.f32 %v3050_v35, %v2972_v62  ;;  %v2856_v55 = vpop.permute.xlu1 %2855  ;;  %v7448_v12 = vld [vmem:[#allocation102_spill] sm:$0xff]  ;;  %v7452_v2 = vld [vmem:[#allocation103_spill] sm:$0xff] }
 0x3c5   : > { %v2976_v19 = vmul.f32 %v2836_v54, %v7419_v53  ;;  %v3088_v27 = vadd.f32 %v3087_v37, %v2973_v32  ;;  %v3125_v39 = vadd.f32 %v3124_v51, %v2974_v17  ;;  %v3162_v8 = vadd.f32 %v3161_v23, %v2975_v38  ;;  %v7434_v17 = vld [vmem:[#allocation89_spill] sm:$0xff] }
 0x3c6   : > { %v2977_v25 = vmul.f32 %v2836_v54, %v7421_v44  ;;  %v2978_v45 = vmul.f32 %v2836_v54, %v7423_v7  ;;  %v2979_v22 = vmul.f32 %v2836_v54, %v7425_v47  ;;  %v7427_v42 = vmax.f32 %v7426_v43, 0.0  ;;  %v7440_v54 = vld [vmem:[#allocation94_spill] sm:$0xff]  ;;  %v7444_v37 = vld [vmem:[#allocation101_spill] sm:$0xff] }
 0x3c7   : > { %v7429_v15 = vmax.f32 %v7428_v63, 0.0  ;;  %v7431_v4 = vmax.f32 %v7430_v14, 0.0  ;;  %v7433_v50 = vmax.f32 %v7432_v56, 0.0  ;;  %v3052_v13 = vadd.f32 %v3051_v10, %v2976_v19  ;;  %v7454_v10 = vld [vmem:[#allocation108_spill] sm:$0xff] }
 0x3c8   : > { %v2988_v24 = vmul.f32 %v2851_v29, %v7427_v42  ;;  %v3089_v16 = vadd.f32 %v3088_v27, %v2977_v25  ;;  %v3126_v62 = vadd.f32 %v3125_v39, %v2978_v45  ;;  %v3163_v32 = vadd.f32 %v3162_v8, %v2979_v22  ;;  %v7456_v8 = vld [vmem:[#allocation104_spill] sm:$0xff]  ;;  %v2881_v42 = vpop.permute.xlu0 %2880  ;;  %v2866_v56 = vpop.permute.xlu1 %2865 }
 0x3c9   : > { %v2989_v28 = vmul.f32 %v2851_v29, %v7429_v15  ;;  %v2990_v48 = vmul.f32 %v2851_v29, %v7431_v4  ;;  %v2991_v18 = vmul.f32 %v2851_v29, %v7433_v50  ;;  %v7435_v38 = vmax.f32 %v7434_v17, 0.0  ;;  %v7458_v50 = vld [vmem:[#allocation105_spill] sm:$0xff] }
 0x3ca   : > { %v7437_v31 = vmax.f32 %v7436_v3, 0.0  ;;  %v7439_v6 = vmax.f32 %v7438_v30, 0.0  ;;  %v7441_v60 = vmax.f32 %v7440_v54, 0.0  ;;  %v3053_v46 = vadd.f32 %v3052_v13, %v2980_v59  ;;  %v7468_v54 = vld [vmem:[#allocation111_spill] sm:$0xff] }
 0x3cb   : > { %v2984_v52 = vmul.f32 %v2846_v11, %v7435_v38  ;;  %v3090_v1 = vadd.f32 %v3089_v16, %v2981_v33  ;;  %v3127_v29 = vadd.f32 %v3126_v62, %v2982_v20  ;;  %v3164_v40 = vadd.f32 %v3163_v32, %v2983_v41  ;;  %v7450_v33 = vld [vmem:[#allocation107_spill] sm:$0xff]  ;;  %v7460_v62 = vld [vmem:[#allocation109_spill] sm:$0xff]  ;;  %v7462_v38 = vld [vmem:[#allocation106_spill] sm:$0xff] }
 0x3cc   : > { %v2985_v9 = vmul.f32 %v2846_v11, %v7437_v31  ;;  %v2986_v36 = vmul.f32 %v2846_v11, %v7439_v6  ;;  %v2987_v26 = vmul.f32 %v2846_v11, %v7441_v60  ;;  %v7443_v57 = vmax.f32 %v7442_v58, 0.0  ;;  %v7464_v31 = vld [vmem:[#allocation110_spill] sm:$0xff] }
 0x3cd   : > { %v7445_v51 = vmax.f32 %v7444_v37, 0.0  ;;  %v7447_v53 = vmax.f32 %v7446_v49, 0.0  ;;  %v7449_v44 = vmax.f32 %v7448_v12, 0.0  ;;  %v3054_v0 = vadd.f32 %v3053_v46, %v2984_v52  ;;  %v7470_v46 = vld [vmem:[#allocation116_spill] sm:$0xff]  ;;  %v7476_v12 = vld [vmem:[#allocation117_spill] sm:$0xff] }
 0x3ce   : > { %v2992_v35 = vmul.f32 %v2856_v55, %v7443_v57  ;;  %v3091_v7 = vadd.f32 %v3090_v1, %v2985_v9  ;;  %v3128_v45 = vadd.f32 %v3127_v29, %v2986_v36  ;;  %v3165_v59 = vadd.f32 %v3164_v40, %v2987_v26  ;;  %v7472_v40 = vld [vmem:[#allocation112_spill] sm:$0xff] }
 0x3cf   : > { %v2993_v23 = vmul.f32 %v2856_v55, %v7445_v51  ;;  %v2994_v19 = vmul.f32 %v2856_v55, %v7447_v53  ;;  %v2995_v25 = vmul.f32 %v2856_v55, %v7449_v44  ;;  %v7451_v20 = vmax.f32 %v7450_v33, 0.0 }
 0x3d0   : > { %v7453_v47 = vmax.f32 %v7452_v2, 0.0  ;;  %v7455_v27 = vmax.f32 %v7454_v10, 0.0  ;;  %v7457_v11 = vmax.f32 %v7456_v8, 0.0  ;;  %v3055_v63 = vadd.f32 %v3054_v0, %v2988_v24  ;;  %v7478_v0 = vld [vmem:[#allocation114_spill] sm:$0xff]  ;;  %v2891_v2 = vpop.permute.xlu0 %2890  ;;  %v7482_v10 = vld [vmem:[#allocation123_spill] sm:$0xff] }
 0x3d1   : > { %v2996_v41 = vmul.f32 %v2861_v5, %v7451_v20  ;;  %v3092_v15 = vadd.f32 %v3091_v7, %v2989_v28  ;;  %v3129_v14 = vadd.f32 %v3128_v45, %v2990_v48  ;;  %v3166_v4 = vadd.f32 %v3165_v59, %v2991_v18  ;;  %v7466_v28 = vld [vmem:[#allocation115_spill] sm:$0xff]  ;;  %v7480_v59 = vld [vmem:[#allocation118_spill] sm:$0xff] }
 0x3d2   : > { %v2997_v22 = vmul.f32 %v2861_v5, %v7453_v47  ;;  %v2998_v39 = vmul.f32 %v2861_v5, %v7455_v27  ;;  %v2999_v43 = vmul.f32 %v2861_v5, %v7457_v11  ;;  %v7459_v13 = vmax.f32 %v7458_v50, 0.0  ;;  %v7484_v8 = vld [vmem:[#allocation119_spill] sm:$0xff] }
 0x3d3   : > { %v7461_v32 = vmax.f32 %v7460_v62, 0.0  ;;  %v7463_v52 = vmax.f32 %v7462_v38, 0.0  ;;  %v7465_v9 = vmax.f32 %v7464_v31, 0.0  ;;  %v3056_v6 = vadd.f32 %v3055_v63, %v2992_v35  ;;  %v2876_v35 = vpop.permute.xlu1 %2875  ;;  %v7486_v63 = vld [vmem:[#allocation124_spill] sm:$0xff]  ;;  %v7492_v31 = vld [vmem:[#allocation125_spill] sm:$0xff] }
 0x3d4   : > { %v3000_v16 = vmul.f32 %v2866_v56, %v7459_v13  ;;  %v3093_v5 = vadd.f32 %v3092_v15, %v2993_v23  ;;  %v3130_v36 = vadd.f32 %v3129_v14, %v2994_v19  ;;  %v3167_v24 = vadd.f32 %v3166_v4, %v2995_v25  ;;  %v7474_v23 = vld [vmem:[#allocation113_spill] sm:$0xff]  ;;  %v7488_v4 = vld [vmem:[#allocation120_spill] sm:$0xff] }
 0x3d5   : > { %v3001_v17 = vmul.f32 %v2866_v56, %v7461_v32  ;;  %v3002_v3 = vmul.f32 %v2866_v56, %v7463_v52  ;;  %v3003_v30 = vmul.f32 %v2866_v56, %v7465_v9  ;;  %v7467_v48 = vmax.f32 %v7466_v28, 0.0 }
 0x3d6   : > { %v7469_v60 = vmax.f32 %v7468_v54, 0.0  ;;  %v7471_v1 = vmax.f32 %v7470_v46, 0.0  ;;  %v7473_v55 = vmax.f32 %v7472_v40, 0.0  ;;  %v3057_v57 = vadd.f32 %v3056_v6, %v2996_v41  ;;  %v7494_v6 = vld [vmem:[#allocation122_spill] sm:$0xff] }
 0x3d7   : > { %v3004_v18 = vmul.f32 %v2871_v61, %v7467_v48  ;;  %v3094_v37 = vadd.f32 %v3093_v5, %v2997_v22  ;;  %v3131_v51 = vadd.f32 %v3130_v36, %v2998_v39  ;;  %v3168_v49 = vadd.f32 %v3167_v24, %v2999_v43  ;;  %v7496_v24 = vld [vmem:[#allocation126_spill] sm:$0xff] }
 0x3d8   : > { %v3005_v26 = vmul.f32 %v2871_v61, %v7469_v60  ;;  %v3006_v29 = vmul.f32 %v2871_v61, %v7471_v1  ;;  %v3007_v58 = vmul.f32 %v2871_v61, %v7473_v55  ;;  %v7475_v53 = vmax.f32 %v7474_v23, 0.0  ;;  %v2901_v23 = vpop.permute.xlu0 %2900 }
 0x3d9   : > { %v7477_v44 = vmax.f32 %v7476_v12, 0.0  ;;  %v7479_v7 = vmax.f32 %v7478_v0, 0.0  ;;  %v7481_v33 = vmax.f32 %v7480_v59, 0.0  ;;  %v3058_v47 = vadd.f32 %v3057_v57, %v3000_v16  ;;  %v2886_v16 = vpop.permute.xlu1 %2885  ;;  %v7506_v0 = vld [vmem:[#allocation129_spill] sm:$0xff] }
 0x3da   : > { %v3008_v19 = vmul.f32 %v2876_v35, %v7475_v53  ;;  %v3095_v61 = vadd.f32 %v3094_v37, %v3001_v17  ;;  %v3132_v41 = vadd.f32 %v3131_v51, %v3002_v3  ;;  %v3169_v22 = vadd.f32 %v3168_v49, %v3003_v30  ;;  %v7490_v17 = vld [vmem:[#allocation121_spill] sm:$0xff]  ;;  %v7504_v51 = vld [vmem:[#allocation128_spill] sm:$0xff] }
 0x3db   : > { %v3009_v25 = vmul.f32 %v2876_v35, %v7477_v44  ;;  %v3010_v45 = vmul.f32 %v2876_v35, %v7479_v7  ;;  %v3011_v20 = vmul.f32 %v2876_v35, %v7481_v33  ;;  %v7483_v27 = vmax.f32 %v7482_v10, 0.0  ;;  %v7508_v59 = vld [vmem:[#allocation133_spill] sm:$0xff] }
 0x3dc   : > { %v7485_v11 = vmax.f32 %v7484_v8, 0.0  ;;  %v7487_v15 = vmax.f32 %v7486_v63, 0.0  ;;  %v7489_v56 = vmax.f32 %v7488_v4, 0.0  ;;  %v3059_v13 = vadd.f32 %v3058_v47, %v3004_v18  ;;  %v7510_v47 = vld [vmem:[#allocation130_spill] sm:$0xff] }
 0x3dd   : > { %v3012_v39 = vmul.f32 %v2881_v42, %v7483_v27  ;;  %v3096_v62 = vadd.f32 %v3095_v61, %v3005_v26  ;;  %v3133_v32 = vadd.f32 %v3132_v41, %v3006_v29  ;;  %v3170_v38 = vadd.f32 %v3169_v22, %v3007_v58  ;;  %v7498_v26 = vld [vmem:[#allocation131_spill] sm:$0xff]  ;;  %v7502_v58 = vld [vmem:[#allocation132_spill] sm:$0xff]  ;;  %v7512_v22 = vld [vmem:[#allocation134_spill] sm:$0xff] }
 0x3de   : > { %v3013_v43 = vmul.f32 %v2881_v42, %v7485_v11  ;;  %v3014_v14 = vmul.f32 %v2881_v42, %v7487_v15  ;;  %v3015_v50 = vmul.f32 %v2881_v42, %v7489_v56  ;;  %v7491_v52 = vmax.f32 %v7490_v17, 0.0  ;;  %v7500_v29 = vld [vmem:[#allocation127_spill] sm:$0xff] }
 0x3df   : > { %v7493_v9 = vmax.f32 %v7492_v31, 0.0  ;;  %v7495_v5 = vmax.f32 %v7494_v6, 0.0  ;;  %v7497_v28 = vmax.f32 %v7496_v24, 0.0  ;;  %v3060_v54 = vadd.f32 %v3059_v13, %v3008_v19 }
 0x3e0   : > { %v3016_v3 = vmul.f32 %v2886_v16, %v7491_v52  ;;  %v3097_v60 = vadd.f32 %v3096_v62, %v3009_v25  ;;  %v3134_v42 = vadd.f32 %v3133_v32, %v3010_v45  ;;  %v3171_v18 = vadd.f32 %v3170_v38, %v3011_v20  ;;  %v2896_v25 = vpop.permute.xlu1 %2895  ;;  %v7520_v32 = vld [vmem:[#allocation136_spill] sm:$0xff] }
 0x3e1   : > { %v3017_v30 = vmul.f32 %v2886_v16, %v7493_v9  ;;  %v3018_v36 = vmul.f32 %v2886_v16, %v7495_v5  ;;  %v3019_v48 = vmul.f32 %v2886_v16, %v7497_v28  ;;  %v7499_v46 = vmax.f32 %v7498_v26, 0.0 }
 0x3e2   : > { %v7501_v40 = vmax.f32 %v7500_v29, 0.0  ;;  %v7503_v57 = vmax.f32 %v7502_v58, 0.0  ;;  %v7505_v49 = vmax.f32 %v7504_v51, 0.0  ;;  %v3061_v53 = vadd.f32 %v3060_v54, %v3012_v39 }
 0x3e3   : > { %v3020_v1 = vmul.f32 %v2891_v2, %v7499_v46  ;;  %v3098_v12 = vadd.f32 %v3097_v60, %v3013_v43  ;;  %v3135_v44 = vadd.f32 %v3134_v42, %v3014_v14  ;;  %v3172_v19 = vadd.f32 %v3171_v18, %v3015_v50  ;;  %v7514_v43 = vld [vmem:[#allocation139_spill] sm:$0xff]  ;;  %v7518_v50 = vld [vmem:[#allocation140_spill] sm:$0xff]  ;;  %v7528_v42 = vld [vmem:[#allocation142_spill] sm:$0xff] }
 0x3e4   : > { %v3021_v55 = vmul.f32 %v2891_v2, %v7501_v40  ;;  %v3022_v37 = vmul.f32 %v2891_v2, %v7503_v57  ;;  %v3023_v35 = vmul.f32 %v2891_v2, %v7505_v49  ;;  %v7507_v7 = vmax.f32 %v7506_v0, 0.0  ;;  %v7516_v14 = vld [vmem:[#allocation135_spill] sm:$0xff] }
 0x3e5   : > { %v7509_v33 = vmax.f32 %v7508_v59, 0.0  ;;  %v7511_v61 = vmax.f32 %v7510_v47, 0.0  ;;  %v7513_v10 = vmax.f32 %v7512_v22, 0.0  ;;  %v3062_v8 = vadd.f32 %v3061_v53, %v3016_v3  ;;  %v2906_v3 = vpop.permute.xlu1 %2905 }
 0x3e6   : > { %v3024_v45 = vmul.f32 %v2896_v25, %v7507_v7  ;;  %v3099_v2 = vadd.f32 %v3098_v12, %v3017_v30  ;;  %v3136_v11 = vadd.f32 %v3135_v44, %v3018_v36  ;;  %v3173_v39 = vadd.f32 %v3172_v19, %v3019_v48  ;;  %v7522_v30 = vld [vmem:[#allocation137_spill] sm:$0xff]  ;;  %v7526_v48 = vld [vmem:[#allocation138_spill] sm:$0xff] }
 0x3e7   : > { %v3025_v20 = vmul.f32 %v2896_v25, %v7509_v33  ;;  %v3026_v41 = vmul.f32 %v2896_v25, %v7511_v61  ;;  %v3027_v27 = vmul.f32 %v2896_v25, %v7513_v10  ;;  %v7515_v63 = vmax.f32 %v7514_v43, 0.0  ;;  %v7524_v36 = vld [vmem:[#allocation141_spill] sm:$0xff] }
 0x3e8   : > { %v7517_v4 = vmax.f32 %v7516_v14, 0.0  ;;  %v7519_v13 = vmax.f32 %v7518_v50, 0.0  ;;  %v7521_v38 = vmax.f32 %v7520_v32, 0.0  ;;  %v3063_v17 = vadd.f32 %v3062_v8, %v3020_v1 }
 0x3e9   : > { %v3028_v15 = vmul.f32 %v2901_v23, %v7515_v63  ;;  %v3100_v52 = vadd.f32 %v3099_v2, %v3021_v55  ;;  %v3137_v31 = vadd.f32 %v3136_v11, %v3022_v37  ;;  %v3174_v9 = vadd.f32 %v3173_v39, %v3023_v35 }
 0x3ea   : > { %v3029_v56 = vmul.f32 %v2901_v23, %v7517_v4  ;;  %v3030_v62 = vmul.f32 %v2901_v23, %v7519_v13  ;;  %v3031_v16 = vmul.f32 %v2901_v23, %v7521_v38  ;;  %v7523_v6 = vmax.f32 %v7522_v30, 0.0 }
 0x3eb   : > { %v7525_v24 = vmax.f32 %v7524_v36, 0.0  ;;  %v7527_v54 = vmax.f32 %v7526_v48, 0.0  ;;  %v7529_v18 = vmax.f32 %v7528_v42, 0.0  ;;  %v3064_v46 = vadd.f32 %v3063_v17, %v3024_v45 }
 0x3ec   : > { %v3032_v5 = vmul.f32 %v2906_v3, %v7523_v6  ;;  %v3101_v29 = vadd.f32 %v3100_v52, %v3025_v20  ;;  %v3138_v40 = vadd.f32 %v3137_v31, %v3026_v41  ;;  %v3175_v1 = vadd.f32 %v3174_v9, %v3027_v27  ;;  %v2737_v52 = vld [vmem:[#allocation4] sm:$0xf] }
 0x3ed   : > { %v3033_v28 = vmul.f32 %v2906_v3, %v7525_v24  ;;  %v3034_v60 = vmul.f32 %v2906_v3, %v7527_v54  ;;  %v3035_v26 = vmul.f32 %v2906_v3, %v7529_v18  ;;  %v3065_v55 = vadd.f32 %v3064_v46, %v3028_v15  ;;  %v7530_v15 = vld [vmem:[#allocation14_spill] sm:$0xff] }
 0x3ee   : > { %v3102_v58 = vadd.f32 %v3101_v29, %v3029_v56  ;;  %v3139_v57 = vadd.f32 %v3138_v40, %v3030_v62  ;;  %v3176_v37 = vadd.f32 %v3175_v1, %v3031_v16  ;;  %v4269_v25 = vmov 1966171168  }
 0x3ef   : > { %v3066_v51 = vadd.f32 %v3065_v55, %v3032_v5  ;;  %v3191_v0 = vunpack.c.l.s4 %v4269_v25  ;;  %v2746_v38 = vrot.slane %v6348_v21, %v4662_v34  ;;  %v7531_v30 = vlaneseq }
 0x3f0   : > { %v3103_v49 = vadd.f32 %v3102_v58, %v3033_v28  ;;  %v3140_v35 = vadd.f32 %v3139_v57, %v3034_v60  ;;  %v3177_v23 = vadd.f32 %v3176_v37, %v3035_v26 }
 0x3f1   : > { %v3067_v53 = vrot.slane %v3066_v51, 4  ;;  %v3192_v22 = vunpack.c.0.s8 %v3191_v0  ;;  %v2747_v9 = vmul.f32 %v2746_v38, %v2737_v52  ;;  %vm3216_vm12 = vcmp.lt.s32.totalorder %v7531_v30, 512 }
 0x3f2   : > { %v3104_v12 = vrot.slane %v3103_v49, 4  ;;  %v3141_v44 = vrot.slane %v3140_v35, 4  ;;  %v3178_v19 = vrot.slane %v3177_v23, 4 }
 0x3f3   : > { %v3068_v7 = vadd.f32 %v3067_v53, %v3066_v51  ;;  %v3195_v14 = vsub.s32 %v3192_v22, %v7530_v15 }
 0x3f4   : > { %v3105_v59 = vadd.f32 %v3104_v12, %v3103_v49  ;;  %v3142_v45 = vadd.f32 %v3141_v44, %v3140_v35  ;;  %v3179_v33 = vadd.f32 %v3178_v19, %v3177_v23 }
 0x3f5   : > { %v3069_v20 = vrot.slane %v3068_v7, 2 }
 0x3f6   : > { %v3106_v47 = vrot.slane %v3105_v59, 2  ;;  %v3143_v61 = vrot.slane %v3142_v45, 2  ;;  %v3180_v41 = vrot.slane %v3179_v33, 2 }
 0x3f7   : > { %v3070_v10 = vadd.f32 %v3069_v20, %v3068_v7 }
 0x3f8   : > { %v3107_v27 = vadd.f32 %v3106_v47, %v3105_v59  ;;  %v3144_v8 = vadd.f32 %v3143_v61, %v3142_v45  ;;  %v3181_v2 = vadd.f32 %v3180_v41, %v3179_v33 }
 0x3f9   : > { %v3071_v11 = vrot.slane %v3070_v10, 1 }
 0x3fa   : > { %v3108_v39 = vrot.slane %v3107_v27, 1  ;;  %v3145_v43 = vrot.slane %v3144_v8, 1  ;;  %v3182_v63 = vrot.slane %v3181_v2, 1 }
 0x3fb   : > { %v3072_v4 = vadd.f32 %v3071_v11, %v3070_v10 }
 0x3fc   : > { %v3109_v56 = vadd.f32 %v3108_v39, %v3107_v27  ;;  %v3146_v50 = vadd.f32 %v3145_v43, %v3144_v8  ;;  %v3183_v13 = vadd.f32 %v3182_v63, %v3181_v2 }
 0x3fe   : > { %v3188_v62 = vcombine.low %v3072_v4, %v3109_v56  ;;  %v3189_v32 = vcombine.low %v3146_v50, %v3183_v13 }
 0x400   : > { %v3196_v16 = vrot.slane %v3188_v62, %v3195_v14  ;;  %v3203_v17 = vrot.slane %v3189_v32, %v3195_v14 }
 0x402   : > { %v3204_v31 = vcombine.low %v3196_v16, %v3203_v17 }
 0x404   : > { %v3211_v3 = vrot.slane %v3204_v31, %v3195_v14  ;;  %3223 = sbr.rel (%p3707_p5) target bundleno = 1694 (0x69e), region = 64 }
 0x406   : > { %v3213_v6 = vadd.f32 %v3211_v3, %v2747_v9 }
 0x408   : > { %3218 = vst.msk [vmem:[#allocation4] sm:$0xf] %vm3216_vm12, %v3213_v6 }
 0x409   : > { %v3225_v5 = vld [vmem:[#allocation3] sm:$0x1]  ;;  %v3268_v36 = vld [vmem:[%s6881_s8 + $0xf8] sm:$0xff]  ;;  %v4270_v24 = vmov 0   ;;  %v3267_v54 = vld [vmem:[%s6881_s8 + $0xf0] sm:$0xff]  ;;  %vm3463_vm6 = vcmask 24576  }
 0x40a   : > { %v3300_v21 = vld [vmem:[%s6881_s8 + $0x1f8] sm:$0xff]  ;;  %4195 = vset.pattern.permute.xlu0 %v4270_v24  ;;  %3714 = vmatprep.subr.mxu0 %v3268_v36  ;;  %v3299_v60 = vld [vmem:[%s6881_s8 + $0x1f0] sm:$0xff]  ;;  %v3266_v26 = vld [vmem:[%s6881_s8 + $0xe8] sm:$0xff] }
 0x40b   : > { %v3252_v28 = vld [vmem:[%s6881_s8 + $0x78] sm:$0xff]  ;;  %3228 = vperm.xlu0 %4195, %v3225_v5   ;;  %3749 = vmatprep.subr.mxu1 %v3300_v21  ;;  %v3251_v42 = vld [vmem:[%s6881_s8 + $0x70] sm:$0xff]  ;;  %v3298_v46 = vld [vmem:[%s6881_s8 + $0x1e8] sm:$0xff] }
 0x40c   : > { %v3284_v48 = vld [vmem:[%s6881_s8 + $0x178] sm:$0xff]  ;;  %v3283_v18 = vld [vmem:[%s6881_s8 + $0x170] sm:$0xff]  ;;  %3715 = vmatpush3.msra.mxu0 %v3252_v28  ;;  %v3250_v29 = vld [vmem:[%s6881_s8 + $0x68] sm:$0xff] }
 0x40d   : > { %3750 = vmatpush3.msra.mxu1 %v3284_v48  ;;  %3716 = vmatprep.subr.mxu0 %v3267_v54  ;;  %v3282_v40 = vld [vmem:[%s6881_s8 + $0x168] sm:$0xff]  ;;  %v3265_v1 = vld [vmem:[%s6881_s8 + $0xe0] sm:$0xff]  ;;  %v3264_v37 = vld [vmem:[%s6881_s8 + $0xd8] sm:$0xff] }
 0x40e   : > { %3751 = vmatprep.subr.mxu1 %v3299_v60  ;;  %3717 = vmatpush3.msra.mxu0 %v3251_v42  ;;  %v3297_v55 = vld [vmem:[%s6881_s8 + $0x1e0] sm:$0xff]  ;;  %v3296_v51 = vld [vmem:[%s6881_s8 + $0x1d8] sm:$0xff]  ;;  %v3263_v23 = vld [vmem:[%s6881_s8 + $0xd0] sm:$0xff] }
 0x40f   : > { %3752 = vmatpush3.msra.mxu1 %v3283_v18  ;;  %3718 = vmatprep.subr.mxu0 %v3266_v26  ;;  %v3249_v58 = vld [vmem:[%s6881_s8 + $0x60] sm:$0xff]  ;;  %v3248_v49 = vld [vmem:[%s6881_s8 + $0x58] sm:$0xff]  ;;  %v3295_v53 = vld [vmem:[%s6881_s8 + $0x1d0] sm:$0xff] }
 0x410   : > { %3753 = vmatprep.subr.mxu1 %v3298_v46  ;;  %v3281_v57 = vld [vmem:[%s6881_s8 + $0x160] sm:$0xff]  ;;  %3719 = vmatpush3.msra.mxu0 %v3250_v29  ;;  %v3280_v35 = vld [vmem:[%s6881_s8 + $0x158] sm:$0xff]  ;;  %v3247_v12 = vld [vmem:[%s6881_s8 + $0x50] sm:$0xff] }
 0x411   : > { %3754 = vmatpush3.msra.mxu1 %v3282_v40  ;;  %3720 = vmatprep.subr.mxu0 %v3265_v1  ;;  %v3279_v44 = vld [vmem:[%s6881_s8 + $0x150] sm:$0xff]  ;;  %v3262_v19 = vld [vmem:[%s6881_s8 + $0xc8] sm:$0xff]  ;;  %v3261_v59 = vld [vmem:[%s6881_s8 + $0xc0] sm:$0xff] }
 0x412   : > { %3755 = vmatprep.subr.mxu1 %v3297_v55  ;;  %3721 = vmatpush3.msra.mxu0 %v3249_v58  ;;  %v3294_v25 = vld [vmem:[%s6881_s8 + $0x1c8] sm:$0xff]  ;;  %v3293_v45 = vld [vmem:[%s6881_s8 + $0x1c0] sm:$0xff]  ;;  %v3260_v47 = vld [vmem:[%s6881_s8 + $0xb8] sm:$0xff] }
 0x413   : > { %3756 = vmatpush3.msra.mxu1 %v3281_v57  ;;  %3722 = vmatprep.subr.mxu0 %v3264_v37  ;;  %v3246_v0 = vld [vmem:[%s6881_s8 + $0x48] sm:$0xff]  ;;  %v3245_v33 = vld [vmem:[%s6881_s8 + $0x40] sm:$0xff]  ;;  %v3292_v61 = vld [vmem:[%s6881_s8 + $0x1b8] sm:$0xff] }
 0x414   : > { %3757 = vmatprep.subr.mxu1 %v3296_v51  ;;  %3723 = vmatpush3.msra.mxu0 %v3248_v49  ;;  %v3278_v7 = vld [vmem:[%s6881_s8 + $0x148] sm:$0xff]  ;;  %v3277_v20 = vld [vmem:[%s6881_s8 + $0x140] sm:$0xff]  ;;  %v3244_v41 = vld [vmem:[%s6881_s8 + $0x38] sm:$0xff] }
 0x415   : > { %3758 = vmatpush3.msra.mxu1 %v3280_v35  ;;  %3724 = vmatprep.subr.mxu0 %v3263_v23  ;;  %v3276_v22 = vld [vmem:[%s6881_s8 + $0x138] sm:$0xff]  ;;  %v3259_v10 = vld [vmem:[%s6881_s8 + $0xb0] sm:$0xff]  ;;  %v3258_v11 = vld [vmem:[%s6881_s8 + $0xa8] sm:$0xff] }
 0x416   : > { %3759 = vmatprep.subr.mxu1 %v3295_v53  ;;  %3725 = vmatpush3.msra.mxu0 %v3247_v12  ;;  %v3291_v27 = vld [vmem:[%s6881_s8 + $0x1b0] sm:$0xff]  ;;  %v3290_v39 = vld [vmem:[%s6881_s8 + $0x1a8] sm:$0xff]  ;;  %v3257_v15 = vld [vmem:[%s6881_s8 + $0xa0] sm:$0xff] }
 0x417   : > { %3760 = vmatpush3.msra.mxu1 %v3279_v44  ;;  %3726 = vmatprep.subr.mxu0 %v3262_v19  ;;  %v3243_v8 = vld [vmem:[%s6881_s8 + $0x30] sm:$0xff]  ;;  %v3242_v43 = vld [vmem:[%s6881_s8 + $0x28] sm:$0xff]  ;;  %v3289_v14 = vld [vmem:[%s6881_s8 + $0x1a0] sm:$0xff] }
 0x418   : > { %3761 = vmatprep.subr.mxu1 %v3294_v25  ;;  %3727 = vmatpush3.msra.mxu0 %v3246_v0  ;;  %v3275_v2 = vld [vmem:[%s6881_s8 + $0x130] sm:$0xff]  ;;  %v3274_v63 = vld [vmem:[%s6881_s8 + $0x128] sm:$0xff]  ;;  %v3241_v4 = vld [vmem:[%s6881_s8 + $0x20] sm:$0xff] }
 0x419   : > { %3762 = vmatpush3.msra.mxu1 %v3278_v7  ;;  %3728 = vmatprep.subr.mxu0 %v3261_v59  ;;  %v3273_v56 = vld [vmem:[%s6881_s8 + $0x120] sm:$0xff]  ;;  %v3256_v50 = vld [vmem:[%s6881_s8 + $0x98] sm:$0xff]  ;;  %v3255_v38 = vld [vmem:[%s6881_s8 + $0x90] sm:$0xff] }
 0x41a   : > { %3763 = vmatprep.subr.mxu1 %v3293_v45  ;;  %3729 = vmatpush3.msra.mxu0 %v3245_v33  ;;  %v3288_v13 = vld [vmem:[%s6881_s8 + $0x198] sm:$0xff]  ;;  %v3287_v16 = vld [vmem:[%s6881_s8 + $0x190] sm:$0xff]  ;;  %v3254_v31 = vld [vmem:[%s6881_s8 + $0x88] sm:$0xff] }
 0x41b   : > { %3764 = vmatpush3.msra.mxu1 %v3277_v20  ;;  %3730 = vmatprep.subr.mxu0 %v3260_v47  ;;  %v3240_v62 = vld [vmem:[%s6881_s8 + $0x18] sm:$0xff]  ;;  %v3239_v17 = vld [vmem:[%s6881_s8 + $0x10] sm:$0xff]  ;;  %v3286_v9 = vld [vmem:[%s6881_s8 + $0x188] sm:$0xff] }
 0x41c   : > { %3765 = vmatprep.subr.mxu1 %v3292_v61  ;;  %3731 = vmatpush3.msra.mxu0 %v3244_v41  ;;  %v3272_v32 = vld [vmem:[%s6881_s8 + $0x118] sm:$0xff]  ;;  %v3271_v52 = vld [vmem:[%s6881_s8 + $0x110] sm:$0xff]  ;;  %v3238_v3 = vld [vmem:[%s6881_s8 + $0x8] sm:$0xff] }
 0x41d   : > { %3766 = vmatpush3.msra.mxu1 %v3276_v22  ;;  %3732 = vmatprep.subr.mxu0 %v3259_v10  ;;  %v3270_v30 = vld [vmem:[%s6881_s8 + $0x108] sm:$0xff]  ;;  %v3253_v6 = vld [vmem:[%s6881_s8 + $0x80] sm:$0xff]  ;;  %v7532_v42 = vld [vmem:[#allocation15_spill] sm:$0xff] }
 0x41e   : > { %3767 = vmatprep.subr.mxu1 %v3291_v27  ;;  %3733 = vmatpush3.msra.mxu0 %v3243_v8  ;;  %v3285_v5 = vld [vmem:[%s6881_s8 + $0x180] sm:$0xff]  ;;  %v7533_v26 = vld [vmem:[#allocation14_spill] sm:$0xff] }
 0x41f   : > { %3768 = vmatpush3.msra.mxu1 %v3275_v2  ;;  %3734 = vmatprep.subr.mxu0 %v3258_v11  ;;  %v3237_v36 = vld [vmem:[%s6881_s8] sm:$0xff]  ;;  %v7534_v46 = vsub.s32 3, %v7533_v26  ;;  %v7535_v1 = vsub.s32 2, %v7533_v26 }
 0x420   : > { %3769 = vmatprep.subr.mxu1 %v3290_v39  ;;  %3735 = vmatpush3.msra.mxu0 %v3242_v43  ;;  %v3269_v21 = vld [vmem:[%s6881_s8 + $0x100] sm:$0xff] }
 0x421   : > { %3770 = vmatpush3.msra.mxu1 %v3274_v63  ;;  %3736 = vmatprep.subr.mxu0 %v3257_v15  ;;  %v3224_v48 = vld [vmem:[#allocation4] sm:$0xf]  ;;  %v3301_v37 = vld [vmem:[%s6882_s9] sm:$0x1] }
 0x422   : > { %3771 = vmatprep.subr.mxu1 %v3289_v14  ;;  %3737 = vmatpush3.msra.mxu0 %v3241_v4 }
 0x423   : > { %3772 = vmatpush3.msra.mxu1 %v3273_v56  ;;  %3738 = vmatprep.subr.mxu0 %v3256_v50 }
 0x424   : > { %3773 = vmatprep.subr.mxu1 %v3288_v13  ;;  %3739 = vmatpush3.msra.mxu0 %v3240_v62 }
 0x425   : > { %3774 = vmatpush3.msra.mxu1 %v3272_v32  ;;  %3740 = vmatprep.subr.mxu0 %v3255_v38 }
 0x426   : > { %3775 = vmatprep.subr.mxu1 %v3287_v16  ;;  %3741 = vmatpush3.msra.mxu0 %v3239_v17 }
 0x427   : > { %3776 = vmatpush3.msra.mxu1 %v3271_v52  ;;  %3742 = vmatprep.subr.mxu0 %v3254_v31 }
 0x428   : > { %3777 = vmatprep.subr.mxu1 %v3286_v9  ;;  %3743 = vmatpush3.msra.mxu0 %v3238_v3 }
 0x429   : > { %3778 = vmatpush3.msra.mxu1 %v3270_v30  ;;  %3744 = vmatprep.subr.mxu0 %v3253_v6 }
 0x42a   : > { %3779 = vmatprep.subr.mxu1 %v3285_v5  ;;  %3745 = vmatpush3.msra.mxu0 %v3237_v36 }
 0x42b   : > { %3780 = vmatpush3.msra.mxu1 %v3269_v21 }
 0x486   : > { %v3229_v24 = vpop.permute.xlu0 %3228 }
 0x487   : > { %v3234_v28 = vrot.slane %v3229_v24, %v4662_v34 }
 0x489   : > { %4196 = vrcp.f32 %v3234_v28 }
 0x496   : > { %v4197_v54 = vpop.eup %4196 }
 0x497   : > { %v3236_v60 = vmul.f32 %v4197_v54, %v3224_v48 }
 0x499   : > { %v3310_v18 = vrot.slane %v3236_v60, %v7532_v42  ;;  %v3318_v29 = vrot.slane %v3236_v60, %v7534_v46  ;;  %v3306_v40 = vrot.slane %v3236_v60, %v4662_v34  ;;  %v3314_v55 = vrot.slane %v3236_v60, %v7535_v1 }
 0x49b   : > { %3387 = vmatprep.mubr.f32.mxu0 %v3310_v18  ;;  %3457 = vmatprep.mubr.f32.mxu1 %v3318_v29 }
 0x49c   : > { %3388 = vmatmul.mubr.f32.vlgmr.msra.gmra.mxu0 %v3306_v40  ;;  %3458 = vmatmul.mubr.f32.vlgmr.msra.gmra.mxu1 %v3314_v55 }
 0x55c   : > { %v3746_v58 = vpop.f32.mrf.mxu0  ;;  %v3781_v57 = vpop.f32.mrf.mxu1 }
 0x55e   : > { %v3747_v51 = vpop.f32.mrf.mxu0  ;;  %v3782_v49 = vpop.f32.mrf.mxu1 }
 0x55f   : > { %v3748_v35 = vadd.f32 %v3747_v51, %v3746_v58  ;;  %v3783_v53 = vadd.f32 %v3782_v49, %v3781_v57 }
 0x561   : > { %v3390_v23 = vadd.f32 %v3748_v35, %v3301_v37 }
 0x563   : > { %v3460_v34 = vadd.f32 %v3783_v53, %v3390_v23 }
 0x565   : > { %v3465_v12 = vsel %vm3463_vm6, %v3460_v34, -inf  ;;  %3464 = vst.msk [vmem:[#allocation8] sm:$0x1] %vm3463_vm6, %v3460_v34 }
 0x566   : > { %3466 = vmax.xlane.f32.xlu0 %v3465_v12 }
 0x5ef   : > { %v3467_v44 = vpop.xlane.xlu0 %3466 }
 0x5f0   : > { %v3468_v19 = vsub.f32 %v3460_v34, %v3467_v44 }
 0x5f2   : > { %v3469_v25 = vmul.f32 1.442695, %v3468_v19 }
 0x5f4   : > { %4198 = vpow2.f32 %v3469_v25 }
 0x601   : > { %v4199_v0 = vpop.eup %4198 }
 0x602   : > { %v3471_v7 = vsel %vm3463_vm6, %v4199_v0, 0.0 }
 0x603   : > { %3472 = vadd.xlane.f32.xlu1 %v3471_v7 }
 0x68c   : > { %v3473_v59 = vpop.xlane.xlu1 %3472 }
 0x68d   : > { %4200 = vrcp.f32 %v3473_v59 }
 0x69a   : > { %v4201_v45 = vpop.eup %4200 }
 0x69b   : > { %v3475_v33 = vmul.f32 %v4201_v45, %v4199_v0 }
 0x69d   : > { %3476 = vst.msk [vmem:[#allocation10] sm:$0x1] %vm3463_vm6, %v3475_v33 }
 0x69e PF: > { %p3792_p6 = scmp.eq.s32.totalorder %s4345_s22, 1  ;;  %s4271_s30 = smov [#allocation8]  }
 0x69f   : > { %s3484_s12 = sshll.u32 %s4271_s30, 4  ;;  %s4272_s13 = smov [#allocation10]   ;;  %s3485_s12 = int_to_ptr.vmem [resolvable:$true] %s3484_s12 }
 0x6a0   : > { %s3495_s14 = sshll.u32 %s4272_s13, 4  ;;  %s4202_s15 = scalar_lea.vmem %s3485_s12, 16  ;;  %s3496_s14 = int_to_ptr.vmem [resolvable:$true] %s3495_s14 }
 0x6a1   : > { %p4203_p7 = scmp.ne.s32.totalorder %s3485_s12, %s4202_s15  ;;  %s4208_s16 = scalar_lea.vmem %s3485_s12, 32 }
 0x6a2   : > { %p4209_p10 = scmp.lt.s32.totalorder %s3485_s12, %s3485_s12  ;;  %p4210_p11 = scmp.lt.s32.totalorder %s4208_s16, %s4202_s15 }
 0x6a3   : > { %p4204_p8 = pnand %p4203_p7, %p3792_p6 }
 0x6a4   : > { %p4211_p12 = por %p4210_p11, %p4209_p10 }
 0x6a5   : > { %p4205_p9 = pneg %p4204_p8 }
 0x6a7   : > { %p4212_p13 = pnand %p4211_p12, %p4205_p9 }
 0x6a9   : > { %4215 = shalt.err (!%p4212_p13)
}
 0x6aa   : > { %3785 = dma.vmem_to_hbm [thread:$0]  (%p3792_p6), %s3485_s12, 16, %s6883_s10, [#allocation9]  }
 0x6ab   : > { %s4226_s19 = scalar_lea.vmem %s3496_s14, 16  ;;  %s4232_s20 = scalar_lea.vmem %s3496_s14, 32 }
 0x6ac   : > { %p4227_p0 = scmp.ne.s32.totalorder %s3496_s14, %s4226_s19  ;;  %p4233_p3 = scmp.lt.s32.totalorder %s3496_s14, %s3496_s14 }
 0x6ad   : > { %p4234_p4 = scmp.lt.s32.totalorder %s4232_s20, %s4226_s19 }
 0x6ae   : > { %p4228_p1 = pnand %p4227_p0, %p3792_p6 }
 0x6af   : > { %p4235_p5 = por %p4234_p4, %p4233_p3 }
 0x6b0   : > { %p4229_p2 = pneg %p4228_p1 }
 0x6b2   : > { %p4236_p7 = pnand %p4235_p5, %p4229_p2 }
 0x6b4   : > { %4239 = shalt.err (!%p4236_p7)
}
 0x6b5   : > { %3787 = dma.vmem_to_hbm [thread:$0]  (%p3792_p6), %s3496_s14, 16, %s6884_s11, [#allocation11]  }
 0x6b6   : > { %4255 = dma.done.wait (%p3792_p6), [#allocation9], 16  }
 0x6b7   : > { %4257 = vsyncadd (%p3792_p6), [#allocation9], 4294967280 }
 0x6b8   : > { %4259 = dma.done.wait (%p3792_p6), [#allocation11], 16  }
 0x6b9   : > { %4261 = vsyncadd (%p3792_p6), [#allocation11], 4294967280 }
 0x6ba PF: > { %s27_s21 = sadd.s32 1, %s4264_s21  }
 0x6bb   : > { %p24_p8 = scmp.ge.s32.totalorder %s27_s21, 4  }
 0x6bd   :  { %26 = sbr.rel (!%p24_p8) target bundleno = 5 (0x5), region = 99 }
 0x6c2   :  { %3512 = vsyncpa [#allocation9], 1 }
 0x6c3   :  { %3514 = vsyncpa [#allocation9 + $0x1], 1 }
 0x6c4   :  { %3515 = vsyncpa [#allocation11], 1 }

</bundles_post_ra>
